<compile_context>
chip_gen: v7x
topology: tpu7x:2x2x1
jax: 0.10.0
libtpu: 0.0.40
codegen_flags: <defaults>
</compile_context>

<pallas_src>
import math

import numpy as np

import jax
import jax.numpy as jnp
from jax.experimental import pallas as pl
from jax.experimental.pallas import tpu as pltpu

_SQRT_HALF = 0.7071067811865476


def _erf(x):
    # Abramowitz & Stegun 7.1.26 (|err| < 1.5e-7); only mul/add/exp so it
    # lowers cleanly in Mosaic.  Reproduces PyTorch's exact (erf) gelu.
    a1, a2, a3, a4, a5 = 0.254829592, -0.284496736, 1.421413741, -1.453152027, 1.061405429
    p = 0.3275911
    sgn = jnp.where(x >= 0.0, 1.0, -1.0)
    ax = jnp.abs(x)
    t = 1.0 / (1.0 + p * ax)
    poly = ((((a5 * t + a4) * t + a3) * t + a2) * t + a1) * t
    return sgn * (1.0 - poly * jnp.exp(-ax * ax))


def _gelu(x):
    # F.gelu default ('none') = exact erf-based gelu.
    return 0.5 * x * (1.0 + _erf(x * _SQRT_HALF))


# ----------------------------------------------------------------------------
# Host-side weight packing: lane-dense matmul forms of the convs.
# ----------------------------------------------------------------------------
def _toeplitz3x3(w_hwio, Ws):
    """(3,3,cin,cout) conv weight -> (3, Ws*cin, Ws*cout) banded matrices.

    out2d[h] = sum_dh hpad[h+dh] @ T[dh]  reproduces a pad=1 3x3
    cross-correlation; W-padding is folded into T (dropped bands)."""
    w = np.asarray(w_hwio, np.float32)
    _, _, cin, cout = w.shape
    T = np.zeros((3, Ws * cin, Ws * cout), np.float32)
    for dh in range(3):
        for wc in range(Ws):
            for kw in range(3):
                wp = wc + kw - 1
                if 0 <= wp < Ws:
                    T[dh, wp * cin:(wp + 1) * cin, wc * cout:(wc + 1) * cout] = w[dh, kw]
    return T


def _blockdiag1x1(w, Ws, splits=None):
    """(cin,cout) 1x1 conv weight -> (Ws*cin, Ws*cout) block-diagonal matrix.

    `splits` permutes the output columns so channel groups (e.g. qm|qv or
    pm|pv|xpp) land in contiguous, 128-aligned lane slabs."""
    w = np.asarray(w, np.float32)
    cin, cout = w.shape
    if splits is None:
        splits = [cout]
    assert sum(splits) == cout
    bd = np.zeros((Ws * cin, Ws * cout), np.float32)
    bounds = np.cumsum([0] + list(splits))
    for wc in range(Ws):
        for g, gsz in enumerate(splits):
            lo = int(bounds[g])
            col0 = Ws * lo + wc * gsz
            bd[wc * cin:(wc + 1) * cin, col0:col0 + gsz] = w[:, lo:lo + gsz]
    return bd


def _lane_bias(b, Ws, splits=None):
    """(cout,) bias -> (1, Ws*cout) lane-dense bias, same column permutation."""
    b = np.asarray(b, np.float32).reshape(-1)
    cout = b.shape[0]
    if splits is None:
        splits = [cout]
    bounds = np.cumsum([0] + list(splits))
    parts = [np.tile(b[int(bounds[g]):int(bounds[g + 1])], Ws) for g in range(len(splits))]
    return np.concatenate(parts).reshape(1, Ws * cout)


def pack_params(raw, *, Ws, width, zdim, cmid):
    """Pack raw (PyTorch-shaped) DecBlock params into kernel matmul form."""
    enc, pri, res = raw["enc"], raw["prior"], raw["resnet"]
    w = []
    # enc block: c1 split into x-part / acts-part (kills the concat),
    #            c4 columns permuted into [qm | qv].
    w1e = np.asarray(enc["w1"], np.float32)
    w += [_blockdiag1x1(w1e[:width], Ws),
          _blockdiag1x1(w1e[width:], Ws),
          _lane_bias(enc["b1"], Ws),
          _toeplitz3x3(enc["w2"], Ws), _lane_bias(enc["b2"], Ws),
          _toeplitz3x3(enc["w3"], Ws), _lane_bias(enc["b3"], Ws),
          _blockdiag1x1(enc["w4"], Ws, [zdim, zdim]),
          _lane_bias(enc["b4"], Ws, [zdim, zdim])]
    # prior block: c4 columns permuted into [pm | pv | xpp].
    w += [_blockdiag1x1(pri["w1"], Ws), _lane_bias(pri["b1"], Ws),
          _toeplitz3x3(pri["w2"], Ws), _lane_bias(pri["b2"], Ws),
          _toeplitz3x3(pri["w3"], Ws), _lane_bias(pri["b3"], Ws),
          _blockdiag1x1(pri["w4"], Ws, [zdim, zdim, width]),
          _lane_bias(pri["b4"], Ws, [zdim, zdim, width])]
    # z_proj (1x1)
    w += [_blockdiag1x1(raw["z_proj_w"], Ws), _lane_bias(raw["z_proj_b"], Ws)]
    # resnet block (residual)
    w += [_blockdiag1x1(res["w1"], Ws), _lane_bias(res["b1"], Ws),
          _toeplitz3x3(res["w2"], Ws), _lane_bias(res["b2"], Ws),
          _toeplitz3x3(res["w3"], Ws), _lane_bias(res["b3"], Ws),
          _blockdiag1x1(res["w4"], Ws), _lane_bias(res["b4"], Ws)]
    return [jnp.asarray(a) for a in w]


# ----------------------------------------------------------------------------
# The single fused DecBlock kernel (one batch element per grid step).
# ----------------------------------------------------------------------------
def _make_fused_kernel(Hs, Ws, width, zdim, cmid):
    WZ = Ws * zdim      # lane width of a zdim-channel slab (= 128 here)

    def kernel(*refs):
        (x_ref, a_ref, e_ref,
         w1ex, w1ea, b1e, t2e, b2e, t3e, b3e, w4e, b4e,
         w1p, b1p, t2p, b2p, t3p, b3p, w4p, b4p,
         wz, bz,
         w1r, b1r, t2r, b2r, t3r, b3r, w4r, b4r,
         z_ref, kl_ref, xo_ref, hpad) = refs

        # Zero the H-pad scratch.  Border rows (0 and Hs+1) must be zero; the
        # interior is rewritten before every use.  Unconditional so it stays
        # correct under any grid/core split (one tiny (Hs+2, Ws*cmid) store).
        hpad[...] = jnp.zeros_like(hpad)

        def mm(a, w_ref, b_ref):
            return jnp.dot(a, w_ref[...], preferred_element_type=jnp.float32) + b_ref[...]

        def conv3x3(t2d, T_ref, b_ref):
            # pad=1 3x3 conv in lane-dense layout: 3 matmuls against the
            # Toeplitz weight, H shifts via the zero-bordered scratch.
            hpad[1:Hs + 1, :] = t2d
            acc = jnp.dot(hpad[0:Hs, :], T_ref[0], preferred_element_type=jnp.float32)
            acc = acc + jnp.dot(hpad[1:Hs + 1, :], T_ref[1], preferred_element_type=jnp.float32)
            acc = acc + jnp.dot(hpad[2:Hs + 2, :], T_ref[2], preferred_element_type=jnp.float32)
            return acc + b_ref[...]

        x = x_ref[0].astype(jnp.float32)      # (Hs, Ws*width)  lane-dense
        a = a_ref[0].astype(jnp.float32)      # (Hs, Ws*width)
        eps = e_ref[0].astype(jnp.float32)    # (Hs, Ws*zdim)
        gx = _gelu(x)
        ga = _gelu(a)

        # ---- enc block: gelu->c1(1x1 on cat[x,acts])->gelu->c2->gelu->c3->gelu->c4
        t = (jnp.dot(gx, w1ex[...], preferred_element_type=jnp.float32)
             + jnp.dot(ga, w1ea[...], preferred_element_type=jnp.float32)
             + b1e[...])
        t = conv3x3(_gelu(t), t2e, b2e)
        t = conv3x3(_gelu(t), t3e, b3e)
        enc_out = mm(_gelu(t), w4e, b4e)            # (Hs, 2*WZ)  = [qm | qv]

        # ---- prior block
        t = mm(gx, w1p, b1p)
        t = conv3x3(_gelu(t), t2p, b2p)
        t = conv3x3(_gelu(t), t3p, b3p)
        prior_out = mm(_gelu(t), w4p, b4p)          # (Hs, 2*WZ + Ws*width) = [pm|pv|xpp]

        # tile-aligned (multiple-of-128) static lane slices -> free
        qm = enc_out[:, :WZ]
        qv = enc_out[:, WZ:2 * WZ]
        pm = prior_out[:, :WZ]
        pv = prior_out[:, WZ:2 * WZ]
        xpp = prior_out[:, 2 * WZ:]

        # ---- sample: z = exp(qv)*eps + qm ; analytical diagonal-Gaussian KL
        eqv = jnp.exp(qv)
        z = eqv * eps + qm
        kl = -0.5 + pv - qv + 0.5 * (eqv * eqv + (qm - pm) ** 2) * jnp.exp(-2.0 * pv)

        # ---- x = x + xpp + z_proj(z)
        xnew = x + xpp + mm(z, wz, bz)

        # ---- resnet block (residual)
        t = mm(_gelu(xnew), w1r, b1r)
        t = conv3x3(_gelu(t), t2r, b2r)
        t = conv3x3(_gelu(t), t3r, b3r)
        xhat = mm(_gelu(t), w4r, b4r)

        z_ref[0] = z.astype(z_ref.dtype)
        kl_ref[0] = kl.astype(kl_ref.dtype)
        xo_ref[0] = (xnew + xhat).astype(xo_ref.dtype)

    return kernel


def _dec_block_pallas(x2d, a2d, e2d, packed, Hs, Ws, width, zdim, cmid):
    B = x2d.shape[0]
    kernel = _make_fused_kernel(Hs, Ws, width, zdim, cmid)

    data_specs = [
        pl.BlockSpec((1, Hs, Ws * width), lambda b: (b, 0, 0)),
        pl.BlockSpec((1, Hs, Ws * width), lambda b: (b, 0, 0)),
        pl.BlockSpec((1, Hs, Ws * zdim), lambda b: (b, 0, 0)),
    ]
    w_specs = [pl.BlockSpec(w.shape, lambda b, nd=w.ndim: (0,) * nd) for w in packed]
    out_specs = (
        pl.BlockSpec((1, Hs, Ws * zdim), lambda b: (b, 0, 0)),
        pl.BlockSpec((1, Hs, Ws * zdim), lambda b: (b, 0, 0)),
        pl.BlockSpec((1, Hs, Ws * width), lambda b: (b, 0, 0)),
    )
    out_shape = (
        jax.ShapeDtypeStruct((B, Hs, Ws * zdim), x2d.dtype),    # z
        jax.ShapeDtypeStruct((B, Hs, Ws * zdim), x2d.dtype),    # kl
        jax.ShapeDtypeStruct((B, Hs, Ws * width), x2d.dtype),   # x_out
    )
    # TODO(synk): on v7x, consider pltpu.CORE_PARALLEL on the batch axis (2 TCs).
    return pl.pallas_call(
        kernel,
        out_shape=out_shape,
        grid_spec=pltpu.PrefetchScalarGridSpec(
            num_scalar_prefetch=0,
            grid=(B,),
            in_specs=data_specs + w_specs,
            out_specs=out_specs,
            scratch_shapes=[pltpu.VMEM((Hs + 2, Ws * cmid), jnp.float32)],
        ),
        compiler_params=pltpu.CompilerParams(dimension_semantics=("parallel",)),
    )(x2d, a2d, e2d, *packed)


def dec_block_forward(x, acts, eps, packed, *, zdim, width, cmid):
    """x, acts: (B,H,W,width) NHWC; eps: (B,H,W,zdim).  Returns (x_out, kl, z)."""
    B, Hs, Ws, _ = x.shape
    # channels are minor -> these reshapes are free lane-dense views
    x2d = x.reshape(B, Hs, Ws * width)
    a2d = acts.reshape(B, Hs, Ws * width)
    e2d = eps.reshape(B, Hs, Ws * zdim)
    z2d, kl2d, xo2d = _dec_block_pallas(x2d, a2d, e2d, packed, Hs, Ws, width, zdim, cmid)
    return (xo2d.reshape(B, Hs, Ws, width),
            kl2d.reshape(B, Hs, Ws, zdim),
            z2d.reshape(B, Hs, Ws, zdim))


# ----------------------------------------------------------------------------
# Deterministic synthetic parameters (module-consistent shapes) + pure-JAX ref.
# ----------------------------------------------------------------------------
def make_block_params(key, cin, cmid, cout, zero_last=False, last_scale=1.0):
    k1, k2, k3, k4 = jax.random.split(key, 4)
    nrm = lambda k, s: jax.random.normal(k, s, jnp.float32) * 0.05
    w1 = nrm(k1, (cin, cmid))
    w2 = nrm(k2, (3, 3, cmid, cmid))
    w3 = nrm(k3, (3, 3, cmid, cmid))
    if zero_last:
        w4 = jnp.zeros((cmid, cout), jnp.float32)          # zero_weights=True
    else:
        w4 = nrm(k4, (cmid, cout)) * last_scale
    z = lambda c: jnp.zeros((c,), jnp.float32)             # zero_bias=True
    return dict(w1=w1, b1=z(cmid), w2=w2, b2=z(cmid), w3=w3, b3=z(cmid), w4=w4, b4=z(cout))


def _block_ref(x, p, residual):
    hp = jax.lax.Precision.HIGHEST

    def c1x1(t, w, b):
        return jnp.einsum('bhwc,cd->bhwd', t, w, precision=hp) + b

    def c3x3(t, w, b):
        y = jax.lax.conv_general_dilated(
            t, w, window_strides=(1, 1), padding='SAME',
            dimension_numbers=('NHWC', 'HWIO', 'NHWC'), precision=hp)
        return y + b

    t = c1x1(_gelu(x), p['w1'], p['b1'])
    t = c3x3(_gelu(t), p['w2'], p['b2'])
    t = c3x3(_gelu(t), p['w3'], p['b3'])
    t = c1x1(_gelu(t), p['w4'], p['b4'])
    return x + t if residual else t


def dec_block_ref(x, acts, eps, raw, zdim):
    hp = jax.lax.Precision.HIGHEST
    enc_out = _block_ref(jnp.concatenate([x, acts], -1), raw['enc'], False)
    prior_out = _block_ref(x, raw['prior'], False)
    qm, qv = enc_out[..., :zdim], enc_out[..., zdim:]
    pm, pv, xpp = (prior_out[..., :zdim], prior_out[..., zdim:2 * zdim],
                   prior_out[..., 2 * zdim:])
    z = jnp.exp(qv) * eps + qm
    kl = -0.5 + pv - qv + 0.5 * (jnp.exp(qv) ** 2 + (qm - pm) ** 2) / jnp.exp(pv) ** 2
    xnew = x + xpp + jnp.einsum('bhwc,cd->bhwd', z, raw['z_proj_w'], precision=hp) + raw['z_proj_b']
    xout = _block_ref(xnew, raw['resnet'], True)
    return xout, kl, z


if __name__ == "__main__":
    # H config: width=32, custom_width_str='', bottleneck_multiple=0.25,
    # zdim=8, res=16 (use_3x3=True), mixin=None, n_blocks=4
    B, res, width, zdim = 2, 16, 32, 8
    n_blocks = 4
    cmid = int(width * 0.25)   # 8

    key = jax.random.PRNGKey(0)
    k_enc, k_prior, k_res, k_zp, k_x, k_a, k_e = jax.random.split(key, 7)

    raw_params = dict(
        enc=make_block_params(k_enc, width * 2, cmid, zdim * 2),
        prior=make_block_params(k_prior, width, cmid, zdim * 2 + width, zero_last=True),
        resnet=make_block_params(k_res, width, cmid, width,
                                 last_scale=math.sqrt(1.0 / n_blocks)),
        z_proj_w=jax.random.normal(k_zp, (zdim, width), jnp.float32)
                 * 0.05 * math.sqrt(1.0 / n_blocks),
        z_proj_b=jnp.zeros((width,), jnp.float32),
    )
    packed = pack_params(raw_params, Ws=res, width=width, zdim=zdim, cmid=cmid)

    # NHWC inputs (NCHW equivalent: x, acts = (2, 32, 16, 16); eps = (2, 8, 16, 16))
    x = jax.random.normal(k_x, (B, res, res, width), jnp.float32)
    acts = jax.random.normal(k_a, (B, res, res, width), jnp.float32)
    eps = jax.random.normal(k_e, (B, res, res, zdim), jnp.float32)

    x_out, kl, z = dec_block_forward(x, acts, eps, packed, zdim=zdim, width=width, cmid=cmid)
    jax.block_until_ready((x_out, kl, z))

    assert x_out.shape == (B, res, res, width)
    assert kl.shape == (B, res, res, zdim)
    assert z.shape == (B, res, res, zdim)

    # Correctness check against a pure-JAX reference (same gelu approximation).
    x_want, kl_want, z_want = dec_block_ref(x, acts, eps, raw_params, zdim)
    for name, got, want in (("x", x_out, x_want), ("kl", kl, kl_want), ("z", z, z_want)):
        err = float(jnp.max(jnp.abs(got - want)))
        assert err < 5e-3, f"{name} mismatch: max abs err {err}"

    print("KERNEL_OK")
</pallas_src>

<mosaic_0001>
module attributes {stable_mosaic.version = 11 : i64} {
  func.func @kernel(%arg0: i32, %arg1: memref<1x16x512xf32, #tpu.memory_space<vmem>>, %arg2: memref<1x16x512xf32, #tpu.memory_space<vmem>>, %arg3: memref<1x16x128xf32, #tpu.memory_space<vmem>>, %arg4: memref<512x128xf32, #tpu.memory_space<vmem>>, %arg5: memref<512x128xf32, #tpu.memory_space<vmem>>, %arg6: memref<1x128xf32, #tpu.memory_space<vmem>>, %arg7: memref<3x128x128xf32, #tpu.memory_space<vmem>>, %arg8: memref<1x128xf32, #tpu.memory_space<vmem>>, %arg9: memref<3x128x128xf32, #tpu.memory_space<vmem>>, %arg10: memref<1x128xf32, #tpu.memory_space<vmem>>, %arg11: memref<128x256xf32, #tpu.memory_space<vmem>>, %arg12: memref<1x256xf32, #tpu.memory_space<vmem>>, %arg13: memref<512x128xf32, #tpu.memory_space<vmem>>, %arg14: memref<1x128xf32, #tpu.memory_space<vmem>>, %arg15: memref<3x128x128xf32, #tpu.memory_space<vmem>>, %arg16: memref<1x128xf32, #tpu.memory_space<vmem>>, %arg17: memref<3x128x128xf32, #tpu.memory_space<vmem>>, %arg18: memref<1x128xf32, #tpu.memory_space<vmem>>, %arg19: memref<128x768xf32, #tpu.memory_space<vmem>>, %arg20: memref<1x768xf32, #tpu.memory_space<vmem>>, %arg21: memref<128x512xf32, #tpu.memory_space<vmem>>, %arg22: memref<1x512xf32, #tpu.memory_space<vmem>>, %arg23: memref<512x128xf32, #tpu.memory_space<vmem>>, %arg24: memref<1x128xf32, #tpu.memory_space<vmem>>, %arg25: memref<3x128x128xf32, #tpu.memory_space<vmem>>, %arg26: memref<1x128xf32, #tpu.memory_space<vmem>>, %arg27: memref<3x128x128xf32, #tpu.memory_space<vmem>>, %arg28: memref<1x128xf32, #tpu.memory_space<vmem>>, %arg29: memref<128x512xf32, #tpu.memory_space<vmem>>, %arg30: memref<1x512xf32, #tpu.memory_space<vmem>>, %arg31: memref<1x16x128xf32, #tpu.memory_space<vmem>>, %arg32: memref<1x16x128xf32, #tpu.memory_space<vmem>>, %arg33: memref<1x16x512xf32, #tpu.memory_space<vmem>>, %arg34: memref<18x128xf32, #tpu.memory_space<vmem>>) attributes {dimension_semantics = [#tpu.dimension_semantics<parallel>], iteration_bounds = array<i64: 2>, scalar_prefetch = 0 : i64, scratch_operands = 1 : i64, tpu.core_type = #tpu.core_type<tc>, window_params = [{transform_indices = @transform_0, window_bounds = array<i64: 1, 16, 512>}, {transform_indices = @transform_1, window_bounds = array<i64: 1, 16, 512>}, {transform_indices = @transform_2, window_bounds = array<i64: 1, 16, 128>}, {pipeline_mode = #tpu.pipeline_mode<synchronous>, transform_indices = @transform_3, window_bounds = array<i64: 512, 128>}, {pipeline_mode = #tpu.pipeline_mode<synchronous>, transform_indices = @transform_4, window_bounds = array<i64: 512, 128>}, {pipeline_mode = #tpu.pipeline_mode<synchronous>, transform_indices = @transform_5, window_bounds = array<i64: 1, 128>}, {pipeline_mode = #tpu.pipeline_mode<synchronous>, transform_indices = @transform_6, window_bounds = array<i64: 3, 128, 128>}, {pipeline_mode = #tpu.pipeline_mode<synchronous>, transform_indices = @transform_7, window_bounds = array<i64: 1, 128>}, {pipeline_mode = #tpu.pipeline_mode<synchronous>, transform_indices = @transform_8, window_bounds = array<i64: 3, 128, 128>}, {pipeline_mode = #tpu.pipeline_mode<synchronous>, transform_indices = @transform_9, window_bounds = array<i64: 1, 128>}, {pipeline_mode = #tpu.pipeline_mode<synchronous>, transform_indices = @transform_10, window_bounds = array<i64: 128, 256>}, {pipeline_mode = #tpu.pipeline_mode<synchronous>, transform_indices = @transform_11, window_bounds = array<i64: 1, 256>}, {pipeline_mode = #tpu.pipeline_mode<synchronous>, transform_indices = @transform_12, window_bounds = array<i64: 512, 128>}, {pipeline_mode = #tpu.pipeline_mode<synchronous>, transform_indices = @transform_13, window_bounds = array<i64: 1, 128>}, {pipeline_mode = #tpu.pipeline_mode<synchronous>, transform_indices = @transform_14, window_bounds = array<i64: 3, 128, 128>}, {pipeline_mode = #tpu.pipeline_mode<synchronous>, transform_indices = @transform_15, window_bounds = array<i64: 1, 128>}, {pipeline_mode = #tpu.pipeline_mode<synchronous>, transform_indices = @transform_16, window_bounds = array<i64: 3, 128, 128>}, {pipeline_mode = #tpu.pipeline_mode<synchronous>, transform_indices = @transform_17, window_bounds = array<i64: 1, 128>}, {pipeline_mode = #tpu.pipeline_mode<synchronous>, transform_indices = @transform_18, window_bounds = array<i64: 128, 768>}, {pipeline_mode = #tpu.pipeline_mode<synchronous>, transform_indices = @transform_19, window_bounds = array<i64: 1, 768>}, {pipeline_mode = #tpu.pipeline_mode<synchronous>, transform_indices = @transform_20, window_bounds = array<i64: 128, 512>}, {pipeline_mode = #tpu.pipeline_mode<synchronous>, transform_indices = @transform_21, window_bounds = array<i64: 1, 512>}, {pipeline_mode = #tpu.pipeline_mode<synchronous>, transform_indices = @transform_22, window_bounds = array<i64: 512, 128>}, {pipeline_mode = #tpu.pipeline_mode<synchronous>, transform_indices = @transform_23, window_bounds = array<i64: 1, 128>}, {pipeline_mode = #tpu.pipeline_mode<synchronous>, transform_indices = @transform_24, window_bounds = array<i64: 3, 128, 128>}, {pipeline_mode = #tpu.pipeline_mode<synchronous>, transform_indices = @transform_25, window_bounds = array<i64: 1, 128>}, {pipeline_mode = #tpu.pipeline_mode<synchronous>, transform_indices = @transform_26, window_bounds = array<i64: 3, 128, 128>}, {pipeline_mode = #tpu.pipeline_mode<synchronous>, transform_indices = @transform_27, window_bounds = array<i64: 1, 128>}, {pipeline_mode = #tpu.pipeline_mode<synchronous>, transform_indices = @transform_28, window_bounds = array<i64: 128, 512>}, {pipeline_mode = #tpu.pipeline_mode<synchronous>, transform_indices = @transform_29, window_bounds = array<i64: 1, 512>}, {transform_indices = @transform_30, window_bounds = array<i64: 1, 16, 128>}, {transform_indices = @transform_31, window_bounds = array<i64: 1, 16, 128>}, {transform_indices = @transform_32, window_bounds = array<i64: 1, 16, 512>}]} {
    %cst = arith.constant 0.000000e+00 : f32
    %0 = vector.broadcast %cst : f32 to vector<18x128xf32>
    %c0 = arith.constant 0 : index
    %c0_0 = arith.constant 0 : index
    %1 = vector.load %arg34[%c0, %c0_0] : memref<18x128xf32, #tpu.memory_space<vmem>>, vector<18x128xf32>
    tpu.vector_store %arg34[%c0, %c0_0], %0 {strides = array<i32>} : memref<18x128xf32, #tpu.memory_space<vmem>>, vector<18x128xf32>,
    %c0_1 = arith.constant 0 : index
    %c0_2 = arith.constant 0 : index
    %c0_3 = arith.constant 0 : index
    %2 = vector.load %arg1[%c0_1, %c0_2, %c0_3] : memref<1x16x512xf32, #tpu.memory_space<vmem>>, vector<1x16x512xf32>
    %3 = vector.shape_cast %2 : vector<1x16x512xf32> to vector<16x512xf32>
    %c0_4 = arith.constant 0 : index
    %c0_5 = arith.constant 0 : index
    %c0_6 = arith.constant 0 : index
    %4 = vector.load %arg2[%c0_4, %c0_5, %c0_6] : memref<1x16x512xf32, #tpu.memory_space<vmem>>, vector<1x16x512xf32>
    %5 = vector.shape_cast %4 : vector<1x16x512xf32> to vector<16x512xf32>
    %c0_7 = arith.constant 0 : index
    %c0_8 = arith.constant 0 : index
    %c0_9 = arith.constant 0 : index
    %6 = vector.load %arg3[%c0_7, %c0_8, %c0_9] : memref<1x16x128xf32, #tpu.memory_space<vmem>>, vector<1x16x128xf32>
    %7 = vector.shape_cast %6 : vector<1x16x128xf32> to vector<16x128xf32>
    %cst_10 = arith.constant 5.000000e-01 : f32
    %8 = vector.broadcast %cst_10 : f32 to vector<16x512xf32>
    %9 = arith.mulf %8, %3 : vector<16x512xf32>
    %cst_11 = arith.constant 0.707106769 : f32
    %10 = vector.broadcast %cst_11 : f32 to vector<16x512xf32>
    %11 = arith.mulf %3, %10 : vector<16x512xf32>
    %cst_12 = arith.constant 0.000000e+00 : f32
    %12 = vector.broadcast %cst_12 : f32 to vector<16x512xf32>
    %13 = arith.cmpf oge, %11, %12 : vector<16x512xf32>
    %cst_13 = arith.constant 1.000000e+00 : f32
    %cst_14 = arith.constant -1.000000e+00 : f32
    %14 = vector.broadcast %cst_13 : f32 to vector<16x512xf32>
    %15 = vector.broadcast %cst_14 : f32 to vector<16x512xf32>
    %16 = arith.select %13, %14, %15 : vector<16x512xi1>, vector<16x512xf32>
    %17 = math.absf %11 : vector<16x512xf32>
    %cst_15 = arith.constant 0.327591091 : f32
    %18 = vector.broadcast %cst_15 : f32 to vector<16x512xf32>
    %19 = arith.mulf %18, %17 : vector<16x512xf32>
    %cst_16 = arith.constant 1.000000e+00 : f32
    %20 = vector.broadcast %cst_16 : f32 to vector<16x512xf32>
    %21 = arith.addf %20, %19 : vector<16x512xf32>
    %cst_17 = arith.constant 1.000000e+00 : f32
    %22 = vector.broadcast %cst_17 : f32 to vector<16x512xf32>
    %23 = arith.divf %22, %21 : vector<16x512xf32>
    %cst_18 = arith.constant 1.06140542 : f32
    %24 = vector.broadcast %cst_18 : f32 to vector<16x512xf32>
    %25 = arith.mulf %24, %23 : vector<16x512xf32>
    %cst_19 = arith.constant -1.45315206 : f32
    %26 = vector.broadcast %cst_19 : f32 to vector<16x512xf32>
    %27 = arith.addf %25, %26 : vector<16x512xf32>
    %28 = arith.mulf %27, %23 : vector<16x512xf32>
    %cst_20 = arith.constant 1.42141378 : f32
    %29 = vector.broadcast %cst_20 : f32 to vector<16x512xf32>
    %30 = arith.addf %28, %29 : vector<16x512xf32>
    %31 = arith.mulf %30, %23 : vector<16x512xf32>
    %cst_21 = arith.constant -0.284496725 : f32
    %32 = vector.broadcast %cst_21 : f32 to vector<16x512xf32>
    %33 = arith.addf %31, %32 : vector<16x512xf32>
    %34 = arith.mulf %33, %23 : vector<16x512xf32>
    %cst_22 = arith.constant 0.254829586 : f32
    %35 = vector.broadcast %cst_22 : f32 to vector<16x512xf32>
    %36 = arith.addf %34, %35 : vector<16x512xf32>
    %37 = arith.mulf %36, %23 : vector<16x512xf32>
    %cst_23 = arith.constant 0.000000e+00 : f32
    %38 = vector.broadcast %cst_23 : f32 to vector<16x512xf32>
    %39 = arith.subf %38, %17 : vector<16x512xf32>
    %40 = arith.mulf %39, %17 : vector<16x512xf32>
    %41 = math.exp %40 : vector<16x512xf32>
    %42 = arith.mulf %37, %41 : vector<16x512xf32>
    %cst_24 = arith.constant 1.000000e+00 : f32
    %43 = vector.broadcast %cst_24 : f32 to vector<16x512xf32>
    %44 = arith.subf %43, %42 : vector<16x512xf32>
    %45 = arith.mulf %16, %44 : vector<16x512xf32>
    %cst_25 = arith.constant 1.000000e+00 : f32
    %46 = vector.broadcast %cst_25 : f32 to vector<16x512xf32>
    %47 = arith.addf %46, %45 : vector<16x512xf32>
    %48 = arith.mulf %9, %47 : vector<16x512xf32>
    %cst_26 = arith.constant 5.000000e-01 : f32
    %49 = vector.broadcast %cst_26 : f32 to vector<16x512xf32>
    %50 = arith.mulf %49, %5 : vector<16x512xf32>
    %cst_27 = arith.constant 0.707106769 : f32
    %51 = vector.broadcast %cst_27 : f32 to vector<16x512xf32>
    %52 = arith.mulf %5, %51 : vector<16x512xf32>
    %cst_28 = arith.constant 0.000000e+00 : f32
    %53 = vector.broadcast %cst_28 : f32 to vector<16x512xf32>
    %54 = arith.cmpf oge, %52, %53 : vector<16x512xf32>
    %cst_29 = arith.constant 1.000000e+00 : f32
    %cst_30 = arith.constant -1.000000e+00 : f32
    %55 = vector.broadcast %cst_29 : f32 to vector<16x512xf32>
    %56 = vector.broadcast %cst_30 : f32 to vector<16x512xf32>
    %57 = arith.select %54, %55, %56 : vector<16x512xi1>, vector<16x512xf32>
    %58 = math.absf %52 : vector<16x512xf32>
    %cst_31 = arith.constant 0.327591091 : f32
    %59 = vector.broadcast %cst_31 : f32 to vector<16x512xf32>
    %60 = arith.mulf %59, %58 : vector<16x512xf32>
    %cst_32 = arith.constant 1.000000e+00 : f32
    %61 = vector.broadcast %cst_32 : f32 to vector<16x512xf32>
    %62 = arith.addf %61, %60 : vector<16x512xf32>
    %cst_33 = arith.constant 1.000000e+00 : f32
    %63 = vector.broadcast %cst_33 : f32 to vector<16x512xf32>
    %64 = arith.divf %63, %62 : vector<16x512xf32>
    %cst_34 = arith.constant 1.06140542 : f32
    %65 = vector.broadcast %cst_34 : f32 to vector<16x512xf32>
    %66 = arith.mulf %65, %64 : vector<16x512xf32>
    %cst_35 = arith.constant -1.45315206 : f32
    %67 = vector.broadcast %cst_35 : f32 to vector<16x512xf32>
    %68 = arith.addf %66, %67 : vector<16x512xf32>
    %69 = arith.mulf %68, %64 : vector<16x512xf32>
    %cst_36 = arith.constant 1.42141378 : f32
    %70 = vector.broadcast %cst_36 : f32 to vector<16x512xf32>
    %71 = arith.addf %69, %70 : vector<16x512xf32>
    %72 = arith.mulf %71, %64 : vector<16x512xf32>
    %cst_37 = arith.constant -0.284496725 : f32
    %73 = vector.broadcast %cst_37 : f32 to vector<16x512xf32>
    %74 = arith.addf %72, %73 : vector<16x512xf32>
    %75 = arith.mulf %74, %64 : vector<16x512xf32>
    %cst_38 = arith.constant 0.254829586 : f32
    %76 = vector.broadcast %cst_38 : f32 to vector<16x512xf32>
    %77 = arith.addf %75, %76 : vector<16x512xf32>
    %78 = arith.mulf %77, %64 : vector<16x512xf32>
    %cst_39 = arith.constant 0.000000e+00 : f32
    %79 = vector.broadcast %cst_39 : f32 to vector<16x512xf32>
    %80 = arith.subf %79, %58 : vector<16x512xf32>
    %81 = arith.mulf %80, %58 : vector<16x512xf32>
    %82 = math.exp %81 : vector<16x512xf32>
    %83 = arith.mulf %78, %82 : vector<16x512xf32>
    %cst_40 = arith.constant 1.000000e+00 : f32
    %84 = vector.broadcast %cst_40 : f32 to vector<16x512xf32>
    %85 = arith.subf %84, %83 : vector<16x512xf32>
    %86 = arith.mulf %57, %85 : vector<16x512xf32>
    %cst_41 = arith.constant 1.000000e+00 : f32
    %87 = vector.broadcast %cst_41 : f32 to vector<16x512xf32>
    %88 = arith.addf %87, %86 : vector<16x512xf32>
    %89 = arith.mulf %50, %88 : vector<16x512xf32>
    %c0_42 = arith.constant 0 : index
    %c0_43 = arith.constant 0 : index
    %90 = vector.load %arg4[%c0_42, %c0_43] : memref<512x128xf32, #tpu.memory_space<vmem>>, vector<512x128xf32>
    %cst_44 = arith.constant dense<0.000000e+00> : vector<16x128xf32>
    %91 = tpu.matmul %48, %90, %cst_44 {dimension_numbers = #tpu.dot_dimension_numbers<[1], [0], [0], [1], [0, 0, 1, 1], [], []>} : vector<16x512xf32>, vector<512x128xf32>, vector<16x128xf32> -> vector<16x128xf32>
    %c0_45 = arith.constant 0 : index
    %c0_46 = arith.constant 0 : index
    %92 = vector.load %arg5[%c0_45, %c0_46] : memref<512x128xf32, #tpu.memory_space<vmem>>, vector<512x128xf32>
    %cst_47 = arith.constant dense<0.000000e+00> : vector<16x128xf32>
    %93 = tpu.matmul %89, %92, %cst_47 {dimension_numbers = #tpu.dot_dimension_numbers<[1], [0], [0], [1], [0, 0, 1, 1], [], []>} : vector<16x512xf32>, vector<512x128xf32>, vector<16x128xf32> -> vector<16x128xf32>
    %94 = arith.addf %91, %93 : vector<16x128xf32>
    %c0_48 = arith.constant 0 : index
    %c0_49 = arith.constant 0 : index
    %95 = vector.load %arg6[%c0_48, %c0_49] : memref<1x128xf32, #tpu.memory_space<vmem>>, vector<1x128xf32>
    %96 = vector.broadcast %95 : vector<1x128xf32> to vector<16x128xf32>
    %97 = arith.addf %94, %96 : vector<16x128xf32>
    %cst_50 = arith.constant 5.000000e-01 : f32
    %98 = vector.broadcast %cst_50 : f32 to vector<16x128xf32>
    %99 = arith.mulf %98, %97 : vector<16x128xf32>
    %cst_51 = arith.constant 0.707106769 : f32
    %100 = vector.broadcast %cst_51 : f32 to vector<16x128xf32>
    %101 = arith.mulf %97, %100 : vector<16x128xf32>
    %cst_52 = arith.constant 0.000000e+00 : f32
    %102 = vector.broadcast %cst_52 : f32 to vector<16x128xf32>
    %103 = arith.cmpf oge, %101, %102 : vector<16x128xf32>
    %cst_53 = arith.constant 1.000000e+00 : f32
    %cst_54 = arith.constant -1.000000e+00 : f32
    %104 = vector.broadcast %cst_53 : f32 to vector<16x128xf32>
    %105 = vector.broadcast %cst_54 : f32 to vector<16x128xf32>
    %106 = arith.select %103, %104, %105 : vector<16x128xi1>, vector<16x128xf32>
    %107 = math.absf %101 : vector<16x128xf32>
    %cst_55 = arith.constant 0.327591091 : f32
    %108 = vector.broadcast %cst_55 : f32 to vector<16x128xf32>
    %109 = arith.mulf %108, %107 : vector<16x128xf32>
    %cst_56 = arith.constant 1.000000e+00 : f32
    %110 = vector.broadcast %cst_56 : f32 to vector<16x128xf32>
    %111 = arith.addf %110, %109 : vector<16x128xf32>
    %cst_57 = arith.constant 1.000000e+00 : f32
    %112 = vector.broadcast %cst_57 : f32 to vector<16x128xf32>
    %113 = arith.divf %112, %111 : vector<16x128xf32>
    %cst_58 = arith.constant 1.06140542 : f32
    %114 = vector.broadcast %cst_58 : f32 to vector<16x128xf32>
    %115 = arith.mulf %114, %113 : vector<16x128xf32>
    %cst_59 = arith.constant -1.45315206 : f32
    %116 = vector.broadcast %cst_59 : f32 to vector<16x128xf32>
    %117 = arith.addf %115, %116 : vector<16x128xf32>
    %118 = arith.mulf %117, %113 : vector<16x128xf32>
    %cst_60 = arith.constant 1.42141378 : f32
    %119 = vector.broadcast %cst_60 : f32 to vector<16x128xf32>
    %120 = arith.addf %118, %119 : vector<16x128xf32>
    %121 = arith.mulf %120, %113 : vector<16x128xf32>
    %cst_61 = arith.constant -0.284496725 : f32
    %122 = vector.broadcast %cst_61 : f32 to vector<16x128xf32>
    %123 = arith.addf %121, %122 : vector<16x128xf32>
    %124 = arith.mulf %123, %113 : vector<16x128xf32>
    %cst_62 = arith.constant 0.254829586 : f32
    %125 = vector.broadcast %cst_62 : f32 to vector<16x128xf32>
    %126 = arith.addf %124, %125 : vector<16x128xf32>
    %127 = arith.mulf %126, %113 : vector<16x128xf32>
    %cst_63 = arith.constant 0.000000e+00 : f32
    %128 = vector.broadcast %cst_63 : f32 to vector<16x128xf32>
    %129 = arith.subf %128, %107 : vector<16x128xf32>
    %130 = arith.mulf %129, %107 : vector<16x128xf32>
    %131 = math.exp %130 : vector<16x128xf32>
    %132 = arith.mulf %127, %131 : vector<16x128xf32>
    %cst_64 = arith.constant 1.000000e+00 : f32
    %133 = vector.broadcast %cst_64 : f32 to vector<16x128xf32>
    %134 = arith.subf %133, %132 : vector<16x128xf32>
    %135 = arith.mulf %106, %134 : vector<16x128xf32>
    %cst_65 = arith.constant 1.000000e+00 : f32
    %136 = vector.broadcast %cst_65 : f32 to vector<16x128xf32>
    %137 = arith.addf %136, %135 : vector<16x128xf32>
    %138 = arith.mulf %99, %137 : vector<16x128xf32>
    %c1 = arith.constant 1 : index
    %c0_66 = arith.constant 0 : index
    %139 = vector.load %arg34[%c1, %c0_66] : memref<18x128xf32, #tpu.memory_space<vmem>>, vector<16x128xf32>
    tpu.vector_store %arg34[%c1, %c0_66], %138 {strides = array<i32>} : memref<18x128xf32, #tpu.memory_space<vmem>>, vector<16x128xf32>,
    %c0_67 = arith.constant 0 : index
    %c0_68 = arith.constant 0 : index
    %140 = vector.load %arg34[%c0_67, %c0_68] : memref<18x128xf32, #tpu.memory_space<vmem>>, vector<16x128xf32>
    %c0_69 = arith.constant 0 : index
    %c0_70 = arith.constant 0 : index
    %c0_71 = arith.constant 0 : index
    %141 = vector.load %arg7[%c0_69, %c0_70, %c0_71] : memref<3x128x128xf32, #tpu.memory_space<vmem>>, vector<1x128x128xf32>
    %142 = vector.shape_cast %141 : vector<1x128x128xf32> to vector<128x128xf32>
    %cst_72 = arith.constant dense<0.000000e+00> : vector<16x128xf32>
    %143 = tpu.matmul %140, %142, %cst_72 {dimension_numbers = #tpu.dot_dimension_numbers<[1], [0], [0], [1], [0, 0, 1, 1], [], []>} : vector<16x128xf32>, vector<128x128xf32>, vector<16x128xf32> -> vector<16x128xf32>
    %c1_73 = arith.constant 1 : index
    %c0_74 = arith.constant 0 : index
    %144 = vector.load %arg34[%c1_73, %c0_74] : memref<18x128xf32, #tpu.memory_space<vmem>>, vector<16x128xf32>
    %c1_75 = arith.constant 1 : index
    %c0_76 = arith.constant 0 : index
    %c0_77 = arith.constant 0 : index
    %145 = vector.load %arg7[%c1_75, %c0_76, %c0_77] : memref<3x128x128xf32, #tpu.memory_space<vmem>>, vector<1x128x128xf32>
    %146 = vector.shape_cast %145 : vector<1x128x128xf32> to vector<128x128xf32>
    %cst_78 = arith.constant dense<0.000000e+00> : vector<16x128xf32>
    %147 = tpu.matmul %144, %146, %cst_78 {dimension_numbers = #tpu.dot_dimension_numbers<[1], [0], [0], [1], [0, 0, 1, 1], [], []>} : vector<16x128xf32>, vector<128x128xf32>, vector<16x128xf32> -> vector<16x128xf32>
    %148 = arith.addf %143, %147 : vector<16x128xf32>
    %c2 = arith.constant 2 : index
    %c0_79 = arith.constant 0 : index
    %149 = vector.load %arg34[%c2, %c0_79] : memref<18x128xf32, #tpu.memory_space<vmem>>, vector<16x128xf32>
    %c2_80 = arith.constant 2 : index
    %c0_81 = arith.constant 0 : index
    %c0_82 = arith.constant 0 : index
    %150 = vector.load %arg7[%c2_80, %c0_81, %c0_82] : memref<3x128x128xf32, #tpu.memory_space<vmem>>, vector<1x128x128xf32>
    %151 = vector.shape_cast %150 : vector<1x128x128xf32> to vector<128x128xf32>
    %cst_83 = arith.constant dense<0.000000e+00> : vector<16x128xf32>
    %152 = tpu.matmul %149, %151, %cst_83 {dimension_numbers = #tpu.dot_dimension_numbers<[1], [0], [0], [1], [0, 0, 1, 1], [], []>} : vector<16x128xf32>, vector<128x128xf32>, vector<16x128xf32> -> vector<16x128xf32>
    %153 = arith.addf %148, %152 : vector<16x128xf32>
    %c0_84 = arith.constant 0 : index
    %c0_85 = arith.constant 0 : index
    %154 = vector.load %arg8[%c0_84, %c0_85] : memref<1x128xf32, #tpu.memory_space<vmem>>, vector<1x128xf32>
    %155 = vector.broadcast %154 : vector<1x128xf32> to vector<16x128xf32>
    %156 = arith.addf %153, %155 : vector<16x128xf32>
    %cst_86 = arith.constant 5.000000e-01 : f32
    %157 = vector.broadcast %cst_86 : f32 to vector<16x128xf32>
    %158 = arith.mulf %157, %156 : vector<16x128xf32>
    %cst_87 = arith.constant 0.707106769 : f32
    %159 = vector.broadcast %cst_87 : f32 to vector<16x128xf32>
    %160 = arith.mulf %156, %159 : vector<16x128xf32>
    %cst_88 = arith.constant 0.000000e+00 : f32
    %161 = vector.broadcast %cst_88 : f32 to vector<16x128xf32>
    %162 = arith.cmpf oge, %160, %161 : vector<16x128xf32>
    %cst_89 = arith.constant 1.000000e+00 : f32
    %cst_90 = arith.constant -1.000000e+00 : f32
    %163 = vector.broadcast %cst_89 : f32 to vector<16x128xf32>
    %164 = vector.broadcast %cst_90 : f32 to vector<16x128xf32>
    %165 = arith.select %162, %163, %164 : vector<16x128xi1>, vector<16x128xf32>
    %166 = math.absf %160 : vector<16x128xf32>
    %cst_91 = arith.constant 0.327591091 : f32
    %167 = vector.broadcast %cst_91 : f32 to vector<16x128xf32>
    %168 = arith.mulf %167, %166 : vector<16x128xf32>
    %cst_92 = arith.constant 1.000000e+00 : f32
    %169 = vector.broadcast %cst_92 : f32 to vector<16x128xf32>
    %170 = arith.addf %169, %168 : vector<16x128xf32>
    %cst_93 = arith.constant 1.000000e+00 : f32
    %171 = vector.broadcast %cst_93 : f32 to vector<16x128xf32>
    %172 = arith.divf %171, %170 : vector<16x128xf32>
    %cst_94 = arith.constant 1.06140542 : f32
    %173 = vector.broadcast %cst_94 : f32 to vector<16x128xf32>
    %174 = arith.mulf %173, %172 : vector<16x128xf32>
    %cst_95 = arith.constant -1.45315206 : f32
    %175 = vector.broadcast %cst_95 : f32 to vector<16x128xf32>
    %176 = arith.addf %174, %175 : vector<16x128xf32>
    %177 = arith.mulf %176, %172 : vector<16x128xf32>
    %cst_96 = arith.constant 1.42141378 : f32
    %178 = vector.broadcast %cst_96 : f32 to vector<16x128xf32>
    %179 = arith.addf %177, %178 : vector<16x128xf32>
    %180 = arith.mulf %179, %172 : vector<16x128xf32>
    %cst_97 = arith.constant -0.284496725 : f32
    %181 = vector.broadcast %cst_97 : f32 to vector<16x128xf32>
    %182 = arith.addf %180, %181 : vector<16x128xf32>
    %183 = arith.mulf %182, %172 : vector<16x128xf32>
    %cst_98 = arith.constant 0.254829586 : f32
    %184 = vector.broadcast %cst_98 : f32 to vector<16x128xf32>
    %185 = arith.addf %183, %184 : vector<16x128xf32>
    %186 = arith.mulf %185, %172 : vector<16x128xf32>
    %cst_99 = arith.constant 0.000000e+00 : f32
    %187 = vector.broadcast %cst_99 : f32 to vector<16x128xf32>
    %188 = arith.subf %187, %166 : vector<16x128xf32>
    %189 = arith.mulf %188, %166 : vector<16x128xf32>
    %190 = math.exp %189 : vector<16x128xf32>
    %191 = arith.mulf %186, %190 : vector<16x128xf32>
    %cst_100 = arith.constant 1.000000e+00 : f32
    %192 = vector.broadcast %cst_100 : f32 to vector<16x128xf32>
    %193 = arith.subf %192, %191 : vector<16x128xf32>
    %194 = arith.mulf %165, %193 : vector<16x128xf32>
    %cst_101 = arith.constant 1.000000e+00 : f32
    %195 = vector.broadcast %cst_101 : f32 to vector<16x128xf32>
    %196 = arith.addf %195, %194 : vector<16x128xf32>
    %197 = arith.mulf %158, %196 : vector<16x128xf32>
    %c1_102 = arith.constant 1 : index
    %c0_103 = arith.constant 0 : index
    %198 = vector.load %arg34[%c1_102, %c0_103] : memref<18x128xf32, #tpu.memory_space<vmem>>, vector<16x128xf32>
    tpu.vector_store %arg34[%c1_102, %c0_103], %197 {strides = array<i32>} : memref<18x128xf32, #tpu.memory_space<vmem>>, vector<16x128xf32>,
    %c0_104 = arith.constant 0 : index
    %c0_105 = arith.constant 0 : index
    %199 = vector.load %arg34[%c0_104, %c0_105] : memref<18x128xf32, #tpu.memory_space<vmem>>, vector<16x128xf32>
    %c0_106 = arith.constant 0 : index
    %c0_107 = arith.constant 0 : index
    %c0_108 = arith.constant 0 : index
    %200 = vector.load %arg9[%c0_106, %c0_107, %c0_108] : memref<3x128x128xf32, #tpu.memory_space<vmem>>, vector<1x128x128xf32>
    %201 = vector.shape_cast %200 : vector<1x128x128xf32> to vector<128x128xf32>
    %cst_109 = arith.constant dense<0.000000e+00> : vector<16x128xf32>
    %202 = tpu.matmul %199, %201, %cst_109 {dimension_numbers = #tpu.dot_dimension_numbers<[1], [0], [0], [1], [0, 0, 1, 1], [], []>} : vector<16x128xf32>, vector<128x128xf32>, vector<16x128xf32> -> vector<16x128xf32>
    %c1_110 = arith.constant 1 : index
    %c0_111 = arith.constant 0 : index
    %203 = vector.load %arg34[%c1_110, %c0_111] : memref<18x128xf32, #tpu.memory_space<vmem>>, vector<16x128xf32>
    %c1_112 = arith.constant 1 : index
    %c0_113 = arith.constant 0 : index
    %c0_114 = arith.constant 0 : index
    %204 = vector.load %arg9[%c1_112, %c0_113, %c0_114] : memref<3x128x128xf32, #tpu.memory_space<vmem>>, vector<1x128x128xf32>
    %205 = vector.shape_cast %204 : vector<1x128x128xf32> to vector<128x128xf32>
    %cst_115 = arith.constant dense<0.000000e+00> : vector<16x128xf32>
    %206 = tpu.matmul %203, %205, %cst_115 {dimension_numbers = #tpu.dot_dimension_numbers<[1], [0], [0], [1], [0, 0, 1, 1], [], []>} : vector<16x128xf32>, vector<128x128xf32>, vector<16x128xf32> -> vector<16x128xf32>
    %207 = arith.addf %202, %206 : vector<16x128xf32>
    %c2_116 = arith.constant 2 : index
    %c0_117 = arith.constant 0 : index
    %208 = vector.load %arg34[%c2_116, %c0_117] : memref<18x128xf32, #tpu.memory_space<vmem>>, vector<16x128xf32>
    %c2_118 = arith.constant 2 : index
    %c0_119 = arith.constant 0 : index
    %c0_120 = arith.constant 0 : index
    %209 = vector.load %arg9[%c2_118, %c0_119, %c0_120] : memref<3x128x128xf32, #tpu.memory_space<vmem>>, vector<1x128x128xf32>
    %210 = vector.shape_cast %209 : vector<1x128x128xf32> to vector<128x128xf32>
    %cst_121 = arith.constant dense<0.000000e+00> : vector<16x128xf32>
    %211 = tpu.matmul %208, %210, %cst_121 {dimension_numbers = #tpu.dot_dimension_numbers<[1], [0], [0], [1], [0, 0, 1, 1], [], []>} : vector<16x128xf32>, vector<128x128xf32>, vector<16x128xf32> -> vector<16x128xf32>
    %212 = arith.addf %207, %211 : vector<16x128xf32>
    %c0_122 = arith.constant 0 : index
    %c0_123 = arith.constant 0 : index
    %213 = vector.load %arg10[%c0_122, %c0_123] : memref<1x128xf32, #tpu.memory_space<vmem>>, vector<1x128xf32>
    %214 = vector.broadcast %213 : vector<1x128xf32> to vector<16x128xf32>
    %215 = arith.addf %212, %214 : vector<16x128xf32>
    %cst_124 = arith.constant 5.000000e-01 : f32
    %216 = vector.broadcast %cst_124 : f32 to vector<16x128xf32>
    %217 = arith.mulf %216, %215 : vector<16x128xf32>
    %cst_125 = arith.constant 0.707106769 : f32
    %218 = vector.broadcast %cst_125 : f32 to vector<16x128xf32>
    %219 = arith.mulf %215, %218 : vector<16x128xf32>
    %cst_126 = arith.constant 0.000000e+00 : f32
    %220 = vector.broadcast %cst_126 : f32 to vector<16x128xf32>
    %221 = arith.cmpf oge, %219, %220 : vector<16x128xf32>
    %cst_127 = arith.constant 1.000000e+00 : f32
    %cst_128 = arith.constant -1.000000e+00 : f32
    %222 = vector.broadcast %cst_127 : f32 to vector<16x128xf32>
    %223 = vector.broadcast %cst_128 : f32 to vector<16x128xf32>
    %224 = arith.select %221, %222, %223 : vector<16x128xi1>, vector<16x128xf32>
    %225 = math.absf %219 : vector<16x128xf32>
    %cst_129 = arith.constant 0.327591091 : f32
    %226 = vector.broadcast %cst_129 : f32 to vector<16x128xf32>
    %227 = arith.mulf %226, %225 : vector<16x128xf32>
    %cst_130 = arith.constant 1.000000e+00 : f32
    %228 = vector.broadcast %cst_130 : f32 to vector<16x128xf32>
    %229 = arith.addf %228, %227 : vector<16x128xf32>
    %cst_131 = arith.constant 1.000000e+00 : f32
    %230 = vector.broadcast %cst_131 : f32 to vector<16x128xf32>
    %231 = arith.divf %230, %229 : vector<16x128xf32>
    %cst_132 = arith.constant 1.06140542 : f32
    %232 = vector.broadcast %cst_132 : f32 to vector<16x128xf32>
    %233 = arith.mulf %232, %231 : vector<16x128xf32>
    %cst_133 = arith.constant -1.45315206 : f32
    %234 = vector.broadcast %cst_133 : f32 to vector<16x128xf32>
    %235 = arith.addf %233, %234 : vector<16x128xf32>
    %236 = arith.mulf %235, %231 : vector<16x128xf32>
    %cst_134 = arith.constant 1.42141378 : f32
    %237 = vector.broadcast %cst_134 : f32 to vector<16x128xf32>
    %238 = arith.addf %236, %237 : vector<16x128xf32>
    %239 = arith.mulf %238, %231 : vector<16x128xf32>
    %cst_135 = arith.constant -0.284496725 : f32
    %240 = vector.broadcast %cst_135 : f32 to vector<16x128xf32>
    %241 = arith.addf %239, %240 : vector<16x128xf32>
    %242 = arith.mulf %241, %231 : vector<16x128xf32>
    %cst_136 = arith.constant 0.254829586 : f32
    %243 = vector.broadcast %cst_136 : f32 to vector<16x128xf32>
    %244 = arith.addf %242, %243 : vector<16x128xf32>
    %245 = arith.mulf %244, %231 : vector<16x128xf32>
    %cst_137 = arith.constant 0.000000e+00 : f32
    %246 = vector.broadcast %cst_137 : f32 to vector<16x128xf32>
    %247 = arith.subf %246, %225 : vector<16x128xf32>
    %248 = arith.mulf %247, %225 : vector<16x128xf32>
    %249 = math.exp %248 : vector<16x128xf32>
    %250 = arith.mulf %245, %249 : vector<16x128xf32>
    %cst_138 = arith.constant 1.000000e+00 : f32
    %251 = vector.broadcast %cst_138 : f32 to vector<16x128xf32>
    %252 = arith.subf %251, %250 : vector<16x128xf32>
    %253 = arith.mulf %224, %252 : vector<16x128xf32>
    %cst_139 = arith.constant 1.000000e+00 : f32
    %254 = vector.broadcast %cst_139 : f32 to vector<16x128xf32>
    %255 = arith.addf %254, %253 : vector<16x128xf32>
    %256 = arith.mulf %217, %255 : vector<16x128xf32>
    %c0_140 = arith.constant 0 : index
    %c0_141 = arith.constant 0 : index
    %257 = vector.load %arg11[%c0_140, %c0_141] : memref<128x256xf32, #tpu.memory_space<vmem>>, vector<128x256xf32>
    %cst_142 = arith.constant dense<0.000000e+00> : vector<16x256xf32>
    %258 = tpu.matmul %256, %257, %cst_142 {dimension_numbers = #tpu.dot_dimension_numbers<[1], [0], [0], [1], [0, 0, 1, 1], [], []>} : vector<16x128xf32>, vector<128x256xf32>, vector<16x256xf32> -> vector<16x256xf32>
    %c0_143 = arith.constant 0 : index
    %c0_144 = arith.constant 0 : index
    %259 = vector.load %arg12[%c0_143, %c0_144] : memref<1x256xf32, #tpu.memory_space<vmem>>, vector<1x256xf32>
    %260 = vector.broadcast %259 : vector<1x256xf32> to vector<16x256xf32>
    %261 = arith.addf %258, %260 : vector<16x256xf32>
    %c0_145 = arith.constant 0 : index
    %c0_146 = arith.constant 0 : index
    %262 = vector.load %arg13[%c0_145, %c0_146] : memref<512x128xf32, #tpu.memory_space<vmem>>, vector<512x128xf32>
    %cst_147 = arith.constant dense<0.000000e+00> : vector<16x128xf32>
    %263 = tpu.matmul %48, %262, %cst_147 {dimension_numbers = #tpu.dot_dimension_numbers<[1], [0], [0], [1], [0, 0, 1, 1], [], []>} : vector<16x512xf32>, vector<512x128xf32>, vector<16x128xf32> -> vector<16x128xf32>
    %c0_148 = arith.constant 0 : index
    %c0_149 = arith.constant 0 : index
    %264 = vector.load %arg14[%c0_148, %c0_149] : memref<1x128xf32, #tpu.memory_space<vmem>>, vector<1x128xf32>
    %265 = vector.broadcast %264 : vector<1x128xf32> to vector<16x128xf32>
    %266 = arith.addf %263, %265 : vector<16x128xf32>
    %cst_150 = arith.constant 5.000000e-01 : f32
    %267 = vector.broadcast %cst_150 : f32 to vector<16x128xf32>
    %268 = arith.mulf %267, %266 : vector<16x128xf32>
    %cst_151 = arith.constant 0.707106769 : f32
    %269 = vector.broadcast %cst_151 : f32 to vector<16x128xf32>
    %270 = arith.mulf %266, %269 : vector<16x128xf32>
    %cst_152 = arith.constant 0.000000e+00 : f32
    %271 = vector.broadcast %cst_152 : f32 to vector<16x128xf32>
    %272 = arith.cmpf oge, %270, %271 : vector<16x128xf32>
    %cst_153 = arith.constant 1.000000e+00 : f32
    %cst_154 = arith.constant -1.000000e+00 : f32
    %273 = vector.broadcast %cst_153 : f32 to vector<16x128xf32>
    %274 = vector.broadcast %cst_154 : f32 to vector<16x128xf32>
    %275 = arith.select %272, %273, %274 : vector<16x128xi1>, vector<16x128xf32>
    %276 = math.absf %270 : vector<16x128xf32>
    %cst_155 = arith.constant 0.327591091 : f32
    %277 = vector.broadcast %cst_155 : f32 to vector<16x128xf32>
    %278 = arith.mulf %277, %276 : vector<16x128xf32>
    %cst_156 = arith.constant 1.000000e+00 : f32
    %279 = vector.broadcast %cst_156 : f32 to vector<16x128xf32>
    %280 = arith.addf %279, %278 : vector<16x128xf32>
    %cst_157 = arith.constant 1.000000e+00 : f32
    %281 = vector.broadcast %cst_157 : f32 to vector<16x128xf32>
    %282 = arith.divf %281, %280 : vector<16x128xf32>
    %cst_158 = arith.constant 1.06140542 : f32
    %283 = vector.broadcast %cst_158 : f32 to vector<16x128xf32>
    %284 = arith.mulf %283, %282 : vector<16x128xf32>
    %cst_159 = arith.constant -1.45315206 : f32
    %285 = vector.broadcast %cst_159 : f32 to vector<16x128xf32>
    %286 = arith.addf %284, %285 : vector<16x128xf32>
    %287 = arith.mulf %286, %282 : vector<16x128xf32>
    %cst_160 = arith.constant 1.42141378 : f32
    %288 = vector.broadcast %cst_160 : f32 to vector<16x128xf32>
    %289 = arith.addf %287, %288 : vector<16x128xf32>
    %290 = arith.mulf %289, %282 : vector<16x128xf32>
    %cst_161 = arith.constant -0.284496725 : f32
    %291 = vector.broadcast %cst_161 : f32 to vector<16x128xf32>
    %292 = arith.addf %290, %291 : vector<16x128xf32>
    %293 = arith.mulf %292, %282 : vector<16x128xf32>
    %cst_162 = arith.constant 0.254829586 : f32
    %294 = vector.broadcast %cst_162 : f32 to vector<16x128xf32>
    %295 = arith.addf %293, %294 : vector<16x128xf32>
    %296 = arith.mulf %295, %282 : vector<16x128xf32>
    %cst_163 = arith.constant 0.000000e+00 : f32
    %297 = vector.broadcast %cst_163 : f32 to vector<16x128xf32>
    %298 = arith.subf %297, %276 : vector<16x128xf32>
    %299 = arith.mulf %298, %276 : vector<16x128xf32>
    %300 = math.exp %299 : vector<16x128xf32>
    %301 = arith.mulf %296, %300 : vector<16x128xf32>
    %cst_164 = arith.constant 1.000000e+00 : f32
    %302 = vector.broadcast %cst_164 : f32 to vector<16x128xf32>
    %303 = arith.subf %302, %301 : vector<16x128xf32>
    %304 = arith.mulf %275, %303 : vector<16x128xf32>
    %cst_165 = arith.constant 1.000000e+00 : f32
    %305 = vector.broadcast %cst_165 : f32 to vector<16x128xf32>
    %306 = arith.addf %305, %304 : vector<16x128xf32>
    %307 = arith.mulf %268, %306 : vector<16x128xf32>
    %c1_166 = arith.constant 1 : index
    %c0_167 = arith.constant 0 : index
    %308 = vector.load %arg34[%c1_166, %c0_167] : memref<18x128xf32, #tpu.memory_space<vmem>>, vector<16x128xf32>
    tpu.vector_store %arg34[%c1_166, %c0_167], %307 {strides = array<i32>} : memref<18x128xf32, #tpu.memory_space<vmem>>, vector<16x128xf32>,
    %c0_168 = arith.constant 0 : index
    %c0_169 = arith.constant 0 : index
    %309 = vector.load %arg34[%c0_168, %c0_169] : memref<18x128xf32, #tpu.memory_space<vmem>>, vector<16x128xf32>
    %c0_170 = arith.constant 0 : index
    %c0_171 = arith.constant 0 : index
    %c0_172 = arith.constant 0 : index
    %310 = vector.load %arg15[%c0_170, %c0_171, %c0_172] : memref<3x128x128xf32, #tpu.memory_space<vmem>>, vector<1x128x128xf32>
    %311 = vector.shape_cast %310 : vector<1x128x128xf32> to vector<128x128xf32>
    %cst_173 = arith.constant dense<0.000000e+00> : vector<16x128xf32>
    %312 = tpu.matmul %309, %311, %cst_173 {dimension_numbers = #tpu.dot_dimension_numbers<[1], [0], [0], [1], [0, 0, 1, 1], [], []>} : vector<16x128xf32>, vector<128x128xf32>, vector<16x128xf32> -> vector<16x128xf32>
    %c1_174 = arith.constant 1 : index
    %c0_175 = arith.constant 0 : index
    %313 = vector.load %arg34[%c1_174, %c0_175] : memref<18x128xf32, #tpu.memory_space<vmem>>, vector<16x128xf32>
    %c1_176 = arith.constant 1 : index
    %c0_177 = arith.constant 0 : index
    %c0_178 = arith.constant 0 : index
    %314 = vector.load %arg15[%c1_176, %c0_177, %c0_178] : memref<3x128x128xf32, #tpu.memory_space<vmem>>, vector<1x128x128xf32>
    %315 = vector.shape_cast %314 : vector<1x128x128xf32> to vector<128x128xf32>
    %cst_179 = arith.constant dense<0.000000e+00> : vector<16x128xf32>
    %316 = tpu.matmul %313, %315, %cst_179 {dimension_numbers = #tpu.dot_dimension_numbers<[1], [0], [0], [1], [0, 0, 1, 1], [], []>} : vector<16x128xf32>, vector<128x128xf32>, vector<16x128xf32> -> vector<16x128xf32>
    %317 = arith.addf %312, %316 : vector<16x128xf32>
    %c2_180 = arith.constant 2 : index
    %c0_181 = arith.constant 0 : index
    %318 = vector.load %arg34[%c2_180, %c0_181] : memref<18x128xf32, #tpu.memory_space<vmem>>, vector<16x128xf32>
    %c2_182 = arith.constant 2 : index
    %c0_183 = arith.constant 0 : index
    %c0_184 = arith.constant 0 : index
    %319 = vector.load %arg15[%c2_182, %c0_183, %c0_184] : memref<3x128x128xf32, #tpu.memory_space<vmem>>, vector<1x128x128xf32>
    %320 = vector.shape_cast %319 : vector<1x128x128xf32> to vector<128x128xf32>
    %cst_185 = arith.constant dense<0.000000e+00> : vector<16x128xf32>
    %321 = tpu.matmul %318, %320, %cst_185 {dimension_numbers = #tpu.dot_dimension_numbers<[1], [0], [0], [1], [0, 0, 1, 1], [], []>} : vector<16x128xf32>, vector<128x128xf32>, vector<16x128xf32> -> vector<16x128xf32>
    %322 = arith.addf %317, %321 : vector<16x128xf32>
    %c0_186 = arith.constant 0 : index
    %c0_187 = arith.constant 0 : index
    %323 = vector.load %arg16[%c0_186, %c0_187] : memref<1x128xf32, #tpu.memory_space<vmem>>, vector<1x128xf32>
    %324 = vector.broadcast %323 : vector<1x128xf32> to vector<16x128xf32>
    %325 = arith.addf %322, %324 : vector<16x128xf32>
    %cst_188 = arith.constant 5.000000e-01 : f32
    %326 = vector.broadcast %cst_188 : f32 to vector<16x128xf32>
    %327 = arith.mulf %326, %325 : vector<16x128xf32>
    %cst_189 = arith.constant 0.707106769 : f32
    %328 = vector.broadcast %cst_189 : f32 to vector<16x128xf32>
    %329 = arith.mulf %325, %328 : vector<16x128xf32>
    %cst_190 = arith.constant 0.000000e+00 : f32
    %330 = vector.broadcast %cst_190 : f32 to vector<16x128xf32>
    %331 = arith.cmpf oge, %329, %330 : vector<16x128xf32>
    %cst_191 = arith.constant 1.000000e+00 : f32
    %cst_192 = arith.constant -1.000000e+00 : f32
    %332 = vector.broadcast %cst_191 : f32 to vector<16x128xf32>
    %333 = vector.broadcast %cst_192 : f32 to vector<16x128xf32>
    %334 = arith.select %331, %332, %333 : vector<16x128xi1>, vector<16x128xf32>
    %335 = math.absf %329 : vector<16x128xf32>
    %cst_193 = arith.constant 0.327591091 : f32
    %336 = vector.broadcast %cst_193 : f32 to vector<16x128xf32>
    %337 = arith.mulf %336, %335 : vector<16x128xf32>
    %cst_194 = arith.constant 1.000000e+00 : f32
    %338 = vector.broadcast %cst_194 : f32 to vector<16x128xf32>
    %339 = arith.addf %338, %337 : vector<16x128xf32>
    %cst_195 = arith.constant 1.000000e+00 : f32
    %340 = vector.broadcast %cst_195 : f32 to vector<16x128xf32>
    %341 = arith.divf %340, %339 : vector<16x128xf32>
    %cst_196 = arith.constant 1.06140542 : f32
    %342 = vector.broadcast %cst_196 : f32 to vector<16x128xf32>
    %343 = arith.mulf %342, %341 : vector<16x128xf32>
    %cst_197 = arith.constant -1.45315206 : f32
    %344 = vector.broadcast %cst_197 : f32 to vector<16x128xf32>
    %345 = arith.addf %343, %344 : vector<16x128xf32>
    %346 = arith.mulf %345, %341 : vector<16x128xf32>
    %cst_198 = arith.constant 1.42141378 : f32
    %347 = vector.broadcast %cst_198 : f32 to vector<16x128xf32>
    %348 = arith.addf %346, %347 : vector<16x128xf32>
    %349 = arith.mulf %348, %341 : vector<16x128xf32>
    %cst_199 = arith.constant -0.284496725 : f32
    %350 = vector.broadcast %cst_199 : f32 to vector<16x128xf32>
    %351 = arith.addf %349, %350 : vector<16x128xf32>
    %352 = arith.mulf %351, %341 : vector<16x128xf32>
    %cst_200 = arith.constant 0.254829586 : f32
    %353 = vector.broadcast %cst_200 : f32 to vector<16x128xf32>
    %354 = arith.addf %352, %353 : vector<16x128xf32>
    %355 = arith.mulf %354, %341 : vector<16x128xf32>
    %cst_201 = arith.constant 0.000000e+00 : f32
    %356 = vector.broadcast %cst_201 : f32 to vector<16x128xf32>
    %357 = arith.subf %356, %335 : vector<16x128xf32>
    %358 = arith.mulf %357, %335 : vector<16x128xf32>
    %359 = math.exp %358 : vector<16x128xf32>
    %360 = arith.mulf %355, %359 : vector<16x128xf32>
    %cst_202 = arith.constant 1.000000e+00 : f32
    %361 = vector.broadcast %cst_202 : f32 to vector<16x128xf32>
    %362 = arith.subf %361, %360 : vector<16x128xf32>
    %363 = arith.mulf %334, %362 : vector<16x128xf32>
    %cst_203 = arith.constant 1.000000e+00 : f32
    %364 = vector.broadcast %cst_203 : f32 to vector<16x128xf32>
    %365 = arith.addf %364, %363 : vector<16x128xf32>
    %366 = arith.mulf %327, %365 : vector<16x128xf32>
    %c1_204 = arith.constant 1 : index
    %c0_205 = arith.constant 0 : index
    %367 = vector.load %arg34[%c1_204, %c0_205] : memref<18x128xf32, #tpu.memory_space<vmem>>, vector<16x128xf32>
    tpu.vector_store %arg34[%c1_204, %c0_205], %366 {strides = array<i32>} : memref<18x128xf32, #tpu.memory_space<vmem>>, vector<16x128xf32>,
    %c0_206 = arith.constant 0 : index
    %c0_207 = arith.constant 0 : index
    %368 = vector.load %arg34[%c0_206, %c0_207] : memref<18x128xf32, #tpu.memory_space<vmem>>, vector<16x128xf32>
    %c0_208 = arith.constant 0 : index
    %c0_209 = arith.constant 0 : index
    %c0_210 = arith.constant 0 : index
    %369 = vector.load %arg17[%c0_208, %c0_209, %c0_210] : memref<3x128x128xf32, #tpu.memory_space<vmem>>, vector<1x128x128xf32>
    %370 = vector.shape_cast %369 : vector<1x128x128xf32> to vector<128x128xf32>
    %cst_211 = arith.constant dense<0.000000e+00> : vector<16x128xf32>
    %371 = tpu.matmul %368, %370, %cst_211 {dimension_numbers = #tpu.dot_dimension_numbers<[1], [0], [0], [1], [0, 0, 1, 1], [], []>} : vector<16x128xf32>, vector<128x128xf32>, vector<16x128xf32> -> vector<16x128xf32>
    %c1_212 = arith.constant 1 : index
    %c0_213 = arith.constant 0 : index
    %372 = vector.load %arg34[%c1_212, %c0_213] : memref<18x128xf32, #tpu.memory_space<vmem>>, vector<16x128xf32>
    %c1_214 = arith.constant 1 : index
    %c0_215 = arith.constant 0 : index
    %c0_216 = arith.constant 0 : index
    %373 = vector.load %arg17[%c1_214, %c0_215, %c0_216] : memref<3x128x128xf32, #tpu.memory_space<vmem>>, vector<1x128x128xf32>
    %374 = vector.shape_cast %373 : vector<1x128x128xf32> to vector<128x128xf32>
    %cst_217 = arith.constant dense<0.000000e+00> : vector<16x128xf32>
    %375 = tpu.matmul %372, %374, %cst_217 {dimension_numbers = #tpu.dot_dimension_numbers<[1], [0], [0], [1], [0, 0, 1, 1], [], []>} : vector<16x128xf32>, vector<128x128xf32>, vector<16x128xf32> -> vector<16x128xf32>
    %376 = arith.addf %371, %375 : vector<16x128xf32>
    %c2_218 = arith.constant 2 : index
    %c0_219 = arith.constant 0 : index
    %377 = vector.load %arg34[%c2_218, %c0_219] : memref<18x128xf32, #tpu.memory_space<vmem>>, vector<16x128xf32>
    %c2_220 = arith.constant 2 : index
    %c0_221 = arith.constant 0 : index
    %c0_222 = arith.constant 0 : index
    %378 = vector.load %arg17[%c2_220, %c0_221, %c0_222] : memref<3x128x128xf32, #tpu.memory_space<vmem>>, vector<1x128x128xf32>
    %379 = vector.shape_cast %378 : vector<1x128x128xf32> to vector<128x128xf32>
    %cst_223 = arith.constant dense<0.000000e+00> : vector<16x128xf32>
    %380 = tpu.matmul %377, %379, %cst_223 {dimension_numbers = #tpu.dot_dimension_numbers<[1], [0], [0], [1], [0, 0, 1, 1], [], []>} : vector<16x128xf32>, vector<128x128xf32>, vector<16x128xf32> -> vector<16x128xf32>
    %381 = arith.addf %376, %380 : vector<16x128xf32>
    %c0_224 = arith.constant 0 : index
    %c0_225 = arith.constant 0 : index
    %382 = vector.load %arg18[%c0_224, %c0_225] : memref<1x128xf32, #tpu.memory_space<vmem>>, vector<1x128xf32>
    %383 = vector.broadcast %382 : vector<1x128xf32> to vector<16x128xf32>
    %384 = arith.addf %381, %383 : vector<16x128xf32>
    %cst_226 = arith.constant 5.000000e-01 : f32
    %385 = vector.broadcast %cst_226 : f32 to vector<16x128xf32>
    %386 = arith.mulf %385, %384 : vector<16x128xf32>
    %cst_227 = arith.constant 0.707106769 : f32
    %387 = vector.broadcast %cst_227 : f32 to vector<16x128xf32>
    %388 = arith.mulf %384, %387 : vector<16x128xf32>
    %cst_228 = arith.constant 0.000000e+00 : f32
    %389 = vector.broadcast %cst_228 : f32 to vector<16x128xf32>
    %390 = arith.cmpf oge, %388, %389 : vector<16x128xf32>
    %cst_229 = arith.constant 1.000000e+00 : f32
    %cst_230 = arith.constant -1.000000e+00 : f32
    %391 = vector.broadcast %cst_229 : f32 to vector<16x128xf32>
    %392 = vector.broadcast %cst_230 : f32 to vector<16x128xf32>
    %393 = arith.select %390, %391, %392 : vector<16x128xi1>, vector<16x128xf32>
    %394 = math.absf %388 : vector<16x128xf32>
    %cst_231 = arith.constant 0.327591091 : f32
    %395 = vector.broadcast %cst_231 : f32 to vector<16x128xf32>
    %396 = arith.mulf %395, %394 : vector<16x128xf32>
    %cst_232 = arith.constant 1.000000e+00 : f32
    %397 = vector.broadcast %cst_232 : f32 to vector<16x128xf32>
    %398 = arith.addf %397, %396 : vector<16x128xf32>
    %cst_233 = arith.constant 1.000000e+00 : f32
    %399 = vector.broadcast %cst_233 : f32 to vector<16x128xf32>
    %400 = arith.divf %399, %398 : vector<16x128xf32>
    %cst_234 = arith.constant 1.06140542 : f32
    %401 = vector.broadcast %cst_234 : f32 to vector<16x128xf32>
    %402 = arith.mulf %401, %400 : vector<16x128xf32>
    %cst_235 = arith.constant -1.45315206 : f32
    %403 = vector.broadcast %cst_235 : f32 to vector<16x128xf32>
    %404 = arith.addf %402, %403 : vector<16x128xf32>
    %405 = arith.mulf %404, %400 : vector<16x128xf32>
    %cst_236 = arith.constant 1.42141378 : f32
    %406 = vector.broadcast %cst_236 : f32 to vector<16x128xf32>
    %407 = arith.addf %405, %406 : vector<16x128xf32>
    %408 = arith.mulf %407, %400 : vector<16x128xf32>
    %cst_237 = arith.constant -0.284496725 : f32
    %409 = vector.broadcast %cst_237 : f32 to vector<16x128xf32>
    %410 = arith.addf %408, %409 : vector<16x128xf32>
    %411 = arith.mulf %410, %400 : vector<16x128xf32>
    %cst_238 = arith.constant 0.254829586 : f32
    %412 = vector.broadcast %cst_238 : f32 to vector<16x128xf32>
    %413 = arith.addf %411, %412 : vector<16x128xf32>
    %414 = arith.mulf %413, %400 : vector<16x128xf32>
    %cst_239 = arith.constant 0.000000e+00 : f32
    %415 = vector.broadcast %cst_239 : f32 to vector<16x128xf32>
    %416 = arith.subf %415, %394 : vector<16x128xf32>
    %417 = arith.mulf %416, %394 : vector<16x128xf32>
    %418 = math.exp %417 : vector<16x128xf32>
    %419 = arith.mulf %414, %418 : vector<16x128xf32>
    %cst_240 = arith.constant 1.000000e+00 : f32
    %420 = vector.broadcast %cst_240 : f32 to vector<16x128xf32>
    %421 = arith.subf %420, %419 : vector<16x128xf32>
    %422 = arith.mulf %393, %421 : vector<16x128xf32>
    %cst_241 = arith.constant 1.000000e+00 : f32
    %423 = vector.broadcast %cst_241 : f32 to vector<16x128xf32>
    %424 = arith.addf %423, %422 : vector<16x128xf32>
    %425 = arith.mulf %386, %424 : vector<16x128xf32>
    %c0_242 = arith.constant 0 : index
    %c0_243 = arith.constant 0 : index
    %426 = vector.load %arg19[%c0_242, %c0_243] : memref<128x768xf32, #tpu.memory_space<vmem>>, vector<128x768xf32>
    %cst_244 = arith.constant dense<0.000000e+00> : vector<16x768xf32>
    %427 = tpu.matmul %425, %426, %cst_244 {dimension_numbers = #tpu.dot_dimension_numbers<[1], [0], [0], [1], [0, 0, 1, 1], [], []>} : vector<16x128xf32>, vector<128x768xf32>, vector<16x768xf32> -> vector<16x768xf32>
    %c0_245 = arith.constant 0 : index
    %c0_246 = arith.constant 0 : index
    %428 = vector.load %arg20[%c0_245, %c0_246] : memref<1x768xf32, #tpu.memory_space<vmem>>, vector<1x768xf32>
    %429 = vector.broadcast %428 : vector<1x768xf32> to vector<16x768xf32>
    %430 = arith.addf %427, %429 : vector<16x768xf32>
    %431 = vector.extract_strided_slice %261 {offsets = [0, 0], sizes = [16, 128], strides = [1, 1]} : vector<16x256xf32> to vector<16x128xf32>
    %432 = vector.extract_strided_slice %261 {offsets = [0, 128], sizes = [16, 128], strides = [1, 1]} : vector<16x256xf32> to vector<16x128xf32>
    %433 = vector.extract_strided_slice %430 {offsets = [0, 0], sizes = [16, 128], strides = [1, 1]} : vector<16x768xf32> to vector<16x128xf32>
    %434 = vector.extract_strided_slice %430 {offsets = [0, 128], sizes = [16, 128], strides = [1, 1]} : vector<16x768xf32> to vector<16x128xf32>
    %435 = vector.extract_strided_slice %430 {offsets = [0, 256], sizes = [16, 512], strides = [1, 1]} : vector<16x768xf32> to vector<16x512xf32>
    %436 = math.exp %432 : vector<16x128xf32>
    %437 = arith.mulf %436, %7 : vector<16x128xf32>
    %438 = arith.addf %437, %431 : vector<16x128xf32>
    %cst_247 = arith.constant -5.000000e-01 : f32
    %439 = vector.broadcast %cst_247 : f32 to vector<16x128xf32>
    %440 = arith.addf %439, %434 : vector<16x128xf32>
    %441 = arith.subf %440, %432 : vector<16x128xf32>
    %442 = arith.mulf %436, %436 : vector<16x128xf32>
    %443 = arith.subf %431, %433 : vector<16x128xf32>
    %444 = arith.mulf %443, %443 : vector<16x128xf32>
    %445 = arith.addf %442, %444 : vector<16x128xf32>
    %cst_248 = arith.constant 5.000000e-01 : f32
    %446 = vector.broadcast %cst_248 : f32 to vector<16x128xf32>
    %447 = arith.mulf %446, %445 : vector<16x128xf32>
    %cst_249 = arith.constant -2.000000e+00 : f32
    %448 = vector.broadcast %cst_249 : f32 to vector<16x128xf32>
    %449 = arith.mulf %448, %434 : vector<16x128xf32>
    %450 = math.exp %449 : vector<16x128xf32>
    %451 = arith.mulf %447, %450 : vector<16x128xf32>
    %452 = arith.addf %441, %451 : vector<16x128xf32>
    %453 = arith.addf %3, %435 : vector<16x512xf32>
    %c0_250 = arith.constant 0 : index
    %c0_251 = arith.constant 0 : index
    %454 = vector.load %arg21[%c0_250, %c0_251] : memref<128x512xf32, #tpu.memory_space<vmem>>, vector<128x512xf32>
    %cst_252 = arith.constant dense<0.000000e+00> : vector<16x512xf32>
    %455 = tpu.matmul %438, %454, %cst_252 {dimension_numbers = #tpu.dot_dimension_numbers<[1], [0], [0], [1], [0, 0, 1, 1], [], []>} : vector<16x128xf32>, vector<128x512xf32>, vector<16x512xf32> -> vector<16x512xf32>
    %c0_253 = arith.constant 0 : index
    %c0_254 = arith.constant 0 : index
    %456 = vector.load %arg22[%c0_253, %c0_254] : memref<1x512xf32, #tpu.memory_space<vmem>>, vector<1x512xf32>
    %457 = vector.broadcast %456 : vector<1x512xf32> to vector<16x512xf32>
    %458 = arith.addf %455, %457 : vector<16x512xf32>
    %459 = arith.addf %453, %458 : vector<16x512xf32>
    %cst_255 = arith.constant 5.000000e-01 : f32
    %460 = vector.broadcast %cst_255 : f32 to vector<16x512xf32>
    %461 = arith.mulf %460, %459 : vector<16x512xf32>
    %cst_256 = arith.constant 0.707106769 : f32
    %462 = vector.broadcast %cst_256 : f32 to vector<16x512xf32>
    %463 = arith.mulf %459, %462 : vector<16x512xf32>
    %cst_257 = arith.constant 0.000000e+00 : f32
    %464 = vector.broadcast %cst_257 : f32 to vector<16x512xf32>
    %465 = arith.cmpf oge, %463, %464 : vector<16x512xf32>
    %cst_258 = arith.constant 1.000000e+00 : f32
    %cst_259 = arith.constant -1.000000e+00 : f32
    %466 = vector.broadcast %cst_258 : f32 to vector<16x512xf32>
    %467 = vector.broadcast %cst_259 : f32 to vector<16x512xf32>
    %468 = arith.select %465, %466, %467 : vector<16x512xi1>, vector<16x512xf32>
    %469 = math.absf %463 : vector<16x512xf32>
    %cst_260 = arith.constant 0.327591091 : f32
    %470 = vector.broadcast %cst_260 : f32 to vector<16x512xf32>
    %471 = arith.mulf %470, %469 : vector<16x512xf32>
    %cst_261 = arith.constant 1.000000e+00 : f32
    %472 = vector.broadcast %cst_261 : f32 to vector<16x512xf32>
    %473 = arith.addf %472, %471 : vector<16x512xf32>
    %cst_262 = arith.constant 1.000000e+00 : f32
    %474 = vector.broadcast %cst_262 : f32 to vector<16x512xf32>
    %475 = arith.divf %474, %473 : vector<16x512xf32>
    %cst_263 = arith.constant 1.06140542 : f32
    %476 = vector.broadcast %cst_263 : f32 to vector<16x512xf32>
    %477 = arith.mulf %476, %475 : vector<16x512xf32>
    %cst_264 = arith.constant -1.45315206 : f32
    %478 = vector.broadcast %cst_264 : f32 to vector<16x512xf32>
    %479 = arith.addf %477, %478 : vector<16x512xf32>
    %480 = arith.mulf %479, %475 : vector<16x512xf32>
    %cst_265 = arith.constant 1.42141378 : f32
    %481 = vector.broadcast %cst_265 : f32 to vector<16x512xf32>
    %482 = arith.addf %480, %481 : vector<16x512xf32>
    %483 = arith.mulf %482, %475 : vector<16x512xf32>
    %cst_266 = arith.constant -0.284496725 : f32
    %484 = vector.broadcast %cst_266 : f32 to vector<16x512xf32>
    %485 = arith.addf %483, %484 : vector<16x512xf32>
    %486 = arith.mulf %485, %475 : vector<16x512xf32>
    %cst_267 = arith.constant 0.254829586 : f32
    %487 = vector.broadcast %cst_267 : f32 to vector<16x512xf32>
    %488 = arith.addf %486, %487 : vector<16x512xf32>
    %489 = arith.mulf %488, %475 : vector<16x512xf32>
    %cst_268 = arith.constant 0.000000e+00 : f32
    %490 = vector.broadcast %cst_268 : f32 to vector<16x512xf32>
    %491 = arith.subf %490, %469 : vector<16x512xf32>
    %492 = arith.mulf %491, %469 : vector<16x512xf32>
    %493 = math.exp %492 : vector<16x512xf32>
    %494 = arith.mulf %489, %493 : vector<16x512xf32>
    %cst_269 = arith.constant 1.000000e+00 : f32
    %495 = vector.broadcast %cst_269 : f32 to vector<16x512xf32>
    %496 = arith.subf %495, %494 : vector<16x512xf32>
    %497 = arith.mulf %468, %496 : vector<16x512xf32>
    %cst_270 = arith.constant 1.000000e+00 : f32
    %498 = vector.broadcast %cst_270 : f32 to vector<16x512xf32>
    %499 = arith.addf %498, %497 : vector<16x512xf32>
    %500 = arith.mulf %461, %499 : vector<16x512xf32>
    %c0_271 = arith.constant 0 : index
    %c0_272 = arith.constant 0 : index
    %501 = vector.load %arg23[%c0_271, %c0_272] : memref<512x128xf32, #tpu.memory_space<vmem>>, vector<512x128xf32>
    %cst_273 = arith.constant dense<0.000000e+00> : vector<16x128xf32>
    %502 = tpu.matmul %500, %501, %cst_273 {dimension_numbers = #tpu.dot_dimension_numbers<[1], [0], [0], [1], [0, 0, 1, 1], [], []>} : vector<16x512xf32>, vector<512x128xf32>, vector<16x128xf32> -> vector<16x128xf32>
    %c0_274 = arith.constant 0 : index
    %c0_275 = arith.constant 0 : index
    %503 = vector.load %arg24[%c0_274, %c0_275] : memref<1x128xf32, #tpu.memory_space<vmem>>, vector<1x128xf32>
    %504 = vector.broadcast %503 : vector<1x128xf32> to vector<16x128xf32>
    %505 = arith.addf %502, %504 : vector<16x128xf32>
    %cst_276 = arith.constant 5.000000e-01 : f32
    %506 = vector.broadcast %cst_276 : f32 to vector<16x128xf32>
    %507 = arith.mulf %506, %505 : vector<16x128xf32>
    %cst_277 = arith.constant 0.707106769 : f32
    %508 = vector.broadcast %cst_277 : f32 to vector<16x128xf32>
    %509 = arith.mulf %505, %508 : vector<16x128xf32>
    %cst_278 = arith.constant 0.000000e+00 : f32
    %510 = vector.broadcast %cst_278 : f32 to vector<16x128xf32>
    %511 = arith.cmpf oge, %509, %510 : vector<16x128xf32>
    %cst_279 = arith.constant 1.000000e+00 : f32
    %cst_280 = arith.constant -1.000000e+00 : f32
    %512 = vector.broadcast %cst_279 : f32 to vector<16x128xf32>
    %513 = vector.broadcast %cst_280 : f32 to vector<16x128xf32>
    %514 = arith.select %511, %512, %513 : vector<16x128xi1>, vector<16x128xf32>
    %515 = math.absf %509 : vector<16x128xf32>
    %cst_281 = arith.constant 0.327591091 : f32
    %516 = vector.broadcast %cst_281 : f32 to vector<16x128xf32>
    %517 = arith.mulf %516, %515 : vector<16x128xf32>
    %cst_282 = arith.constant 1.000000e+00 : f32
    %518 = vector.broadcast %cst_282 : f32 to vector<16x128xf32>
    %519 = arith.addf %518, %517 : vector<16x128xf32>
    %cst_283 = arith.constant 1.000000e+00 : f32
    %520 = vector.broadcast %cst_283 : f32 to vector<16x128xf32>
    %521 = arith.divf %520, %519 : vector<16x128xf32>
    %cst_284 = arith.constant 1.06140542 : f32
    %522 = vector.broadcast %cst_284 : f32 to vector<16x128xf32>
    %523 = arith.mulf %522, %521 : vector<16x128xf32>
    %cst_285 = arith.constant -1.45315206 : f32
    %524 = vector.broadcast %cst_285 : f32 to vector<16x128xf32>
    %525 = arith.addf %523, %524 : vector<16x128xf32>
    %526 = arith.mulf %525, %521 : vector<16x128xf32>
    %cst_286 = arith.constant 1.42141378 : f32
    %527 = vector.broadcast %cst_286 : f32 to vector<16x128xf32>
    %528 = arith.addf %526, %527 : vector<16x128xf32>
    %529 = arith.mulf %528, %521 : vector<16x128xf32>
    %cst_287 = arith.constant -0.284496725 : f32
    %530 = vector.broadcast %cst_287 : f32 to vector<16x128xf32>
    %531 = arith.addf %529, %530 : vector<16x128xf32>
    %532 = arith.mulf %531, %521 : vector<16x128xf32>
    %cst_288 = arith.constant 0.254829586 : f32
    %533 = vector.broadcast %cst_288 : f32 to vector<16x128xf32>
    %534 = arith.addf %532, %533 : vector<16x128xf32>
    %535 = arith.mulf %534, %521 : vector<16x128xf32>
    %cst_289 = arith.constant 0.000000e+00 : f32
    %536 = vector.broadcast %cst_289 : f32 to vector<16x128xf32>
    %537 = arith.subf %536, %515 : vector<16x128xf32>
    %538 = arith.mulf %537, %515 : vector<16x128xf32>
    %539 = math.exp %538 : vector<16x128xf32>
    %540 = arith.mulf %535, %539 : vector<16x128xf32>
    %cst_290 = arith.constant 1.000000e+00 : f32
    %541 = vector.broadcast %cst_290 : f32 to vector<16x128xf32>
    %542 = arith.subf %541, %540 : vector<16x128xf32>
    %543 = arith.mulf %514, %542 : vector<16x128xf32>
    %cst_291 = arith.constant 1.000000e+00 : f32
    %544 = vector.broadcast %cst_291 : f32 to vector<16x128xf32>
    %545 = arith.addf %544, %543 : vector<16x128xf32>
    %546 = arith.mulf %507, %545 : vector<16x128xf32>
    %c1_292 = arith.constant 1 : index
    %c0_293 = arith.constant 0 : index
    %547 = vector.load %arg34[%c1_292, %c0_293] : memref<18x128xf32, #tpu.memory_space<vmem>>, vector<16x128xf32>
    tpu.vector_store %arg34[%c1_292, %c0_293], %546 {strides = array<i32>} : memref<18x128xf32, #tpu.memory_space<vmem>>, vector<16x128xf32>,
    %c0_294 = arith.constant 0 : index
    %c0_295 = arith.constant 0 : index
    %548 = vector.load %arg34[%c0_294, %c0_295] : memref<18x128xf32, #tpu.memory_space<vmem>>, vector<16x128xf32>
    %c0_296 = arith.constant 0 : index
    %c0_297 = arith.constant 0 : index
    %c0_298 = arith.constant 0 : index
    %549 = vector.load %arg25[%c0_296, %c0_297, %c0_298] : memref<3x128x128xf32, #tpu.memory_space<vmem>>, vector<1x128x128xf32>
    %550 = vector.shape_cast %549 : vector<1x128x128xf32> to vector<128x128xf32>
    %cst_299 = arith.constant dense<0.000000e+00> : vector<16x128xf32>
    %551 = tpu.matmul %548, %550, %cst_299 {dimension_numbers = #tpu.dot_dimension_numbers<[1], [0], [0], [1], [0, 0, 1, 1], [], []>} : vector<16x128xf32>, vector<128x128xf32>, vector<16x128xf32> -> vector<16x128xf32>
    %c1_300 = arith.constant 1 : index
    %c0_301 = arith.constant 0 : index
    %552 = vector.load %arg34[%c1_300, %c0_301] : memref<18x128xf32, #tpu.memory_space<vmem>>, vector<16x128xf32>
    %c1_302 = arith.constant 1 : index
    %c0_303 = arith.constant 0 : index
    %c0_304 = arith.constant 0 : index
    %553 = vector.load %arg25[%c1_302, %c0_303, %c0_304] : memref<3x128x128xf32, #tpu.memory_space<vmem>>, vector<1x128x128xf32>
    %554 = vector.shape_cast %553 : vector<1x128x128xf32> to vector<128x128xf32>
    %cst_305 = arith.constant dense<0.000000e+00> : vector<16x128xf32>
    %555 = tpu.matmul %552, %554, %cst_305 {dimension_numbers = #tpu.dot_dimension_numbers<[1], [0], [0], [1], [0, 0, 1, 1], [], []>} : vector<16x128xf32>, vector<128x128xf32>, vector<16x128xf32> -> vector<16x128xf32>
    %556 = arith.addf %551, %555 : vector<16x128xf32>
    %c2_306 = arith.constant 2 : index
    %c0_307 = arith.constant 0 : index
    %557 = vector.load %arg34[%c2_306, %c0_307] : memref<18x128xf32, #tpu.memory_space<vmem>>, vector<16x128xf32>
    %c2_308 = arith.constant 2 : index
    %c0_309 = arith.constant 0 : index
    %c0_310 = arith.constant 0 : index
    %558 = vector.load %arg25[%c2_308, %c0_309, %c0_310] : memref<3x128x128xf32, #tpu.memory_space<vmem>>, vector<1x128x128xf32>
    %559 = vector.shape_cast %558 : vector<1x128x128xf32> to vector<128x128xf32>
    %cst_311 = arith.constant dense<0.000000e+00> : vector<16x128xf32>
    %560 = tpu.matmul %557, %559, %cst_311 {dimension_numbers = #tpu.dot_dimension_numbers<[1], [0], [0], [1], [0, 0, 1, 1], [], []>} : vector<16x128xf32>, vector<128x128xf32>, vector<16x128xf32> -> vector<16x128xf32>
    %561 = arith.addf %556, %560 : vector<16x128xf32>
    %c0_312 = arith.constant 0 : index
    %c0_313 = arith.constant 0 : index
    %562 = vector.load %arg26[%c0_312, %c0_313] : memref<1x128xf32, #tpu.memory_space<vmem>>, vector<1x128xf32>
    %563 = vector.broadcast %562 : vector<1x128xf32> to vector<16x128xf32>
    %564 = arith.addf %561, %563 : vector<16x128xf32>
    %cst_314 = arith.constant 5.000000e-01 : f32
    %565 = vector.broadcast %cst_314 : f32 to vector<16x128xf32>
    %566 = arith.mulf %565, %564 : vector<16x128xf32>
    %cst_315 = arith.constant 0.707106769 : f32
    %567 = vector.broadcast %cst_315 : f32 to vector<16x128xf32>
    %568 = arith.mulf %564, %567 : vector<16x128xf32>
    %cst_316 = arith.constant 0.000000e+00 : f32
    %569 = vector.broadcast %cst_316 : f32 to vector<16x128xf32>
    %570 = arith.cmpf oge, %568, %569 : vector<16x128xf32>
    %cst_317 = arith.constant 1.000000e+00 : f32
    %cst_318 = arith.constant -1.000000e+00 : f32
    %571 = vector.broadcast %cst_317 : f32 to vector<16x128xf32>
    %572 = vector.broadcast %cst_318 : f32 to vector<16x128xf32>
    %573 = arith.select %570, %571, %572 : vector<16x128xi1>, vector<16x128xf32>
    %574 = math.absf %568 : vector<16x128xf32>
    %cst_319 = arith.constant 0.327591091 : f32
    %575 = vector.broadcast %cst_319 : f32 to vector<16x128xf32>
    %576 = arith.mulf %575, %574 : vector<16x128xf32>
    %cst_320 = arith.constant 1.000000e+00 : f32
    %577 = vector.broadcast %cst_320 : f32 to vector<16x128xf32>
    %578 = arith.addf %577, %576 : vector<16x128xf32>
    %cst_321 = arith.constant 1.000000e+00 : f32
    %579 = vector.broadcast %cst_321 : f32 to vector<16x128xf32>
    %580 = arith.divf %579, %578 : vector<16x128xf32>
    %cst_322 = arith.constant 1.06140542 : f32
    %581 = vector.broadcast %cst_322 : f32 to vector<16x128xf32>
    %582 = arith.mulf %581, %580 : vector<16x128xf32>
    %cst_323 = arith.constant -1.45315206 : f32
    %583 = vector.broadcast %cst_323 : f32 to vector<16x128xf32>
    %584 = arith.addf %582, %583 : vector<16x128xf32>
    %585 = arith.mulf %584, %580 : vector<16x128xf32>
    %cst_324 = arith.constant 1.42141378 : f32
    %586 = vector.broadcast %cst_324 : f32 to vector<16x128xf32>
    %587 = arith.addf %585, %586 : vector<16x128xf32>
    %588 = arith.mulf %587, %580 : vector<16x128xf32>
    %cst_325 = arith.constant -0.284496725 : f32
    %589 = vector.broadcast %cst_325 : f32 to vector<16x128xf32>
    %590 = arith.addf %588, %589 : vector<16x128xf32>
    %591 = arith.mulf %590, %580 : vector<16x128xf32>
    %cst_326 = arith.constant 0.254829586 : f32
    %592 = vector.broadcast %cst_326 : f32 to vector<16x128xf32>
    %593 = arith.addf %591, %592 : vector<16x128xf32>
    %594 = arith.mulf %593, %580 : vector<16x128xf32>
    %cst_327 = arith.constant 0.000000e+00 : f32
    %595 = vector.broadcast %cst_327 : f32 to vector<16x128xf32>
    %596 = arith.subf %595, %574 : vector<16x128xf32>
    %597 = arith.mulf %596, %574 : vector<16x128xf32>
    %598 = math.exp %597 : vector<16x128xf32>
    %599 = arith.mulf %594, %598 : vector<16x128xf32>
    %cst_328 = arith.constant 1.000000e+00 : f32
    %600 = vector.broadcast %cst_328 : f32 to vector<16x128xf32>
    %601 = arith.subf %600, %599 : vector<16x128xf32>
    %602 = arith.mulf %573, %601 : vector<16x128xf32>
    %cst_329 = arith.constant 1.000000e+00 : f32
    %603 = vector.broadcast %cst_329 : f32 to vector<16x128xf32>
    %604 = arith.addf %603, %602 : vector<16x128xf32>
    %605 = arith.mulf %566, %604 : vector<16x128xf32>
    %c1_330 = arith.constant 1 : index
    %c0_331 = arith.constant 0 : index
    %606 = vector.load %arg34[%c1_330, %c0_331] : memref<18x128xf32, #tpu.memory_space<vmem>>, vector<16x128xf32>
    tpu.vector_store %arg34[%c1_330, %c0_331], %605 {strides = array<i32>} : memref<18x128xf32, #tpu.memory_space<vmem>>, vector<16x128xf32>,
    %c0_332 = arith.constant 0 : index
    %c0_333 = arith.constant 0 : index
    %607 = vector.load %arg34[%c0_332, %c0_333] : memref<18x128xf32, #tpu.memory_space<vmem>>, vector<16x128xf32>
    %c0_334 = arith.constant 0 : index
    %c0_335 = arith.constant 0 : index
    %c0_336 = arith.constant 0 : index
    %608 = vector.load %arg27[%c0_334, %c0_335, %c0_336] : memref<3x128x128xf32, #tpu.memory_space<vmem>>, vector<1x128x128xf32>
    %609 = vector.shape_cast %608 : vector<1x128x128xf32> to vector<128x128xf32>
    %cst_337 = arith.constant dense<0.000000e+00> : vector<16x128xf32>
    %610 = tpu.matmul %607, %609, %cst_337 {dimension_numbers = #tpu.dot_dimension_numbers<[1], [0], [0], [1], [0, 0, 1, 1], [], []>} : vector<16x128xf32>, vector<128x128xf32>, vector<16x128xf32> -> vector<16x128xf32>
    %c1_338 = arith.constant 1 : index
    %c0_339 = arith.constant 0 : index
    %611 = vector.load %arg34[%c1_338, %c0_339] : memref<18x128xf32, #tpu.memory_space<vmem>>, vector<16x128xf32>
    %c1_340 = arith.constant 1 : index
    %c0_341 = arith.constant 0 : index
    %c0_342 = arith.constant 0 : index
    %612 = vector.load %arg27[%c1_340, %c0_341, %c0_342] : memref<3x128x128xf32, #tpu.memory_space<vmem>>, vector<1x128x128xf32>
    %613 = vector.shape_cast %612 : vector<1x128x128xf32> to vector<128x128xf32>
    %cst_343 = arith.constant dense<0.000000e+00> : vector<16x128xf32>
    %614 = tpu.matmul %611, %613, %cst_343 {dimension_numbers = #tpu.dot_dimension_numbers<[1], [0], [0], [1], [0, 0, 1, 1], [], []>} : vector<16x128xf32>, vector<128x128xf32>, vector<16x128xf32> -> vector<16x128xf32>
    %615 = arith.addf %610, %614 : vector<16x128xf32>
    %c2_344 = arith.constant 2 : index
    %c0_345 = arith.constant 0 : index
    %616 = vector.load %arg34[%c2_344, %c0_345] : memref<18x128xf32, #tpu.memory_space<vmem>>, vector<16x128xf32>
    %c2_346 = arith.constant 2 : index
    %c0_347 = arith.constant 0 : index
    %c0_348 = arith.constant 0 : index
    %617 = vector.load %arg27[%c2_346, %c0_347, %c0_348] : memref<3x128x128xf32, #tpu.memory_space<vmem>>, vector<1x128x128xf32>
    %618 = vector.shape_cast %617 : vector<1x128x128xf32> to vector<128x128xf32>
    %cst_349 = arith.constant dense<0.000000e+00> : vector<16x128xf32>
    %619 = tpu.matmul %616, %618, %cst_349 {dimension_numbers = #tpu.dot_dimension_numbers<[1], [0], [0], [1], [0, 0, 1, 1], [], []>} : vector<16x128xf32>, vector<128x128xf32>, vector<16x128xf32> -> vector<16x128xf32>
    %620 = arith.addf %615, %619 : vector<16x128xf32>
    %c0_350 = arith.constant 0 : index
    %c0_351 = arith.constant 0 : index
    %621 = vector.load %arg28[%c0_350, %c0_351] : memref<1x128xf32, #tpu.memory_space<vmem>>, vector<1x128xf32>
    %622 = vector.broadcast %621 : vector<1x128xf32> to vector<16x128xf32>
    %623 = arith.addf %620, %622 : vector<16x128xf32>
    %cst_352 = arith.constant 5.000000e-01 : f32
    %624 = vector.broadcast %cst_352 : f32 to vector<16x128xf32>
    %625 = arith.mulf %624, %623 : vector<16x128xf32>
    %cst_353 = arith.constant 0.707106769 : f32
    %626 = vector.broadcast %cst_353 : f32 to vector<16x128xf32>
    %627 = arith.mulf %623, %626 : vector<16x128xf32>
    %cst_354 = arith.constant 0.000000e+00 : f32
    %628 = vector.broadcast %cst_354 : f32 to vector<16x128xf32>
    %629 = arith.cmpf oge, %627, %628 : vector<16x128xf32>
    %cst_355 = arith.constant 1.000000e+00 : f32
    %cst_356 = arith.constant -1.000000e+00 : f32
    %630 = vector.broadcast %cst_355 : f32 to vector<16x128xf32>
    %631 = vector.broadcast %cst_356 : f32 to vector<16x128xf32>
    %632 = arith.select %629, %630, %631 : vector<16x128xi1>, vector<16x128xf32>
    %633 = math.absf %627 : vector<16x128xf32>
    %cst_357 = arith.constant 0.327591091 : f32
    %634 = vector.broadcast %cst_357 : f32 to vector<16x128xf32>
    %635 = arith.mulf %634, %633 : vector<16x128xf32>
    %cst_358 = arith.constant 1.000000e+00 : f32
    %636 = vector.broadcast %cst_358 : f32 to vector<16x128xf32>
    %637 = arith.addf %636, %635 : vector<16x128xf32>
    %cst_359 = arith.constant 1.000000e+00 : f32
    %638 = vector.broadcast %cst_359 : f32 to vector<16x128xf32>
    %639 = arith.divf %638, %637 : vector<16x128xf32>
    %cst_360 = arith.constant 1.06140542 : f32
    %640 = vector.broadcast %cst_360 : f32 to vector<16x128xf32>
    %641 = arith.mulf %640, %639 : vector<16x128xf32>
    %cst_361 = arith.constant -1.45315206 : f32
    %642 = vector.broadcast %cst_361 : f32 to vector<16x128xf32>
    %643 = arith.addf %641, %642 : vector<16x128xf32>
    %644 = arith.mulf %643, %639 : vector<16x128xf32>
    %cst_362 = arith.constant 1.42141378 : f32
    %645 = vector.broadcast %cst_362 : f32 to vector<16x128xf32>
    %646 = arith.addf %644, %645 : vector<16x128xf32>
    %647 = arith.mulf %646, %639 : vector<16x128xf32>
    %cst_363 = arith.constant -0.284496725 : f32
    %648 = vector.broadcast %cst_363 : f32 to vector<16x128xf32>
    %649 = arith.addf %647, %648 : vector<16x128xf32>
    %650 = arith.mulf %649, %639 : vector<16x128xf32>
    %cst_364 = arith.constant 0.254829586 : f32
    %651 = vector.broadcast %cst_364 : f32 to vector<16x128xf32>
    %652 = arith.addf %650, %651 : vector<16x128xf32>
    %653 = arith.mulf %652, %639 : vector<16x128xf32>
    %cst_365 = arith.constant 0.000000e+00 : f32
    %654 = vector.broadcast %cst_365 : f32 to vector<16x128xf32>
    %655 = arith.subf %654, %633 : vector<16x128xf32>
    %656 = arith.mulf %655, %633 : vector<16x128xf32>
    %657 = math.exp %656 : vector<16x128xf32>
    %658 = arith.mulf %653, %657 : vector<16x128xf32>
    %cst_366 = arith.constant 1.000000e+00 : f32
    %659 = vector.broadcast %cst_366 : f32 to vector<16x128xf32>
    %660 = arith.subf %659, %658 : vector<16x128xf32>
    %661 = arith.mulf %632, %660 : vector<16x128xf32>
    %cst_367 = arith.constant 1.000000e+00 : f32
    %662 = vector.broadcast %cst_367 : f32 to vector<16x128xf32>
    %663 = arith.addf %662, %661 : vector<16x128xf32>
    %664 = arith.mulf %625, %663 : vector<16x128xf32>
    %c0_368 = arith.constant 0 : index
    %c0_369 = arith.constant 0 : index
    %665 = vector.load %arg29[%c0_368, %c0_369] : memref<128x512xf32, #tpu.memory_space<vmem>>, vector<128x512xf32>
    %cst_370 = arith.constant dense<0.000000e+00> : vector<16x512xf32>
    %666 = tpu.matmul %664, %665, %cst_370 {dimension_numbers = #tpu.dot_dimension_numbers<[1], [0], [0], [1], [0, 0, 1, 1], [], []>} : vector<16x128xf32>, vector<128x512xf32>, vector<16x512xf32> -> vector<16x512xf32>
    %c0_371 = arith.constant 0 : index
    %c0_372 = arith.constant 0 : index
    %667 = vector.load %arg30[%c0_371, %c0_372] : memref<1x512xf32, #tpu.memory_space<vmem>>, vector<1x512xf32>
    %668 = vector.broadcast %667 : vector<1x512xf32> to vector<16x512xf32>
    %669 = arith.addf %666, %668 : vector<16x512xf32>
    %c0_373 = arith.constant 0 : index
    %c0_374 = arith.constant 0 : index
    %c0_375 = arith.constant 0 : index
    %670 = vector.load %arg31[%c0_373, %c0_374, %c0_375] : memref<1x16x128xf32, #tpu.memory_space<vmem>>, vector<1x16x128xf32>
    %671 = vector.shape_cast %670 : vector<1x16x128xf32> to vector<16x128xf32>
    %672 = vector.shape_cast %438 : vector<16x128xf32> to vector<1x16x128xf32>
    tpu.vector_store %arg31[%c0_373, %c0_374, %c0_375], %672 {strides = array<i32>} : memref<1x16x128xf32, #tpu.memory_space<vmem>>, vector<1x16x128xf32>,
    %c0_376 = arith.constant 0 : index
    %c0_377 = arith.constant 0 : index
    %c0_378 = arith.constant 0 : index
    %673 = vector.load %arg32[%c0_376, %c0_377, %c0_378] : memref<1x16x128xf32, #tpu.memory_space<vmem>>, vector<1x16x128xf32>
    %674 = vector.shape_cast %673 : vector<1x16x128xf32> to vector<16x128xf32>
    %675 = vector.shape_cast %452 : vector<16x128xf32> to vector<1x16x128xf32>
    tpu.vector_store %arg32[%c0_376, %c0_377, %c0_378], %675 {strides = array<i32>} : memref<1x16x128xf32, #tpu.memory_space<vmem>>, vector<1x16x128xf32>,
    %676 = arith.addf %459, %669 : vector<16x512xf32>
    %c0_379 = arith.constant 0 : index
    %c0_380 = arith.constant 0 : index
    %c0_381 = arith.constant 0 : index
    %677 = vector.load %arg33[%c0_379, %c0_380, %c0_381] : memref<1x16x512xf32, #tpu.memory_space<vmem>>, vector<1x16x512xf32>
    %678 = vector.shape_cast %677 : vector<1x16x512xf32> to vector<16x512xf32>
    %679 = vector.shape_cast %676 : vector<16x512xf32> to vector<1x16x512xf32>
    tpu.vector_store %arg33[%c0_379, %c0_380, %c0_381], %679 {strides = array<i32>} : memref<1x16x512xf32, #tpu.memory_space<vmem>>, vector<1x16x512xf32>,
    return
  }
  func.func @transform_0(%arg0: i32) -> (i32, i32, i32) {
    %c0_i32 = arith.constant 0 : i32
    %c0_i32_0 = arith.constant 0 : i32
    %c0_i32_1 = arith.constant 0 : i32
    return %arg0, %c0_i32, %c0_i32_0 : i32, i32, i32
  }
  func.func @transform_1(%arg0: i32) -> (i32, i32, i32) {
    %c0_i32 = arith.constant 0 : i32
    %c0_i32_0 = arith.constant 0 : i32
    %c0_i32_1 = arith.constant 0 : i32
    return %arg0, %c0_i32, %c0_i32_0 : i32, i32, i32
  }
  func.func @transform_2(%arg0: i32) -> (i32, i32, i32) {
    %c0_i32 = arith.constant 0 : i32
    %c0_i32_0 = arith.constant 0 : i32
    %c0_i32_1 = arith.constant 0 : i32
    return %arg0, %c0_i32, %c0_i32_0 : i32, i32, i32
  }
  func.func @transform_3(%arg0: i32) -> (i32, i32) {
    %c0_i32 = arith.constant 0 : i32
    %c0_i32_0 = arith.constant 0 : i32
    %c0_i32_1 = arith.constant 0 : i32
    return %c0_i32, %c0_i32_0 : i32, i32
  }
  func.func @transform_4(%arg0: i32) -> (i32, i32) {
    %c0_i32 = arith.constant 0 : i32
    %c0_i32_0 = arith.constant 0 : i32
    %c0_i32_1 = arith.constant 0 : i32
    return %c0_i32, %c0_i32_0 : i32, i32
  }
  func.func @transform_5(%arg0: i32) -> (i32, i32) {
    %c0_i32 = arith.constant 0 : i32
    %c0_i32_0 = arith.constant 0 : i32
    %c0_i32_1 = arith.constant 0 : i32
    return %c0_i32, %c0_i32_0 : i32, i32
  }
  func.func @transform_6(%arg0: i32) -> (i32, i32, i32) {
    %c0_i32 = arith.constant 0 : i32
    %c0_i32_0 = arith.constant 0 : i32
    %c0_i32_1 = arith.constant 0 : i32
    %c0_i32_2 = arith.constant 0 : i32
    return %c0_i32, %c0_i32_0, %c0_i32_1 : i32, i32, i32
  }
  func.func @transform_7(%arg0: i32) -> (i32, i32) {
    %c0_i32 = arith.constant 0 : i32
    %c0_i32_0 = arith.constant 0 : i32
    %c0_i32_1 = arith.constant 0 : i32
    return %c0_i32, %c0_i32_0 : i32, i32
  }
  func.func @transform_8(%arg0: i32) -> (i32, i32, i32) {
    %c0_i32 = arith.constant 0 : i32
    %c0_i32_0 = arith.constant 0 : i32
    %c0_i32_1 = arith.constant 0 : i32
    %c0_i32_2 = arith.constant 0 : i32
    return %c0_i32, %c0_i32_0, %c0_i32_1 : i32, i32, i32
  }
  func.func @transform_9(%arg0: i32) -> (i32, i32) {
    %c0_i32 = arith.constant 0 : i32
    %c0_i32_0 = arith.constant 0 : i32
    %c0_i32_1 = arith.constant 0 : i32
    return %c0_i32, %c0_i32_0 : i32, i32
  }
  func.func @transform_10(%arg0: i32) -> (i32, i32) {
    %c0_i32 = arith.constant 0 : i32
    %c0_i32_0 = arith.constant 0 : i32
    %c0_i32_1 = arith.constant 0 : i32
    return %c0_i32, %c0_i32_0 : i32, i32
  }
  func.func @transform_11(%arg0: i32) -> (i32, i32) {
    %c0_i32 = arith.constant 0 : i32
    %c0_i32_0 = arith.constant 0 : i32
    %c0_i32_1 = arith.constant 0 : i32
    return %c0_i32, %c0_i32_0 : i32, i32
  }
  func.func @transform_12(%arg0: i32) -> (i32, i32) {
    %c0_i32 = arith.constant 0 : i32
    %c0_i32_0 = arith.constant 0 : i32
    %c0_i32_1 = arith.constant 0 : i32
    return %c0_i32, %c0_i32_0 : i32, i32
  }
  func.func @transform_13(%arg0: i32) -> (i32, i32) {
    %c0_i32 = arith.constant 0 : i32
    %c0_i32_0 = arith.constant 0 : i32
    %c0_i32_1 = arith.constant 0 : i32
    return %c0_i32, %c0_i32_0 : i32, i32
  }
  func.func @transform_14(%arg0: i32) -> (i32, i32, i32) {
    %c0_i32 = arith.constant 0 : i32
    %c0_i32_0 = arith.constant 0 : i32
    %c0_i32_1 = arith.constant 0 : i32
    %c0_i32_2 = arith.constant 0 : i32
    return %c0_i32, %c0_i32_0, %c0_i32_1 : i32, i32, i32
  }
  func.func @transform_15(%arg0: i32) -> (i32, i32) {
    %c0_i32 = arith.constant 0 : i32
    %c0_i32_0 = arith.constant 0 : i32
    %c0_i32_1 = arith.constant 0 : i32
    return %c0_i32, %c0_i32_0 : i32, i32
  }
  func.func @transform_16(%arg0: i32) -> (i32, i32, i32) {
    %c0_i32 = arith.constant 0 : i32
    %c0_i32_0 = arith.constant 0 : i32
    %c0_i32_1 = arith.constant 0 : i32
    %c0_i32_2 = arith.constant 0 : i32
    return %c0_i32, %c0_i32_0, %c0_i32_1 : i32, i32, i32
  }
  func.func @transform_17(%arg0: i32) -> (i32, i32) {
    %c0_i32 = arith.constant 0 : i32
    %c0_i32_0 = arith.constant 0 : i32
    %c0_i32_1 = arith.constant 0 : i32
    return %c0_i32, %c0_i32_0 : i32, i32
  }
  func.func @transform_18(%arg0: i32) -> (i32, i32) {
    %c0_i32 = arith.constant 0 : i32
    %c0_i32_0 = arith.constant 0 : i32
    %c0_i32_1 = arith.constant 0 : i32
    return %c0_i32, %c0_i32_0 : i32, i32
  }
  func.func @transform_19(%arg0: i32) -> (i32, i32) {
    %c0_i32 = arith.constant 0 : i32
    %c0_i32_0 = arith.constant 0 : i32
    %c0_i32_1 = arith.constant 0 : i32
    return %c0_i32, %c0_i32_0 : i32, i32
  }
  func.func @transform_20(%arg0: i32) -> (i32, i32) {
    %c0_i32 = arith.constant 0 : i32
    %c0_i32_0 = arith.constant 0 : i32
    %c0_i32_1 = arith.constant 0 : i32
    return %c0_i32, %c0_i32_0 : i32, i32
  }
  func.func @transform_21(%arg0: i32) -> (i32, i32) {
    %c0_i32 = arith.constant 0 : i32
    %c0_i32_0 = arith.constant 0 : i32
    %c0_i32_1 = arith.constant 0 : i32
    return %c0_i32, %c0_i32_0 : i32, i32
  }
  func.func @transform_22(%arg0: i32) -> (i32, i32) {
    %c0_i32 = arith.constant 0 : i32
    %c0_i32_0 = arith.constant 0 : i32
    %c0_i32_1 = arith.constant 0 : i32
    return %c0_i32, %c0_i32_0 : i32, i32
  }
  func.func @transform_23(%arg0: i32) -> (i32, i32) {
    %c0_i32 = arith.constant 0 : i32
    %c0_i32_0 = arith.constant 0 : i32
    %c0_i32_1 = arith.constant 0 : i32
    return %c0_i32, %c0_i32_0 : i32, i32
  }
  func.func @transform_24(%arg0: i32) -> (i32, i32, i32) {
    %c0_i32 = arith.constant 0 : i32
    %c0_i32_0 = arith.constant 0 : i32
    %c0_i32_1 = arith.constant 0 : i32
    %c0_i32_2 = arith.constant 0 : i32
    return %c0_i32, %c0_i32_0, %c0_i32_1 : i32, i32, i32
  }
  func.func @transform_25(%arg0: i32) -> (i32, i32) {
    %c0_i32 = arith.constant 0 : i32
    %c0_i32_0 = arith.constant 0 : i32
    %c0_i32_1 = arith.constant 0 : i32
    return %c0_i32, %c0_i32_0 : i32, i32
  }
  func.func @transform_26(%arg0: i32) -> (i32, i32, i32) {
    %c0_i32 = arith.constant 0 : i32
    %c0_i32_0 = arith.constant 0 : i32
    %c0_i32_1 = arith.constant 0 : i32
    %c0_i32_2 = arith.constant 0 : i32
    return %c0_i32, %c0_i32_0, %c0_i32_1 : i32, i32, i32
  }
  func.func @transform_27(%arg0: i32) -> (i32, i32) {
    %c0_i32 = arith.constant 0 : i32
    %c0_i32_0 = arith.constant 0 : i32
    %c0_i32_1 = arith.constant 0 : i32
    return %c0_i32, %c0_i32_0 : i32, i32
  }
  func.func @transform_28(%arg0: i32) -> (i32, i32) {
    %c0_i32 = arith.constant 0 : i32
    %c0_i32_0 = arith.constant 0 : i32
    %c0_i32_1 = arith.constant 0 : i32
    return %c0_i32, %c0_i32_0 : i32, i32
  }
  func.func @transform_29(%arg0: i32) -> (i32, i32) {
    %c0_i32 = arith.constant 0 : i32
    %c0_i32_0 = arith.constant 0 : i32
    %c0_i32_1 = arith.constant 0 : i32
    return %c0_i32, %c0_i32_0 : i32, i32
  }
  func.func @transform_30(%arg0: i32) -> (i32, i32, i32) {
    %c0_i32 = arith.constant 0 : i32
    %c0_i32_0 = arith.constant 0 : i32
    %c0_i32_1 = arith.constant 0 : i32
    return %arg0, %c0_i32, %c0_i32_0 : i32, i32, i32
  }
  func.func @transform_31(%arg0: i32) -> (i32, i32, i32) {
    %c0_i32 = arith.constant 0 : i32
    %c0_i32_0 = arith.constant 0 : i32
    %c0_i32_1 = arith.constant 0 : i32
    return %arg0, %c0_i32, %c0_i32_0 : i32, i32, i32
  }
  func.func @transform_32(%arg0: i32) -> (i32, i32, i32) {
    %c0_i32 = arith.constant 0 : i32
    %c0_i32_0 = arith.constant 0 : i32
    %c0_i32_1 = arith.constant 0 : i32
    return %arg0, %c0_i32, %c0_i32_0 : i32, i32, i32
  }
}

</mosaic_0001>

<bundles_post_ra>
// kernel: tpu_custom_call.1
= control target key start
LH: loop header
LB: loop body
LE: loop exit
PB: predicated region body
PF: predicated region fallthrough
CT: control target
= control target key end

     0   :  { %s10083_s6 = smov 1   ;;  %s10084_s10 = smov 2   ;;  %s11806_s0 = inlined_call_operand.smem [shape: u32[33], index: -1, kind: input, shape index: {}] }
   0x1   :  { %s10157_s5 = sld [smem:[%s11806_s0]]   ;;  %s10085_s14 = smov 3  }
   0x2   :  { %s10162_s9 = sld [smem:[%s11806_s0 + %s10083_s6]]   ;;  %s10086_s18 = smov 4  }
   0x3   :  { %s10167_s13 = sld [smem:[%s11806_s0 + %s10084_s10]]   ;;  %s10087_s22 = smov 5  }
   0x4   :  { %s10172_s17 = sld [smem:[%s11806_s0 + %s10085_s14]]   ;;  %s10088_s26 = smov 6  }
   0x5   :  { %s10177_s21 = sld [smem:[%s11806_s0 + %s10086_s18]]   ;;  %s10089_s30 = smov 7  }
   0x6   :  { %s10182_s25 = sld [smem:[%s11806_s0 + %s10087_s22]]   ;;  %s10090_s4 = smov 8  }
   0x7   :  { %11869 = sst [smem:[#allocation45_spill]] %s10157_s5  ;;  %s10091_s10 = smov 9  }
   0x8   :  { %11870 = sst [smem:[#allocation46_spill]] %s10162_s9  ;;  %s10092_s15 = smov 10  }
   0x9   :  { %11871 = sst [smem:[#allocation47_spill]] %s10167_s13  ;;  %s10093_s20 = smov 11  }
   0xa   :  { %11872 = sst [smem:[#allocation48_spill]] %s10172_s17  ;;  %s10095_s1 = smov 13  }
   0xb   :  { %11873 = sst [smem:[#allocation49_spill]] %s10177_s21  ;;  %s10096_s7 = smov 14  }
   0xc   :  { %11874 = sst [smem:[#allocation50_spill]] %s10182_s25  ;;  %s10098_s22 = smov 16  }
   0xd   :  { %s10187_s29 = sld [smem:[%s11806_s0 + %s10088_s26]]   ;;  %s10094_s26 = smov 12  }
   0xe   :  { %s10192_s3 = sld [smem:[%s11806_s0 + %s10089_s30]]   ;;  %s10099_s28 = smov 17  }
   0xf   :  { %s10197_s8 = sld [smem:[%s11806_s0 + %s10090_s4]]  }
  0x10   :  { %s10202_s14 = sld [smem:[%s11806_s0 + %s10091_s10]]  }
  0x11   :  { %s10207_s19 = sld [smem:[%s11806_s0 + %s10092_s15]]   ;;  %s10097_s15 = smov 15  }
  0x12   :  { %s10212_s24 = sld [smem:[%s11806_s0 + %s10093_s20]]  }
  0x13   :  { %11875 = sst [smem:[#allocation51_spill]] %s10187_s29 }
  0x14   :  { %11876 = sst [smem:[#allocation52_spill]] %s10192_s3 }
  0x15   :  { %11877 = sst [smem:[#allocation53_spill]] %s10197_s8 }
  0x16   :  { %11878 = sst [smem:[#allocation54_spill]] %s10202_s14 }
  0x17   :  { %11879 = sst [smem:[#allocation55_spill]] %s10207_s19 }
  0x18   :  { %11880 = sst [smem:[#allocation56_spill]] %s10212_s24 }
  0x19   :  { %s10217_s30 = sld [smem:[%s11806_s0 + %s10094_s26]]  }
  0x1a   :  { %s10222_s6 = sld [smem:[%s11806_s0 + %s10095_s1]]  }
  0x1b   :  { %s10227_s12 = sld [smem:[%s11806_s0 + %s10096_s7]]   ;;  %s10100_s7 = smov 18  }
  0x1c   :  { %s10232_s20 = sld [smem:[%s11806_s0 + %s10097_s15]]   ;;  %s10101_s15 = smov 19  }
  0x1d   :  { %s10237_s27 = sld [smem:[%s11806_s0 + %s10098_s22]]   ;;  %s10102_s22 = smov 20  }
  0x1e   :  { %s10242_s4 = sld [smem:[%s11806_s0 + %s10099_s28]]   ;;  %s10103_s28 = smov 21  }
  0x1f   :  { %s10257_s24 = sld [smem:[%s11806_s0 + %s10102_s22]]   ;;  %s10106_s22 = smov 24  }
  0x20   :  { %11881 = sst [smem:[#allocation57_spill]] %s10222_s6 }
  0x21   :  { %11882 = sst [smem:[#allocation58_spill]] %s10227_s12 }
  0x22   :  { %11883 = sst [smem:[#allocation59_spill]] %s10232_s20 }
  0x23   :  { %s10247_s6 = sld [smem:[%s11806_s0 + %s10100_s7]]   ;;  %s10104_s7 = smov 22  }
  0x24   :  { %11884 = sst [smem:[#allocation60_spill]] %s10242_s4 }
  0x25   :  { %s10252_s20 = sld [smem:[%s11806_s0 + %s10101_s15]]   ;;  %s10105_s15 = smov 23  }
  0x26   :  { %s10262_s4 = sld [smem:[%s11806_s0 + %s10103_s28]]   ;;  %s10107_s28 = smov 25  }
  0x27   :  { %s10267_s14 = sld [smem:[%s11806_s0 + %s10104_s7]]   ;;  %s10108_s7 = smov 26  }
  0x28   :  { %s10277_s3 = sld [smem:[%s11806_s0 + %s10106_s22]]   ;;  %s10110_s22 = smov 28  }
  0x29   :  { %11885 = sst [smem:[#allocation61_spill]] %s10247_s6 }
  0x2a   :  { %s10287_s25 = sld [smem:[%s11806_s0 + %s10108_s7]]   ;;  %s10112_s7 = smov 30  }
  0x2b   :  { %11886 = sst [smem:[#allocation62_spill]] %s10252_s20 }
  0x2c   :  { %11887 = sst [smem:[#allocation63_spill]] %s10262_s4 }
  0x2d   :  { %11888 = sst [smem:[#allocation64_spill]] %s10267_s14 }
  0x2e   :  { %s10272_s20 = sld [smem:[%s11806_s0 + %s10105_s15]]   ;;  %s10109_s15 = smov 27  }
  0x2f   :  { %11890 = sst [smem:[#allocation66_spill]] %s10277_s3 }
  0x30   :  { %s10282_s4 = sld [smem:[%s11806_s0 + %s10107_s28]]   ;;  %s10111_s28 = smov 29  }
  0x31   :  { %11892 = sst [smem:[#allocation68_spill]] %s10287_s25 }
  0x32   :  { %s10297_s13 = sld [smem:[%s11806_s0 + %s10110_s22]]   ;;  %s10114_s22 = smov 32  }
  0x33   :  { %s10307_s5 = sld [smem:[%s11806_s0 + %s10112_s7]]  }
  0x34   :  { %11889 = sst [smem:[#allocation65_spill]] %s10272_s20 }
  0x35   :  { %s10292_s20 = sld [smem:[%s11806_s0 + %s10109_s15]]   ;;  %s10113_s15 = smov 31  }
  0x36   :  { %11891 = sst [smem:[#allocation67_spill]] %s10282_s4 }
  0x37   :  { %s10302_s4 = sld [smem:[%s11806_s0 + %s10111_s28]]  }
  0x38   :  { %11894 = sst [smem:[#allocation70_spill]] %s10297_s13 }
  0x39   :  { %11896 = sst [smem:[#allocation72_spill]] %s10307_s5 }
  0x3a   :  { %s10317_s13 = sld [smem:[%s11806_s0 + %s10114_s22]]  }
  0x3b   :  { %11893 = sst [smem:[#allocation69_spill]] %s10292_s20 }
  0x3c   :  { %s10312_s20 = sld [smem:[%s11806_s0 + %s10113_s15]]  }
  0x3d   :  { %11895 = sst [smem:[#allocation71_spill]] %s10302_s4 }
  0x40   :  { %11897 = sst [smem:[#allocation73_spill]] %s10317_s13 }
  0x41   :  { %71 = vsyncpa [#allocation4], 0 }
  0x42   :  { %73 = vsyncpa [#allocation4 + $0x1], 0 }
  0x43   :  { %74 = vsyncpa [#allocation7], 0 }
  0x44   :  { %76 = vsyncpa [#allocation7 + $0x1], 0 }
  0x45   :  { %77 = vsyncpa [#allocation10], 0 }
  0x46   :  { %78 = vsyncpa [#allocation13], 0 }
  0x47   :  { %79 = vsyncpa [#allocation16], 0 }
  0x48   :  { %80 = vsyncpa [#allocation19], 0 }
  0x49   :  { %81 = vsyncpa [#allocation22], 0 }
  0x4a   :  { %82 = vsyncpa [#allocation25], 0 }
  0x4b   :  { %83 = vsyncpa [#allocation28], 0 }
  0x4c   :  { %84 = vsyncpa [#allocation5], 0 }
  0x4d   :  { %86 = vsyncpa [#allocation5 + $0x1], 0 }
  0x4e   :  { %87 = vsyncpa [#allocation32], 0 }
  0x4f   :  { %89 = vsyncpa [#allocation32 + $0x1], 0  ;;  %s10319_s28 = smov 0   ;;  %s10321_s1 = smov 0  }
  0x50   :  { %s10323_s0 = smov 0   ;;  %s10325_s2 = smov 0  }
  0x51 LB: > { %s11898_s21 = sld [smem:[#allocation49_spill]]  ;;  %s11899_s8 = sld [smem:[#allocation53_spill]]  ;;  %s10077_s0 = sphi %s10323_s0, %s12038_s0   ;;  %s10073_s1 = sphi %s10321_s1, %s12040_s1   ;;  %s10069_s28 = sphi %s10319_s28, %s12039_s28   ;;  %s10081_s2 = sphi %s10325_s2, %s12036_s2  }
  0x52   : > { %s11900_s3 = sld [smem:[#allocation66_spill]]  ;;  %s11901_s9 = sld [smem:[#allocation46_spill]] }
  0x53   : > { %s11902_s25 = sld [smem:[#allocation68_spill]]  ;;  %s11903_s14 = sld [smem:[#allocation64_spill]] }
  0x54   : > { %s11904_s6 = sld [smem:[#allocation61_spill]]  ;;  %s11905_s19 = sld [smem:[#allocation55_spill]] }
  0x55   : > { %s11906_s12 = sld [smem:[#allocation58_spill]]  ;;  %s11907_s29 = sld [smem:[#allocation51_spill]] }
  0x56   : > { %s11908_s17 = sld [smem:[#allocation48_spill]]  ;;  %11909 = sst [smem:[#allocation74_spill]] %s10069_s28 }
  0x57   : > { %11910 = sst [smem:[#allocation75_spill]] %s10077_s0  ;;  %s10115_s7 = smov [#allocation9]  }
  0x58   : > { %s835_s10 = sshll.u32 %s10115_s7, 4  ;;  %s10340_s11 = sadd.s32 4294967295, %s10081_s2   ;;  %s10345_s10 = int_to_ptr.vmem [resolvable:$true] %s835_s10 }
  0x59   : > { %p6528_p0 = scmp.ge.s32.totalorder %s10081_s2, 1  ;;  %p11811_p1 = scmp.eq.s32.totalorder %s10340_s11, 0 }
  0x5a   : > { %p823_p2 = scmp.lt.s32.totalorder %s10081_s2, 3  ;;  %s10116_s16 = smov [#allocation12]  }
  0x5b   : > { %s864_s18 = sshll.u32 %s10116_s16, 4  ;;  %s10117_s23 = smov [#allocation15]   ;;  %s10360_s18 = int_to_ptr.vmem [resolvable:$true] %s864_s18 }
  0x5c   : > { %p10347_p3 = pnand %p6528_p0, %p823_p2  ;;  %s896_s26 = sshll.u32 %s10117_s23, 4  ;;  %s10362_s26 = int_to_ptr.vmem [resolvable:$true] %s896_s26 }
  0x5d   : > { %s9441_s7 = scalar_lea.hbm %s11908_s17, 8192 }
  0x5e   : > { %s11911_s15 = scalar_select %p10347_p3, 1, 0 }
  0x5f   : > { %p9070_p5 = pneg %p10347_p3  ;;  %p9442_p7 = scmp.ne.s32.totalorder %s11908_s17, %s9441_s7 }
  0x60   : > { %p9448_p11 = scmp.lt.u32.totalorder %s9441_s7, %s11908_s17 }
  0x61   : > { %p10356_p6 = pnand %p9070_p5, %p11811_p1 }
  0x63   : > { %s11912_s22 = scalar_select %p10356_p6, 1, 0 }
  0x64   : > { %p10368_p8 = pneg %p10356_p6 }
  0x66   : > { %s11913_s13 = scalar_select %p10368_p8, 1, 0 }
  0x67   : > { %p9444_p9 = pnand %p10368_p8, %p9442_p7 }
  0x69   : > { %p9445_p10 = pneg %p9444_p9 }
  0x6b   : > { %p9450_p12 = pnand %p9448_p11, %p9445_p10 }
  0x6d   : > { %9453 = shalt.err (!%p9450_p12)
}
  0x6e   : > { %s9454_s16 = scalar_lea.vmem %s10345_s10, 8192  ;;  %p9462_p5 = scmp.lt.s32.totalorder %s10345_s10, %s10345_s10 }
  0x6f   : > { %p9455_p13 = scmp.ne.s32.totalorder %s10345_s10, %s9454_s16  ;;  %p9463_p4 = scmp.lt.s32.totalorder %s9454_s16, %s9454_s16 }
  0x71   : > { %p9457_p0 = pnand %p9455_p13, %p10368_p8  ;;  %p9464_p1 = por %p9463_p4, %p9462_p5 }
  0x73   : > { %p9458_p2 = pneg %p9457_p0 }
  0x75   : > { %p9465_p3 = pnand %p9464_p1, %p9458_p2 }
  0x77   : > { %9468 = shalt.err (!%p9465_p3)
}
  0x78   : > { %s11813_s23 = smov 128   ;;  %s11815_s7 = smov 8  }
  0x79   : > { %9073 = dma.hbm_to_vmem [thread:$0]  (!%p10356_p6), %s11908_s17, 8192, %s10345_s10, [#allocation10], %s11813_s23, %s11813_s23, %s11815_s7  }
  0x7a   : > { %s9469_s4 = scalar_lea.hbm %s11907_s29, 6144 }
  0x7b   : > { %p9470_p7 = scmp.ne.s32.totalorder %s11907_s29, %s9469_s4  ;;  %p9476_p3 = scmp.lt.u32.totalorder %s9469_s4, %s11907_s29 }
  0x7d   : > { %p9472_p4 = pnand %p9470_p7, %p10368_p8 }
  0x7f   : > { %p9473_p1 = pneg %p9472_p4 }
  0x81   : > { %p9478_p9 = pnand %p9476_p3, %p9473_p1 }
  0x83   : > { %9481 = shalt.err (!%p9478_p9)
}
  0x84   : > { %s9482_s16 = scalar_lea.vmem %s10360_s18, 6144  ;;  %p9490_p13 = scmp.lt.s32.totalorder %s10360_s18, %s10360_s18 }
  0x85   : > { %p9483_p10 = scmp.ne.s32.totalorder %s10360_s18, %s9482_s16  ;;  %p9491_p0 = scmp.lt.s32.totalorder %s9482_s16, %s9482_s16 }
  0x87   : > { %p9485_p11 = pnand %p9483_p10, %p10368_p8  ;;  %p9492_p2 = por %p9491_p0, %p9490_p13 }
  0x89   : > { %p9486_p12 = pneg %p9485_p11 }
  0x8b   : > { %p9493_p5 = pnand %p9492_p2, %p9486_p12 }
  0x8d   : > { %9496 = shalt.err (!%p9493_p5)
}
  0x8e   : > { %9079 = dma.hbm_to_vmem [thread:$0]  (!%p10356_p6), %s11907_s29, 6144, %s10360_s18, [#allocation13], %s11813_s23, %s11813_s23, %s11815_s7  }
  0x8f   : > { %s9497_s4 = scalar_lea.hbm %s11905_s19, 4096 }
  0x90   : > { %p9498_p7 = scmp.ne.s32.totalorder %s11905_s19, %s9497_s4  ;;  %p9504_p3 = scmp.lt.u32.totalorder %s9497_s4, %s11905_s19 }
  0x92   : > { %p9500_p4 = pnand %p9498_p7, %p10368_p8 }
  0x94   : > { %p9501_p1 = pneg %p9500_p4 }
  0x96   : > { %p9506_p9 = pnand %p9504_p3, %p9501_p1 }
  0x98   : > { %9509 = shalt.err (!%p9506_p9)
}
  0x99   : > { %s9510_s10 = scalar_lea.vmem %s10362_s26, 4096  ;;  %p9518_p13 = scmp.lt.s32.totalorder %s10362_s26, %s10362_s26 }
  0x9a   : > { %p9511_p10 = scmp.ne.s32.totalorder %s10362_s26, %s9510_s10  ;;  %p9519_p0 = scmp.lt.s32.totalorder %s9510_s10, %s9510_s10 }
  0x9c   : > { %p9513_p11 = pnand %p9511_p10, %p10368_p8  ;;  %p9520_p2 = por %p9519_p0, %p9518_p13 }
  0x9e   : > { %p9514_p12 = pneg %p9513_p11 }
  0xa0   : > { %p9521_p5 = pnand %p9520_p2, %p9514_p12 }
  0xa2   : > { %9524 = shalt.err (!%p9521_p5)
}
  0xa3   : > { %s10120_s18 = smov 256   ;;  %s10121_s16 = smov 16  }
  0xa4   : > { %9085 = dma.hbm_to_vmem [thread:$0]  (!%p10356_p6), %s11905_s19, 4096, %s10362_s26, [#allocation16], %s10120_s18, %s10120_s18, %s10121_s16  }
  0xa5   : > { %s10122_s4 = smov [#allocation18]   ;;  %s10123_s7 = smov [#allocation21]  }
  0xa6   : > { %s928_s23 = sshll.u32 %s10122_s4, 4  ;;  %s960_s17 = sshll.u32 %s10123_s7, 4  ;;  %s929_s23 = int_to_ptr.vmem [resolvable:$true] %s928_s23  ;;  %s961_s17 = int_to_ptr.vmem [resolvable:$true] %s960_s17 }
  0xa7   : > { %s9525_s10 = scalar_lea.hbm %s11906_s12, 6144 }
  0xa8   : > { %p9526_p7 = scmp.ne.s32.totalorder %s11906_s12, %s9525_s10  ;;  %p9532_p3 = scmp.lt.u32.totalorder %s9525_s10, %s11906_s12 }
  0xaa   : > { %p9528_p4 = pnand %p9526_p7, %p10368_p8 }
  0xac   : > { %p9529_p1 = pneg %p9528_p4 }
  0xae   : > { %p9534_p9 = pnand %p9532_p3, %p9529_p1 }
  0xb0   : > { %9537 = shalt.err (!%p9534_p9)
}
  0xb1   : > { %s9538_s29 = scalar_lea.vmem %s929_s23, 6144  ;;  %p9546_p13 = scmp.lt.s32.totalorder %s929_s23, %s929_s23 }
  0xb2   : > { %p9539_p10 = scmp.ne.s32.totalorder %s929_s23, %s9538_s29  ;;  %p9547_p0 = scmp.lt.s32.totalorder %s9538_s29, %s9538_s29 }
  0xb4   : > { %p9541_p11 = pnand %p9539_p10, %p10368_p8  ;;  %p9548_p2 = por %p9547_p0, %p9546_p13 }
  0xb6   : > { %p9542_p12 = pneg %p9541_p11 }
  0xb8   : > { %p9549_p5 = pnand %p9548_p2, %p9542_p12 }
  0xba   : > { %9552 = shalt.err (!%p9549_p5)
}
  0xbb   : > { %s11914_s26 = smov 8   ;;  %s11915_s7 = smov 128  }
  0xbc   : > { %9091 = dma.hbm_to_vmem [thread:$0]  (!%p10356_p6), %s11906_s12, 6144, %s929_s23, [#allocation19], %s11915_s7, %s11915_s7, %s11914_s26  }
  0xbd   : > { %s9553_s18 = scalar_lea.hbm %s11904_s6, 12288 }
  0xbe   : > { %p9554_p7 = scmp.ne.s32.totalorder %s11904_s6, %s9553_s18  ;;  %p9560_p3 = scmp.lt.u32.totalorder %s9553_s18, %s11904_s6 }
  0xc0   : > { %p9556_p4 = pnand %p9554_p7, %p10368_p8 }
  0xc2   : > { %p9557_p1 = pneg %p9556_p4 }
  0xc4   : > { %p9562_p9 = pnand %p9560_p3, %p9557_p1 }
  0xc6   : > { %9565 = shalt.err (!%p9562_p9)
}
  0xc7   : > { %s9566_s29 = scalar_lea.vmem %s961_s17, 12288  ;;  %p9574_p13 = scmp.lt.s32.totalorder %s961_s17, %s961_s17 }
  0xc8   : > { %p9567_p10 = scmp.ne.s32.totalorder %s961_s17, %s9566_s29  ;;  %p9575_p0 = scmp.lt.s32.totalorder %s9566_s29, %s9566_s29 }
  0xca   : > { %p9569_p11 = pnand %p9567_p10, %p10368_p8  ;;  %p9576_p2 = por %p9575_p0, %p9574_p13 }
  0xcc   : > { %p9570_p12 = pneg %p9569_p11 }
  0xce   : > { %p9577_p5 = pnand %p9576_p2, %p9570_p12 }
  0xd0   : > { %9580 = shalt.err (!%p9577_p5)
}
  0xd1   : > { %s10124_s23 = smov 768   ;;  %s10125_s16 = smov 48  }
  0xd2   : > { %9097 = dma.hbm_to_vmem [thread:$0]  (!%p10356_p6), %s11904_s6, 12288, %s961_s17, [#allocation22], %s10124_s23, %s10124_s23, %s10125_s16  }
  0xd3   : > { %s10126_s4 = smov [#allocation24]   ;;  %s10127_s18 = smov [#allocation27]  }
  0xd4   : > { %s992_s10 = sshll.u32 %s10126_s4, 4  ;;  %s1024_s12 = sshll.u32 %s10127_s18, 4  ;;  %s993_s10 = int_to_ptr.vmem [resolvable:$true] %s992_s10  ;;  %s1025_s12 = int_to_ptr.vmem [resolvable:$true] %s1024_s12 }
  0xd5   : > { %s9581_s19 = scalar_lea.hbm %s11903_s14, 8192 }
  0xd6   : > { %p9582_p7 = scmp.ne.s32.totalorder %s11903_s14, %s9581_s19  ;;  %p9588_p3 = scmp.lt.u32.totalorder %s9581_s19, %s11903_s14 }
  0xd8   : > { %p9584_p4 = pnand %p9582_p7, %p10368_p8 }
  0xda   : > { %p9585_p1 = pneg %p9584_p4 }
  0xdc   : > { %p9590_p9 = pnand %p9588_p3, %p9585_p1 }
  0xde   : > { %9593 = shalt.err (!%p9590_p9)
}
  0xdf   : > { %s9594_s29 = scalar_lea.vmem %s993_s10, 8192  ;;  %p9602_p13 = scmp.lt.s32.totalorder %s993_s10, %s993_s10 }
  0xe0   : > { %p9595_p10 = scmp.ne.s32.totalorder %s993_s10, %s9594_s29  ;;  %p9603_p0 = scmp.lt.s32.totalorder %s9594_s29, %s9594_s29 }
  0xe2   : > { %p9597_p11 = pnand %p9595_p10, %p10368_p8  ;;  %p9604_p2 = por %p9603_p0, %p9602_p13 }
  0xe4   : > { %p9598_p12 = pneg %p9597_p11 }
  0xe6   : > { %p9605_p5 = pnand %p9604_p2, %p9598_p12 }
  0xe8   : > { %9608 = shalt.err (!%p9605_p5)
}
  0xe9   : > { %9103 = dma.hbm_to_vmem [thread:$0]  (!%p10356_p6), %s11903_s14, 8192, %s993_s10, [#allocation25], %s11915_s7, %s11915_s7, %s11914_s26  }
  0xea   : > { %s9609_s17 = scalar_lea.hbm %s11902_s25, 6144 }
  0xeb   : > { %p9610_p7 = scmp.ne.s32.totalorder %s11902_s25, %s9609_s17  ;;  %p9616_p3 = scmp.lt.u32.totalorder %s9609_s17, %s11902_s25 }
  0xed   : > { %p9612_p4 = pnand %p9610_p7, %p10368_p8 }
  0xef   : > { %p9613_p1 = pneg %p9612_p4 }
  0xf1   : > { %p9618_p9 = pnand %p9616_p3, %p9613_p1 }
  0xf3   : > { %9621 = shalt.err (!%p9618_p9)
}
  0xf4   : > { %s9622_s19 = scalar_lea.vmem %s1025_s12, 6144  ;;  %p9630_p13 = scmp.lt.s32.totalorder %s1025_s12, %s1025_s12 }
  0xf5   : > { %p9623_p10 = scmp.ne.s32.totalorder %s1025_s12, %s9622_s19  ;;  %p9631_p0 = scmp.lt.s32.totalorder %s9622_s19, %s9622_s19 }
  0xf7   : > { %p9625_p11 = pnand %p9623_p10, %p10368_p8  ;;  %p9632_p2 = por %p9631_p0, %p9630_p13 }
  0xf9   : > { %p9626_p12 = pneg %p9625_p11 }
  0xfb   : > { %p9633_p5 = pnand %p9632_p2, %p9626_p12 }
  0xfd   : > { %9636 = shalt.err (!%p9633_p5)
}
  0xfe   : > { %9109 = dma.hbm_to_vmem [thread:$0]  (!%p10356_p6), %s11902_s25, 6144, %s1025_s12, [#allocation28], %s11915_s7, %s11915_s7, %s11914_s26  }
  0xff   : > { %s11823_s23 = sadd.s32 4294967294, %s10081_s2   ;;  %s10472_s16 = sadd.s32 1, %s10081_s2  }
 0x100   : > { %11916 = sst [smem:[#allocation76_spill]] %s10472_s16  ;;  %s102_s4 = sadd.s32 1, %s10077_s0 }
 0x101   : > { %s99_s10 = ssub.s32 %s10081_s2, %s10472_s16  ;;  %p109_p7 = scmp.ne.s32.totalorder %s10077_s0, %s10073_s1 }
 0x102   : > { %p100_p4 = scmp.eq.s32.totalorder %s99_s10, 0  ;;  %p110_p1 = scmp.eq.s32.totalorder %s10081_s2, 0 }
 0x103   : > { %p115_p3 = scmp.ne.s32.totalorder %s10073_s1, %s10069_s28  ;;  %p758_p9 = scmp.eq.s32.totalorder %s10340_s11, 1 }
 0x104   : > { %s10484_s18 = scalar_select %p100_p4, %s10077_s0, %s102_s4  }
 0x105   : > { %p111_p10 = por %p110_p1, %p109_p7  ;;  %p11918_p11 = scmp.eq.s32.totalorder %s10340_s11, 0 }
 0x106   : > { %11917 = sst [smem:[#allocation77_spill]] %s10484_s18  ;;  %p10492_p13 = por %p758_p9, %p109_p7 }
 0x107   : > { %p10488_p12 = por %p11918_p11, %p115_p3  ;;  %p764_p0 = scmp.eq.s32.totalorder %s11823_s23, 1 }
 0x108   : > { %s11920_s29 = scalar_select %p10492_p13, 1, 0 }
 0x109   : > { %s11919_s12 = scalar_select %p10488_p12, 1, 0 }
 0x10a   : > { %p10498_p2 = por %p764_p0, %p115_p3  ;;  %p9147_p5 = scmp.lt.s32.totalorder %s10081_s2, 2 }
 0x10b   : > { %s10504_s19 = sand.u32 1, %s10077_s0   ;;  %s11829_s4 = sshll.u32 %s10081_s2, 10 }
 0x10c   : > { %s11921_s17 = scalar_select %p10498_p2, 1, 0 }
 0x10d   : > { %s11836_s10 = sshll.u32 %s10504_s19, 6  ;;  %p10508_p4 = pnand %p9147_p5, %p111_p10 }
 0x10e   : > { %11922 = sst [smem:[#allocation78_spill]] %s11921_s17  ;;  %s1078_s14 = sand.u32 1, %s10081_s2  }
 0x10f   : > { %s11923_s6 = scalar_select %p10508_p4, 1, 0 }
 0x110   : > { %s10516_s23 = scalar_lea.hbm %s11901_s9, %s11829_s4  ;;  %s1082_s25 = scalar_lea.vmem [#allocation6], %s11836_s10 }
 0x111   : > { %s1089_s18 = sshll.u32 %s1082_s25, 4  ;;  %s10522_s0 = scalar_lea.sflag [#allocation7], %s1078_s14  ;;  %s10520_s18 = int_to_ptr.vmem [resolvable:$true] %s1089_s18 }
 0x112   : > { %s9637_s16 = scalar_lea.hbm %s10516_s23, 1024  ;;  %p10528_p1 = pneg %p10508_p4 }
 0x113   : > { %p9638_p7 = scmp.ne.s32.totalorder %s10516_s23, %s9637_s16  ;;  %s9642_s4 = scalar_lea.hbm %s11901_s9, 2048 }
 0x114   : > { %s11924_s17 = scalar_select %p10528_p1, 1, 0 }
 0x115   : > { %p9640_p3 = pnand %p10528_p1, %p9638_p7  ;;  %p9643_p10 = scmp.lt.u32.totalorder %s10516_s23, %s11901_s9 }
 0x116   : > { %p9644_p11 = scmp.lt.u32.totalorder %s9642_s4, %s9637_s16  ;;  %p9646_p5 = scmp.lt.u32.totalorder %s9637_s16, %s10516_s23 }
 0x117   : > { %p9641_p9 = pneg %p9640_p3 }
 0x118   : > { %p9645_p0 = por %p9644_p11, %p9643_p10 }
 0x11a   : > { %p9647_p2 = por %p9646_p5, %p9645_p0 }
 0x11c   : > { %p9648_p13 = pnand %p9647_p2, %p9641_p9 }
 0x11e   : > { %9651 = shalt.err (!%p9648_p13)
}
 0x11f   : > { %s9652_s25 = scalar_lea.vmem %s10520_s18, 1024  ;;  %s10128_s14 = smov [#allocation6]  }
 0x120   : > { %p9653_p12 = scmp.ne.s32.totalorder %s10520_s18, %s9652_s25  ;;  %s9657_s10 = sshll.u32 %s10128_s14, 4  ;;  %s9658_s10 = int_to_ptr.vmem [resolvable:$false] %s9657_s10 }
 0x121   : > { %s9659_s28 = scalar_lea.vmem %s9658_s10, 2048  ;;  %p9660_p7 = scmp.lt.s32.totalorder %s10520_s18, %s9658_s10 }
 0x122   : > { %p9655_p6 = pnand %p9653_p12, %p10528_p1  ;;  %p9661_p3 = scmp.lt.s32.totalorder %s9659_s28, %s9652_s25 }
 0x124   : > { %p9656_p8 = pneg %p9655_p6  ;;  %p9662_p10 = por %p9661_p3, %p9660_p7 }
 0x126   : > { %p9663_p11 = pnand %p9662_p10, %p9656_p8 }
 0x128   : > { %9666 = shalt.err (!%p9663_p11)
}
 0x129   : > { %s10129_s16 = smov 512   ;;  %s10130_s4 = smov 32  }
 0x12a   : > { %9119 = dma.hbm_to_vmem [thread:$0]  (!%p10508_p4), %s10516_s23, 1024, %s10520_s18, %s10522_s0, %s10129_s16, %s10129_s16, %s10130_s4  }
 0x12b   : > { %s10131_s10 = smov [#allocation11]   ;;  %s10132_s25 = smov [#allocation14]  }
 0x12c   : > { %s848_s28 = sshll.u32 %s10131_s10, 4  ;;  %s880_s14 = sshll.u32 %s10132_s25, 4  ;;  %s849_s28 = int_to_ptr.vmem [resolvable:$true] %s848_s28  ;;  %s881_s14 = int_to_ptr.vmem [resolvable:$true] %s880_s14 }
 0x12d   : > { %s9667_s9 = scalar_lea.hbm %s11898_s21, 8192  ;;  %p11925_p8 = scmp.ne.s32.totalorder %s11913_s13, 0 }
 0x12e   : > { %p9668_p6 = scmp.ne.s32.totalorder %s11898_s21, %s9667_s9  ;;  %p9674_p2 = scmp.lt.u32.totalorder %s9667_s9, %s11898_s21 }
 0x130   : > { %p9670_p12 = pnand %p9668_p6, %p11925_p8 }
 0x132   : > { %p9671_p13 = pneg %p9670_p12 }
 0x134   : > { %p9676_p9 = pnand %p9674_p2, %p9671_p13 }
 0x136   : > { %9679 = shalt.err (!%p9676_p9)
}
 0x137   : > { %s9680_s5 = scalar_lea.vmem %s849_s28, 8192  ;;  %p9688_p3 = scmp.lt.s32.totalorder %s849_s28, %s849_s28 }
 0x138   : > { %p9681_p0 = scmp.ne.s32.totalorder %s849_s28, %s9680_s5  ;;  %p9689_p10 = scmp.lt.s32.totalorder %s9680_s5, %s9680_s5 }
 0x13a   : > { %p9683_p5 = pnand %p9681_p0, %p11925_p8  ;;  %p9690_p11 = por %p9689_p10, %p9688_p3 }
 0x13c   : > { %p9684_p7 = pneg %p9683_p5 }
 0x13e   : > { %p9691_p4 = pnand %p9690_p11, %p9684_p7 }
 0x140   : > { %9694 = shalt.err (!%p9691_p4)
}
 0x141   : > { %p11926_p1 = scmp.ne.s32.totalorder %s11912_s22, 0  ;;  %s9695_s9 = scalar_lea.hbm %s11899_s8, 6144 }
 0x142   : > { %p9696_p6 = scmp.ne.s32.totalorder %s11899_s8, %s9695_s9  ;;  %p9702_p2 = scmp.lt.u32.totalorder %s9695_s9, %s11899_s8 }
 0x143   : > { %9076 = dma.hbm_to_vmem [thread:$0]  (!%p11926_p1), %s11898_s21, 8192, %s849_s28, [#allocation10], %s11915_s7, %s11915_s7, %s11914_s26  }
 0x144   : > { %p9698_p12 = pnand %p9696_p6, %p11925_p8 }
 0x146   : > { %p9699_p13 = pneg %p9698_p12 }
 0x148   : > { %p9704_p9 = pnand %p9702_p2, %p9699_p13 }
 0x14a   : > { %9707 = shalt.err (!%p9704_p9)
}
 0x14b   : > { %s9708_s5 = scalar_lea.vmem %s881_s14, 6144  ;;  %p9716_p7 = scmp.lt.s32.totalorder %s881_s14, %s881_s14 }
 0x14c   : > { %p9709_p4 = scmp.ne.s32.totalorder %s881_s14, %s9708_s5  ;;  %p9717_p3 = scmp.lt.s32.totalorder %s9708_s5, %s9708_s5 }
 0x14e   : > { %p9711_p0 = pnand %p9709_p4, %p11925_p8  ;;  %p9718_p10 = por %p9717_p3, %p9716_p7 }
 0x150   : > { %p9712_p5 = pneg %p9711_p0 }
 0x152   : > { %p9719_p11 = pnand %p9718_p10, %p9712_p5 }
 0x154   : > { %9722 = shalt.err (!%p9719_p11)
}
 0x155   : > { %9082 = dma.hbm_to_vmem [thread:$0]  (!%p11926_p1), %s11899_s8, 6144, %s881_s14, [#allocation13], %s11915_s7, %s11915_s7, %s11914_s26  }
 0x156   : > { %s10133_s23 = smov [#allocation17]   ;;  %s10134_s10 = smov [#allocation20]  }
 0x157   : > { %s912_s18 = sshll.u32 %s10133_s23, 4  ;;  %s944_s28 = sshll.u32 %s10134_s10, 4  ;;  %s913_s18 = int_to_ptr.vmem [resolvable:$true] %s912_s18  ;;  %s945_s28 = int_to_ptr.vmem [resolvable:$true] %s944_s28 }
 0x158   : > { %s9723_s25 = scalar_lea.hbm %s10217_s30, 8192 }
 0x159   : > { %p9724_p6 = scmp.ne.s32.totalorder %s10217_s30, %s9723_s25  ;;  %p9730_p2 = scmp.lt.u32.totalorder %s9723_s25, %s10217_s30 }
 0x15b   : > { %p9726_p12 = pnand %p9724_p6, %p11925_p8 }
 0x15d   : > { %p9727_p13 = pneg %p9726_p12 }
 0x15f   : > { %p9732_p9 = pnand %p9730_p2, %p9727_p13 }
 0x161   : > { %9735 = shalt.err (!%p9732_p9)
}
 0x162   : > { %s9736_s9 = scalar_lea.vmem %s913_s18, 8192  ;;  %p9744_p7 = scmp.lt.s32.totalorder %s913_s18, %s913_s18 }
 0x163   : > { %p9737_p4 = scmp.ne.s32.totalorder %s913_s18, %s9736_s9  ;;  %p9745_p3 = scmp.lt.s32.totalorder %s9736_s9, %s9736_s9 }
 0x165   : > { %p9739_p0 = pnand %p9737_p4, %p11925_p8  ;;  %p9746_p10 = por %p9745_p3, %p9744_p7 }
 0x167   : > { %p9740_p5 = pneg %p9739_p0 }
 0x169   : > { %p9747_p11 = pnand %p9746_p10, %p9740_p5 }
 0x16b   : > { %9750 = shalt.err (!%p9747_p11)
}
 0x16c   : > { %9088 = dma.hbm_to_vmem [thread:$0]  (!%p11926_p1), %s10217_s30, 8192, %s913_s18, [#allocation16], %s11915_s7, %s11915_s7, %s11914_s26  }
 0x16d   : > { %s9751_s14 = scalar_lea.hbm %s10237_s27, 6144 }
 0x16e   : > { %p9752_p6 = scmp.ne.s32.totalorder %s10237_s27, %s9751_s14  ;;  %p9758_p2 = scmp.lt.u32.totalorder %s9751_s14, %s10237_s27 }
 0x170   : > { %p9754_p12 = pnand %p9752_p6, %p11925_p8 }
 0x172   : > { %p9755_p13 = pneg %p9754_p12 }
 0x174   : > { %p9760_p9 = pnand %p9758_p2, %p9755_p13 }
 0x176   : > { %9763 = shalt.err (!%p9760_p9)
}
 0x177   : > { %s9764_s5 = scalar_lea.vmem %s945_s28, 6144  ;;  %p9772_p7 = scmp.lt.s32.totalorder %s945_s28, %s945_s28 }
 0x178   : > { %p9765_p4 = scmp.ne.s32.totalorder %s945_s28, %s9764_s5  ;;  %p9773_p3 = scmp.lt.s32.totalorder %s9764_s5, %s9764_s5 }
 0x17a   : > { %p9767_p0 = pnand %p9765_p4, %p11925_p8  ;;  %p9774_p10 = por %p9773_p3, %p9772_p7 }
 0x17c   : > { %p9768_p5 = pneg %p9767_p0 }
 0x17e   : > { %p9775_p11 = pnand %p9774_p10, %p9768_p5 }
 0x180   : > { %9778 = shalt.err (!%p9775_p11)
}
 0x181   : > { %9094 = dma.hbm_to_vmem [thread:$0]  (!%p11926_p1), %s10237_s27, 6144, %s945_s28, [#allocation19], %s11915_s7, %s11915_s7, %s11914_s26  }
 0x182   : > { %s10135_s23 = smov [#allocation23]   ;;  %s10136_s10 = smov [#allocation26]  }
 0x183   : > { %s976_s18 = sshll.u32 %s10135_s23, 4  ;;  %s1008_s25 = sshll.u32 %s10136_s10, 4  ;;  %s977_s18 = int_to_ptr.vmem [resolvable:$true] %s976_s18  ;;  %s1009_s25 = int_to_ptr.vmem [resolvable:$true] %s1008_s25 }
 0x184   : > { %s9779_s9 = scalar_lea.hbm %s10257_s24, 8192 }
 0x185   : > { %p9780_p6 = scmp.ne.s32.totalorder %s10257_s24, %s9779_s9  ;;  %p9786_p2 = scmp.lt.u32.totalorder %s9779_s9, %s10257_s24 }
 0x187   : > { %p9782_p12 = pnand %p9780_p6, %p11925_p8 }
 0x189   : > { %p9783_p13 = pneg %p9782_p12 }
 0x18b   : > { %p9788_p9 = pnand %p9786_p2, %p9783_p13 }
 0x18d   : > { %9791 = shalt.err (!%p9788_p9)
}
 0x18e   : > { %s9792_s14 = scalar_lea.vmem %s977_s18, 8192  ;;  %p9800_p7 = scmp.lt.s32.totalorder %s977_s18, %s977_s18 }
 0x18f   : > { %p9793_p4 = scmp.ne.s32.totalorder %s977_s18, %s9792_s14  ;;  %p9801_p3 = scmp.lt.s32.totalorder %s9792_s14, %s9792_s14 }
 0x191   : > { %p9795_p0 = pnand %p9793_p4, %p11925_p8  ;;  %p9802_p10 = por %p9801_p3, %p9800_p7 }
 0x193   : > { %p9796_p5 = pneg %p9795_p0 }
 0x195   : > { %p9803_p11 = pnand %p9802_p10, %p9796_p5 }
 0x197   : > { %9806 = shalt.err (!%p9803_p11)
}
 0x198   : > { %9100 = dma.hbm_to_vmem [thread:$0]  (!%p11926_p1), %s10257_s24, 8192, %s977_s18, [#allocation22], %s10129_s16, %s10129_s16, %s10130_s4  }
 0x199   : > { %s9807_s28 = scalar_lea.hbm %s11900_s3, 6144 }
 0x19a   : > { %p9808_p6 = scmp.ne.s32.totalorder %s11900_s3, %s9807_s28  ;;  %p9814_p2 = scmp.lt.u32.totalorder %s9807_s28, %s11900_s3 }
 0x19c   : > { %p9810_p12 = pnand %p9808_p6, %p11925_p8 }
 0x19e   : > { %p9811_p13 = pneg %p9810_p12 }
 0x1a0   : > { %p9816_p9 = pnand %p9814_p2, %p9811_p13 }
 0x1a2   : > { %9819 = shalt.err (!%p9816_p9)
}
 0x1a3   : > { %s9820_s5 = scalar_lea.vmem %s1009_s25, 6144  ;;  %p9828_p7 = scmp.lt.s32.totalorder %s1009_s25, %s1009_s25 }
 0x1a4   : > { %p9821_p4 = scmp.ne.s32.totalorder %s1009_s25, %s9820_s5  ;;  %p9829_p3 = scmp.lt.s32.totalorder %s9820_s5, %s9820_s5 }
 0x1a6   : > { %p9823_p0 = pnand %p9821_p4, %p11925_p8  ;;  %p9830_p10 = por %p9829_p3, %p9828_p7 }
 0x1a8   : > { %p9824_p5 = pneg %p9823_p0 }
 0x1aa   : > { %p9831_p11 = pnand %p9830_p10, %p9824_p5 }
 0x1ac   : > { %9834 = shalt.err (!%p9831_p11)
}
 0x1ad   : > { %s11927_s23 = sld [smem:[#allocation70_spill]]  ;;  %s10137_s18 = smov [#allocation29]  }
 0x1ae   : > { %9106 = dma.hbm_to_vmem [thread:$0]  (!%p11926_p1), %s11900_s3, 6144, %s1009_s25, [#allocation25], %s11915_s7, %s11915_s7, %s11914_s26  }
 0x1af   : > { %s1040_s10 = sshll.u32 %s10137_s18, 4  ;;  %s1041_s10 = int_to_ptr.vmem [resolvable:$true] %s1040_s10 }
 0x1b3   : > { %s9835_s9 = scalar_lea.hbm %s11927_s23, 8192 }
 0x1b4   : > { %p9836_p6 = scmp.ne.s32.totalorder %s11927_s23, %s9835_s9  ;;  %p9842_p2 = scmp.lt.u32.totalorder %s9835_s9, %s11927_s23 }
 0x1b6   : > { %p9838_p12 = pnand %p9836_p6, %p11925_p8 }
 0x1b8   : > { %p9839_p13 = pneg %p9838_p12 }
 0x1ba   : > { %p9844_p9 = pnand %p9842_p2, %p9839_p13 }
 0x1bc   : > { %9847 = shalt.err (!%p9844_p9)
}
 0x1bd   : > { %s9848_s14 = scalar_lea.vmem %s1041_s10, 8192  ;;  %p9856_p7 = scmp.lt.s32.totalorder %s1041_s10, %s1041_s10 }
 0x1be   : > { %p9849_p4 = scmp.ne.s32.totalorder %s1041_s10, %s9848_s14  ;;  %p9857_p3 = scmp.lt.s32.totalorder %s9848_s14, %s9848_s14 }
 0x1c0   : > { %p9851_p0 = pnand %p9849_p4, %p11925_p8  ;;  %p9858_p10 = por %p9857_p3, %p9856_p7 }
 0x1c2   : > { %p9852_p5 = pneg %p9851_p0 }
 0x1c4   : > { %p9859_p11 = pnand %p9858_p10, %p9852_p5 }
 0x1c6   : > { %9862 = shalt.err (!%p9859_p11)
}
 0x1c7   : > { %s11928_s25 = sld [smem:[#allocation45_spill]]  ;;  %s11929_s13 = sshll.u32 %s10081_s2, 10 }
 0x1c8   : > { %9112 = dma.hbm_to_vmem [thread:$0]  (!%p11926_p1), %s11927_s23, 8192, %s1041_s10, [#allocation28], %s10129_s16, %s10129_s16, %s10130_s4  }
 0x1c9   : > { %s11930_s5 = sshll.u32 %s10504_s19, 6  ;;  %s1058_s14 = scalar_lea.sflag [#allocation4], %s10504_s19 }
 0x1ca   : > { %s1061_s22 = scalar_lea.vmem [#allocation3], %s11930_s5  ;;  %p11931_p6 = scmp.ne.s32.totalorder %s11924_s17, 0 }
 0x1cb   : > { %s1068_s18 = sshll.u32 %s1061_s22, 4  ;;  %s10649_s18 = int_to_ptr.vmem [resolvable:$true] %s1068_s18 }
 0x1cd   : > { %s10645_s28 = scalar_lea.hbm %s11928_s25, %s11929_s13  ;;  %s9868_s10 = scalar_lea.hbm %s11928_s25, 2048 }
 0x1ce   : > { %s9863_s3 = scalar_lea.hbm %s10645_s28, 1024  ;;  %p9869_p1 = scmp.lt.u32.totalorder %s10645_s28, %s11928_s25 }
 0x1cf   : > { %p9864_p8 = scmp.ne.s32.totalorder %s10645_s28, %s9863_s3  ;;  %p9870_p2 = scmp.lt.u32.totalorder %s9868_s10, %s9863_s3 }
 0x1d0   : > { %p9872_p4 = scmp.lt.u32.totalorder %s9863_s3, %s10645_s28 }
 0x1d1   : > { %p9866_p12 = pnand %p9864_p8, %p11931_p6  ;;  %p9871_p9 = por %p9870_p2, %p9869_p1 }
 0x1d3   : > { %p9867_p13 = pneg %p9866_p12  ;;  %p9873_p0 = por %p9872_p4, %p9871_p9 }
 0x1d5   : > { %p9874_p5 = pnand %p9873_p0, %p9867_p13 }
 0x1d7   : > { %9877 = shalt.err (!%p9874_p5)
}
 0x1d8   : > { %s9878_s13 = scalar_lea.vmem %s10649_s18, 1024  ;;  %s10138_s5 = smov [#allocation3]  }
 0x1d9   : > { %p9879_p7 = scmp.ne.s32.totalorder %s10649_s18, %s9878_s13  ;;  %s9883_s22 = sshll.u32 %s10138_s5, 4  ;;  %s9884_s22 = int_to_ptr.vmem [resolvable:$false] %s9883_s22 }
 0x1da   : > { %s9885_s9 = scalar_lea.vmem %s9884_s22, 2048  ;;  %p9886_p11 = scmp.lt.s32.totalorder %s10649_s18, %s9884_s22 }
 0x1db   : > { %p9881_p3 = pnand %p9879_p7, %p11931_p6  ;;  %p9887_p8 = scmp.lt.s32.totalorder %s9885_s9, %s9878_s13 }
 0x1dd   : > { %p9882_p10 = pneg %p9881_p3  ;;  %p9888_p12 = por %p9887_p8, %p9886_p11 }
 0x1df   : > { %p9889_p1 = pnand %p9888_p12, %p9882_p10 }
 0x1e1   : > { %9892 = shalt.err (!%p9889_p1)
}
 0x1e2   : > { %p11932_p13 = scmp.ne.s32.totalorder %s11923_s6, 0  ;;  %s11933_s3 = sld [smem:[#allocation47_spill]] }
 0x1e3   : > { %s6596_s9 = sshll.u32 %s10081_s2, 8  ;;  %s11934_s13 = sshll.u32 %s10504_s19, 4 }
 0x1e4   : > { %9116 = dma.hbm_to_vmem [thread:$0]  (!%p11932_p13), %s10645_s28, 1024, %s10649_s18, %s1058_s14, %s10129_s16, %s10129_s16, %s10130_s4  }
 0x1e5   : > { %s1103_s5 = scalar_lea.vmem [#allocation8], %s11934_s13 }
 0x1e6   : > { %s1110_s22 = sshll.u32 %s1103_s5, 4  ;;  %s10681_s22 = int_to_ptr.vmem [resolvable:$true] %s1110_s22 }
 0x1e8   : > { %s10677_s10 = scalar_lea.hbm %s11933_s3, %s6596_s9  ;;  %s9898_s21 = scalar_lea.hbm %s11933_s3, 512 }
 0x1e9   : > { %s9893_s8 = scalar_lea.hbm %s10677_s10, 256  ;;  %p9899_p0 = scmp.lt.u32.totalorder %s10677_s10, %s11933_s3 }
 0x1ea   : > { %p9894_p2 = scmp.ne.s32.totalorder %s10677_s10, %s9893_s8  ;;  %p9900_p5 = scmp.lt.u32.totalorder %s9898_s21, %s9893_s8 }
 0x1eb   : > { %p9902_p3 = scmp.lt.u32.totalorder %s9893_s8, %s10677_s10 }
 0x1ec   : > { %p9896_p9 = pnand %p9894_p2, %p11931_p6  ;;  %p9901_p7 = por %p9900_p5, %p9899_p0 }
 0x1ee   : > { %p9897_p4 = pneg %p9896_p9  ;;  %p9903_p10 = por %p9902_p3, %p9901_p7 }
 0x1f0   : > { %p9904_p11 = pnand %p9903_p10, %p9897_p4 }
 0x1f2   : > { %9907 = shalt.err (!%p9904_p11)
}
 0x1f3   : > { %s9908_s19 = scalar_lea.vmem %s10681_s22, 256  ;;  %s10139_s16 = smov [#allocation8]  }
 0x1f4   : > { %p9909_p8 = scmp.ne.s32.totalorder %s10681_s22, %s9908_s19  ;;  %s9913_s4 = sshll.u32 %s10139_s16, 4  ;;  %s9914_s4 = int_to_ptr.vmem [resolvable:$false] %s9913_s4 }
 0x1f5   : > { %s9915_s28 = scalar_lea.vmem %s9914_s4, 512  ;;  %p9916_p2 = scmp.lt.s32.totalorder %s10681_s22, %s9914_s4 }
 0x1f6   : > { %p9911_p12 = pnand %p9909_p8, %p11931_p6  ;;  %p9917_p9 = scmp.lt.s32.totalorder %s9915_s28, %s9908_s19 }
 0x1f8   : > { %p9912_p1 = pneg %p9911_p12  ;;  %p9918_p0 = por %p9917_p9, %p9916_p2 }
 0x1fa   : > { %p9919_p5 = pnand %p9918_p0, %p9912_p1 }
 0x1fc   : > { %9922 = shalt.err (!%p9919_p5)
}
 0x1fd   : > { %9122 = dma.hbm_to_vmem [thread:$0]  (!%p11932_p13), %s10677_s10, 256, %s10681_s22, %s10522_s0, %s11915_s7, %s11915_s7, %s11914_s26  }
 0x1fe   : > { %p11935_p6 = scmp.ne.s32.totalorder %s11911_s15, 0 }
 0x200   : > { %1122 = sbr.rel (%p11935_p6) target bundleno = 4070 (0xfe6), region = 140 }
 0x207   : > { %s10707_s21 = sand.u32 1, %s10073_s1   ;;  %p11936_p4 = scmp.ne.s32.totalorder %s11919_s12, 0 }
 0x208   : > { %s10710_s8 = sshll.u32 %s10707_s21, 6  ;;  %s1125_s6 = scalar_lea.sflag [#allocation4], %s10707_s21 }
 0x209   : > { %s10714_s17 = scalar_lea.vmem [#allocation3], %s10710_s8 }
 0x20a   : > { %10024 = dma.done.wait (%p11936_p4), %s1125_s6, 1024  }
 0x20b   : > { %10026 = vsyncadd (%p11936_p4), %s1125_s6, 4294966272  ;;  %s1133_s0 = sand.u32 1, %s10340_s11   ;;  %s10724_s26 = scalar_lea.vmem [#allocation6], %s10710_s8 }
 0x20c   : > { %s1134_s15 = scalar_lea.sflag [#allocation7], %s1133_s0 }
 0x20d   : > { %10028 = dma.done.wait (%p11936_p4), %s1134_s15, 1280  }
 0x20e   : > { %10030 = vsyncadd (%p11936_p4), %s1134_s15, 4294966016  ;;  %s10731_s7 = sshll.u32 %s10707_s21, 4  ;;  %p11937_p13 = scmp.eq.s32.totalorder %s10340_s11, 0 }
 0x20f   : > { %s1146_s18 = scalar_lea.vmem [#allocation8], %s10731_s7 }
 0x210   : > { %10032 = dma.done.wait (%p11937_p13), [#allocation10], 16384   ;;  %p11938_p7 = pmov %p11937_p13 }
 0x212   : > { %10034 = vsyncadd (%p11938_p7), [#allocation10], 4294950912  ;;  %p11939_p3 = pmov %p11938_p7 }
 0x214   : > { %10036 = dma.done.wait (%p11939_p3), [#allocation13], 12288   ;;  %p11940_p10 = pmov %p11939_p3 }
 0x215   : > { %p11941_p11 = pmov %p11939_p3 }
 0x216   : > { %10038 = vsyncadd (%p11940_p10), [#allocation13], 4294955008 }
 0x217   : > { %10040 = dma.done.wait (%p11941_p11), [#allocation16], 12288   ;;  %p11942_p8 = pmov %p11939_p3 }
 0x218   : > { %p11943_p12 = pmov %p11939_p3 }
 0x219   : > { %10042 = vsyncadd (%p11942_p8), [#allocation16], 4294955008 }
 0x21a   : > { %10044 = dma.done.wait (%p11943_p12), [#allocation19], 12288   ;;  %p11944_p1 = pmov %p11939_p3 }
 0x21c   : > { %10046 = vsyncadd (%p11944_p1), [#allocation19], 4294955008  ;;  %p11945_p2 = pmov %p11944_p1 }
 0x21d   : > { %p11946_p9 = pmov %p11944_p1 }
 0x21e   : > { %10048 = dma.done.wait (%p11945_p2), [#allocation22], 20480  }
 0x21f   : > { %10050 = vsyncadd (%p11946_p9), [#allocation22], 4294946816  ;;  %p11947_p0 = pmov %p11944_p1 }
 0x221   : > { %10052 = dma.done.wait (%p11947_p0), [#allocation25], 14336   ;;  %p11948_p5 = pmov %p11947_p0 }
 0x222   : > { %p11949_p6 = pmov %p11947_p0 }
 0x223   : > { %10054 = vsyncadd (%p11948_p5), [#allocation25], 4294952960 }
 0x224   : > { %10056 = dma.done.wait (%p11949_p6), [#allocation28], 14336   ;;  %p11950_p4 = pmov %p11947_p0 }
 0x225   : > { %v1836_v0 = vld [vmem:[#allocation11 + $0x80] sm:$0xff]  ;;  %v1837_v1 = vld [vmem:[#allocation11 + $0x88] sm:$0xff]  ;;  %v1838_v11 = vld [vmem:[#allocation11 + $0x90] sm:$0xff]  ;;  %s12015_s12 = sld [smem:[#allocation50_spill]]  ;;  %s12016_s14 = sld [smem:[#allocation52_spill]] }
 0x226   : > { %10058 = vsyncadd (%p11950_p4), [#allocation28], 4294952960  ;;  %v1820_v2 = vld [vmem:[#allocation11] sm:$0xff]  ;;  %v7858_v3 = vpack.c.bf16 %v1837_v1, %v1836_v0  ;;  %v1821_v4 = vld [vmem:[#allocation11 + $0x8] sm:$0xff]  ;;  %s12017_s9 = sld [smem:[#allocation54_spill]]  ;;  %s12018_s10 = sld [smem:[#allocation56_spill]] }
 0x227   : > { %v1868_v5 = vld [vmem:[#allocation11 + $0x180] sm:$0xff]  ;;  %v1869_v6 = vld [vmem:[#allocation11 + $0x188] sm:$0xff]  ;;  %v7860_v7 = vpack.c.bf16 %v1821_v4, %v1820_v2  ;;  %v1839_v13 = vld [vmem:[#allocation11 + $0x98] sm:$0xff]  ;;  %s12019_s13 = sld [smem:[#allocation57_spill]]  ;;  %s11441_s5 = scalar_lea.vmem [#allocation30], %s10731_s7 }
 0x228   : > { %v7890_v8 = vpack.c.bf16 %v1869_v6, %v1868_v5  ;;  %v1852_v9 = vld [vmem:[#allocation11 + $0x100] sm:$0xff]  ;;  %v1853_v10 = vld [vmem:[#allocation11 + $0x108] sm:$0xff]  ;;  %7859 = vmatprep.subr.bf16.mxu0 %v7858_v3  ;;  %v1822_v14 = vld [vmem:[#allocation11 + $0x10] sm:$0xff]  ;;  %v7862_v16 = vpack.c.bf16 %v1839_v13, %v1838_v11  ;;  %s12020_s22 = sld [smem:[#allocation59_spill]]  ;;  %s12021_s19 = sld [smem:[#allocation60_spill]] }
 0x229   : > { %v7892_v12 = vpack.c.bf16 %v1853_v10, %v1852_v9  ;;  %v1823_v15 = vld [vmem:[#allocation11 + $0x18] sm:$0xff]  ;;  %7861 = vmatpush3.bf16.msra.mxu0 %v7860_v7  ;;  %v1870_v18 = vld [vmem:[#allocation11 + $0x190] sm:$0xff]  ;;  %v1840_v23 = vld [vmem:[#allocation11 + $0xa0] sm:$0xff]  ;;  %s12022_s16 = sld [smem:[#allocation62_spill]]  ;;  %s12023_s4 = sld [smem:[#allocation63_spill]] }
 0x22a   : > { %7891 = vmatprep.subr.bf16.mxu1 %v7890_v8  ;;  %v7864_v17 = vpack.c.bf16 %v1823_v15, %v1822_v14  ;;  %v1871_v19 = vld [vmem:[#allocation11 + $0x198] sm:$0xff]  ;;  %v1854_v20 = vld [vmem:[#allocation11 + $0x110] sm:$0xff]  ;;  %v1841_v24 = vld [vmem:[#allocation11 + $0xa8] sm:$0xff]  ;;  %7863 = vmatprep.subr.bf16.mxu0 %v7862_v16  ;;  %s11516_s28 = scalar_lea.vmem [#allocation31], %s10731_s7  ;;  %s12024_s6 = sld [smem:[#allocation65_spill]] }
 0x22b   : > { %7893 = vmatpush3.bf16.msra.mxu1 %v7892_v12  ;;  %v7894_v21 = vpack.c.bf16 %v1871_v19, %v1870_v18  ;;  %v1855_v22 = vld [vmem:[#allocation11 + $0x118] sm:$0xff]  ;;  %v7866_v26 = vpack.c.bf16 %v1841_v24, %v1840_v23  ;;  %v1824_v27 = vld [vmem:[#allocation11 + $0x20] sm:$0xff]  ;;  %v1825_v28 = vld [vmem:[#allocation11 + $0x28] sm:$0xff]  ;;  %s12026_s15 = sld [smem:[#allocation69_spill]]  ;;  %s6169_s7 = sshll.u32 %s11516_s28, 4  ;;  %s11693_s7 = int_to_ptr.vmem [resolvable:$true] %s6169_s7 }
 0x22c   : > { %v7896_v25 = vpack.c.bf16 %v1855_v22, %v1854_v20  ;;  %v1872_v29 = vld [vmem:[#allocation11 + $0x1a0] sm:$0xff]  ;;  %v1873_v30 = vld [vmem:[#allocation11 + $0x1a8] sm:$0xff]  ;;  %v7868_v33 = vpack.c.bf16 %v1825_v28, %v1824_v27  ;;  %v1842_v35 = vld [vmem:[#allocation11 + $0xb0] sm:$0xff]  ;;  %p12027_p7 = scmp.ne.s32.totalorder %s11920_s29, 0 }
 0x22d   : > { %7895 = vmatprep.subr.bf16.mxu1 %v7894_v21  ;;  %v1856_v31 = vld [vmem:[#allocation11 + $0x120] sm:$0xff]  ;;  %v1857_v32 = vld [vmem:[#allocation11 + $0x128] sm:$0xff]  ;;  %7865 = vmatpush3.bf16.msra.mxu0 %v7864_v17  ;;  %v7898_v34 = vpack.c.bf16 %v1873_v30, %v1872_v29  ;;  %v1843_v36 = vld [vmem:[#allocation11 + $0xb8] sm:$0xff] }
 0x22e   : > { %v1826_v37 = vld [vmem:[#allocation11 + $0x30] sm:$0xff]  ;;  %7867 = vmatprep.subr.bf16.mxu0 %v7866_v26  ;;  %v7900_v38 = vpack.c.bf16 %v1857_v32, %v1856_v31  ;;  %v7870_v39 = vpack.c.bf16 %v1843_v36, %v1842_v35  ;;  %v1827_v40 = vld [vmem:[#allocation11 + $0x38] sm:$0xff]  ;;  %v1844_v46 = vld [vmem:[#allocation11 + $0xc0] sm:$0xff] }
 0x22f   : > { %7897 = vmatpush3.bf16.msra.mxu1 %v7896_v25  ;;  %v1874_v41 = vld [vmem:[#allocation11 + $0x1b0] sm:$0xff]  ;;  %v1875_v42 = vld [vmem:[#allocation11 + $0x1b8] sm:$0xff]  ;;  %v1845_v47 = vld [vmem:[#allocation11 + $0xc8] sm:$0xff]  ;;  %v7872_v48 = vpack.c.bf16 %v1827_v40, %v1826_v37 }
 0x230   : > { %7899 = vmatprep.subr.bf16.mxu1 %v7898_v34  ;;  %v7902_v43 = vpack.c.bf16 %v1875_v42, %v1874_v41  ;;  %v1858_v44 = vld [vmem:[#allocation11 + $0x130] sm:$0xff]  ;;  %v1859_v45 = vld [vmem:[#allocation11 + $0x138] sm:$0xff]  ;;  %v1876_v49 = vld [vmem:[#allocation11 + $0x1c0] sm:$0xff]  ;;  %v7874_v52 = vpack.c.bf16 %v1845_v47, %v1844_v46 }
 0x231   : > { %7869 = vmatpush3.bf16.msra.mxu0 %v7868_v33  ;;  %v1877_v50 = vld [vmem:[#allocation11 + $0x1c8] sm:$0xff]  ;;  %v7904_v51 = vpack.c.bf16 %v1859_v45, %v1858_v44  ;;  %v1828_v53 = vld [vmem:[#allocation11 + $0x40] sm:$0xff]  ;;  %v1846_v58 = vld [vmem:[#allocation11 + $0xd0] sm:$0xff] }
 0x232   : > { %7871 = vmatprep.subr.bf16.mxu0 %v7870_v39  ;;  %v1829_v54 = vld [vmem:[#allocation11 + $0x48] sm:$0xff]  ;;  %v1860_v55 = vld [vmem:[#allocation11 + $0x140] sm:$0xff]  ;;  %v7906_v56 = vpack.c.bf16 %v1877_v50, %v1876_v49  ;;  %v1847_v59 = vld [vmem:[#allocation11 + $0xd8] sm:$0xff] }
 0x233   : > { %7901 = vmatpush3.bf16.msra.mxu1 %v7900_v38  ;;  %v1861_v57 = vld [vmem:[#allocation11 + $0x148] sm:$0xff]  ;;  %v1878_v60 = vld [vmem:[#allocation11 + $0x1d0] sm:$0xff]  ;;  %v1879_v61 = vld [vmem:[#allocation11 + $0x1d8] sm:$0xff]  ;;  %v7876_v62 = vpack.c.bf16 %v1829_v54, %v1828_v53  ;;  %v7878_v0 = vpack.c.bf16 %v1847_v59, %v1846_v58 }
 0x234   : > { %7903 = vmatprep.subr.bf16.mxu1 %v7902_v43  ;;  %v7908_v63 = vpack.c.bf16 %v1861_v57, %v1860_v55  ;;  %v1830_v1 = vld [vmem:[#allocation11 + $0x50] sm:$0xff]  ;;  %v1831_v2 = vld [vmem:[#allocation11 + $0x58] sm:$0xff]  ;;  %v7910_v4 = vpack.c.bf16 %v1879_v61, %v1878_v60  ;;  %v1848_v6 = vld [vmem:[#allocation11 + $0xe0] sm:$0xff] }
 0x235   : > { %7873 = vmatpush3.bf16.msra.mxu0 %v7872_v48  ;;  %v1862_v3 = vld [vmem:[#allocation11 + $0x150] sm:$0xff]  ;;  %v1863_v5 = vld [vmem:[#allocation11 + $0x158] sm:$0xff]  ;;  %v1849_v7 = vld [vmem:[#allocation11 + $0xe8] sm:$0xff]  ;;  %v7880_v10 = vpack.c.bf16 %v1831_v2, %v1830_v1  ;;  %v11847_v2 = vmov -1.0  }
 0x236   : > { %7875 = vmatprep.subr.bf16.mxu0 %v7874_v52  ;;  %v1880_v8 = vld [vmem:[#allocation11 + $0x1e0] sm:$0xff]  ;;  %v1881_v9 = vld [vmem:[#allocation11 + $0x1e8] sm:$0xff]  ;;  %v7912_v13 = vpack.c.bf16 %v1863_v5, %v1862_v3  ;;  %v7882_v14 = vpack.c.bf16 %v1849_v7, %v1848_v6  ;;  %v10766_v17 = vld [vmem:[%s10724_s26 + $0x18] sm:$0xff] }
 0x237   : > { %7905 = vmatpush3.bf16.msra.mxu1 %v7904_v51  ;;  %v1832_v11 = vld [vmem:[#allocation11 + $0x60] sm:$0xff]  ;;  %v1833_v12 = vld [vmem:[#allocation11 + $0x68] sm:$0xff]  ;;  %v7914_v18 = vpack.c.bf16 %v1881_v9, %v1880_v8  ;;  %v1850_v20 = vld [vmem:[#allocation11 + $0xf0] sm:$0xff]  ;;  %v10772_v25 = vmul.f32 0.70710677, %v10766_v17 }
 0x238   : > { %7907 = vmatprep.subr.bf16.mxu1 %v7906_v56  ;;  %v1864_v15 = vld [vmem:[#allocation11 + $0x160] sm:$0xff]  ;;  %v10763_v16 = vld [vmem:[%s10724_s26 + $0x8] sm:$0xff]  ;;  %v1851_v21 = vld [vmem:[#allocation11 + $0xf8] sm:$0xff]  ;;  %v7884_v27 = vpack.c.bf16 %v1833_v12, %v1832_v11 }
 0x239   : > { %7877 = vmatpush3.bf16.msra.mxu0 %v7876_v62  ;;  %v1865_v19 = vld [vmem:[#allocation11 + $0x168] sm:$0xff]  ;;  %v10769_v22 = vmul.f32 0.70710677, %v10763_v16  ;;  %v1882_v23 = vld [vmem:[#allocation11 + $0x1f0] sm:$0xff]  ;;  %v1883_v24 = vld [vmem:[#allocation11 + $0x1f8] sm:$0xff]  ;;  %v7886_v32 = vpack.c.bf16 %v1851_v21, %v1850_v20  ;;  %vm1559_vm1 = vcmp.ge.f32.partialorder %v10772_v25, 0.0 }
 0x23a   : > { %7879 = vmatprep.subr.bf16.mxu0 %v7878_v0  ;;  %v1314_v26 = vld [vmem:[%s10724_s26] sm:$0xff]  ;;  %v1834_v28 = vld [vmem:[#allocation11 + $0x70] sm:$0xff]  ;;  %v7916_v31 = vpack.c.bf16 %v1865_v19, %v1864_v15  ;;  %v1835_v33 = vld [vmem:[#allocation11 + $0x78] sm:$0xff]  ;;  %v1575_v35 = vand.u32 2147483647, %v10772_v25  ;;  %v7918_v37 = vpack.c.bf16 %v1883_v24, %v1882_v23  ;;  %v10790_v0 = vmul.f32 0.5, %v10766_v17 }
 0x23b   : > { %7909 = vmatpush3.bf16.msra.mxu1 %v7908_v63  ;;  %v1573_v29 = vand.u32 2147483647, %v10769_v22  ;;  %v10776_v30 = vmul.f32 0.70710677, %v1314_v26  ;;  %v1866_v34 = vld [vmem:[#allocation11 + $0x170] sm:$0xff]  ;;  %v1867_v38 = vld [vmem:[#allocation11 + $0x178] sm:$0xff]  ;;  %v7888_v44 = vpack.c.bf16 %v1835_v33, %v1834_v28 }
 0x23c   : > { %7911 = vmatprep.subr.bf16.mxu1 %v7910_v4  ;;  %v1316_v36 = vld [vmem:[%s10724_s26 + $0x10] sm:$0xff]  ;;  %v1772_v40 = vld [vmem:[#allocation9 + $0x80] sm:$0xff]  ;;  %v1773_v41 = vld [vmem:[#allocation9 + $0x88] sm:$0xff]  ;;  %v1583_v42 = vmul.f32 0.3275911, %v1575_v35  ;;  %v7920_v47 = vpack.c.bf16 %v1867_v38, %v1866_v34  ;;  %v1687_v56 = vsub.f32 0.0, %v1575_v35 }
 0x23d   : > { %7881 = vmatpush3.bf16.msra.mxu0 %v7880_v10  ;;  %v1581_v39 = vmul.f32 0.3275911, %v1573_v29  ;;  %v1572_v43 = vand.u32 2147483647, %v10776_v30  ;;  %v10781_v46 = vmul.f32 0.70710677, %v1316_v36  ;;  %v7922_v49 = vpack.c.bf16 %v1773_v41, %v1772_v40 }
 0x23e   : > { %7883 = vmatprep.subr.bf16.mxu0 %v7882_v14  ;;  %v1591_v48 = vadd.f32 1.0, %v1583_v42  ;;  %v1804_v52 = vld [vmem:[#allocation9 + $0x180] sm:$0xff]  ;;  %v1805_v53 = vld [vmem:[#allocation9 + $0x188] sm:$0xff]  ;;  %v1685_v54 = vsub.f32 0.0, %v1573_v29  ;;  %vm1557_vm0 = vcmp.ge.f32.partialorder %v10769_v22, 0.0  ;;  %v1695_v62 = vmul.f32 %v1687_v56, %v1575_v35  ;;  %v10814_v15 = vld [vmem:[#allocation9 + $0x90] sm:$0xff] }
 0x23f   : > { %7913 = vmatpush3.bf16.msra.mxu1 %v7912_v13  ;;  %v1589_v45 = vadd.f32 1.0, %v1581_v39  ;;  %v1580_v50 = vmul.f32 0.3275911, %v1572_v43  ;;  %v1574_v51 = vand.u32 2147483647, %v10781_v46  ;;  %v1684_v58 = vsub.f32 0.0, %v1572_v43 }
 0x240   : > { %7915 = vmatprep.subr.bf16.mxu1 %v7914_v18  ;;  %v7954_v59 = vpack.c.bf16 %v1805_v53, %v1804_v52  ;;  %v1693_v61 = vmul.f32 %v1685_v54, %v1573_v29  ;;  %v10787_v63 = vmul.f32 0.5, %v10763_v16  ;;  %v10793_v3 = vsel %vm1557_vm0, 1.0, %v11847_v2  ;;  %v10799_v7 = vld [vmem:[#allocation9] sm:$0xff]  ;;  %v10805_v10 = vld [vmem:[#allocation9 + $0x8] sm:$0xff]  ;;  %v10816_v16 = vld [vmem:[#allocation9 + $0x98] sm:$0xff] }
 0x241   : > { %7885 = vmatpush3.bf16.msra.mxu0 %v7884_v27  ;;  %9255 = vrcp.f32 %v1589_v45  ;;  %v1588_v55 = vadd.f32 1.0, %v1580_v50  ;;  %v1582_v57 = vmul.f32 0.3275911, %v1574_v51  ;;  %v1692_v1 = vmul.f32 %v1684_v58, %v1572_v43  ;;  %v10807_v11 = vld [vmem:[#allocation9 + $0x100] sm:$0xff]  ;;  %v10812_v14 = vld [vmem:[#allocation9 + $0x108] sm:$0xff]  ;;  %v10821_v20 = vld [vmem:[#allocation9 + $0x10] sm:$0xff] }
 0x242   : > { %7887 = vmatprep.subr.bf16.mxu0 %v7886_v32  ;;  %9257 = vrcp.f32 %v1591_v48  ;;  %v10795_v4 = vmul.f32 0.5, %v1314_v26  ;;  %v10797_v5 = vmul.f32 0.5, %v1316_v36  ;;  %v1686_v6 = vsub.f32 0.0, %v1574_v51  ;;  %v10823_v21 = vld [vmem:[#allocation9 + $0x18] sm:$0xff]  ;;  %v10829_v25 = vld [vmem:[#allocation9 + $0x190] sm:$0xff]  ;;  %v10844_v32 = vld [vmem:[#allocation9 + $0xa0] sm:$0xff] }
 0x243   : > { %7917 = vmatpush3.bf16.msra.mxu1 %v7916_v31  ;;  %9259 = vrcp.f32 %v1588_v55  ;;  %v1590_v60 = vadd.f32 1.0, %v1582_v57  ;;  %v1702_v8 = vmul.f32 1.442695, %v1693_v61  ;;  %v10802_v9 = vsel %vm1559_vm1, 1.0, %v11847_v2  ;;  %v10831_v26 = vld [vmem:[#allocation9 + $0x198] sm:$0xff]  ;;  %v10833_v27 = vld [vmem:[#allocation9 + $0x110] sm:$0xff] }
 0x244   : > { %7919 = vmatprep.subr.bf16.mxu1 %v7918_v37  ;;  %vm1556_vm2 = vcmp.ge.f32.partialorder %v10776_v30, 0.0  ;;  %v1706_v13 = vmul.f32 1.442695, %v1695_v62  ;;  %vm1558_vm3 = vcmp.ge.f32.partialorder %v10781_v46, 0.0  ;;  %v1700_v19 = vmul.f32 1.442695, %v1692_v1 }
 0x245   : > { %7889 = vmatpush3.bf16.msra.mxu0 %v7888_v44  ;;  %9261 = vrcp.f32 %v1590_v60  ;;  %v10827_v23 = vsel %vm1556_vm2, 1.0, %v11847_v2  ;;  %v1694_v24 = vmul.f32 %v1686_v6, %v1574_v51  ;;  %v10838_v29 = vsel %vm1558_vm3, 1.0, %v11847_v2  ;;  %v10842_v31 = vld [vmem:[#allocation9 + $0x118] sm:$0xff]  ;;  %v10846_v33 = vld [vmem:[#allocation9 + $0xa8] sm:$0xff]  ;;  %v10854_v38 = vld [vmem:[#allocation9 + $0x20] sm:$0xff] }
 0x246   : > { %7923 = vmatprep.subr.bf16.mxu0 %v7922_v49  ;;  %9263 = vpow2.f32 %v1702_v8  ;;  %v10856_v39 = vld [vmem:[#allocation9 + $0x28] sm:$0xff]  ;;  %v10858_v40 = vld [vmem:[#allocation9 + $0x1a0] sm:$0xff]  ;;  %v10882_v53 = vld [vmem:[%s10724_s26 + $0x38] sm:$0xff] }
 0x247   : > { %7921 = vmatpush3.bf16.msra.mxu1 %v7920_v47  ;;  %9265 = vpow2.f32 %v1706_v13  ;;  %v10864_v44 = vld [vmem:[#allocation9 + $0x1a8] sm:$0xff]  ;;  %v10866_v45 = vld [vmem:[#allocation9 + $0x120] sm:$0xff]  ;;  %v1704_v49 = vmul.f32 1.442695, %v1694_v24  ;;  %v10891_v61 = vld [vmem:[#allocation9 + $0xb0] sm:$0xff] }
 0x248   : > { %7955 = vmatprep.subr.bf16.mxu1 %v7954_v59  ;;  %9267 = vpow2.f32 %v1700_v19  ;;  %11951 = vst [vmem:[#allocation79_spill] sm:$0xff] %v10866_v45  ;;  %v10869_v46 = vld [vmem:[%s10724_s26 + $0x28] sm:$0xff]  ;;  %11953 = vst [vmem:[#allocation81_spill] sm:$0xff] %v10891_v61  ;;  %v10893_v62 = vld [vmem:[#allocation9 + $0xb8] sm:$0xff] }
 0x249   : > { %v10876_v51 = vld [vmem:[#allocation9 + $0x128] sm:$0xff]  ;;  %v10879_v52 = vmul.f32 0.70710677, %v10869_v46  ;;  %v10902_v19 = vld [vmem:[#allocation9 + $0x30] sm:$0xff]  ;;  %9269 = vpow2.f32 %v1704_v49  ;;  %v10926_v59 = vld [vmem:[#allocation9 + $0xc0] sm:$0xff] }
 0x24a   : > { %11952 = vst [vmem:[#allocation80_spill] sm:$0xff] %v10876_v51  ;;  %11954 = vst [vmem:[#allocation82_spill] sm:$0xff] %v10902_v19  ;;  %v10920_v60 = vld [vmem:[#allocation9 + $0x130] sm:$0xff]  ;;  %v10928_v43 = vld [vmem:[#allocation9 + $0xc8] sm:$0xff] }
 0x24b   : > { %v10809_v12 = vpop.eup %9255  ;;  %v10896_v1 = vand.u32 2147483647, %v10879_v52  ;;  %11958 = vst [vmem:[#allocation86_spill] sm:$0xff] %v10920_v60  ;;  %11960 = vst [vmem:[#allocation88_spill] sm:$0xff] %v10926_v59  ;;  %v10937_v49 = vld [vmem:[#allocation9 + $0x40] sm:$0xff]  ;;  %v10939_v2 = vld [vmem:[#allocation9 + $0x48] sm:$0xff] }
 0x24c   : > { %v10818_v17 = vpop.eup %9257  ;;  %v1613_v18 = vmul.f32 1.0614054, %v10809_v12  ;;  %11961 = vst [vmem:[#allocation89_spill] sm:$0xff] %v10928_v43  ;;  %11962 = vst [vmem:[#allocation90_spill] sm:$0xff] %v10937_v49  ;;  %v10941_v57 = vld [vmem:[#allocation9 + $0x1c0] sm:$0xff]  ;;  %v10946_v19 = vld [vmem:[#allocation9 + $0x1c8] sm:$0xff] }
 0x24d   : > { %v1615_v22 = vmul.f32 1.0614054, %v10818_v17  ;;  %v10848_v34 = vpop.eup %9259  ;;  %11963 = vst [vmem:[#allocation91_spill] sm:$0xff] %v10939_v2  ;;  %11964 = vst [vmem:[#allocation92_spill] sm:$0xff] %v10941_v57  ;;  %v10972_v61 = vld [vmem:[#allocation9 + $0x50] sm:$0xff]  ;;  %v10974_v30 = vld [vmem:[#allocation9 + $0x58] sm:$0xff] }
 0x24e   : > { %v1621_v28 = vadd.f32 -1.4531521, %v1613_v18  ;;  %v1612_v42 = vmul.f32 1.0614054, %v10848_v34  ;;  %11965 = vst [vmem:[#allocation93_spill] sm:$0xff] %v10946_v19  ;;  %11968 = vst [vmem:[#allocation96_spill] sm:$0xff] %v10972_v61 }
 0x24f   : > { %v1623_v35 = vadd.f32 -1.4531521, %v1615_v22  ;;  %v10871_v47 = vpop.eup %9261  ;;  %v10904_v22 = vld [vmem:[#allocation9 + $0x38] sm:$0xff]  ;;  %11969 = vst [vmem:[#allocation97_spill] sm:$0xff] %v10974_v30  ;;  %v10979_v2 = vld [vmem:[#allocation9 + $0x1d0] sm:$0xff]  ;;  %vm1561_vm4 = vcmp.ge.f32.partialorder %v10879_v52, 0.0 }
 0x250   : > { %v1629_v41 = vmul.f32 %v10809_v12, %v1621_v28  ;;  %v1620_v55 = vadd.f32 -1.4531521, %v1612_v42  ;;  %v1614_v56 = vmul.f32 1.0614054, %v10871_v47  ;;  %11955 = vst [vmem:[#allocation83_spill] sm:$0xff] %v10904_v22  ;;  %v10922_v28 = vld [vmem:[#allocation9 + $0x138] sm:$0xff] }
 0x251   : > { %v1631_v48 = vmul.f32 %v10818_v17, %v1623_v35  ;;  %v10909_v35 = vld [vmem:[#allocation9 + $0x1b0] sm:$0xff]  ;;  %v1585_v42 = vmul.f32 0.3275911, %v10896_v1  ;;  %11959 = vst [vmem:[#allocation87_spill] sm:$0xff] %v10922_v28  ;;  %v10983_v57 = vld [vmem:[#allocation9 + $0x1d8] sm:$0xff] }
 0x252   : > { %v1637_v54 = vadd.f32 1.4214138, %v1629_v41  ;;  %v1628_v8 = vmul.f32 %v10848_v34, %v1620_v55  ;;  %v1622_v13 = vadd.f32 -1.4531521, %v1614_v56  ;;  %11956 = vst [vmem:[#allocation84_spill] sm:$0xff] %v10909_v35  ;;  %v10911_v41 = vld [vmem:[#allocation9 + $0x1b8] sm:$0xff] }
 0x253   : > { %v1639_v58 = vadd.f32 1.4214138, %v1631_v48  ;;  %11957 = vst [vmem:[#allocation85_spill] sm:$0xff] %v10911_v41  ;;  %v10915_v48 = vmul.f32 0.70710677, %v10882_v53  ;;  %v10963_v28 = vld [vmem:[#allocation9 + $0xd0] sm:$0xff] }
 0x254   : > { %v1645_v6 = vmul.f32 %v10809_v12, %v1637_v54  ;;  %v1636_v55 = vadd.f32 1.4214138, %v1628_v8  ;;  %v1630_v56 = vmul.f32 %v10871_v47, %v1622_v13  ;;  %v10931_v8 = vld [vmem:[%s10724_s26 + $0x20] sm:$0xff]  ;;  %v9264_v13 = vpop.eup %9263  ;;  %v10987_v59 = vld [vmem:[%s10724_s26 + $0x30] sm:$0xff]  ;;  %s6153_s26 = sshll.u32 %s11441_s5, 4  ;;  %s11684_s26 = int_to_ptr.vmem [resolvable:$true] %s6153_s26 }
 0x255   : > { %v1647_v24 = vmul.f32 %v10818_v17, %v1639_v58  ;;  %v9266_v37 = vpop.eup %9265  ;;  %v10993_v49 = vld [vmem:[#allocation9 + $0x150] sm:$0xff]  ;;  %vm1563_vm5 = vcmp.ge.f32.partialorder %v10915_v48, 0.0 }
 0x256   : > { %v1653_v54 = vadd.f32 -0.28449672, %v1645_v6  ;;  %v1593_v6 = vadd.f32 1.0, %v1585_v42  ;;  %v1644_v58 = vmul.f32 %v10848_v34, %v1636_v55  ;;  %v1638_v36 = vadd.f32 1.4214138, %v1630_v56  ;;  %v10950_v55 = vld [vmem:[#allocation9 + $0x148] sm:$0xff] }
 0x257   : > { %v1655_v18 = vadd.f32 -0.28449672, %v1647_v24  ;;  %11967 = vst [vmem:[#allocation95_spill] sm:$0xff] %v10950_v55  ;;  %v10953_v56 = vand.u32 2147483647, %v10915_v48  ;;  %v9268_v24 = vpop.eup %9267  ;;  %11970 = vst [vmem:[#allocation98_spill] sm:$0xff] %v10993_v49 }
 0x258   : > { %v1661_v50 = vmul.f32 %v10809_v12, %v1653_v54  ;;  %v10948_v54 = vld [vmem:[#allocation9 + $0x140] sm:$0xff]  ;;  %9271 = vrcp.f32 %v1593_v6  ;;  %v1652_v35 = vadd.f32 -0.28449672, %v1644_v58  ;;  %v1646_v41 = vmul.f32 %v10871_v47, %v1638_v36 }
 0x259   : > { %v1663_v42 = vmul.f32 %v10818_v17, %v1655_v18  ;;  %11966 = vst [vmem:[#allocation94_spill] sm:$0xff] %v10948_v54  ;;  %v10957_v18 = vmul.f32 0.70710677, %v10931_v8  ;;  %v1587_v6 = vmul.f32 0.3275911, %v10953_v56  ;;  %v9270_v54 = vpop.eup %9269 }
 0x25a   : > { %v1669_v22 = vadd.f32 0.2548296, %v1661_v50  ;;  %v1660_v50 = vmul.f32 %v10848_v34, %v1652_v35  ;;  %v1654_v36 = vadd.f32 -0.28449672, %v1646_v41 }
 0x25b   : > { %v1671_v45 = vadd.f32 0.2548296, %v1663_v42  ;;  %v10970_v42 = vld [vmem:[#allocation9 + $0xd8] sm:$0xff]  ;;  %v1576_v19 = vand.u32 2147483647, %v10957_v18  ;;  %vm1560_vm6 = vcmp.ge.f32.partialorder %v10957_v18, 0.0 }
 0x25c   : > { %v1677_v51 = vmul.f32 %v10809_v12, %v1669_v22  ;;  %v1689_v12 = vsub.f32 0.0, %v10896_v1  ;;  %v1595_v22 = vadd.f32 1.0, %v1587_v6  ;;  %v1668_v41 = vadd.f32 0.2548296, %v1660_v50  ;;  %v10996_v50 = vld [vmem:[#allocation9 + $0x158] sm:$0xff] }
 0x25d   : > { %v1679_v60 = vmul.f32 %v10818_v17, %v1671_v45  ;;  %v1662_v58 = vmul.f32 %v10871_v47, %v1654_v36  ;;  %v1584_v36 = vmul.f32 0.3275911, %v1576_v19  ;;  %v11002_v17 = vmul.f32 0.70710677, %v10987_v59 }
 0x25e   : > { %v1717_v35 = vmul.f32 %v9264_v13, %v1677_v51  ;;  %9273 = vrcp.f32 %v1595_v22  ;;  %v1676_v13 = vmul.f32 %v10848_v34, %v1668_v41 }
 0x25f   : > { %v1719_v43 = vmul.f32 %v9266_v37, %v1679_v60  ;;  %v1670_v6 = vadd.f32 0.2548296, %v1662_v58  ;;  %v1697_v60 = vmul.f32 %v1689_v12, %v10896_v1  ;;  %v1592_v34 = vadd.f32 1.0, %v1584_v36 }
 0x260   : > { %v1725_v51 = vsub.f32 1.0, %v1717_v35  ;;  %v1716_v22 = vmul.f32 %v9268_v24, %v1676_v13  ;;  %v1691_v37 = vsub.f32 0.0, %v10953_v56  ;;  %v11013_v1 = vand.u32 2147483647, %v11002_v17  ;;  %v11017_v24 = vld [vmem:[#allocation9 + $0xe8] sm:$0xff]  ;;  %v11020_v13 = vld [vmem:[#allocation9 + $0x60] sm:$0xff] }
 0x261   : > { %v1727_v55 = vsub.f32 1.0, %v1719_v43  ;;  %v1678_v35 = vmul.f32 %v10871_v47, %v1670_v6  ;;  %9275 = vrcp.f32 %v1592_v34  ;;  %v1688_v6 = vsub.f32 0.0, %v1576_v19 }
 0x262   : > { %v1733_v45 = vmul.f32 %v1725_v51, %v10793_v3  ;;  %v11006_v58 = vpop.eup %9271  ;;  %v1724_v61 = vsub.f32 1.0, %v1716_v22  ;;  %v11015_v3 = vld [vmem:[#allocation9 + $0xe0] sm:$0xff]  ;;  %v1586_v34 = vmul.f32 0.3275911, %v11013_v1  ;;  %vm1562_vm7 = vcmp.ge.f32.partialorder %v11002_v17, 0.0  ;;  %v11183_v17 = vld [vmem:[#allocation9 + $0xf8] sm:$0xff] }
 0x263   : > { %v1735_v41 = vmul.f32 %v1727_v55, %v10802_v9  ;;  %v1718_v30 = vmul.f32 %v9270_v54, %v1678_v35  ;;  %v1617_v47 = vmul.f32 1.0614054, %v11006_v58  ;;  %v11022_v9 = vld [vmem:[#allocation9 + $0x68] sm:$0xff]  ;;  %v1710_v55 = vmul.f32 1.442695, %v1697_v60  ;;  %v11026_v54 = vld [vmem:[#allocation9 + $0x1e0] sm:$0xff] }
 0x264   : > { %v1741_v12 = vadd.f32 1.0, %v1733_v45  ;;  %v1732_v45 = vmul.f32 %v1724_v61, %v10827_v23  ;;  %v11028_v35 = vld [vmem:[#allocation9 + $0x1e8] sm:$0xff]  ;;  %v1699_v60 = vmul.f32 %v1691_v37, %v10953_v56  ;;  %v11043_v56 = vld [vmem:[#allocation9 + $0x160] sm:$0xff] }
 0x265   : > { %v1743_v51 = vadd.f32 1.0, %v1735_v41  ;;  %v1726_v22 = vsub.f32 1.0, %v1718_v30  ;;  %v1625_v43 = vadd.f32 -1.4531521, %v1617_v47  ;;  %v7946_v41 = vpack.c.bf16 %v11017_v24, %v11015_v3  ;;  %v11045_v37 = vld [vmem:[#allocation9 + $0x168] sm:$0xff]  ;;  %v11053_v30 = vld [vmem:[%s10714_s17] sm:$0xff] }
 0x266   : > { %v1749_v36 = vmul.f32 %v1741_v12, %v10787_v63  ;;  %v1740_v63 = vadd.f32 1.0, %v1732_v45  ;;  %9277 = vpow2.f32 %v1710_v55  ;;  %v1696_v47 = vmul.f32 %v1688_v6, %v1576_v19 }
 0x267   : > { %v1751_v49 = vmul.f32 %v1743_v51, %v10790_v0  ;;  %v1734_v23 = vmul.f32 %v1726_v22, %v10838_v29  ;;  %v1633_v61 = vmul.f32 %v11006_v58, %v1625_v43  ;;  %v7978_v0 = vpack.c.bf16 %v11028_v35, %v11026_v54  ;;  %v11048_v29 = vld [vmem:[%s10714_s17 + $0x8] sm:$0xff] }
 0x268   : > { %1948 = vmatprep.mubr.f32.mxu0 %v1749_v36  ;;  %v11039_v12 = vpop.eup %9273  ;;  %v1594_v51 = vadd.f32 1.0, %v1586_v34  ;;  %v1748_v36 = vmul.f32 %v1740_v63, %v10795_v4  ;;  %v1714_v55 = vmul.f32 1.442695, %v1699_v60  ;;  %v11062_v4 = vmul.f32 0.70710677, %v11048_v29 }
 0x269   : > { %2023 = vmatprep.mubr.f32.mxu1 %v1751_v49  ;;  %v1742_v45 = vadd.f32 1.0, %v1734_v23  ;;  %v1641_v22 = vadd.f32 1.4214138, %v1633_v61  ;;  %v1619_v43 = vmul.f32 1.0614054, %v11039_v12  ;;  %v11056_v49 = vmul.f32 0.5, %v10869_v46 }
 0x26a   : > { %9279 = vrcp.f32 %v1594_v51  ;;  %1949 = vmatmul.mubr.f32.vlgmr.msra.gmra.mrb[0].mxu0 %v1748_v36  ;;  %v11971_v63 = vpack.c.bf16 %v10805_v10, %v10799_v7  ;;  %v11068_v46 = vmul.f32 0.5, %v10882_v53  ;;  %v7980_v52 = vpack.c.bf16 %v11045_v37, %v11043_v56 }
 0x26b   : > { %v1750_v19 = vmul.f32 %v1742_v45, %v10797_v5  ;;  %v1649_v6 = vmul.f32 %v11006_v58, %v1641_v22  ;;  %v1627_v34 = vadd.f32 -1.4531521, %v1619_v43  ;;  %v1708_v60 = vmul.f32 1.442695, %v1696_v47  ;;  %v11083_v36 = vpop.eup %9275  ;;  %v11096_v22 = vld [vmem:[%s10714_s17 + $0x18] sm:$0xff] }
 0x26c   : > { %7925 = vmatpush3.bf16.msra.mxu0 %v11971_v63  ;;  %v11073_v5 = vmul.f32 0.70710677, %v11053_v30  ;;  %v11972_v23 = vpack.c.bf16 %v10816_v16, %v10814_v15  ;;  %v11973_v61 = vmov -1.0   ;;  %v1357_v53 = vand.u32 2147483647, %v11062_v4 }
 0x26d   : > { %2024 = vmatmul.mubr.f32.vlgmr.msra.gmra.mrb[0].mxu1 %v1750_v19  ;;  %v11079_v51 = vsel %vm1561_vm4, 1.0, %v11973_v61  ;;  %v1657_v7 = vadd.f32 -0.28449672, %v1649_v6  ;;  %v1635_v10 = vmul.f32 %v11039_v12, %v1627_v34  ;;  %v11974_v47 = vpack.c.bf16 %v10812_v14, %v10807_v11 }
 0x26e   : > { %7927 = vmatprep.subr.bf16.mxu0 %v11972_v23  ;;  %9281 = vpow2.f32 %v1714_v55  ;;  %v11089_v45 = vmul.f32 0.5, %v10931_v8  ;;  %v1690_v15 = vsub.f32 0.0, %v11013_v1  ;;  %v11093_v16 = vand.u32 2147483647, %v11073_v5 }
 0x26f   : > { %7957 = vmatpush3.bf16.msra.mxu1 %v11974_v47  ;;  %v11975_v43 = vpack.c.bf16 %v10831_v26, %v10829_v25  ;;  %v1665_v19 = vmul.f32 %v11006_v58, %v1657_v7  ;;  %v1643_v6 = vadd.f32 1.4214138, %v1635_v10  ;;  %v1616_v11 = vmul.f32 1.0614054, %v11083_v36 }
 0x270   : > { %v1365_v14 = vmul.f32 0.3275911, %v1357_v53  ;;  %v11976_v8 = vpack.c.bf16 %v10823_v21, %v10821_v20  ;;  %9283 = vpow2.f32 %v1708_v60  ;;  %v1364_v55 = vmul.f32 0.3275911, %v11093_v16  ;;  %v9278_v7 = vpop.eup %9277 }
 0x271   : > { %7959 = vmatprep.subr.bf16.mxu1 %v11975_v43  ;;  %v11977_v25 = vpack.c.bf16 %v10846_v33, %v10844_v32  ;;  %v1673_v26 = vadd.f32 0.2548296, %v1665_v19  ;;  %v1651_v34 = vmul.f32 %v11039_v12, %v1643_v6  ;;  %v1624_v63 = vadd.f32 -1.4531521, %v1616_v11  ;;  %v11126_v6 = vld [vmem:[%s10714_s17 + $0x10] sm:$0xff]  ;;  %v11983_v11 = vld [vmem:[#allocation80_spill] sm:$0xff] }
 0x272   : > { %7929 = vmatpush3.bf16.msra.mxu0 %v11976_v8  ;;  %v1373_v23 = vadd.f32 1.0, %v1365_v14  ;;  %v11978_v20 = vpack.c.bf16 %v10842_v31, %v10833_v27  ;;  %v1698_v21 = vmul.f32 %v1690_v15, %v11013_v1  ;;  %v1469_v60 = vsub.f32 0.0, %v1357_v53  ;;  %v11984_v14 = vld [vmem:[#allocation79_spill] sm:$0xff] }
 0x273   : > { %7931 = vmatprep.subr.bf16.mxu0 %v11977_v25  ;;  %v1372_v10 = vadd.f32 1.0, %v1364_v55  ;;  %v11118_v47 = vmul.f32 0.70710677, %v11096_v22  ;;  %v11979_v32 = vpack.c.bf16 %v10864_v44, %v10858_v40  ;;  %v1681_v33 = vmul.f32 %v11006_v58, %v1673_v26  ;;  %v11981_v44 = vld [vmem:[#allocation81_spill] sm:$0xff] }
 0x274   : > { %7961 = vmatpush3.bf16.msra.mxu1 %v11978_v20  ;;  %v1659_v43 = vadd.f32 -0.28449672, %v1651_v34  ;;  %v1632_v19 = vmul.f32 %v11083_v36, %v1624_v63  ;;  %9285 = vrcp.f32 %v1373_v23  ;;  %v11128_v27 = vpop.eup %9279  ;;  %v11980_v31 = vpack.c.bf16 %v10856_v39, %v10854_v38  ;;  %v11987_v34 = vld [vmem:[#allocation84_spill] sm:$0xff] }
 0x275   : > { %7963 = vmatprep.subr.bf16.mxu1 %v11979_v32  ;;  %v11136_v1 = vsel %vm1563_vm5, 1.0, %v11973_v61  ;;  %v11141_v40 = vsel %vm1560_vm6, 1.0, %v11973_v61  ;;  %9287 = vrcp.f32 %v1372_v10  ;;  %v11982_v58 = vpack.c.bf16 %v10893_v62, %v11981_v44  ;;  %v11986_v62 = vld [vmem:[#allocation85_spill] sm:$0xff] }
 0x276   : > { %7933 = vmatpush3.bf16.msra.mxu0 %v11980_v31  ;;  %v1721_v15 = vmul.f32 %v9278_v7, %v1681_v33  ;;  %v1667_v38 = vmul.f32 %v11039_v12, %v1659_v43  ;;  %v1640_v39 = vadd.f32 1.4214138, %v1632_v19  ;;  %v1618_v48 = vmul.f32 1.0614054, %v11128_v27  ;;  %v11989_v33 = vld [vmem:[#allocation83_spill] sm:$0xff]  ;;  %v11990_v43 = vld [vmem:[#allocation82_spill] sm:$0xff] }
 0x277   : > { %7935 = vmatprep.subr.bf16.mxu0 %v11982_v58  ;;  %v11985_v8 = vpack.c.bf16 %v11983_v11, %v11984_v14  ;;  %v1712_v18 = vmul.f32 1.442695, %v1698_v21  ;;  %v1477_v55 = vmul.f32 %v1469_v60, %v1357_v53  ;;  %v11153_v25 = vand.u32 2147483647, %v11118_v47  ;;  %v11992_v44 = vld [vmem:[#allocation89_spill] sm:$0xff]  ;;  %v11993_v58 = vld [vmem:[#allocation88_spill] sm:$0xff] }
 0x278   : > { %v11156_v26 = vmul.f32 0.70710677, %v11126_v6  ;;  %v11988_v63 = vpack.c.bf16 %v11986_v62, %v11987_v34  ;;  %v1729_v23 = vsub.f32 1.0, %v1721_v15  ;;  %v1675_v7 = vadd.f32 0.2548296, %v1667_v38  ;;  %v9282_v32 = vpop.eup %9281  ;;  %v11181_v11 = vld [vmem:[#allocation9 + $0xf0] sm:$0xff] }
 0x279   : > { %7965 = vmatpush3.bf16.msra.mxu1 %v11985_v8  ;;  %v1648_v20 = vmul.f32 %v11083_v36, %v1640_v39  ;;  %v1626_v10 = vadd.f32 -1.4531521, %v1618_v48  ;;  %v11991_v21 = vpack.c.bf16 %v11989_v33, %v11990_v43  ;;  %v11166_v53 = vmul.f32 0.5, %v10987_v59  ;;  %v11995_v8 = vld [vmem:[#allocation87_spill] sm:$0xff]  ;;  %v11996_v62 = vld [vmem:[#allocation86_spill] sm:$0xff] }
 0x27a   : > { %7967 = vmatprep.subr.bf16.mxu1 %v11988_v63  ;;  %v11171_v60 = vsel %vm1562_vm7, 1.0, %v11973_v61  ;;  %v1468_v19 = vsub.f32 0.0, %v11093_v16  ;;  %v1367_v31 = vmul.f32 0.3275911, %v11153_v25  ;;  %v11994_v15 = vpack.c.bf16 %v11992_v44, %v11993_v58  ;;  %v9284_v14 = vpop.eup %9283  ;;  %v12001_v44 = vld [vmem:[#allocation91_spill] sm:$0xff]  ;;  %v12002_v58 = vld [vmem:[#allocation90_spill] sm:$0xff] }
 0x27b   : > { %7937 = vmatpush3.bf16.msra.mxu0 %v11991_v21  ;;  %v1737_v38 = vmul.f32 %v1729_v23, %v11079_v51  ;;  %v1683_v39 = vmul.f32 %v11039_v12, %v1675_v7  ;;  %v1656_v48 = vadd.f32 -0.28449672, %v1648_v20  ;;  %v1634_v59 = vmul.f32 %v11128_v27, %v1626_v10  ;;  %v11998_v51 = vld [vmem:[#allocation93_spill] sm:$0xff]  ;;  %v11999_v12 = vld [vmem:[#allocation92_spill] sm:$0xff] }
 0x27c   : > { %7939 = vmatprep.subr.bf16.mxu0 %v11994_v15  ;;  %v11997_v34 = vpack.c.bf16 %v11995_v8, %v11996_v62  ;;  %9289 = vpow2.f32 %v1712_v18  ;;  %v1486_v63 = vmul.f32 1.442695, %v1477_v55  ;;  %v1375_v33 = vadd.f32 1.0, %v1367_v31  ;;  %v1818_v62 = vld [vmem:[#allocation9 + $0x1f0] sm:$0xff] }
 0x27d   : > { %v11189_v43 = vand.u32 2147483647, %v11156_v26  ;;  %v12000_v23 = vpack.c.bf16 %v11998_v51, %v11999_v12  ;;  %v1745_v7 = vadd.f32 1.0, %v1737_v38  ;;  %v1723_v20 = vmul.f32 %v9282_v32, %v1683_v39 }
 0x27e   : > { %7969 = vmatpush3.bf16.msra.mxu1 %v11997_v34  ;;  %v1664_v10 = vmul.f32 %v11083_v36, %v1656_v48  ;;  %v1642_v21 = vadd.f32 1.4214138, %v1634_v59  ;;  %v12003_v15 = vpack.c.bf16 %v12001_v44, %v12002_v58  ;;  %v7950_v18 = vpack.c.bf16 %v11183_v17, %v11181_v11  ;;  %v11202_v8 = vpop.eup %9285  ;;  %v1819_v11 = vld [vmem:[#allocation9 + $0x1f8] sm:$0xff] }
 0x27f   : > { %7971 = vmatprep.subr.bf16.mxu1 %v12000_v23  ;;  %v1476_v55 = vmul.f32 %v1468_v19, %v11093_v16  ;;  %9291 = vrcp.f32 %v1375_v33  ;;  %v1366_v31 = vmul.f32 0.3275911, %v11189_v43  ;;  %v12004_v32 = vpack.c.bf16 %v10970_v42, %v10963_v28  ;;  %v11209_v17 = vpop.eup %9287  ;;  %v12005_v16 = vld [vmem:[#allocation95_spill] sm:$0xff]  ;;  %v12006_v19 = vld [vmem:[#allocation94_spill] sm:$0xff] }
 0x280   : > { %7941 = vmatpush3.bf16.msra.mxu0 %v12003_v15  ;;  %v1753_v38 = vmul.f32 %v1745_v7, %v11056_v49  ;;  %v1731_v39 = vsub.f32 1.0, %v1723_v20  ;;  %v1672_v48 = vadd.f32 0.2548296, %v1664_v10  ;;  %v1650_v59 = vmul.f32 %v11128_v27, %v1642_v21  ;;  %v11223_v20 = vld [vmem:[%s10714_s17 + $0x28] sm:$0xff]  ;;  %v12009_v10 = vld [vmem:[#allocation97_spill] sm:$0xff] }
 0x281   : > { %7943 = vmatprep.subr.bf16.mxu0 %v12004_v32  ;;  %v12007_v34 = vpack.c.bf16 %v12005_v16, %v12006_v19  ;;  %v1397_v33 = vmul.f32 1.0614054, %v11202_v8  ;;  %9293 = vpow2.f32 %v1486_v63  ;;  %v1471_v28 = vsub.f32 0.0, %v11153_v25  ;;  %v12010_v21 = vld [vmem:[#allocation96_spill] sm:$0xff] }
 0x282   : > { %v1374_v42 = vadd.f32 1.0, %v1366_v31  ;;  %v12008_v49 = vpack.c.bf16 %v10983_v57, %v10979_v2  ;;  %1953 = vmatprep.mubr.f32.mxu0 %v1753_v38  ;;  %v1739_v51 = vmul.f32 %v1731_v39, %v11136_v1  ;;  %v1680_v12 = vmul.f32 %v11083_v36, %v1672_v48  ;;  %v1770_v1 = vld [vmem:[#allocation9 + $0x70] sm:$0xff]  ;;  %v1771_v31 = vld [vmem:[#allocation9 + $0x78] sm:$0xff] }
 0x283   : > { %7973 = vmatpush3.bf16.msra.mxu1 %v12007_v34  ;;  %v1658_v23 = vadd.f32 -0.28449672, %v1650_v59  ;;  %v1396_v7 = vmul.f32 1.0614054, %v11209_v17  ;;  %v12011_v63 = vpack.c.bf16 %v12009_v10, %v12010_v21  ;;  %v7982_v44 = vpack.c.bf16 %v1819_v11, %v1818_v62  ;;  %v12012_v38 = vld [vmem:[#allocation98_spill] sm:$0xff]  ;;  %v1802_v48 = vld [vmem:[#allocation9 + $0x170] sm:$0xff] }
 0x284   : > { %7975 = vmatprep.subr.bf16.mxu1 %v12008_v49  ;;  %v1405_v58 = vadd.f32 -1.4531521, %v1397_v33  ;;  %v1484_v15 = vmul.f32 1.442695, %v1476_v55  ;;  %9295 = vrcp.f32 %v1374_v42  ;;  %v1747_v2 = vadd.f32 1.0, %v1739_v51  ;;  %v1803_v59 = vld [vmem:[#allocation9 + $0x178] sm:$0xff] }
 0x285   : > { %7945 = vmatpush3.bf16.msra.mxu0 %v12011_v63  ;;  %v1720_v57 = vmul.f32 %v9284_v14, %v1680_v12  ;;  %v1666_v36 = vmul.f32 %v11128_v27, %v1658_v23  ;;  %v1404_v32 = vadd.f32 -1.4531521, %v1396_v7  ;;  %v12013_v39 = vpack.c.bf16 %v10996_v50, %v12012_v38 }
 0x286   : > { %7947 = vmatprep.subr.bf16.mxu0 %v7946_v41  ;;  %v1413_v55 = vmul.f32 %v11202_v8, %v1405_v58  ;;  %v1479_v62 = vmul.f32 %v1471_v28, %v11153_v25  ;;  %v1470_v3 = vsub.f32 0.0, %v11189_v43  ;;  %v11239_v24 = vmul.f32 0.70710677, %v11223_v20  ;;  %v9290_v16 = vpop.eup %9289  ;;  %v11255_v28 = vld [vmem:[%s10714_s17 + $0x20] sm:$0xff] }
 0x287   : > { %7977 = vmatpush3.bf16.msra.mxu1 %v12013_v39  ;;  %v1755_v41 = vmul.f32 %v1747_v2, %v11068_v46  ;;  %v1728_v50 = vsub.f32 1.0, %v1720_v57  ;;  %v1674_v14 = vadd.f32 0.2548296, %v1666_v36  ;;  %v1412_v11 = vmul.f32 %v11209_v17, %v1404_v32 }
 0x288   : > { %7979 = vmatprep.subr.bf16.mxu1 %v7978_v0  ;;  %v12014_v25 = vpack.c.bf16 %v11022_v9, %v11020_v13  ;;  %v7952_v19 = vpack.c.bf16 %v1771_v31, %v1770_v1  ;;  %v1421_v34 = vadd.f32 1.4214138, %v1413_v55  ;;  %9297 = vpow2.f32 %v1484_v15 }
 0x289   : > { %v11250_v33 = vand.u32 2147483647, %v11239_v24  ;;  %2028 = vmatprep.mubr.f32.mxu1 %v1755_v41  ;;  %v1736_v54 = vmul.f32 %v1728_v50, %v11141_v40  ;;  %v1682_v35 = vmul.f32 %v11128_v27, %v1674_v14  ;;  %v7984_v0 = vpack.c.bf16 %v1803_v59, %v1802_v48  ;;  %v11257_v42 = vpop.eup %9291 }
 0x28a   : > { %7949 = vmatpush3.bf16.msra.mxu0 %v12014_v25  ;;  %v1420_v46 = vadd.f32 1.4214138, %v1412_v11  ;;  %v1429_v13 = vmul.f32 %v11202_v8, %v1421_v34  ;;  %v1490_v9 = vmul.f32 1.442695, %v1479_v62  ;;  %v1478_v49 = vmul.f32 %v1470_v3, %v11189_v43 }
 0x28b   : > { %7951 = vmatprep.subr.bf16.mxu0 %v7950_v18  ;;  %7981 = vmatpush3.bf16.msra.mxu1 %v7980_v52  ;;  %v1369_v40 = vmul.f32 0.3275911, %v11250_v33  ;;  %v1744_v27 = vadd.f32 1.0, %v1736_v54  ;;  %v1722_v18 = vmul.f32 %v9290_v16, %v1682_v35  ;;  %v1399_v12 = vmul.f32 1.0614054, %v11257_v42  ;;  %v9294_v23 = vpop.eup %9293  ;;  %v11302_v54 = vld [vmem:[%s10714_s17 + $0x30] sm:$0xff] }
 0x28c   : > { %7983 = vmatprep.subr.bf16.mxu1 %v7982_v44  ;;  %v1428_v51 = vmul.f32 %v11209_v17, %v1420_v46  ;;  %v11268_v56 = vmul.f32 0.5, %v11048_v29  ;;  %v1437_v37 = vadd.f32 -0.28449672, %v1429_v13  ;;  %v11271_v7 = vmul.f32 0.70710677, %v11255_v28  ;;  %v11275_v44 = vld [vmem:[%s10714_s17 + $0x38] sm:$0xff] }
 0x28d   : > { %v1377_v52 = vadd.f32 1.0, %v1369_v40  ;;  %v1752_v43 = vmul.f32 %v1744_v27, %v11089_v45  ;;  %v1730_v10 = vsub.f32 1.0, %v1722_v18  ;;  %v1407_v63 = vadd.f32 -1.4531521, %v1399_v12 }
 0x28e   : > { %7953 = vmatpush3.bf16.msra.mxu0 %v7952_v19  ;;  %v1436_v21 = vadd.f32 -0.28449672, %v1428_v51  ;;  %v11277_v58 = vpop.eup %9295  ;;  %vm1341_vm8 = vcmp.ge.f32.partialorder %v11062_v4, 0.0  ;;  %v1445_v29 = vmul.f32 %v11202_v8, %v1437_v37  ;;  %v1488_v15 = vmul.f32 1.442695, %v1478_v49 }
 0x28f   : > { %7985 = vmatpush3.bf16.msra.mxu1 %v7984_v0  ;;  %9299 = vrcp.f32 %v1377_v52  ;;  %1954 = vmatmul.mubr.f32.gmra.mrb[2].mxu0 %v1752_v43  ;;  %v1738_v2 = vmul.f32 %v1730_v10, %v11171_v60  ;;  %v1415_v45 = vmul.f32 %v11257_v42, %v1407_v63  ;;  %v1398_v36 = vmul.f32 1.0614054, %v11277_v58 }
 0x290   : > { %v1444_v57 = vmul.f32 %v11209_v17, %v1436_v21  ;;  %v1453_v1 = vadd.f32 0.2548296, %v1445_v29  ;;  %9301 = vpow2.f32 %v1490_v9  ;;  %v1360_v31 = vand.u32 2147483647, %v11271_v7 }
 0x291   : > { %v11287_v32 = vmul.f32 0.70710677, %v11275_v44  ;;  %v1746_v38 = vadd.f32 1.0, %v1738_v2  ;;  %vm1340_vm9 = vcmp.ge.f32.partialorder %v11073_v5, 0.0  ;;  %v1423_v48 = vadd.f32 1.4214138, %v1415_v45 }
 0x292   : > { %v1452_v39 = vadd.f32 0.2548296, %v1444_v57  ;;  %v9298_v59 = vpop.eup %9297  ;;  %v1461_v60 = vmul.f32 %v11202_v8, %v1453_v1  ;;  %v1406_v55 = vadd.f32 -1.4531521, %v1398_v36  ;;  %v1473_v62 = vsub.f32 0.0, %v11250_v33 }
 0x293   : > { %v1368_v3 = vmul.f32 0.3275911, %v1360_v31  ;;  %v1754_v41 = vmul.f32 %v1746_v38, %v11166_v53  ;;  %v1349_v50 = vsel %vm1341_vm8, 1.0, %v11973_v61  ;;  %v1431_v5 = vmul.f32 %v11257_v42, %v1423_v48 }
 0x294   : > { %v1460_v14 = vmul.f32 %v11209_v17, %v1452_v39  ;;  %v1501_v11 = vmul.f32 %v9294_v23, %v1461_v60  ;;  %v1348_v16 = vsel %vm1340_vm9, 1.0, %v11973_v61  ;;  %v1414_v8 = vmul.f32 %v11277_v58, %v1406_v55 }
 0x295   : > { %v1376_v25 = vadd.f32 1.0, %v1368_v3  ;;  %2029 = vmatmul.mubr.f32.gmra.mrb[2].mxu1 %v1754_v41  ;;  %v1439_v34 = vadd.f32 -0.28449672, %v1431_v5  ;;  %9303 = vpow2.f32 %v1488_v15  ;;  %v1363_v53 = vand.u32 2147483647, %v11287_v32 }
 0x296   : > { %v1500_v19 = vmul.f32 %v9298_v59, %v1460_v14  ;;  %v1509_v4 = vsub.f32 1.0, %v1501_v11  ;;  %v1422_v35 = vadd.f32 1.4214138, %v1414_v8  ;;  %v1481_v17 = vmul.f32 %v1473_v62, %v11250_v33 }
 0x297   : > { %9305 = vrcp.f32 %v1376_v25  ;;  %v1324_v0 = vmul.f32 0.5, %v11053_v30  ;;  %v1447_v13 = vmul.f32 %v11257_v42, %v1439_v34  ;;  %v1371_v9 = vmul.f32 0.3275911, %v1363_v53 }
 0x298   : > { %v1508_v46 = vsub.f32 1.0, %v1500_v19  ;;  %v1517_v40 = vmul.f32 %v1509_v4, %v1349_v50  ;;  %vm1343_vm10 = vcmp.ge.f32.partialorder %v11118_v47, 0.0  ;;  %v1430_v27 = vmul.f32 %v11277_v58, %v1422_v35 }
 0x299   : > { %v11307_v49 = vpop.eup %9299  ;;  %v11312_v18 = vmul.f32 0.70710677, %v11302_v54  ;;  %v1455_v12 = vadd.f32 0.2548296, %v1447_v13  ;;  %v1379_v23 = vadd.f32 1.0, %v1371_v9  ;;  %v1472_v10 = vsub.f32 0.0, %v1360_v31 }
 0x29a   : > { %v1516_v51 = vmul.f32 %v1508_v46, %v1348_v16  ;;  %v1401_v33 = vmul.f32 1.0614054, %v11307_v49  ;;  %v9302_v30 = vpop.eup %9301  ;;  %v1525_v37 = vadd.f32 1.0, %v1517_v40  ;;  %v1438_v52 = vadd.f32 -0.28449672, %v1430_v27 }
 0x29b   : > { %v1494_v43 = vmul.f32 1.442695, %v1481_v17  ;;  %v1463_v63 = vmul.f32 %v11257_v42, %v1455_v12  ;;  %9307 = vrcp.f32 %v1379_v23  ;;  %v1351_v2 = vsel %vm1343_vm10, 1.0, %v11973_v61 }
 0x29c   : > { %v1524_v21 = vadd.f32 1.0, %v1516_v51  ;;  %v1409_v29 = vadd.f32 -1.4531521, %v1401_v33  ;;  %v11317_v15 = vmul.f32 %v1525_v37, %v11268_v56  ;;  %v1446_v57 = vmul.f32 %v11277_v58, %v1438_v52 }
 0x29d   : > { %v1503_v36 = vmul.f32 %v9302_v30, %v1463_v63  ;;  %v1362_v38 = vand.u32 2147483647, %v11312_v18  ;;  %9309 = vpow2.f32 %v1494_v43  ;;  %v1480_v39 = vmul.f32 %v1472_v10, %v1360_v31 }
 0x29e   : > { %v11323_v45 = vmul.f32 %v1524_v21, %v1324_v0  ;;  %v1417_v1 = vmul.f32 %v11307_v49, %v1409_v29  ;;  %2098 = vmatprep.mubr.f32.mxu0 %v11317_v15  ;;  %v1454_v42 = vadd.f32 0.2548296, %v1446_v57  ;;  %v1475_v56 = vsub.f32 0.0, %v1363_v53 }
 0x29f   : > { %v9304_v48 = vpop.eup %9303  ;;  %v1511_v47 = vsub.f32 1.0, %v1503_v36  ;;  %vm1342_vm11 = vcmp.ge.f32.partialorder %v11156_v26, 0.0  ;;  %v1370_v60 = vmul.f32 0.3275911, %v1362_v38  ;;  %v1327_v62 = vmul.f32 0.5, %v11096_v22 }
 0x2a0   : > { %2099 = vmatmul.mubr.f32.vlgmr.msra.gmra.mrb[4].mxu0 %v11323_v45  ;;  %v1425_v59 = vadd.f32 1.4214138, %v1417_v1  ;;  %v1462_v3 = vmul.f32 %v11277_v58, %v1454_v42  ;;  %v1350_v31 = vsel %vm1342_vm11, 1.0, %v11973_v61  ;;  %v1492_v16 = vmul.f32 1.442695, %v1480_v39 }
 0x2a1   : > { %v9306_v55 = vpop.eup %9305  ;;  %v1519_v41 = vmul.f32 %v1511_v47, %v1351_v2  ;;  %v1378_v5 = vadd.f32 1.0, %v1370_v60  ;;  %v1483_v8 = vmul.f32 %v1475_v56, %v1363_v53  ;;  %v1326_v22 = vmul.f32 0.5, %v11126_v6 }
 0x2a2   : > { %v1433_v50 = vmul.f32 %v11307_v49, %v1425_v59  ;;  %v1400_v14 = vmul.f32 1.0614054, %v9306_v55  ;;  %v1502_v11 = vmul.f32 %v9304_v48, %v1462_v3  ;;  %v1474_v40 = vsub.f32 0.0, %v1362_v38 }
 0x2a3   : > { %v1527_v25 = vadd.f32 1.0, %v1519_v41  ;;  %9311 = vrcp.f32 %v1378_v5  ;;  %v1498_v13 = vmul.f32 1.442695, %v1483_v8  ;;  %vm1345_vm12 = vcmp.ge.f32.partialorder %v11239_v24, 0.0 }
 0x2a4   : > { %v1441_v19 = vadd.f32 -0.28449672, %v1433_v50  ;;  %v1408_v26 = vadd.f32 -1.4531521, %v1400_v14  ;;  %v1510_v34 = vsub.f32 1.0, %v1502_v11  ;;  %9313 = vpow2.f32 %v1492_v16 }
 0x2a5   : > { %v9308_v4 = vpop.eup %9307  ;;  %v11334_v35 = vmul.f32 %v1527_v25, %v1327_v62  ;;  %9315 = vpow2.f32 %v1498_v13  ;;  %v1482_v43 = vmul.f32 %v1474_v40, %v1362_v38  ;;  %v1353_v10 = vsel %vm1345_vm12, 1.0, %v11973_v61 }
 0x2a6   : > { %v1449_v58 = vmul.f32 %v11307_v49, %v1441_v19  ;;  %v1416_v17 = vmul.f32 %v9306_v55, %v1408_v26  ;;  %v1518_v0 = vmul.f32 %v1510_v34, %v1350_v31  ;;  %v1403_v46 = vmul.f32 1.0614054, %v9308_v4 }
 0x2a7   : > { %2173 = vmatprep.mubr.f32.mxu1 %v11334_v35  ;;  %v9310_v27 = vpop.eup %9309  ;;  %v1496_v42 = vmul.f32 1.442695, %v1482_v43  ;;  %vm1344_vm13 = vcmp.ge.f32.partialorder %v11271_v7, 0.0  ;;  %vm1347_vm14 = vcmp.ge.f32.partialorder %v11287_v32, 0.0  ;;  %v1328_v7 = vmul.f32 0.5, %v11255_v28  ;;  %v2275_v43 = vld [vmem:[#allocation12 + $0xa8] sm:$0xff] }
 0x2a8   : > { %v1457_v53 = vadd.f32 0.2548296, %v1449_v58  ;;  %v1424_v9 = vadd.f32 1.4214138, %v1416_v17  ;;  %v1526_v51 = vadd.f32 1.0, %v1518_v0  ;;  %v1352_v41 = vsel %vm1344_vm13, 1.0, %v11973_v61 }
 0x2a9   : > { %v1411_v12 = vadd.f32 -1.4531521, %v1403_v46  ;;  %9317 = vpow2.f32 %v1496_v42  ;;  %v1355_v19 = vsel %vm1347_vm14, 1.0, %v11973_v61  ;;  %v1331_v58 = vmul.f32 0.5, %v11275_v44 }
 0x2aa   : > { %v1465_v33 = vmul.f32 %v11307_v49, %v1457_v53  ;;  %v1432_v6 = vmul.f32 %v9306_v55, %v1424_v9  ;;  %v11341_v23 = vmul.f32 %v1526_v51, %v1326_v22  ;;  %v1329_v49 = vmul.f32 0.5, %v11223_v20 }
 0x2ab   : > { %v1419_v30 = vmul.f32 %v9308_v4, %v1411_v12  ;;  %vm1346_vm15 = vcmp.ge.f32.partialorder %v11312_v18, 0.0  ;;  %v1330_v40 = vmul.f32 0.5, %v11302_v54  ;;  %v10141_v12 = vmov 0.0   ;;  %v2270_v18 = vld [vmem:[#allocation12 + $0x80] sm:$0xff]  ;;  %v2273_v54 = vld [vmem:[#allocation12 + $0x98] sm:$0xff] }
 0x2ac   : > { %v1505_v37 = vmul.f32 %v9310_v27, %v1465_v33  ;;  %v1440_v52 = vadd.f32 -0.28449672, %v1432_v6  ;;  %2174 = vmatmul.mubr.f32.vlgmr.msra.gmra.mrb[4].mxu1 %v11341_v23  ;;  %v1354_v53 = vsel %vm1346_vm15, 1.0, %v11973_v61  ;;  %1303 = vst [vmem:[#allocation2] sm:$0xff] %v10141_v12  ;;  %1304 = vst [vmem:[#allocation2 + $0x8] sm:$0xff] %v10141_v12  ;;  %v2271_v33 = vld [vmem:[#allocation12 + $0x88] sm:$0xff] }
 0x2ad   : > { %v1427_v21 = vadd.f32 1.4214138, %v1419_v30  ;;  %v9312_v63 = vpop.eup %9311  ;;  %1305 = vst [vmem:[#allocation2 + $0x10] sm:$0x3] %v10141_v12  ;;  %v7986_v6 = vpack.c.bf16 %v2271_v33, %v2270_v18  ;;  %v2272_v30 = vld [vmem:[#allocation12 + $0x90] sm:$0xff] }
 0x2ae   : > { %v1513_v29 = vsub.f32 1.0, %v1505_v37  ;;  %v1448_v2 = vmul.f32 %v9306_v55, %v1440_v52  ;;  %v1402_v24 = vmul.f32 1.0614054, %v9312_v63  ;;  %v9314_v39 = vpop.eup %9313  ;;  %v7990_v37 = vpack.c.bf16 %v2273_v54, %v2272_v30  ;;  %v2274_v52 = vld [vmem:[#allocation12 + $0xa0] sm:$0xff] }
 0x2af   : > { %v1435_v57 = vmul.f32 %v9308_v4, %v1427_v21  ;;  %v9316_v14 = vpop.eup %9315  ;;  %7987 = vmatprep.subr.bf16.mxu0 %v7986_v6  ;;  %v2276_v21 = vld [vmem:[#allocation12 + $0xb0] sm:$0xff] }
 0x2b0   : > { %v1521_v36 = vmul.f32 %v1513_v29, %v1353_v10  ;;  %v1456_v1 = vadd.f32 0.2548296, %v1448_v2  ;;  %v1410_v48 = vadd.f32 -1.4531521, %v1402_v24  ;;  %7989 = vmatpush3.bf16.msra.mxu0 %v7986_v6  ;;  %v7994_v10 = vpack.c.bf16 %v2275_v43, %v2274_v52  ;;  %v2278_v2 = vld [vmem:[#allocation12 + $0xc0] sm:$0xff] }
 0x2b1   : > { %v1443_v56 = vadd.f32 -0.28449672, %v1435_v57  ;;  %7991 = vmatprep.subr.bf16.mxu0 %v7990_v37  ;;  %v2279_v57 = vld [vmem:[#allocation12 + $0xc8] sm:$0xff] }
 0x2b2   : > { %v1529_v47 = vadd.f32 1.0, %v1521_v36  ;;  %v1464_v38 = vmul.f32 %v9306_v55, %v1456_v1  ;;  %v1418_v60 = vmul.f32 %v9312_v63, %v1410_v48  ;;  %v2281_v48 = vld [vmem:[#allocation12 + $0xd8] sm:$0xff] }
 0x2b3   : > { %v1451_v59 = vmul.f32 %v9308_v4, %v1443_v56  ;;  %v9318_v46 = vpop.eup %9317  ;;  %v2280_v56 = vld [vmem:[#allocation12 + $0xd0] sm:$0xff] }
 0x2b4   : > { %v11347_v62 = vmul.f32 %v1529_v47, %v1329_v49  ;;  %v1504_v3 = vmul.f32 %v9314_v39, %v1464_v38  ;;  %v1426_v20 = vadd.f32 1.4214138, %v1418_v60  ;;  %7993 = vmatpush3.bf16.msra.mxu0 %v7990_v37  ;;  %v8002_v49 = vpack.c.bf16 %v2279_v57, %v2278_v2  ;;  %v2282_v60 = vld [vmem:[#allocation12 + $0xe0] sm:$0xff] }
 0x2b5   : > { %v1459_v50 = vadd.f32 0.2548296, %v1451_v59  ;;  %7995 = vmatprep.subr.bf16.mxu0 %v7994_v10  ;;  %v8006_v38 = vpack.c.bf16 %v2281_v48, %v2280_v56 }
 0x2b6   : > { %2103 = vmatprep.mubr.f32.mxu0 %v11347_v62  ;;  %v1512_v5 = vsub.f32 1.0, %v1504_v3  ;;  %v1434_v11 = vmul.f32 %v9312_v63, %v1426_v20  ;;  %v2283_v3 = vld [vmem:[#allocation12 + $0xe8] sm:$0xff]  ;;  %v2285_v20 = vld [vmem:[#allocation12 + $0xf8] sm:$0xff] }
 0x2b7   : > { %v1467_v31 = vmul.f32 %v9308_v4, %v1459_v50  ;;  %v2284_v50 = vld [vmem:[#allocation12 + $0xf0] sm:$0xff] }
 0x2b8   : > { %v1520_v55 = vmul.f32 %v1512_v5, %v1352_v41  ;;  %v1442_v8 = vadd.f32 -0.28449672, %v1434_v11  ;;  %7997 = vmatpush3.bf16.msra.mxu0 %v7994_v10  ;;  %v8010_v41 = vpack.c.bf16 %v2283_v3, %v2282_v60  ;;  %v2251_v5 = vld [vmem:[#allocation12] sm:$0xff] }
 0x2b9   : > { %v1507_v16 = vmul.f32 %v9316_v14, %v1467_v31  ;;  %v8014_v14 = vpack.c.bf16 %v2285_v20, %v2284_v50  ;;  %v2252_v31 = vld [vmem:[#allocation12 + $0x8] sm:$0xff] }
 0x2ba   : > { %v1528_v25 = vadd.f32 1.0, %v1520_v55  ;;  %v1450_v34 = vmul.f32 %v9312_v63, %v1442_v8  ;;  %v11370_v11 = vpack.c.bf16 %v2252_v31, %v2251_v5 }
 0x2bb   : > { %v1515_v26 = vsub.f32 1.0, %v1507_v16 }
 0x2bc   : > { %v11354_v22 = vmul.f32 %v1528_v25, %v1328_v7  ;;  %v1458_v0 = vadd.f32 0.2548296, %v1450_v34 }
 0x2bd   : > { %v1523_v17 = vmul.f32 %v1515_v26, %v1355_v19 }
 0x2be   : > { %2104 = vmatmul.mubr.f32.gmra.mrb[6].mxu0 %v11354_v22  ;;  %v1466_v28 = vmul.f32 %v9312_v63, %v1458_v0  ;;  %v2277_v63 = vld [vmem:[#allocation12 + $0xb8] sm:$0xff] }
 0x2bf   : > { %v1531_v32 = vadd.f32 1.0, %v1523_v17  ;;  %v7998_v29 = vpack.c.bf16 %v2277_v63, %v2276_v21 }
 0x2c0   : > { %v1506_v13 = vmul.f32 %v9318_v46, %v1466_v28 }
 0x2c1   : > { %v11359_v4 = vmul.f32 %v1531_v32, %v1331_v58  ;;  %7999 = vmatprep.subr.bf16.mxu0 %v7998_v29 }
 0x2c2   : > { %v1514_v9 = vsub.f32 1.0, %v1506_v13  ;;  %8001 = vmatpush3.bf16.msra.mxu0 %v7998_v29  ;;  %v6574_v13 = vld [vmem:[%s12015_s12] ss:$0 sm:$0xff] }
 0x2c3   : > { %2178 = vmatprep.mubr.f32.mxu1 %v11359_v4  ;;  %8003 = vmatprep.subr.bf16.mxu0 %v8002_v49 }
 0x2c4   : > { %v1522_v44 = vmul.f32 %v1514_v9, %v1354_v53 }
 0x2c6   : > { %v1530_v27 = vadd.f32 1.0, %v1522_v44  ;;  %8005 = vmatpush3.bf16.msra.mxu0 %v8002_v49 }
 0x2c7   : > { %8007 = vmatprep.subr.bf16.mxu0 %v8006_v38 }
 0x2c8   : > { %v11364_v51 = vmul.f32 %v1530_v27, %v1330_v40 }
 0x2ca   : > { %2179 = vmatmul.mubr.f32.gmra.mrb[6].mxu1 %v11364_v51  ;;  %8009 = vmatpush3.bf16.msra.mxu0 %v8006_v38 }
 0x2cb   : > { %8011 = vmatprep.subr.bf16.mxu0 %v8010_v41 }
 0x2ce   : > { %8013 = vmatpush3.bf16.msra.mxu0 %v8010_v41 }
 0x2cf   : > { %8015 = vmatprep.subr.bf16.mxu0 %v8014_v14 }
 0x2d2   : > { %8017 = vmatpush3.bf16.msra.mxu0 %v8014_v14 }
 0x2d3   : > { %8019 = vmatprep.subr.bf16.mxu0 %v11370_v11 }
 0x33d   : > { %v6632_v24 = vpop.f32.mrb[0].mxu0 }
 0x33e   : > { %v6633_v36 = vpop.f32.mrb[1].mxu0 }
 0x33f   : > { %v6634_v42 = vadd.f32 %v6633_v36, %v6632_v24 }
 0x340   : > { %v6670_v1 = vpop.f32.mrb[0].mxu1 }
 0x341   : > { %v6671_v39 = vpop.f32.mrb[1].mxu1 }
 0x342   : > { %v6672_v47 = vadd.f32 %v6671_v39, %v6670_v1 }
 0x344   : > { %v2026_v59 = vadd.f32 %v6672_v47, %v6634_v42 }
 0x362   : > { %v6635_v7 = vpop.f32.mrb[2].mxu0 }
 0x363   : > { %v6636_v55 = vpop.f32.mrb[3].mxu0 }
 0x364   : > { %v6637_v16 = vadd.f32 %v6636_v55, %v6635_v7 }
 0x368   : > { %v6673_v8 = vpop.f32.mrb[2].mxu1 }
 0x369   : > { %v6674_v25 = vpop.f32.mrb[3].mxu1 }
 0x36a   : > { %v6675_v19 = vadd.f32 %v6674_v25, %v6673_v8 }
 0x36c   : > { %v2031_v26 = vadd.f32 %v6675_v19, %v6637_v16 }
 0x373   : > { %v6708_v34 = vpop.f32.mrb[4].mxu0 }
 0x374   : > { %v6709_v58 = vpop.f32.mrb[5].mxu0 }
 0x375   : > { %v6710_v17 = vadd.f32 %v6709_v58, %v6708_v34 }
 0x377   : > { %v2101_v0 = vadd.f32 %v6710_v17, %v2026_v59 }
 0x37f   : > { %v6746_v46 = vpop.f32.mrb[4].mxu1 }
 0x380   : > { %v6747_v32 = vpop.f32.mrb[5].mxu1 }
 0x381   : > { %v6748_v28 = vadd.f32 %v6747_v32, %v6746_v46 }
 0x383   : > { %v2176_v53 = vadd.f32 %v6748_v28, %v2101_v0 }
 0x385   : > { %v2191_v9 = vadd.f32 %v6574_v13, %v2176_v53 }
 0x387   : > { %v2195_v40 = vmul.f32 0.70710677, %v2191_v9  ;;  %v2193_v31 = vmul.f32 0.5, %v2191_v9 }
 0x389   : > { %v2201_v44 = vand.u32 2147483647, %v2195_v40  ;;  %vm2197_vm0 = vcmp.ge.f32.partialorder %v2195_v40, 0.0 }
 0x38a   : > { %v2199_v14 = vsel %vm2197_vm0, 1.0, %v11973_v61 }
 0x38b   : > { %v2203_v27 = vmul.f32 0.3275911, %v2201_v44  ;;  %v2229_v37 = vsub.f32 0.0, %v2201_v44 }
 0x38d   : > { %v2205_v18 = vadd.f32 1.0, %v2203_v27  ;;  %v2231_v43 = vmul.f32 %v2229_v37, %v2201_v44 }
 0x38f   : > { %9319 = vrcp.f32 %v2205_v18  ;;  %v2233_v63 = vmul.f32 1.442695, %v2231_v43  ;;  %v2253_v18 = vld [vmem:[#allocation12 + $0x10] sm:$0xff]  ;;  %v2255_v43 = vld [vmem:[#allocation12 + $0x20] sm:$0xff] }
 0x391   : > { %v6711_v33 = vpop.f32.mrb[6].mxu0  ;;  %9321 = vpow2.f32 %v2233_v63  ;;  %v2257_v63 = vld [vmem:[#allocation12 + $0x30] sm:$0xff] }
 0x392   : > { %v6712_v6 = vpop.f32.mrb[7].mxu0 }
 0x393   : > { %v6713_v30 = vadd.f32 %v6712_v6, %v6711_v33  ;;  %v2254_v33 = vld [vmem:[#allocation12 + $0x18] sm:$0xff] }
 0x395   : > { %v2106_v54 = vadd.f32 %v6713_v30, %v2031_v26 }
 0x399   : > { %v9320_v52 = vpop.eup %9319 }
 0x39a   : > { %v2211_v10 = vmul.f32 1.0614054, %v9320_v52 }
 0x39b   : > { %v9322_v3 = vpop.eup %9321 }
 0x39c   : > { %v2213_v21 = vadd.f32 -1.4531521, %v2211_v10  ;;  %v2256_v10 = vld [vmem:[#allocation12 + $0x28] sm:$0xff] }
 0x39d   : > { %v6749_v29 = vpop.f32.mrb[6].mxu1 }
 0x39e   : > { %v2215_v2 = vmul.f32 %v9320_v52, %v2213_v21  ;;  %v6750_v57 = vpop.f32.mrb[7].mxu1  ;;  %v8026_v21 = vpack.c.bf16 %v2256_v10, %v2255_v43  ;;  %v2624_v43 = vld [vmem:[#allocation14 + $0xb0] sm:$0xff]  ;;  %v2625_v10 = vld [vmem:[#allocation14 + $0xb8] sm:$0xff] }
 0x39f   : > { %v6751_v24 = vadd.f32 %v6750_v57, %v6749_v29  ;;  %v2258_v29 = vld [vmem:[#allocation12 + $0x38] sm:$0xff]  ;;  %v2259_v57 = vld [vmem:[#allocation12 + $0x40] sm:$0xff] }
 0x3a0   : > { %v2217_v49 = vadd.f32 1.4214138, %v2215_v2  ;;  %v8030_v2 = vpack.c.bf16 %v2258_v29, %v2257_v63  ;;  %v2626_v63 = vld [vmem:[#allocation14 + $0xc0] sm:$0xff]  ;;  %v2627_v29 = vld [vmem:[#allocation14 + $0xc8] sm:$0xff] }
 0x3a1   : > { %v2181_v36 = vadd.f32 %v6751_v24, %v2106_v54  ;;  %v2260_v24 = vld [vmem:[#allocation12 + $0x48] sm:$0xff] }
 0x3a2   : > { %v2219_v1 = vmul.f32 %v9320_v52, %v2217_v49  ;;  %v8034_v49 = vpack.c.bf16 %v2260_v24, %v2259_v57  ;;  %v2628_v57 = vld [vmem:[#allocation14 + $0xd0] sm:$0xff]  ;;  %v2629_v24 = vld [vmem:[#allocation14 + $0xd8] sm:$0xff] }
 0x3a3   : > { %v2192_v42 = vadd.f32 %v6574_v13, %v2181_v36  ;;  %v2261_v36 = vld [vmem:[#allocation12 + $0x50] sm:$0xff] }
 0x3a4   : > { %v2221_v39 = vadd.f32 -0.28449672, %v2219_v1  ;;  %v2262_v1 = vld [vmem:[#allocation12 + $0x58] sm:$0xff] }
 0x3a5   : > { %v2196_v56 = vmul.f32 0.70710677, %v2192_v42  ;;  %v2194_v6 = vmul.f32 0.5, %v2192_v42  ;;  %v8038_v42 = vpack.c.bf16 %v2262_v1, %v2261_v36  ;;  %v2630_v36 = vld [vmem:[#allocation14 + $0xe0] sm:$0xff]  ;;  %v2631_v1 = vld [vmem:[#allocation14 + $0xe8] sm:$0xff] }
 0x3a6   : > { %v2223_v48 = vmul.f32 %v9320_v52, %v2221_v39  ;;  %v2263_v39 = vld [vmem:[#allocation12 + $0x60] sm:$0xff] }
 0x3a7   : > { %v2202_v47 = vand.u32 2147483647, %v2196_v56  ;;  %vm2198_vm1 = vcmp.ge.f32.partialorder %v2196_v56, 0.0 }
 0x3a8   : > { %v2225_v38 = vadd.f32 0.2548296, %v2223_v48  ;;  %v2200_v44 = vsel %vm2198_vm1, 1.0, %v11973_v61  ;;  %v2265_v48 = vld [vmem:[#allocation12 + $0x70] sm:$0xff] }
 0x3a9   : > { %v2204_v59 = vmul.f32 0.3275911, %v2202_v47  ;;  %v2230_v55 = vsub.f32 0.0, %v2202_v47 }
 0x3aa   : > { %v2227_v60 = vmul.f32 %v9320_v52, %v2225_v38  ;;  %v8022_v52 = vpack.c.bf16 %v2254_v33, %v2253_v18  ;;  %v2620_v33 = vld [vmem:[#allocation14 + $0x90] sm:$0xff] }
 0x3ab   : > { %v2206_v41 = vadd.f32 1.0, %v2204_v59  ;;  %v2232_v25 = vmul.f32 %v2230_v55, %v2202_v47  ;;  %v2266_v47 = vld [vmem:[#allocation12 + $0x78] sm:$0xff]  ;;  %v2439_v59 = vld [vmem:[#allocation12 + $0x100] sm:$0xff] }
 0x3ac   : > { %v2237_v50 = vmul.f32 %v9322_v3, %v2227_v60  ;;  %v8046_v38 = vpack.c.bf16 %v2266_v47, %v2265_v48  ;;  %v2440_v60 = vld [vmem:[#allocation12 + $0x108] sm:$0xff]  ;;  %v2599_v48 = vld [vmem:[#allocation14] sm:$0xff] }
 0x3ad   : > { %9323 = vrcp.f32 %v2206_v41  ;;  %v2235_v34 = vmul.f32 1.442695, %v2232_v25  ;;  %v8050_v3 = vpack.c.bf16 %v2440_v60, %v2439_v59  ;;  %v2441_v41 = vld [vmem:[#allocation12 + $0x110] sm:$0xff]  ;;  %v2600_v47 = vld [vmem:[#allocation14 + $0x8] sm:$0xff] }
 0x3ae   : > { %v2239_v20 = vsub.f32 1.0, %v2237_v50  ;;  %v2442_v50 = vld [vmem:[#allocation12 + $0x118] sm:$0xff]  ;;  %v6575_v59 = vld [vmem:[%s12016_s14] ss:$0 sm:$0xff]  ;;  %s11697_s14 = scalar_lea.sflag [#allocation32], %s1133_s0 }
 0x3af   : > { %9325 = vpow2.f32 %v2235_v34 }
 0x3b0   : > { %v2241_v5 = vmul.f32 %v2239_v20, %v2199_v14  ;;  %v8054_v20 = vpack.c.bf16 %v2442_v50, %v2441_v41 }
 0x3b2   : > { %v2243_v7 = vadd.f32 1.0, %v2241_v5  ;;  %v2443_v5 = vld [vmem:[#allocation12 + $0x120] sm:$0xff] }
 0x3b4   : > { %v2245_v16 = vmul.f32 %v2243_v7, %v2193_v31  ;;  %v2444_v31 = vld [vmem:[#allocation12 + $0x128] sm:$0xff] }
 0x3b5   : > { %v8058_v55 = vpack.c.bf16 %v2444_v31, %v2443_v5 }
 0x3b6   : > { %2247 = vst [vmem:[#allocation2 + $0x1] sm:$0xff] %v2245_v16  ;;  %7260 = vmatprep.mubr.f32.mxu0 %v2245_v16  ;;  %v2445_v16 = vld [vmem:[#allocation12 + $0x130] sm:$0xff] }
 0x3b7   : > { %v9324_v8 = vpop.eup %9323 }
 0x3b8   : > { %v2212_v19 = vmul.f32 1.0614054, %v9324_v8 }
 0x3b9   : > { %v9326_v53 = vpop.eup %9325 }
 0x3ba   : > { %v2214_v26 = vadd.f32 -1.4531521, %v2212_v19  ;;  %v2447_v19 = vld [vmem:[#allocation12 + $0x140] sm:$0xff] }
 0x3bc   : > { %v2216_v58 = vmul.f32 %v9324_v8, %v2214_v26  ;;  %v2448_v26 = vld [vmem:[#allocation12 + $0x148] sm:$0xff] }
 0x3bd   : > { %v2249_v37 = vld [vmem:[#allocation2] sm:$0xff]  ;;  %v8066_v34 = vpack.c.bf16 %v2448_v26, %v2447_v19 }
 0x3be   : > { %v2218_v17 = vadd.f32 1.4214138, %v2216_v58  ;;  %v2449_v58 = vld [vmem:[#allocation12 + $0x150] sm:$0xff] }
 0x3c0   : > { %v2220_v0 = vmul.f32 %v9324_v8, %v2218_v17  ;;  %v2450_v17 = vld [vmem:[#allocation12 + $0x158] sm:$0xff] }
 0x3c2   : > { %v2222_v46 = vadd.f32 -0.28449672, %v2220_v0  ;;  %v8070_v0 = vpack.c.bf16 %v2450_v17, %v2449_v58 }
 0x3c4   : > { %v2224_v32 = vmul.f32 %v9324_v8, %v2222_v46  ;;  %v2451_v46 = vld [vmem:[#allocation12 + $0x160] sm:$0xff] }
 0x3c6   : > { %v2226_v28 = vadd.f32 0.2548296, %v2224_v32  ;;  %v2452_v32 = vld [vmem:[#allocation12 + $0x168] sm:$0xff] }
 0x3c8   : > { %v2228_v13 = vmul.f32 %v9324_v8, %v2226_v28  ;;  %v2446_v8 = vld [vmem:[#allocation12 + $0x138] sm:$0xff]  ;;  %v8074_v28 = vpack.c.bf16 %v2452_v32, %v2451_v46 }
 0x3c9   : > { %v8062_v25 = vpack.c.bf16 %v2446_v8, %v2445_v16 }
 0x3ca   : > { %v2238_v9 = vmul.f32 %v9326_v53, %v2228_v13  ;;  %v2453_v13 = vld [vmem:[#allocation12 + $0x170] sm:$0xff]  ;;  %v2454_v53 = vld [vmem:[#allocation12 + $0x178] sm:$0xff] }
 0x3cc   : > { %v2240_v40 = vsub.f32 1.0, %v2238_v9  ;;  %v8078_v9 = vpack.c.bf16 %v2454_v53, %v2453_v13 }
 0x3ce   : > { %v2242_v27 = vmul.f32 %v2240_v40, %v2200_v44  ;;  %v2618_v44 = vld [vmem:[#allocation14 + $0x80] sm:$0xff] }
 0x3d0   : > { %v2244_v30 = vadd.f32 1.0, %v2242_v27  ;;  %v2619_v27 = vld [vmem:[#allocation14 + $0x88] sm:$0xff] }
 0x3d1   : > { %v8082_v18 = vpack.c.bf16 %v2619_v27, %v2618_v44 }
 0x3d2   : > { %v2246_v54 = vmul.f32 %v2244_v30, %v2194_v6  ;;  %v2621_v6 = vld [vmem:[#allocation14 + $0x98] sm:$0xff] }
 0x3d3   : > { %8083 = vmatprep.subr.bf16.mxu1 %v8082_v18  ;;  %v8086_v30 = vpack.c.bf16 %v2621_v6, %v2620_v33 }
 0x3d4   : > { %2248 = vst [vmem:[#allocation2 + $0x9] sm:$0xff] %v2246_v54  ;;  %7261 = vmatmul.mubr.f32.vlgmr.msra.gmra.mrb[8].mxu0 %v2246_v54  ;;  %8085 = vmatpush3.bf16.msra.mxu1 %v8082_v18  ;;  %v2622_v54 = vld [vmem:[#allocation14 + $0xa0] sm:$0xff] }
 0x3d5   : > { %8021 = vmatpush3.bf16.msra.mxu0 %v11370_v11  ;;  %7295 = vmatprep.mubr.f32.mxu0 %v2249_v37  ;;  %v2264_v11 = vld [vmem:[#allocation12 + $0x68] sm:$0xff] }
 0x3d6   : > { %8023 = vmatprep.subr.bf16.mxu0 %v8022_v52  ;;  %v8042_v56 = vpack.c.bf16 %v2264_v11, %v2263_v39  ;;  %8087 = vmatprep.subr.bf16.mxu1 %v8086_v30  ;;  %v2623_v37 = vld [vmem:[#allocation14 + $0xa8] sm:$0xff]  ;;  %v2632_v39 = vld [vmem:[#allocation14 + $0xf0] sm:$0xff]  ;;  %v2633_v11 = vld [vmem:[#allocation14 + $0xf8] sm:$0xff] }
 0x3d8   : > { %8089 = vmatpush3.bf16.msra.mxu1 %v8086_v30 }
 0x3d9   : > { %8025 = vmatpush3.bf16.msra.mxu0 %v8022_v52  ;;  %v8090_v52 = vpack.c.bf16 %v2623_v37, %v2622_v54 }
 0x3da   : > { %8027 = vmatprep.subr.bf16.mxu0 %v8026_v21 }
 0x3db   : > { %v2250_v14 = vld [vmem:[#allocation2 + $0x8] sm:$0xff]  ;;  %8091 = vmatprep.subr.bf16.mxu1 %v8090_v52 }
 0x3dc   : > { %v2436_v7 = vld [vmem:[#allocation2 + $0x2] sm:$0xff]  ;;  %v2437_v40 = vld [vmem:[#allocation2 + $0xa] sm:$0xff]  ;;  %8093 = vmatpush3.bf16.msra.mxu1 %v8090_v52 }
 0x3dd   : > { %8029 = vmatpush3.bf16.msra.mxu0 %v8026_v21  ;;  %v8094_v21 = vpack.c.bf16 %v2625_v10, %v2624_v43 }
 0x3de   : > { %8031 = vmatprep.subr.bf16.mxu0 %v8030_v2 }
 0x3df   : > { %8095 = vmatprep.subr.bf16.mxu1 %v8094_v21 }
 0x3e0   : > { %8097 = vmatpush3.bf16.msra.mxu1 %v8094_v21 }
 0x3e1   : > { %8033 = vmatpush3.bf16.msra.mxu0 %v8030_v2  ;;  %v8098_v2 = vpack.c.bf16 %v2627_v29, %v2626_v63 }
 0x3e2   : > { %8035 = vmatprep.subr.bf16.mxu0 %v8034_v49 }
 0x3e3   : > { %8099 = vmatprep.subr.bf16.mxu1 %v8098_v2 }
 0x3e4   : > { %8101 = vmatpush3.bf16.msra.mxu1 %v8098_v2 }
 0x3e5   : > { %8037 = vmatpush3.bf16.msra.mxu0 %v8034_v49  ;;  %v8102_v49 = vpack.c.bf16 %v2629_v24, %v2628_v57 }
 0x3e6   : > { %8039 = vmatprep.subr.bf16.mxu0 %v8038_v42 }
 0x3e7   : > { %8103 = vmatprep.subr.bf16.mxu1 %v8102_v49 }
 0x3e8   : > { %8105 = vmatpush3.bf16.msra.mxu1 %v8102_v49 }
 0x3e9   : > { %8041 = vmatpush3.bf16.msra.mxu0 %v8038_v42  ;;  %v8106_v42 = vpack.c.bf16 %v2631_v1, %v2630_v36 }
 0x3ea   : > { %8043 = vmatprep.subr.bf16.mxu0 %v8042_v56 }
 0x3eb   : > { %8107 = vmatprep.subr.bf16.mxu1 %v8106_v42 }
 0x3ec   : > { %8109 = vmatpush3.bf16.msra.mxu1 %v8106_v42 }
 0x3ed   : > { %8045 = vmatpush3.bf16.msra.mxu0 %v8042_v56  ;;  %v8110_v56 = vpack.c.bf16 %v2633_v11, %v2632_v39 }
 0x3ee   : > { %8047 = vmatprep.subr.bf16.mxu0 %v8046_v38 }
 0x3ef   : > { %8111 = vmatprep.subr.bf16.mxu1 %v8110_v56 }
 0x3f0   : > { %8113 = vmatpush3.bf16.msra.mxu1 %v8110_v56 }
 0x3f1   : > { %8049 = vmatpush3.bf16.msra.mxu0 %v8046_v38  ;;  %v11378_v38 = vpack.c.bf16 %v2600_v47, %v2599_v48 }
 0x3f2   : > { %8051 = vmatprep.subr.bf16.mxu0 %v8050_v3 }
 0x3f3   : > { %8115 = vmatprep.subr.bf16.mxu1 %v11378_v38 }
 0x3f4   : > { %7296 = vmatmul.mubr.f32.vlgmr.msra.gmra.mrb[8].mxu0 %v2250_v14 }
 0x3f5   : > { %8053 = vmatpush3.bf16.msra.mxu0 %v8050_v3  ;;  %7330 = vmatprep.mubr.f32.mxu0 %v2436_v7 }
 0x3f6   : > { %8055 = vmatprep.subr.bf16.mxu0 %v8054_v20 }
 0x3f9   : > { %8057 = vmatpush3.bf16.msra.mxu0 %v8054_v20 }
 0x3fa   : > { %8059 = vmatprep.subr.bf16.mxu0 %v8058_v55 }
 0x3fd   : > { %8061 = vmatpush3.bf16.msra.mxu0 %v8058_v55 }
 0x3fe   : > { %8063 = vmatprep.subr.bf16.mxu0 %v8062_v25 }
 0x401   : > { %8065 = vmatpush3.bf16.msra.mxu0 %v8062_v25 }
 0x402   : > { %8067 = vmatprep.subr.bf16.mxu0 %v8066_v34 }
 0x405   : > { %8069 = vmatpush3.bf16.msra.mxu0 %v8066_v34 }
 0x406   : > { %8071 = vmatprep.subr.bf16.mxu0 %v8070_v0 }
 0x409   : > { %8073 = vmatpush3.bf16.msra.mxu0 %v8070_v0 }
 0x40a   : > { %8075 = vmatprep.subr.bf16.mxu0 %v8074_v28 }
 0x40d   : > { %8077 = vmatpush3.bf16.msra.mxu0 %v8074_v28 }
 0x40e   : > { %8079 = vmatprep.subr.bf16.mxu0 %v8078_v9 }
 0x411   : > { %8081 = vmatpush3.bf16.msra.mxu0 %v8078_v9 }
 0x414   : > { %7331 = vmatmul.mubr.f32.vlgmr.msra.gmra.mrb[8].mxu0 %v2437_v40 }
 0x415   : > { %3051 = vmatprep.mubr.f32.mxu0 %v10141_v12 }
 0x4e7   : > { %v7332_v60 = vpop.f32.mrb[8].mxu0 }
 0x4e8   : > { %v2540_v3 = vadd.f32 %v7332_v60, %v6575_v59  ;;  %v2521_v41 = vpop.f32.mrb[9].mxu0  ;;  %v2602_v60 = vld [vmem:[#allocation14 + $0x18] sm:$0xff] }
 0x4e9   : > { %v2539_v50 = vadd.f32 %v6575_v59, %v2521_v41  ;;  %v2601_v59 = vld [vmem:[#allocation14 + $0x10] sm:$0xff] }
 0x4ea   : > { %v2544_v20 = vmul.f32 0.70710677, %v2540_v3  ;;  %v2542_v11 = vmul.f32 0.5, %v2540_v3  ;;  %v2606_v3 = vld [vmem:[#allocation14 + $0x38] sm:$0xff] }
 0x4eb   : > { %v2543_v14 = vmul.f32 0.70710677, %v2539_v50  ;;  %v2541_v48 = vmul.f32 0.5, %v2539_v50 }
 0x4ec   : > { %v2550_v5 = vand.u32 2147483647, %v2544_v20  ;;  %vm2546_vm2 = vcmp.ge.f32.partialorder %v2544_v20, 0.0  ;;  %v8118_v20 = vpack.c.bf16 %v2602_v60, %v2601_v59  ;;  %v2943_v59 = vld [vmem:[#allocation15] sm:$0xff]  ;;  %v2945_v60 = vld [vmem:[#allocation15 + $0x10] sm:$0xff] }
 0x4ed   : > { %v2549_v31 = vand.u32 2147483647, %v2543_v14  ;;  %vm2545_vm3 = vcmp.ge.f32.partialorder %v2543_v14, 0.0  ;;  %v2548_v49 = vsel %vm2546_vm2, 1.0, %v11973_v61  ;;  %v2603_v14 = vld [vmem:[#allocation14 + $0x20] sm:$0xff] }
 0x4ee   : > { %v2552_v7 = vmul.f32 0.3275911, %v2550_v5  ;;  %v2578_v25 = vsub.f32 0.0, %v2550_v5  ;;  %v2547_v42 = vsel %vm2545_vm3, 1.0, %v11973_v61 }
 0x4ef   : > { %v2551_v55 = vmul.f32 0.3275911, %v2549_v31  ;;  %v2577_v19 = vsub.f32 0.0, %v2549_v31 }
 0x4f0   : > { %v2554_v16 = vadd.f32 1.0, %v2552_v7  ;;  %v2580_v34 = vmul.f32 %v2578_v25, %v2550_v5  ;;  %v2608_v25 = vld [vmem:[#allocation14 + $0x48] sm:$0xff] }
 0x4f1   : > { %v2553_v8 = vadd.f32 1.0, %v2551_v55  ;;  %v2579_v0 = vmul.f32 %v2577_v19, %v2549_v31  ;;  %v2604_v31 = vld [vmem:[#allocation14 + $0x28] sm:$0xff]  ;;  %v2605_v55 = vld [vmem:[#allocation14 + $0x30] sm:$0xff] }
 0x4f2   : > { %9327 = vrcp.f32 %v2554_v16  ;;  %v2583_v28 = vmul.f32 1.442695, %v2580_v34  ;;  %v8122_v7 = vpack.c.bf16 %v2604_v31, %v2603_v14  ;;  %v8126_v16 = vpack.c.bf16 %v2606_v3, %v2605_v55  ;;  %v2610_v34 = vld [vmem:[#allocation14 + $0x58] sm:$0xff]  ;;  %v2947_v31 = vld [vmem:[#allocation15 + $0x20] sm:$0xff]  ;;  %v2952_v3 = vld [vmem:[#allocation15 + $0x48] sm:$0xff] }
 0x4f3   : > { %9329 = vrcp.f32 %v2553_v8  ;;  %v2581_v9 = vmul.f32 1.442695, %v2579_v0  ;;  %v2607_v8 = vld [vmem:[#allocation14 + $0x40] sm:$0xff] }
 0x4f4   : > { %9331 = vpow2.f32 %v2583_v28  ;;  %v8130_v19 = vpack.c.bf16 %v2608_v25, %v2607_v8  ;;  %v2953_v8 = vld [vmem:[#allocation15 + $0x50] sm:$0xff] }
 0x4f5   : > { %9333 = vpow2.f32 %v2581_v9 }
 0x4fc   : > { %v9328_v26 = vpop.eup %9327 }
 0x4fd   : > { %v9330_v58 = vpop.eup %9329  ;;  %v2560_v17 = vmul.f32 1.0614054, %v9328_v26 }
 0x4fe   : > { %v2559_v46 = vmul.f32 1.0614054, %v9330_v58  ;;  %v9332_v21 = vpop.eup %9331 }
 0x4ff   : > { %v2562_v32 = vadd.f32 -1.4531521, %v2560_v17  ;;  %v9334_v29 = vpop.eup %9333  ;;  %v2612_v17 = vld [vmem:[#allocation14 + $0x68] sm:$0xff] }
 0x500   : > { %v2561_v13 = vadd.f32 -1.4531521, %v2559_v46  ;;  %v2613_v46 = vld [vmem:[#allocation14 + $0x70] sm:$0xff] }
 0x501   : > { %v2564_v53 = vmul.f32 %v9328_v26, %v2562_v32  ;;  %v2614_v32 = vld [vmem:[#allocation14 + $0x78] sm:$0xff] }
 0x502   : > { %v2563_v40 = vmul.f32 %v9330_v58, %v2561_v13  ;;  %v8142_v28 = vpack.c.bf16 %v2614_v32, %v2613_v46  ;;  %v2787_v13 = vld [vmem:[#allocation14 + $0x100] sm:$0xff]  ;;  %v2962_v46 = vld [vmem:[#allocation15 + $0x98] sm:$0xff] }
 0x503   : > { %v2566_v44 = vadd.f32 1.4214138, %v2564_v53  ;;  %v2788_v53 = vld [vmem:[#allocation14 + $0x108] sm:$0xff] }
 0x504   : > { %v2565_v27 = vadd.f32 1.4214138, %v2563_v40  ;;  %v8146_v9 = vpack.c.bf16 %v2788_v53, %v2787_v13  ;;  %v2789_v40 = vld [vmem:[#allocation14 + $0x110] sm:$0xff] }
 0x505   : > { %v2568_v18 = vmul.f32 %v9328_v26, %v2566_v44  ;;  %v2790_v44 = vld [vmem:[#allocation14 + $0x118] sm:$0xff]  ;;  %v2961_v13 = vld [vmem:[#allocation15 + $0x90] sm:$0xff] }
 0x506   : > { %v2567_v33 = vmul.f32 %v9330_v58, %v2565_v27  ;;  %v8150_v27 = vpack.c.bf16 %v2790_v44, %v2789_v40  ;;  %v2966_v40 = vld [vmem:[#allocation15 + $0xb8] sm:$0xff] }
 0x507   : > { %v2570_v6 = vadd.f32 -0.28449672, %v2568_v18 }
 0x508   : > { %v2569_v30 = vadd.f32 -0.28449672, %v2567_v33  ;;  %v2791_v33 = vld [vmem:[#allocation14 + $0x120] sm:$0xff] }
 0x509   : > { %v2572_v54 = vmul.f32 %v9328_v26, %v2570_v6  ;;  %v2792_v6 = vld [vmem:[#allocation14 + $0x128] sm:$0xff] }
 0x50a   : > { %v2571_v37 = vmul.f32 %v9330_v58, %v2569_v30 }
 0x50b   : > { %v2574_v52 = vadd.f32 0.2548296, %v2572_v54  ;;  %v8154_v54 = vpack.c.bf16 %v2792_v6, %v2791_v33  ;;  %v2968_v6 = vld [vmem:[#allocation15 + $0xc8] sm:$0xff] }
 0x50c   : > { %v2573_v43 = vadd.f32 0.2548296, %v2571_v37  ;;  %v2793_v37 = vld [vmem:[#allocation14 + $0x130] sm:$0xff] }
 0x50d   : > { %v2576_v10 = vmul.f32 %v9328_v26, %v2574_v52  ;;  %v2609_v26 = vld [vmem:[#allocation14 + $0x50] sm:$0xff]  ;;  %v2794_v52 = vld [vmem:[#allocation14 + $0x138] sm:$0xff] }
 0x50e   : > { %v2575_v63 = vmul.f32 %v9330_v58, %v2573_v43  ;;  %v8134_v58 = vpack.c.bf16 %v2610_v34, %v2609_v26  ;;  %v8158_v43 = vpack.c.bf16 %v2794_v52, %v2793_v37  ;;  %v2958_v26 = vld [vmem:[#allocation15 + $0x78] sm:$0xff]  ;;  %v2967_v37 = vld [vmem:[#allocation15 + $0xc0] sm:$0xff]  ;;  %v2969_v52 = vld [vmem:[#allocation15 + $0xd0] sm:$0xff] }
 0x50f   : > { %v2586_v2 = vmul.f32 %v9332_v21, %v2576_v10  ;;  %v2795_v10 = vld [vmem:[#allocation14 + $0x140] sm:$0xff]  ;;  %v2796_v21 = vld [vmem:[#allocation14 + $0x148] sm:$0xff] }
 0x510   : > { %v2585_v57 = vmul.f32 %v9334_v29, %v2575_v63  ;;  %v8162_v63 = vpack.c.bf16 %v2796_v21, %v2795_v10  ;;  %v2797_v29 = vld [vmem:[#allocation14 + $0x150] sm:$0xff]  ;;  %v2972_v10 = vld [vmem:[#allocation15 + $0xe8] sm:$0xff]  ;;  %v2974_v21 = vld [vmem:[#allocation15 + $0xf8] sm:$0xff] }
 0x511   : > { %v2588_v24 = vsub.f32 1.0, %v2586_v2  ;;  %v2798_v2 = vld [vmem:[#allocation14 + $0x158] sm:$0xff] }
 0x512   : > { %v2587_v36 = vsub.f32 1.0, %v2585_v57  ;;  %v8166_v57 = vpack.c.bf16 %v2798_v2, %v2797_v29  ;;  %v2971_v29 = vld [vmem:[#allocation15 + $0xe0] sm:$0xff]  ;;  %v2973_v2 = vld [vmem:[#allocation15 + $0xf0] sm:$0xff] }
 0x513   : > { %v2590_v1 = vmul.f32 %v2588_v24, %v2548_v49  ;;  %v2799_v24 = vld [vmem:[#allocation14 + $0x160] sm:$0xff]  ;;  %v2800_v49 = vld [vmem:[#allocation14 + $0x168] sm:$0xff] }
 0x514   : > { %v2589_v39 = vmul.f32 %v2587_v36, %v2547_v42  ;;  %v8170_v36 = vpack.c.bf16 %v2800_v49, %v2799_v24  ;;  %v2802_v42 = vld [vmem:[#allocation14 + $0x178] sm:$0xff]  ;;  %v8208_v24 = vpack.c.bf16 %v2973_v2, %v2971_v29  ;;  %v3081_v49 = vld [vmem:[#allocation17 + $0x88] sm:$0xff] }
 0x515   : > { %v2592_v56 = vadd.f32 1.0, %v2590_v1  ;;  %v2801_v1 = vld [vmem:[#allocation14 + $0x170] sm:$0xff] }
 0x516   : > { %v2591_v47 = vadd.f32 1.0, %v2589_v39  ;;  %v8174_v39 = vpack.c.bf16 %v2802_v42, %v2801_v1  ;;  %v3065_v1 = vld [vmem:[#allocation17 + $0x8] sm:$0xff] }
 0x517   : > { %v2594_v41 = vmul.f32 %v2592_v56, %v2542_v11  ;;  %v2944_v56 = vld [vmem:[#allocation15 + $0x8] sm:$0xff] }
 0x518   : > { %v2593_v5 = vmul.f32 %v2591_v47, %v2541_v48  ;;  %v2946_v48 = vld [vmem:[#allocation15 + $0x18] sm:$0xff] }
 0x519   : > { %2596 = vst [vmem:[#allocation2 + $0x9] sm:$0xff] %v2594_v41  ;;  %v8178_v47 = vpack.c.bf16 %v2946_v48, %v2944_v56  ;;  %v3113_v56 = vld [vmem:[#allocation17 + $0x188] sm:$0xff] }
 0x51a   : > { %2595 = vst [vmem:[#allocation2 + $0x1] sm:$0xff] %v2593_v5  ;;  %7365 = vmatprep.mubr.f32.mxu1 %v2593_v5  ;;  %v2948_v5 = vld [vmem:[#allocation15 + $0x28] sm:$0xff] }
 0x51b   : > { %7366 = vmatmul.mubr.f32.vlgmr.msra.gmra.mrb[8].mxu1 %v2594_v41  ;;  %v8180_v41 = vpack.c.bf16 %v2945_v60, %v2943_v59  ;;  %8179 = vmatprep.subr.bf16.mxu0 %v8178_v47  ;;  %v3082_v47 = vld [vmem:[#allocation17 + $0x90] sm:$0xff]  ;;  %v3083_v59 = vld [vmem:[#allocation17 + $0x98] sm:$0xff] }
 0x51c   : > { %8117 = vmatpush3.bf16.msra.mxu1 %v11378_v38  ;;  %v2611_v38 = vld [vmem:[#allocation14 + $0x60] sm:$0xff]  ;;  %v8214_v60 = vpack.c.bf16 %v3083_v59, %v3082_v47 }
 0x51d   : > { %8119 = vmatprep.subr.bf16.mxu1 %v8118_v20  ;;  %v8138_v0 = vpack.c.bf16 %v2612_v17, %v2611_v38  ;;  %8181 = vmatpush1.bf16.msra.mxu0 %v8180_v41  ;;  %v2957_v38 = vld [vmem:[#allocation15 + $0x70] sm:$0xff] }
 0x51e   : > { %v3066_v41 = vld [vmem:[#allocation17 + $0x10] sm:$0xff] }
 0x520   : > { %8121 = vmatpush3.bf16.msra.mxu1 %v8118_v20  ;;  %v2785_v11 = vld [vmem:[#allocation2 + $0xa] sm:$0xff] }
 0x521   : > { %v2597_v50 = vld [vmem:[#allocation2] sm:$0xff]  ;;  %8123 = vmatprep.subr.bf16.mxu1 %v8122_v7  ;;  %v2598_v18 = vld [vmem:[#allocation2 + $0x8] sm:$0xff]  ;;  %v2950_v20 = vld [vmem:[#allocation15 + $0x38] sm:$0xff] }
 0x522   : > { %7400 = vmatprep.mubr.f32.mxu1 %v2597_v50  ;;  %v2784_v30 = vld [vmem:[#allocation2 + $0x2] sm:$0xff]  ;;  %v8182_v14 = vpack.c.bf16 %v2950_v20, %v2948_v5  ;;  %v2954_v50 = vld [vmem:[#allocation15 + $0x58] sm:$0xff] }
 0x523   : > { %v3067_v5 = vld [vmem:[#allocation17 + $0x18] sm:$0xff] }
 0x524   : > { %8125 = vmatpush3.bf16.msra.mxu1 %v8122_v7  ;;  %v2949_v7 = vld [vmem:[#allocation15 + $0x30] sm:$0xff]  ;;  %8183 = vmatprep.subr.bf16.mxu0 %v8182_v14  ;;  %v8216_v20 = vpack.c.bf16 %v3067_v5, %v3066_v41  ;;  %v3084_v14 = vld [vmem:[#allocation17 + $0xa0] sm:$0xff] }
 0x525   : > { %8127 = vmatprep.subr.bf16.mxu1 %v8126_v16  ;;  %v8184_v55 = vpack.c.bf16 %v2949_v7, %v2947_v31  ;;  %v3085_v31 = vld [vmem:[#allocation17 + $0xa8] sm:$0xff] }
 0x526   : > { %v8218_v7 = vpack.c.bf16 %v3085_v31, %v3084_v14 }
 0x527   : > { %8185 = vmatpush1.bf16.msra.mxu0 %v8184_v55  ;;  %v3068_v55 = vld [vmem:[#allocation17 + $0x20] sm:$0xff] }
 0x528   : > { %8129 = vmatpush3.bf16.msra.mxu1 %v8126_v16  ;;  %v8186_v16 = vpack.c.bf16 %v2954_v50, %v2952_v3  ;;  %v3069_v3 = vld [vmem:[#allocation17 + $0x28] sm:$0xff] }
 0x529   : > { %8131 = vmatprep.subr.bf16.mxu1 %v8130_v19  ;;  %v8220_v50 = vpack.c.bf16 %v3069_v3, %v3068_v55 }
 0x52a   : > { %8187 = vmatprep.subr.bf16.mxu0 %v8186_v16  ;;  %v3086_v16 = vld [vmem:[#allocation17 + $0xb0] sm:$0xff] }
 0x52c   : > { %8133 = vmatpush3.bf16.msra.mxu1 %v8130_v19  ;;  %v2956_v19 = vld [vmem:[#allocation15 + $0x68] sm:$0xff] }
 0x52d   : > { %8135 = vmatprep.subr.bf16.mxu1 %v8134_v58  ;;  %v8190_v34 = vpack.c.bf16 %v2958_v26, %v2956_v19  ;;  %v3071_v19 = vld [vmem:[#allocation17 + $0x38] sm:$0xff] }
 0x530   : > { %8137 = vmatpush3.bf16.msra.mxu1 %v8134_v58  ;;  %v2955_v58 = vld [vmem:[#allocation15 + $0x60] sm:$0xff] }
 0x531   : > { %8139 = vmatprep.subr.bf16.mxu1 %v8138_v0  ;;  %v8192_v17 = vpack.c.bf16 %v2957_v38, %v2955_v58  ;;  %v3089_v58 = vld [vmem:[#allocation17 + $0xc8] sm:$0xff] }
 0x534   : > { %8141 = vmatpush3.bf16.msra.mxu1 %v8138_v0  ;;  %v2960_v0 = vld [vmem:[#allocation15 + $0x88] sm:$0xff] }
 0x535   : > { %8143 = vmatprep.subr.bf16.mxu1 %v8142_v28  ;;  %v8194_v32 = vpack.c.bf16 %v2962_v46, %v2960_v0  ;;  %v3073_v0 = vld [vmem:[#allocation17 + $0x48] sm:$0xff] }
 0x538   : > { %8145 = vmatpush3.bf16.msra.mxu1 %v8142_v28  ;;  %v2959_v28 = vld [vmem:[#allocation15 + $0x80] sm:$0xff] }
 0x539   : > { %8147 = vmatprep.subr.bf16.mxu1 %v8146_v9  ;;  %v8196_v53 = vpack.c.bf16 %v2961_v13, %v2959_v28  ;;  %v3091_v28 = vld [vmem:[#allocation17 + $0xd8] sm:$0xff] }
 0x53b   : > { %7401 = vmatmul.mubr.f32.vlgmr.msra.gmra.mrb[8].mxu1 %v2598_v18  ;;  %v2965_v18 = vld [vmem:[#allocation15 + $0xb0] sm:$0xff] }
 0x53c   : > { %8149 = vmatpush3.bf16.msra.mxu1 %v8146_v9  ;;  %7435 = vmatprep.mubr.f32.mxu1 %v2784_v30  ;;  %v2964_v9 = vld [vmem:[#allocation15 + $0xa8] sm:$0xff]  ;;  %v2970_v30 = vld [vmem:[#allocation15 + $0xd8] sm:$0xff] }
 0x53d   : > { %8151 = vmatprep.subr.bf16.mxu1 %v8150_v27  ;;  %v8198_v44 = vpack.c.bf16 %v2966_v40, %v2964_v9  ;;  %v3075_v9 = vld [vmem:[#allocation17 + $0x58] sm:$0xff] }
 0x540   : > { %8153 = vmatpush3.bf16.msra.mxu1 %v8150_v27  ;;  %v2963_v27 = vld [vmem:[#allocation15 + $0xa0] sm:$0xff] }
 0x541   : > { %8155 = vmatprep.subr.bf16.mxu1 %v8154_v54  ;;  %v8200_v33 = vpack.c.bf16 %v2965_v18, %v2963_v27  ;;  %v3093_v27 = vld [vmem:[#allocation17 + $0xe8] sm:$0xff] }
 0x544   : > { %8157 = vmatpush3.bf16.msra.mxu1 %v8154_v54  ;;  %v8202_v54 = vpack.c.bf16 %v2970_v30, %v2968_v6  ;;  %v3077_v6 = vld [vmem:[#allocation17 + $0x68] sm:$0xff] }
 0x545   : > { %8159 = vmatprep.subr.bf16.mxu1 %v8158_v43 }
 0x548   : > { %8161 = vmatpush3.bf16.msra.mxu1 %v8158_v43  ;;  %v8204_v43 = vpack.c.bf16 %v2969_v52, %v2967_v37  ;;  %v3095_v37 = vld [vmem:[#allocation17 + $0xf8] sm:$0xff] }
 0x549   : > { %8163 = vmatprep.subr.bf16.mxu1 %v8162_v63 }
 0x54c   : > { %8165 = vmatpush3.bf16.msra.mxu1 %v8162_v63  ;;  %v8206_v63 = vpack.c.bf16 %v2974_v21, %v2972_v10  ;;  %v3079_v10 = vld [vmem:[#allocation17 + $0x78] sm:$0xff] }
 0x54d   : > { %8167 = vmatprep.subr.bf16.mxu1 %v8166_v57 }
 0x550   : > { %8169 = vmatpush3.bf16.msra.mxu1 %v8166_v57  ;;  %v3080_v57 = vld [vmem:[#allocation17 + $0x80] sm:$0xff] }
 0x551   : > { %8171 = vmatprep.subr.bf16.mxu1 %v8170_v36  ;;  %v8210_v42 = vpack.c.bf16 %v3081_v49, %v3080_v57 }
 0x554   : > { %8173 = vmatpush3.bf16.msra.mxu1 %v8170_v36  ;;  %v3064_v36 = vld [vmem:[#allocation17] sm:$0xff] }
 0x555   : > { %8175 = vmatprep.subr.bf16.mxu1 %v8174_v39 }
 0x558   : > { %8177 = vmatpush3.bf16.msra.mxu1 %v8174_v39  ;;  %v8212_v39 = vpack.c.bf16 %v3065_v1, %v3064_v36 }
 0x559   : > { %8211 = vmatprep.subr.bf16.mxu1 %v8210_v42 }
 0x55b   : > { %7436 = vmatmul.mubr.f32.vlgmr.msra.gmra.mrb[8].mxu1 %v2785_v11  ;;  %v3112_v11 = vld [vmem:[#allocation17 + $0x180] sm:$0xff] }
 0x55c   : > { %3199 = vmatprep.mubr.f32.mxu1 %v11317_v15  ;;  %v2951_v15 = vld [vmem:[#allocation15 + $0x40] sm:$0xff]  ;;  %v8242_v48 = vpack.c.bf16 %v3113_v56, %v3112_v11  ;;  %8213 = vmatpush3.bf16.msra.mxu1 %v8212_v39 }
 0x55d   : > { %v8188_v25 = vpack.c.bf16 %v2953_v8, %v2951_v15  ;;  %8215 = vmatprep.subr.bf16.mxu1 %v8214_v60  ;;  %v3087_v15 = vld [vmem:[#allocation17 + $0xb8] sm:$0xff] }
 0x55e   : > { %v8222_v8 = vpack.c.bf16 %v3087_v15, %v3086_v16 }
 0x55f   : > { %8189 = vmatpush1.bf16.msra.mxu0 %v8188_v25  ;;  %v3070_v25 = vld [vmem:[#allocation17 + $0x30] sm:$0xff] }
 0x560   : > { %8191 = vmatprep.subr.bf16.mxu0 %v8190_v34  ;;  %8217 = vmatpush3.bf16.msra.mxu1 %v8216_v20  ;;  %v8224_v26 = vpack.c.bf16 %v3071_v19, %v3070_v25  ;;  %v3088_v34 = vld [vmem:[#allocation17 + $0xc0] sm:$0xff] }
 0x561   : > { %8219 = vmatprep.subr.bf16.mxu1 %v8218_v7  ;;  %v8226_v38 = vpack.c.bf16 %v3089_v58, %v3088_v34 }
 0x563   : > { %8193 = vmatpush1.bf16.msra.mxu0 %v8192_v17  ;;  %v3072_v17 = vld [vmem:[#allocation17 + $0x40] sm:$0xff] }
 0x564   : > { %8195 = vmatprep.subr.bf16.mxu0 %v8194_v32  ;;  %8221 = vmatpush3.bf16.msra.mxu1 %v8220_v50  ;;  %v8228_v46 = vpack.c.bf16 %v3073_v0, %v3072_v17  ;;  %v3090_v32 = vld [vmem:[#allocation17 + $0xd0] sm:$0xff] }
 0x565   : > { %8223 = vmatprep.subr.bf16.mxu1 %v8222_v8  ;;  %v8230_v13 = vpack.c.bf16 %v3091_v28, %v3090_v32 }
 0x567   : > { %8197 = vmatpush1.bf16.msra.mxu0 %v8196_v53  ;;  %v3074_v53 = vld [vmem:[#allocation17 + $0x50] sm:$0xff] }
 0x568   : > { %8199 = vmatprep.subr.bf16.mxu0 %v8198_v44  ;;  %8225 = vmatpush3.bf16.msra.mxu1 %v8224_v26  ;;  %v8232_v40 = vpack.c.bf16 %v3075_v9, %v3074_v53  ;;  %v3092_v44 = vld [vmem:[#allocation17 + $0xe0] sm:$0xff] }
 0x569   : > { %8227 = vmatprep.subr.bf16.mxu1 %v8226_v38  ;;  %v8234_v18 = vpack.c.bf16 %v3093_v27, %v3092_v44 }
 0x56b   : > { %8201 = vmatpush1.bf16.msra.mxu0 %v8200_v33  ;;  %v3076_v33 = vld [vmem:[#allocation17 + $0x60] sm:$0xff] }
 0x56c   : > { %8203 = vmatprep.subr.bf16.mxu0 %v8202_v54  ;;  %8229 = vmatpush3.bf16.msra.mxu1 %v8228_v46  ;;  %v8236_v30 = vpack.c.bf16 %v3077_v6, %v3076_v33  ;;  %v3094_v54 = vld [vmem:[#allocation17 + $0xf0] sm:$0xff]  ;;  %v3097_v33 = vld [vmem:[#allocation17 + $0x108] sm:$0xff] }
 0x56d   : > { %8231 = vmatprep.subr.bf16.mxu1 %v8230_v13  ;;  %v8238_v52 = vpack.c.bf16 %v3095_v37, %v3094_v54  ;;  %v3115_v54 = vld [vmem:[#allocation17 + $0x198] sm:$0xff] }
 0x56f   : > { %8205 = vmatpush1.bf16.msra.mxu0 %v8204_v43  ;;  %v3078_v43 = vld [vmem:[#allocation17 + $0x70] sm:$0xff] }
 0x570   : > { %8207 = vmatprep.subr.bf16.mxu0 %v8206_v63  ;;  %8233 = vmatpush3.bf16.msra.mxu1 %v8232_v40  ;;  %v8240_v21 = vpack.c.bf16 %v3079_v10, %v3078_v43  ;;  %v6576_v63 = vld [vmem:[%s12017_s9] ss:$0 sm:$0xff]  ;;  %s9923_s9 = scalar_lea.vmem %s11693_s7, 256 }
 0x571   : > { %8235 = vmatprep.subr.bf16.mxu1 %v8234_v18  ;;  %v3096_v18 = vld [vmem:[#allocation17 + $0x100] sm:$0xff]  ;;  %p9924_p13 = scmp.ne.s32.totalorder %s11693_s7, %s9923_s9 }
 0x572   : > { %v8244_v43 = vpack.c.bf16 %v3097_v33, %v3096_v18  ;;  %v3363_v18 = vld [vmem:[#allocation18 + $0x88] sm:$0xff] }
 0x573   : > { %8209 = vmatpush1.bf16.msra.mxu0 %v8208_v24  ;;  %p9925_p3 = pnand %p9924_p13, %p12027_p7 }
 0x574   : > { %8243 = vmatprep.subr.bf16.mxu0 %v8242_v48  ;;  %8237 = vmatpush3.bf16.msra.mxu1 %v8236_v30  ;;  %v3114_v30 = vld [vmem:[#allocation17 + $0x190] sm:$0xff] }
 0x575   : > { %8239 = vmatprep.subr.bf16.mxu1 %v8238_v52  ;;  %p9926_p10 = pneg %p9925_p3 }
 0x578   : > { %8241 = vmatpush3.bf16.msra.mxu1 %v8240_v21  ;;  %v8246_v21 = vpack.c.bf16 %v3115_v54, %v3114_v30  ;;  %v3365_v30 = vld [vmem:[#allocation18 + $0x98] sm:$0xff] }
 0x57b   : > { %3200 = vmatmul.mubr.f32.vlgmr.msra.gmra.mrb[10].mxu1 %v11323_v45 }
 0x57c   : > { %3204 = vmatprep.mubr.f32.mxu1 %v11347_v62 }
 0x57f   : > { %3205 = vmatmul.mubr.f32.gmra.mrb[12].mxu1 %v11354_v22 }
 0x62e   : > { %v7437_v29 = vpop.f32.mrb[8].mxu1 }
 0x62f   : > { %v11390_v2 = vadd.f32 %v7437_v29, %v6576_v63  ;;  %v2869_v57 = vpop.f32.mrb[9].mxu1  ;;  %v3098_v29 = vld [vmem:[#allocation17 + $0x110] sm:$0xff] }
 0x630   : > { %v2887_v24 = vadd.f32 %v6576_v63, %v2869_v57  ;;  %v3099_v57 = vld [vmem:[#allocation17 + $0x118] sm:$0xff] }
 0x631   : > { %v2892_v49 = vmul.f32 0.70710677, %v11390_v2 }
 0x632   : > { %v2891_v36 = vmul.f32 0.70710677, %v2887_v24  ;;  %v2889_v37 = vmul.f32 0.5, %v2887_v24  ;;  %v3100_v24 = vld [vmem:[#allocation17 + $0x120] sm:$0xff] }
 0x633   : > { %v2898_v1 = vand.u32 2147483647, %v2892_v49  ;;  %vm2894_vm4 = vcmp.ge.f32.partialorder %v2892_v49, 0.0  ;;  %v3116_v49 = vld [vmem:[#allocation17 + $0x1a0] sm:$0xff] }
 0x634   : > { %v2897_v42 = vand.u32 2147483647, %v2891_v36  ;;  %vm2893_vm5 = vcmp.ge.f32.partialorder %v2891_v36, 0.0  ;;  %v2896_v40 = vsel %vm2894_vm4, 1.0, %v11973_v61  ;;  %v3117_v36 = vld [vmem:[#allocation17 + $0x1a8] sm:$0xff] }
 0x635   : > { %v2900_v39 = vmul.f32 0.3275911, %v2898_v1  ;;  %v2926_v45 = vsub.f32 0.0, %v2898_v1  ;;  %v2895_v44 = vsel %vm2893_vm5, 1.0, %v11973_v61 }
 0x636   : > { %v2899_v11 = vmul.f32 0.3275911, %v2897_v42  ;;  %v2925_v62 = vsub.f32 0.0, %v2897_v42 }
 0x637   : > { %v2902_v56 = vadd.f32 1.0, %v2900_v39  ;;  %v2928_v47 = vmul.f32 %v2926_v45, %v2898_v1  ;;  %v2890_v1 = vmul.f32 0.5, %v11390_v2  ;;  %v3119_v45 = vld [vmem:[#allocation17 + $0x1b8] sm:$0xff]  ;;  %v3102_v2 = vld [vmem:[#allocation17 + $0x130] sm:$0xff] }
 0x638   : > { %v2901_v48 = vadd.f32 1.0, %v2899_v11  ;;  %v2927_v60 = vmul.f32 %v2925_v62, %v2897_v42  ;;  %v8248_v42 = vpack.c.bf16 %v3099_v57, %v3098_v29  ;;  %v8250_v11 = vpack.c.bf16 %v3117_v36, %v3116_v49  ;;  %v3372_v29 = vld [vmem:[#allocation18 + $0xd0] sm:$0xff]  ;;  %v3373_v57 = vld [vmem:[#allocation18 + $0xd8] sm:$0xff]  ;;  %v3374_v36 = vld [vmem:[#allocation18 + $0xe0] sm:$0xff] }
 0x639   : > { %9335 = vrcp.f32 %v2902_v56  ;;  %v2931_v14 = vmul.f32 1.442695, %v2928_v47  ;;  %v3101_v56 = vld [vmem:[#allocation17 + $0x128] sm:$0xff]  ;;  %v3103_v47 = vld [vmem:[#allocation17 + $0x138] sm:$0xff]  ;;  %v8294_v49 = vpack.c.bf16 %v3373_v57, %v3372_v29 }
 0x63a   : > { %9337 = vrcp.f32 %v2901_v48  ;;  %v2929_v7 = vmul.f32 1.442695, %v2927_v60  ;;  %v3118_v48 = vld [vmem:[#allocation17 + $0x1b0] sm:$0xff]  ;;  %v8252_v62 = vpack.c.bf16 %v3101_v56, %v3100_v24  ;;  %v3121_v60 = vld [vmem:[#allocation17 + $0x1c8] sm:$0xff]  ;;  %v3343_v56 = vld [vmem:[#allocation18] sm:$0xff] }
 0x63b   : > { %9339 = vpow2.f32 %v2931_v14  ;;  %v3105_v14 = vld [vmem:[#allocation17 + $0x148] sm:$0xff] }
 0x63c   : > { %9341 = vpow2.f32 %v2929_v7  ;;  %v3123_v7 = vld [vmem:[#allocation17 + $0x1d8] sm:$0xff] }
 0x643   : > { %v9336_v22 = vpop.eup %9335 }
 0x644   : > { %v9338_v59 = vpop.eup %9337  ;;  %v2908_v41 = vmul.f32 1.0614054, %v9336_v22 }
 0x645   : > { %v2907_v5 = vmul.f32 1.0614054, %v9338_v59  ;;  %v9340_v0 = vpop.eup %9339 }
 0x646   : > { %v2910_v20 = vadd.f32 -1.4531521, %v2908_v41  ;;  %v9342_v32 = vpop.eup %9341  ;;  %v8256_v41 = vpack.c.bf16 %v3103_v47, %v3102_v2  ;;  %v2975_v47 = vld [vmem:[%s12018_s10] sm:$0x3]  ;;  %s10142_s10 = smov [#allocation31]  }
 0x647   : > { %v2909_v31 = vadd.f32 -1.4531521, %v2907_v5 }
 0x648   : > { %v2912_v55 = vmul.f32 %v9336_v22, %v2910_v20  ;;  %v3104_v20 = vld [vmem:[#allocation17 + $0x140] sm:$0xff] }
 0x649   : > { %v2911_v3 = vmul.f32 %v9338_v59, %v2909_v31  ;;  %v3122_v31 = vld [vmem:[#allocation17 + $0x1d0] sm:$0xff] }
 0x64a   : > { %v2914_v50 = vadd.f32 1.4214138, %v2912_v55  ;;  %v8260_v55 = vpack.c.bf16 %v3105_v14, %v3104_v20 }
 0x64b   : > { %v2913_v16 = vadd.f32 1.4214138, %v2911_v3  ;;  %v8262_v3 = vpack.c.bf16 %v3123_v7, %v3122_v31 }
 0x64c   : > { %v2916_v15 = vmul.f32 %v9336_v22, %v2914_v50  ;;  %v3106_v50 = vld [vmem:[#allocation17 + $0x150] sm:$0xff] }
 0x64d   : > { %v2915_v8 = vmul.f32 %v9338_v59, %v2913_v16  ;;  %v3124_v16 = vld [vmem:[#allocation17 + $0x1e0] sm:$0xff] }
 0x64e   : > { %v2918_v25 = vadd.f32 -0.28449672, %v2916_v15  ;;  %v3125_v15 = vld [vmem:[#allocation17 + $0x1e8] sm:$0xff] }
 0x64f   : > { %v2917_v19 = vadd.f32 -0.28449672, %v2915_v8 }
 0x650   : > { %v2920_v26 = vmul.f32 %v9336_v22, %v2918_v25  ;;  %v8266_v25 = vpack.c.bf16 %v3125_v15, %v3124_v16 }
 0x651   : > { %v2919_v34 = vmul.f32 %v9338_v59, %v2917_v19  ;;  %v3108_v19 = vld [vmem:[#allocation17 + $0x160] sm:$0xff] }
 0x652   : > { %v2922_v58 = vadd.f32 0.2548296, %v2920_v26  ;;  %v3109_v26 = vld [vmem:[#allocation17 + $0x168] sm:$0xff] }
 0x653   : > { %v2921_v38 = vadd.f32 0.2548296, %v2919_v34  ;;  %v3126_v34 = vld [vmem:[#allocation17 + $0x1f0] sm:$0xff] }
 0x654   : > { %v2924_v17 = vmul.f32 %v9336_v22, %v2922_v58  ;;  %v8254_v22 = vpack.c.bf16 %v3119_v45, %v3118_v48  ;;  %v3127_v58 = vld [vmem:[#allocation17 + $0x1f8] sm:$0xff]  ;;  %v3344_v48 = vld [vmem:[#allocation18 + $0x8] sm:$0xff] }
 0x655   : > { %v2923_v46 = vmul.f32 %v9338_v59, %v2921_v38  ;;  %v3120_v59 = vld [vmem:[#allocation17 + $0x1c0] sm:$0xff]  ;;  %v8268_v38 = vpack.c.bf16 %v3109_v26, %v3108_v19  ;;  %v11405_v45 = vpack.c.bf16 %v3344_v48, %v3343_v56 }
 0x656   : > { %v2934_v28 = vmul.f32 %v9340_v0, %v2924_v17  ;;  %v8258_v5 = vpack.c.bf16 %v3121_v60, %v3120_v59  ;;  %v8270_v17 = vpack.c.bf16 %v3127_v58, %v3126_v34  ;;  %v3110_v0 = vld [vmem:[#allocation17 + $0x170] sm:$0xff] }
 0x657   : > { %v2933_v13 = vmul.f32 %v9342_v32, %v2923_v46  ;;  %v3111_v46 = vld [vmem:[#allocation17 + $0x178] sm:$0xff] }
 0x658   : > { %v2936_v53 = vsub.f32 1.0, %v2934_v28  ;;  %v8272_v32 = vpack.c.bf16 %v3111_v46, %v3110_v0  ;;  %v6892_v28 = vpop.f32.mrb[10].mxu1 }
 0x659   : > { %v2935_v9 = vsub.f32 1.0, %v2933_v13  ;;  %v6893_v13 = vpop.f32.mrb[11].mxu1 }
 0x65a   : > { %v2938_v6 = vmul.f32 %v2936_v53, %v2896_v40  ;;  %v11401_v53 = vadd.f32 %v6893_v13, %v6892_v28 }
 0x65b   : > { %v2937_v27 = vmul.f32 %v2935_v9, %v2895_v44  ;;  %v6895_v9 = vpop.f32.mrb[12].mxu1 }
 0x65c   : > { %v2940_v63 = vadd.f32 1.0, %v2938_v6  ;;  %v6896_v40 = vpop.f32.mrb[13].mxu1  ;;  %v3364_v6 = vld [vmem:[#allocation18 + $0x90] sm:$0xff] }
 0x65d   : > { %v2939_v52 = vadd.f32 1.0, %v2937_v27  ;;  %v11403_v44 = vadd.f32 %v6896_v40, %v6895_v9  ;;  %v3362_v27 = vld [vmem:[#allocation18 + $0x80] sm:$0xff] }
 0x65e   : > { %v2942_v39 = vmul.f32 %v2940_v63, %v2890_v1  ;;  %v8274_v33 = vpack.c.bf16 %v3363_v18, %v3362_v27  ;;  %v3375_v1 = vld [vmem:[#allocation18 + $0xe8] sm:$0xff] }
 0x65f   : > { %v2941_v10 = vmul.f32 %v2939_v52, %v2889_v37  ;;  %v3368_v37 = vld [vmem:[#allocation18 + $0xb0] sm:$0xff]  ;;  %v3369_v52 = vld [vmem:[#allocation18 + $0xb8] sm:$0xff] }
 0x660   : > { %8275 = vmatprep.subr.bf16.mxu1 %v8274_v33 }
 0x661   : > { %3052 = vmatmul.mubr.f32.vlgmr.msra.gmra.mrb[10].mxu0 %v2941_v10  ;;  %8277 = vmatpush3.bf16.msra.mxu1 %v8274_v33  ;;  %v3370_v10 = vld [vmem:[#allocation18 + $0xc0] sm:$0xff] }
 0x662   : > { %8245 = vmatpush3.bf16.msra.mxu0 %v8244_v43  ;;  %3057 = vmatprep.mubr.f32.mxu0 %v10141_v12  ;;  %v8286_v43 = vpack.c.bf16 %v3369_v52, %v3368_v37 }
 0x663   : > { %8247 = vmatprep.subr.bf16.mxu0 %v8246_v21  ;;  %v3371_v21 = vld [vmem:[#allocation18 + $0xc8] sm:$0xff] }
 0x664   : > { %v8290_v63 = vpack.c.bf16 %v3371_v21, %v3370_v10 }
 0x665   : > { %3058 = vmatmul.mubr.f32.gmra.mrb[12].mxu0 %v2942_v39  ;;  %v3376_v39 = vld [vmem:[#allocation18 + $0xf0] sm:$0xff] }
 0x666   : > { %8249 = vmatpush3.bf16.msra.mxu0 %v8248_v42  ;;  %3274 = vmatprep.mubr.f32.mxu0 %v11334_v35  ;;  %v3107_v35 = vld [vmem:[#allocation17 + $0x158] sm:$0xff]  ;;  %v8298_v42 = vpack.c.bf16 %v3375_v1, %v3374_v36 }
 0x667   : > { %8251 = vmatprep.subr.bf16.mxu0 %v8250_v11  ;;  %v8264_v8 = vpack.c.bf16 %v3107_v35, %v3106_v50  ;;  %v3377_v11 = vld [vmem:[#allocation18 + $0xf8] sm:$0xff]  ;;  %v1322_v35 = vld [vmem:[%s1146_s18] sm:$0xff] }
 0x668   : > { %v8302_v24 = vpack.c.bf16 %v3377_v11, %v3376_v39 }
 0x66a   : > { %8253 = vmatpush3.bf16.msra.mxu0 %v8252_v62  ;;  %v2977_v62 = vlaneseq }
 0x66b   : > { %8255 = vmatprep.subr.bf16.mxu0 %v8254_v22 }
 0x66c   : > { %v11408_v22 = vshrl.u32 %v2977_v62, 7 }
 0x66e   : > { %8257 = vmatpush3.bf16.msra.mxu0 %v8256_v41  ;;  %v11411_v2 = vsub.s32 1, %v11408_v22 }
 0x66f   : > { %8259 = vmatprep.subr.bf16.mxu0 %v8258_v5 }
 0x670   : > { %v2984_v59 = vrot.slane %v2975_v47, %v11411_v2 }
 0x672   : > { %8261 = vmatpush3.bf16.msra.mxu0 %v8260_v55 }
 0x673   : > { %8263 = vmatprep.subr.bf16.mxu0 %v8262_v3  ;;  %v11422_v3 = vsub.s32 0, %v11408_v22 }
 0x675   : > { %v2980_v50 = vrot.slane %v2975_v47, %v11422_v3 }
 0x676   : > { %8265 = vmatpush3.bf16.msra.mxu0 %v8264_v8 }
 0x677   : > { %8267 = vmatprep.subr.bf16.mxu0 %v8266_v25  ;;  %v1323_v25 = vld [vmem:[%s1146_s18 + $0x8] sm:$0xff]  ;;  %s6597_s18 = sshll.u32 %s10340_s11, 8 }
 0x678   : > { %s11691_s12 = scalar_lea.hbm %s10312_s20, %s6597_s18 }
 0x67a   : > { %8269 = vmatpush3.bf16.msra.mxu0 %v8268_v38 }
 0x67b   : > { %8271 = vmatprep.subr.bf16.mxu0 %v8270_v17  ;;  %v6577_v17 = vld [vmem:[%s12019_s13] ss:$0 sm:$0xff]  ;;  %s9927_s13 = sshll.u32 %s10142_s10, 4  ;;  %s9928_s13 = int_to_ptr.vmem [resolvable:$false] %s9927_s13 }
 0x67c   : > { %v3202_v0 = vadd.f32 %v11401_v53, %v6577_v17  ;;  %v3207_v9 = vadd.f32 %v11403_v44, %v6577_v17  ;;  %p9930_p11 = scmp.lt.s32.totalorder %s11693_s7, %s9928_s13 }
 0x67e   : > { %8273 = vmatpush3.bf16.msra.mxu0 %v8272_v32 }
 0x681   : > { %3275 = vmatmul.mubr.f32.vlgmr.msra.gmra.mrb[14].mxu0 %v11341_v23  ;;  %v8278_v23 = vpack.c.bf16 %v3365_v30, %v3364_v6 }
 0x682   : > { %3279 = vmatprep.mubr.f32.mxu0 %v11359_v4  ;;  %v3366_v4 = vld [vmem:[#allocation18 + $0xa0] sm:$0xff] }
 0x683   : > { %8279 = vmatprep.subr.bf16.mxu1 %v8278_v23 }
 0x684   : > { %8281 = vmatpush3.bf16.msra.mxu1 %v8278_v23 }
 0x685   : > { %3280 = vmatmul.mubr.f32.gmra.mrb[16].mxu0 %v11364_v51  ;;  %v3367_v51 = vld [vmem:[#allocation18 + $0xa8] sm:$0xff] }
 0x686   : > { %v8282_v54 = vpack.c.bf16 %v3367_v51, %v3366_v4 }
 0x688   : > { %8283 = vmatprep.subr.bf16.mxu1 %v8282_v54 }
 0x689   : > { %8285 = vmatpush3.bf16.msra.mxu1 %v8282_v54 }
 0x68a   : > { %8287 = vmatprep.subr.bf16.mxu1 %v8286_v43 }
 0x68d   : > { %8289 = vmatpush3.bf16.msra.mxu1 %v8286_v43 }
 0x68e   : > { %8291 = vmatprep.subr.bf16.mxu1 %v8290_v63 }
 0x691   : > { %8293 = vmatpush3.bf16.msra.mxu1 %v8290_v63 }
 0x692   : > { %8295 = vmatprep.subr.bf16.mxu1 %v8294_v49 }
 0x695   : > { %8297 = vmatpush3.bf16.msra.mxu1 %v8294_v49 }
 0x696   : > { %8299 = vmatprep.subr.bf16.mxu1 %v8298_v42 }
 0x699   : > { %8301 = vmatpush3.bf16.msra.mxu1 %v8298_v42 }
 0x69a   : > { %8303 = vmatprep.subr.bf16.mxu1 %v8302_v24 }
 0x69d   : > { %8305 = vmatpush3.bf16.msra.mxu1 %v8302_v24 }
 0x69e   : > { %8307 = vmatprep.subr.bf16.mxu1 %v11405_v45 }
 0x734   : > { %v3053_v60 = vpop.f32.mrb[10].mxu0 }
 0x735   : > { %v3055_v41 = vpop.f32.mrb[11].mxu0  ;;  %v11429_v15 = vadd.f32 %v3053_v60, %v2980_v50 }
 0x736   : > { %v11415_v5 = vadd.f32 %v3055_v41, %v2984_v59 }
 0x738   : > { %v4394_v20 = vmul.f32 1.442695, %v11415_v5  ;;  %v3059_v14 = vpop.f32.mrb[12].mxu0 }
 0x739   : > { %v3061_v31 = vpop.f32.mrb[13].mxu0  ;;  %v11437_v34 = vadd.f32 %v3059_v14, %v2980_v50 }
 0x73a   : > { %9343 = vpow2.f32 %v4394_v20  ;;  %v11418_v7 = vadd.f32 %v3061_v31, %v2984_v59 }
 0x73c   : > { %v4396_v55 = vmul.f32 1.442695, %v11418_v7 }
 0x73e   : > { %9345 = vpow2.f32 %v4396_v55 }
 0x744   : > { %v11427_v16 = vpop.eup %9343 }
 0x745   : > { %v4398_v8 = vmul.f32 %v11427_v16, %v1322_v35 }
 0x747   : > { %v4400_v19 = vadd.f32 %v4398_v8, %v11429_v15 }
 0x748   : > { %v11435_v26 = vpop.eup %9345 }
 0x749   : > { %v4399_v58 = vmul.f32 %v11435_v26, %v1323_v25  ;;  %6109 = vst [vmem:[%s11441_s5] sm:$0xff] %v4400_v19 }
 0x74b   : > { %v4401_v38 = vadd.f32 %v4399_v58, %v11437_v34 }
 0x74d   : > { %6110 = vst [vmem:[%s11441_s5 + $0x8] sm:$0xff] %v4401_v38 }
 0x754   : > { %v6930_v46 = vpop.f32.mrb[14].mxu0 }
 0x755   : > { %v6931_v32 = vpop.f32.mrb[15].mxu0 }
 0x756   : > { %v6932_v28 = vadd.f32 %v6931_v32, %v6930_v46 }
 0x758   : > { %v3277_v13 = vadd.f32 %v6932_v28, %v3202_v0  ;;  %v6933_v40 = vpop.f32.mrb[16].mxu0 }
 0x759   : > { %v6934_v27 = vpop.f32.mrb[17].mxu0 }
 0x75a   : > { %v3287_v18 = vmul.f32 0.70710677, %v3277_v13  ;;  %v6935_v33 = vadd.f32 %v6934_v27, %v6933_v40  ;;  %v3285_v17 = vmul.f32 0.5, %v3277_v13  ;;  %v3345_v40 = vld [vmem:[#allocation18 + $0x10] sm:$0xff]  ;;  %v3346_v27 = vld [vmem:[#allocation18 + $0x18] sm:$0xff] }
 0x75c   : > { %v3293_v6 = vand.u32 2147483647, %v3287_v18  ;;  %v3282_v30 = vadd.f32 %v6935_v33, %v3207_v9  ;;  %vm3289_vm6 = vcmp.ge.f32.partialorder %v3287_v18, 0.0 }
 0x75d   : > { %v3291_v19 = vsel %vm3289_vm6, 1.0, %v11973_v61 }
 0x75e   : > { %v3295_v23 = vmul.f32 0.3275911, %v3293_v6  ;;  %v3288_v4 = vmul.f32 0.70710677, %v3282_v30  ;;  %v3321_v53 = vsub.f32 0.0, %v3293_v6  ;;  %v3286_v18 = vmul.f32 0.5, %v3282_v30 }
 0x75f   : > { %v3351_v30 = vld [vmem:[#allocation18 + $0x40] sm:$0xff] }
 0x760   : > { %v3297_v51 = vadd.f32 1.0, %v3295_v23  ;;  %v3294_v54 = vand.u32 2147483647, %v3288_v4  ;;  %v3323_v10 = vmul.f32 %v3321_v53, %v3293_v6  ;;  %vm3290_vm7 = vcmp.ge.f32.partialorder %v3288_v4, 0.0 }
 0x761   : > { %v3292_v32 = vsel %vm3290_vm7, 1.0, %v11973_v61  ;;  %v8310_v23 = vpack.c.bf16 %v3346_v27, %v3345_v40  ;;  %v3711_v40 = vld [vmem:[#allocation20 + $0x88] sm:$0xff] }
 0x762   : > { %9347 = vrcp.f32 %v3297_v51  ;;  %v3296_v37 = vmul.f32 0.3275911, %v3294_v54  ;;  %v3322_v21 = vsub.f32 0.0, %v3294_v54  ;;  %v3325_v57 = vmul.f32 1.442695, %v3323_v10  ;;  %v3347_v51 = vld [vmem:[#allocation18 + $0x20] sm:$0xff] }
 0x764   : > { %v3298_v52 = vadd.f32 1.0, %v3296_v37  ;;  %v3324_v49 = vmul.f32 %v3322_v21, %v3294_v54  ;;  %v3348_v54 = vld [vmem:[#allocation18 + $0x28] sm:$0xff]  ;;  %v3349_v37 = vld [vmem:[#allocation18 + $0x30] sm:$0xff] }
 0x765   : > { %v8314_v13 = vpack.c.bf16 %v3348_v54, %v3347_v51  ;;  %v3353_v21 = vld [vmem:[#allocation18 + $0x50] sm:$0xff]  ;;  %v3715_v51 = vld [vmem:[#allocation20 + $0xa8] sm:$0xff] }
 0x766   : > { %9349 = vrcp.f32 %v3298_v52  ;;  %v3327_v11 = vmul.f32 1.442695, %v3324_v49  ;;  %v3350_v52 = vld [vmem:[#allocation18 + $0x38] sm:$0xff]  ;;  %v3357_v49 = vld [vmem:[#allocation18 + $0x70] sm:$0xff] }
 0x767   : > { %9351 = vpow2.f32 %v3325_v57  ;;  %v8318_v53 = vpack.c.bf16 %v3350_v52, %v3349_v37  ;;  %v3718_v52 = vld [vmem:[#allocation20 + $0xc0] sm:$0xff] }
 0x768   : > { %9353 = vpow2.f32 %v3327_v11 }
 0x76c   : > { %v9348_v43 = vpop.eup %9347 }
 0x76d   : > { %v3303_v63 = vmul.f32 1.0614054, %v9348_v43 }
 0x76f   : > { %v3305_v44 = vadd.f32 -1.4531521, %v3303_v63  ;;  %v3354_v63 = vld [vmem:[#allocation18 + $0x58] sm:$0xff] }
 0x770   : > { %v9350_v29 = vpop.eup %9349 }
 0x771   : > { %v3307_v36 = vmul.f32 %v9348_v43, %v3305_v44  ;;  %v3304_v1 = vmul.f32 1.0614054, %v9350_v29  ;;  %v9352_v31 = vpop.eup %9351  ;;  %v8326_v44 = vpack.c.bf16 %v3354_v63, %v3353_v21  ;;  %v3722_v63 = vld [vmem:[#allocation20 + $0xe0] sm:$0xff] }
 0x772   : > { %v9354_v25 = vpop.eup %9353 }
 0x773   : > { %v3309_v42 = vadd.f32 1.4214138, %v3307_v36  ;;  %v3306_v39 = vadd.f32 -1.4531521, %v3304_v1  ;;  %v3358_v36 = vld [vmem:[#allocation18 + $0x78] sm:$0xff] }
 0x774   : > { %v8334_v1 = vpack.c.bf16 %v3358_v36, %v3357_v49  ;;  %v3691_v36 = vld [vmem:[#allocation20] sm:$0xff] }
 0x775   : > { %v3311_v24 = vmul.f32 %v9348_v43, %v3309_v42  ;;  %v3308_v56 = vmul.f32 %v9350_v29, %v3306_v39  ;;  %v3531_v42 = vld [vmem:[#allocation18 + $0x100] sm:$0xff]  ;;  %v3532_v39 = vld [vmem:[#allocation18 + $0x108] sm:$0xff] }
 0x776   : > { %v8338_v11 = vpack.c.bf16 %v3532_v39, %v3531_v42  ;;  %v6578_v39 = vld [vmem:[%s12020_s22] ss:$0 sm:$0xff] }
 0x777   : > { %v3313_v48 = vadd.f32 -0.28449672, %v3311_v24  ;;  %v3310_v62 = vadd.f32 1.4214138, %v3308_v56  ;;  %v3533_v24 = vld [vmem:[#allocation18 + $0x110] sm:$0xff]  ;;  %v3534_v56 = vld [vmem:[#allocation18 + $0x118] sm:$0xff] }
 0x779   : > { %v3315_v47 = vmul.f32 %v9348_v43, %v3313_v48  ;;  %v3312_v59 = vmul.f32 %v9350_v29, %v3310_v62  ;;  %v8342_v48 = vpack.c.bf16 %v3534_v56, %v3533_v24 }
 0x77b   : > { %v3317_v60 = vadd.f32 0.2548296, %v3315_v47  ;;  %v3314_v41 = vadd.f32 -0.28449672, %v3312_v59  ;;  %v3535_v47 = vld [vmem:[#allocation18 + $0x120] sm:$0xff]  ;;  %v3536_v59 = vld [vmem:[#allocation18 + $0x128] sm:$0xff] }
 0x77d   : > { %v3319_v20 = vmul.f32 %v9348_v43, %v3317_v60  ;;  %v3316_v14 = vmul.f32 %v9350_v29, %v3314_v41  ;;  %v3352_v43 = vld [vmem:[#allocation18 + $0x48] sm:$0xff]  ;;  %v8346_v41 = vpack.c.bf16 %v3536_v59, %v3535_v47 }
 0x77e   : > { %v8322_v10 = vpack.c.bf16 %v3352_v43, %v3351_v30  ;;  %v3720_v43 = vld [vmem:[#allocation20 + $0xd0] sm:$0xff] }
 0x77f   : > { %v3329_v55 = vmul.f32 %v9352_v31, %v3319_v20  ;;  %v3318_v50 = vadd.f32 0.2548296, %v3316_v14  ;;  %v3537_v20 = vld [vmem:[#allocation18 + $0x130] sm:$0xff]  ;;  %v3538_v14 = vld [vmem:[#allocation18 + $0x138] sm:$0xff] }
 0x780   : > { %v8350_v31 = vpack.c.bf16 %v3538_v14, %v3537_v20 }
 0x781   : > { %v3331_v35 = vsub.f32 1.0, %v3329_v55  ;;  %v3320_v8 = vmul.f32 %v9350_v29, %v3318_v50  ;;  %v3356_v29 = vld [vmem:[#allocation18 + $0x68] sm:$0xff]  ;;  %v3539_v55 = vld [vmem:[#allocation18 + $0x140] sm:$0xff] }
 0x782   : > { %v3540_v50 = vld [vmem:[#allocation18 + $0x148] sm:$0xff] }
 0x783   : > { %v3333_v58 = vmul.f32 %v3331_v35, %v3291_v19  ;;  %v3330_v38 = vmul.f32 %v9354_v25, %v3320_v8  ;;  %v8354_v35 = vpack.c.bf16 %v3540_v50, %v3539_v55  ;;  %v3541_v8 = vld [vmem:[#allocation18 + $0x150] sm:$0xff]  ;;  %v3542_v25 = vld [vmem:[#allocation18 + $0x158] sm:$0xff] }
 0x784   : > { %v8358_v19 = vpack.c.bf16 %v3542_v25, %v3541_v8 }
 0x785   : > { %v3335_v0 = vadd.f32 1.0, %v3333_v58  ;;  %v3332_v46 = vsub.f32 1.0, %v3330_v38  ;;  %v3543_v58 = vld [vmem:[#allocation18 + $0x160] sm:$0xff]  ;;  %v3544_v38 = vld [vmem:[#allocation18 + $0x168] sm:$0xff] }
 0x787   : > { %v3337_v28 = vmul.f32 %v3335_v0, %v3285_v17  ;;  %v3334_v9 = vmul.f32 %v3332_v46, %v3292_v32  ;;  %v8362_v17 = vpack.c.bf16 %v3544_v38, %v3543_v58  ;;  %v3545_v0 = vld [vmem:[#allocation18 + $0x170] sm:$0xff]  ;;  %v3546_v46 = vld [vmem:[#allocation18 + $0x178] sm:$0xff] }
 0x788   : > { %v8366_v32 = vpack.c.bf16 %v3546_v46, %v3545_v0 }
 0x789   : > { %3339 = vst [vmem:[#allocation2 + $0x1] sm:$0xff] %v3337_v28  ;;  %v3336_v33 = vadd.f32 1.0, %v3334_v9  ;;  %7470 = vmatprep.mubr.f32.mxu1 %v3337_v28  ;;  %v3710_v9 = vld [vmem:[#allocation20 + $0x80] sm:$0xff] }
 0x78a   : > { %v8370_v27 = vpack.c.bf16 %v3711_v40, %v3710_v9 }
 0x78b   : > { %v3338_v6 = vmul.f32 %v3336_v33, %v3286_v18  ;;  %v3712_v18 = vld [vmem:[#allocation20 + $0x90] sm:$0xff]  ;;  %v3713_v33 = vld [vmem:[#allocation20 + $0x98] sm:$0xff] }
 0x78c   : > { %8371 = vmatprep.subr.bf16.mxu0 %v8370_v27 }
 0x78d   : > { %3340 = vst [vmem:[#allocation2 + $0x9] sm:$0xff] %v3338_v6  ;;  %7471 = vmatmul.mubr.f32.vlgmr.msra.gmra.mrb[14].mxu1 %v3338_v6  ;;  %8373 = vmatpush3.bf16.msra.mxu0 %v8370_v27  ;;  %v8374_v6 = vpack.c.bf16 %v3713_v33, %v3712_v18 }
 0x78e   : > { %8309 = vmatpush3.bf16.msra.mxu1 %v11405_v45  ;;  %v3355_v45 = vld [vmem:[#allocation18 + $0x60] sm:$0xff] }
 0x78f   : > { %8311 = vmatprep.subr.bf16.mxu1 %v8310_v23  ;;  %v8330_v57 = vpack.c.bf16 %v3356_v29, %v3355_v45  ;;  %8375 = vmatprep.subr.bf16.mxu0 %v8374_v6  ;;  %v3724_v29 = vld [vmem:[#allocation20 + $0xf0] sm:$0xff] }
 0x790   : > { %v3341_v4 = vld [vmem:[#allocation2] sm:$0xff] }
 0x791   : > { %7505 = vmatprep.mubr.f32.mxu1 %v3341_v4  ;;  %8377 = vmatpush3.bf16.msra.mxu0 %v8374_v6  ;;  %v3717_v4 = vld [vmem:[#allocation20 + $0xb8] sm:$0xff] }
 0x792   : > { %8313 = vmatpush3.bf16.msra.mxu1 %v8310_v23  ;;  %v3714_v23 = vld [vmem:[#allocation20 + $0xa0] sm:$0xff] }
 0x793   : > { %8315 = vmatprep.subr.bf16.mxu1 %v8314_v13  ;;  %v8378_v54 = vpack.c.bf16 %v3715_v51, %v3714_v23 }
 0x794   : > { %v3342_v62 = vld [vmem:[#allocation2 + $0x8] sm:$0xff] }
 0x795   : > { %v3528_v60 = vld [vmem:[#allocation2 + $0x2] sm:$0xff]  ;;  %v3529_v28 = vld [vmem:[#allocation2 + $0xa] sm:$0xff]  ;;  %8379 = vmatprep.subr.bf16.mxu0 %v8378_v54 }
 0x796   : > { %8317 = vmatpush3.bf16.msra.mxu1 %v8314_v13  ;;  %8381 = vmatpush3.bf16.msra.mxu0 %v8378_v54  ;;  %v3716_v13 = vld [vmem:[#allocation20 + $0xb0] sm:$0xff] }
 0x797   : > { %8319 = vmatprep.subr.bf16.mxu1 %v8318_v53  ;;  %v8382_v37 = vpack.c.bf16 %v3717_v4, %v3716_v13 }
 0x799   : > { %8383 = vmatprep.subr.bf16.mxu0 %v8382_v37 }
 0x79a   : > { %8321 = vmatpush3.bf16.msra.mxu1 %v8318_v53  ;;  %8385 = vmatpush3.bf16.msra.mxu0 %v8382_v37  ;;  %v3719_v53 = vld [vmem:[#allocation20 + $0xc8] sm:$0xff] }
 0x79b   : > { %8323 = vmatprep.subr.bf16.mxu1 %v8322_v10  ;;  %v8386_v30 = vpack.c.bf16 %v3719_v53, %v3718_v52 }
 0x79d   : > { %8387 = vmatprep.subr.bf16.mxu0 %v8386_v30 }
 0x79e   : > { %8325 = vmatpush3.bf16.msra.mxu1 %v8322_v10  ;;  %8389 = vmatpush3.bf16.msra.mxu0 %v8386_v30  ;;  %v3721_v10 = vld [vmem:[#allocation20 + $0xd8] sm:$0xff] }
 0x79f   : > { %8327 = vmatprep.subr.bf16.mxu1 %v8326_v44  ;;  %v8390_v21 = vpack.c.bf16 %v3721_v10, %v3720_v43 }
 0x7a1   : > { %8391 = vmatprep.subr.bf16.mxu0 %v8390_v21 }
 0x7a2   : > { %8329 = vmatpush3.bf16.msra.mxu1 %v8326_v44  ;;  %8393 = vmatpush3.bf16.msra.mxu0 %v8390_v21  ;;  %v3723_v44 = vld [vmem:[#allocation20 + $0xe8] sm:$0xff] }
 0x7a3   : > { %8331 = vmatprep.subr.bf16.mxu1 %v8330_v57  ;;  %v8394_v45 = vpack.c.bf16 %v3723_v44, %v3722_v63 }
 0x7a5   : > { %8395 = vmatprep.subr.bf16.mxu0 %v8394_v45 }
 0x7a6   : > { %8333 = vmatpush3.bf16.msra.mxu1 %v8330_v57  ;;  %8397 = vmatpush3.bf16.msra.mxu0 %v8394_v45  ;;  %v3725_v57 = vld [vmem:[#allocation20 + $0xf8] sm:$0xff] }
 0x7a7   : > { %8335 = vmatprep.subr.bf16.mxu1 %v8334_v1  ;;  %v8398_v49 = vpack.c.bf16 %v3725_v57, %v3724_v29 }
 0x7a9   : > { %8399 = vmatprep.subr.bf16.mxu0 %v8398_v49 }
 0x7aa   : > { %8337 = vmatpush3.bf16.msra.mxu1 %v8334_v1  ;;  %8401 = vmatpush3.bf16.msra.mxu0 %v8398_v49  ;;  %v3692_v1 = vld [vmem:[#allocation20 + $0x8] sm:$0xff] }
 0x7ab   : > { %8339 = vmatprep.subr.bf16.mxu1 %v8338_v11  ;;  %v11453_v42 = vpack.c.bf16 %v3692_v1, %v3691_v36 }
 0x7ad   : > { %7506 = vmatmul.mubr.f32.vlgmr.msra.gmra.mrb[14].mxu1 %v3342_v62  ;;  %8403 = vmatprep.subr.bf16.mxu0 %v11453_v42 }
 0x7ae   : > { %8341 = vmatpush3.bf16.msra.mxu1 %v8338_v11  ;;  %7540 = vmatprep.mubr.f32.mxu1 %v3528_v60 }
 0x7af   : > { %8343 = vmatprep.subr.bf16.mxu1 %v8342_v48 }
 0x7b2   : > { %8345 = vmatpush3.bf16.msra.mxu1 %v8342_v48 }
 0x7b3   : > { %8347 = vmatprep.subr.bf16.mxu1 %v8346_v41 }
 0x7b6   : > { %8349 = vmatpush3.bf16.msra.mxu1 %v8346_v41 }
 0x7b7   : > { %8351 = vmatprep.subr.bf16.mxu1 %v8350_v31 }
 0x7ba   : > { %8353 = vmatpush3.bf16.msra.mxu1 %v8350_v31 }
 0x7bb   : > { %8355 = vmatprep.subr.bf16.mxu1 %v8354_v35 }
 0x7be   : > { %8357 = vmatpush3.bf16.msra.mxu1 %v8354_v35 }
 0x7bf   : > { %8359 = vmatprep.subr.bf16.mxu1 %v8358_v19 }
 0x7c2   : > { %8361 = vmatpush3.bf16.msra.mxu1 %v8358_v19 }
 0x7c3   : > { %8363 = vmatprep.subr.bf16.mxu1 %v8362_v17 }
 0x7c6   : > { %8365 = vmatpush3.bf16.msra.mxu1 %v8362_v17 }
 0x7c7   : > { %8367 = vmatprep.subr.bf16.mxu1 %v8366_v32 }
 0x7ca   : > { %8369 = vmatpush3.bf16.msra.mxu1 %v8366_v32 }
 0x7cd   : > { %7541 = vmatmul.mubr.f32.vlgmr.msra.gmra.mrb[14].mxu1 %v3529_v28 }
 0x7ce   : > { %4227 = vmatprep.mubr.f32.mxu1 %v10141_v12 }
 0x8a0   : > { %v7542_v11 = vpop.f32.mrb[14].mxu1 }
 0x8a1   : > { %v3632_v24 = vadd.f32 %v7542_v11, %v6578_v39  ;;  %v3613_v56 = vpop.f32.mrb[15].mxu1  ;;  %v3693_v11 = vld [vmem:[#allocation20 + $0x10] sm:$0xff] }
 0x8a2   : > { %v3631_v48 = vadd.f32 %v6578_v39, %v3613_v56  ;;  %v3694_v56 = vld [vmem:[#allocation20 + $0x18] sm:$0xff] }
 0x8a3   : > { %v3636_v62 = vmul.f32 0.70710677, %v3632_v24  ;;  %v3634_v49 = vmul.f32 0.5, %v3632_v24  ;;  %v3698_v24 = vld [vmem:[#allocation20 + $0x38] sm:$0xff] }
 0x8a4   : > { %v3635_v47 = vmul.f32 0.70710677, %v3631_v48  ;;  %v3633_v1 = vmul.f32 0.5, %v3631_v48 }
 0x8a5   : > { %v3642_v59 = vand.u32 2147483647, %v3636_v62  ;;  %vm3638_vm8 = vcmp.ge.f32.partialorder %v3636_v62, 0.0  ;;  %v8406_v62 = vpack.c.bf16 %v3694_v56, %v3693_v11  ;;  %v4038_v11 = vld [vmem:[#allocation21 + $0x18] sm:$0xff] }
 0x8a6   : > { %v3641_v60 = vand.u32 2147483647, %v3635_v47  ;;  %vm3637_vm9 = vcmp.ge.f32.partialorder %v3635_v47, 0.0  ;;  %v3640_v63 = vsel %vm3638_vm8, 1.0, %v11973_v61  ;;  %v3695_v47 = vld [vmem:[#allocation20 + $0x20] sm:$0xff] }
 0x8a7   : > { %v3644_v41 = vmul.f32 0.3275911, %v3642_v59  ;;  %v3670_v55 = vsub.f32 0.0, %v3642_v59  ;;  %v3639_v29 = vsel %vm3637_vm9, 1.0, %v11973_v61 }
 0x8a8   : > { %v3643_v20 = vmul.f32 0.3275911, %v3641_v60  ;;  %v3669_v50 = vsub.f32 0.0, %v3641_v60 }
 0x8a9   : > { %v3646_v14 = vadd.f32 1.0, %v3644_v41  ;;  %v3672_v8 = vmul.f32 %v3670_v55, %v3642_v59  ;;  %v3696_v41 = vld [vmem:[#allocation20 + $0x28] sm:$0xff]  ;;  %v3699_v55 = vld [vmem:[#allocation20 + $0x40] sm:$0xff] }
 0x8aa   : > { %v3645_v31 = vadd.f32 1.0, %v3643_v20  ;;  %v3671_v58 = vmul.f32 %v3669_v50, %v3641_v60  ;;  %v8410_v20 = vpack.c.bf16 %v3696_v41, %v3695_v47  ;;  %v3700_v50 = vld [vmem:[#allocation20 + $0x48] sm:$0xff] }
 0x8ab   : > { %9355 = vrcp.f32 %v3646_v14  ;;  %v3675_v0 = vmul.f32 1.442695, %v3672_v8  ;;  %v3697_v14 = vld [vmem:[#allocation20 + $0x30] sm:$0xff] }
 0x8ac   : > { %9357 = vrcp.f32 %v3645_v31  ;;  %v3673_v28 = vmul.f32 1.442695, %v3671_v58  ;;  %v8414_v31 = vpack.c.bf16 %v3698_v24, %v3697_v14  ;;  %v3701_v8 = vld [vmem:[#allocation20 + $0x50] sm:$0xff]  ;;  %v3704_v58 = vld [vmem:[#allocation20 + $0x68] sm:$0xff]  ;;  %v4043_v14 = vld [vmem:[#allocation21 + $0x40] sm:$0xff] }
 0x8ad   : > { %9359 = vpow2.f32 %v3675_v0  ;;  %v3706_v0 = vld [vmem:[#allocation20 + $0x78] sm:$0xff] }
 0x8ae   : > { %9361 = vpow2.f32 %v3673_v28  ;;  %v3880_v28 = vld [vmem:[#allocation20 + $0x108] sm:$0xff] }
 0x8b5   : > { %v9356_v35 = vpop.eup %9355 }
 0x8b6   : > { %v9358_v25 = vpop.eup %9357  ;;  %v3652_v19 = vmul.f32 1.0614054, %v9356_v35 }
 0x8b7   : > { %v3651_v38 = vmul.f32 1.0614054, %v9358_v25  ;;  %v9360_v52 = vpop.eup %9359 }
 0x8b8   : > { %v3654_v17 = vadd.f32 -1.4531521, %v3652_v19  ;;  %v9362_v30 = vpop.eup %9361 }
 0x8b9   : > { %v3653_v46 = vadd.f32 -1.4531521, %v3651_v38 }
 0x8ba   : > { %v3656_v32 = vmul.f32 %v9356_v35, %v3654_v17  ;;  %v3705_v17 = vld [vmem:[#allocation20 + $0x70] sm:$0xff] }
 0x8bb   : > { %v3655_v9 = vmul.f32 %v9358_v25, %v3653_v46  ;;  %v8430_v46 = vpack.c.bf16 %v3706_v0, %v3705_v17  ;;  %v4060_v0 = vld [vmem:[#allocation21 + $0xc8] sm:$0xff] }
 0x8bc   : > { %v3658_v40 = vadd.f32 1.4214138, %v3656_v32  ;;  %v3879_v32 = vld [vmem:[#allocation20 + $0x100] sm:$0xff] }
 0x8bd   : > { %v3657_v27 = vadd.f32 1.4214138, %v3655_v9  ;;  %v8434_v9 = vpack.c.bf16 %v3880_v28, %v3879_v32  ;;  %v4062_v32 = vld [vmem:[#allocation21 + $0xd8] sm:$0xff] }
 0x8be   : > { %v3660_v18 = vmul.f32 %v9356_v35, %v3658_v40  ;;  %v3881_v40 = vld [vmem:[#allocation20 + $0x110] sm:$0xff] }
 0x8bf   : > { %v3659_v33 = vmul.f32 %v9358_v25, %v3657_v27  ;;  %v3882_v27 = vld [vmem:[#allocation20 + $0x118] sm:$0xff] }
 0x8c0   : > { %v3662_v6 = vadd.f32 -0.28449672, %v3660_v18  ;;  %v8438_v18 = vpack.c.bf16 %v3882_v27, %v3881_v40  ;;  %v4059_v40 = vld [vmem:[#allocation21 + $0xc0] sm:$0xff]  ;;  %v4065_v27 = vld [vmem:[#allocation21 + $0xf0] sm:$0xff] }
 0x8c1   : > { %v3661_v23 = vadd.f32 -0.28449672, %v3659_v33 }
 0x8c2   : > { %v3664_v51 = vmul.f32 %v9356_v35, %v3662_v6  ;;  %v3883_v6 = vld [vmem:[#allocation20 + $0x120] sm:$0xff] }
 0x8c3   : > { %v3663_v54 = vmul.f32 %v9358_v25, %v3661_v23  ;;  %v3884_v23 = vld [vmem:[#allocation20 + $0x128] sm:$0xff] }
 0x8c4   : > { %v3666_v13 = vadd.f32 0.2548296, %v3664_v51 }
 0x8c5   : > { %v3665_v4 = vadd.f32 0.2548296, %v3663_v54  ;;  %v8442_v54 = vpack.c.bf16 %v3884_v23, %v3883_v6  ;;  %v4061_v6 = vld [vmem:[#allocation21 + $0xd0] sm:$0xff]  ;;  %v4067_v23 = vld [vmem:[#allocation21 + $0x100] sm:$0xff] }
 0x8c6   : > { %v3668_v37 = vmul.f32 %v9356_v35, %v3666_v13  ;;  %v8418_v35 = vpack.c.bf16 %v3700_v50, %v3699_v55  ;;  %v3885_v13 = vld [vmem:[#allocation20 + $0x130] sm:$0xff]  ;;  %v4050_v55 = vld [vmem:[#allocation21 + $0x78] sm:$0xff] }
 0x8c7   : > { %v3667_v53 = vmul.f32 %v9358_v25, %v3665_v4  ;;  %v3702_v25 = vld [vmem:[#allocation20 + $0x58] sm:$0xff] }
 0x8c8   : > { %v3678_v43 = vmul.f32 %v9360_v52, %v3668_v37  ;;  %v8422_v19 = vpack.c.bf16 %v3702_v25, %v3701_v8  ;;  %v3886_v4 = vld [vmem:[#allocation20 + $0x138] sm:$0xff]  ;;  %v3887_v52 = vld [vmem:[#allocation20 + $0x140] sm:$0xff]  ;;  %v4053_v25 = vld [vmem:[#allocation21 + $0x90] sm:$0xff] }
 0x8c9   : > { %v3677_v10 = vmul.f32 %v9362_v30, %v3667_v53  ;;  %v8446_v37 = vpack.c.bf16 %v3886_v4, %v3885_v13  ;;  %v3888_v53 = vld [vmem:[#allocation20 + $0x148] sm:$0xff]  ;;  %v4047_v8 = vld [vmem:[#allocation21 + $0x60] sm:$0xff]  ;;  %v4078_v13 = vld [vmem:[#allocation21 + $0x158] sm:$0xff] }
 0x8ca   : > { %v3680_v21 = vsub.f32 1.0, %v3678_v43  ;;  %v8450_v30 = vpack.c.bf16 %v3888_v53, %v3887_v52  ;;  %v3889_v43 = vld [vmem:[#allocation20 + $0x150] sm:$0xff]  ;;  %v4074_v4 = vld [vmem:[#allocation21 + $0x138] sm:$0xff]  ;;  %v4080_v52 = vld [vmem:[#allocation21 + $0x168] sm:$0xff] }
 0x8cb   : > { %v3679_v44 = vsub.f32 1.0, %v3677_v10  ;;  %v3890_v10 = vld [vmem:[#allocation20 + $0x158] sm:$0xff]  ;;  %v4071_v53 = vld [vmem:[#allocation21 + $0x120] sm:$0xff] }
 0x8cc   : > { %v3682_v45 = vmul.f32 %v3680_v21, %v3640_v63  ;;  %v8454_v21 = vpack.c.bf16 %v3890_v10, %v3889_v43  ;;  %v3891_v63 = vld [vmem:[#allocation20 + $0x160] sm:$0xff]  ;;  %v8510_v43 = vpack.c.bf16 %v4080_v52, %v4074_v4  ;;  %v4121_v52 = vld [vmem:[#allocation21 + $0x2b0] sm:$0xff] }
 0x8cd   : > { %v3681_v57 = vmul.f32 %v3679_v44, %v3639_v29  ;;  %v3892_v44 = vld [vmem:[#allocation20 + $0x168] sm:$0xff]  ;;  %v3893_v29 = vld [vmem:[#allocation20 + $0x170] sm:$0xff] }
 0x8ce   : > { %v3684_v36 = vadd.f32 1.0, %v3682_v45  ;;  %v8458_v45 = vpack.c.bf16 %v3892_v44, %v3891_v63  ;;  %v4079_v63 = vld [vmem:[#allocation21 + $0x160] sm:$0xff] }
 0x8cf   : > { %v3683_v39 = vadd.f32 1.0, %v3681_v57  ;;  %v3894_v57 = vld [vmem:[#allocation20 + $0x178] sm:$0xff] }
 0x8d0   : > { %v3686_v59 = vmul.f32 %v3684_v36, %v3634_v49  ;;  %v8462_v49 = vpack.c.bf16 %v3894_v57, %v3893_v29  ;;  %v4090_v29 = vld [vmem:[#allocation21 + $0x1b8] sm:$0xff] }
 0x8d1   : > { %v3685_v60 = vmul.f32 %v3683_v39, %v3633_v1  ;;  %v4036_v1 = vld [vmem:[#allocation21 + $0x8] sm:$0xff]  ;;  %v4042_v39 = vld [vmem:[#allocation21 + $0x38] sm:$0xff] }
 0x8d2   : > { %3688 = vst [vmem:[#allocation2 + $0x9] sm:$0xff] %v3686_v59  ;;  %v8466_v56 = vpack.c.bf16 %v4042_v39, %v4036_v1  ;;  %v4086_v57 = vld [vmem:[#allocation21 + $0x198] sm:$0xff]  ;;  %v4083_v1 = vld [vmem:[#allocation21 + $0x180] sm:$0xff]  ;;  %v4089_v39 = vld [vmem:[#allocation21 + $0x1b0] sm:$0xff] }
 0x8d3   : > { %3687 = vst [vmem:[#allocation2 + $0x1] sm:$0xff] %v3685_v60  ;;  %7575 = vmatprep.mubr.f32.mxu0 %v3685_v60  ;;  %v4035_v60 = vld [vmem:[#allocation21] sm:$0xff] }
 0x8d4   : > { %7576 = vmatmul.mubr.f32.vlgmr.msra.gmra.mrb[18].mxu0 %v3686_v59  ;;  %v4044_v59 = vld [vmem:[#allocation21 + $0x48] sm:$0xff]  ;;  %8467 = vmatprep.subr.bf16.mxu1 %v8466_v56  ;;  %v8484_v56 = vpack.c.bf16 %v4089_v39, %v4083_v1 }
 0x8d5   : > { %8405 = vmatpush3.bf16.msra.mxu0 %v11453_v42  ;;  %v3703_v42 = vld [vmem:[#allocation20 + $0x60] sm:$0xff]  ;;  %v8498_v47 = vpack.c.bf16 %v4044_v59, %v4038_v11  ;;  %v4085_v59 = vld [vmem:[#allocation21 + $0x190] sm:$0xff] }
 0x8d6   : > { %8407 = vmatprep.subr.bf16.mxu0 %v8406_v62  ;;  %v8426_v38 = vpack.c.bf16 %v3704_v58, %v3703_v42  ;;  %v8472_v42 = vpack.c.bf16 %v4053_v25, %v4047_v8  ;;  %v4049_v58 = vld [vmem:[#allocation21 + $0x70] sm:$0xff]  ;;  %v4103_v8 = vld [vmem:[#allocation21 + $0x220] sm:$0xff] }
 0x8d9   : > { %8409 = vmatpush3.bf16.msra.mxu0 %v8406_v62  ;;  %v3877_v36 = vld [vmem:[#allocation2 + $0xa] sm:$0xff] }
 0x8da   : > { %v3689_v48 = vld [vmem:[#allocation2] sm:$0xff]  ;;  %8411 = vmatprep.subr.bf16.mxu0 %v8410_v20  ;;  %v3690_v33 = vld [vmem:[#allocation2 + $0x8] sm:$0xff] }
 0x8db   : > { %7610 = vmatprep.mubr.f32.mxu0 %v3689_v48  ;;  %v3876_v51 = vld [vmem:[#allocation2 + $0x2] sm:$0xff] }
 0x8dc   : > { %v4041_v62 = vld [vmem:[#allocation21 + $0x30] sm:$0xff]  ;;  %v4048_v48 = vld [vmem:[#allocation21 + $0x68] sm:$0xff] }
 0x8dd   : > { %8413 = vmatpush3.bf16.msra.mxu0 %v8410_v20  ;;  %v8468_v41 = vpack.c.bf16 %v4041_v62, %v4035_v60  ;;  %v4037_v20 = vld [vmem:[#allocation21 + $0x10] sm:$0xff]  ;;  %v4091_v60 = vld [vmem:[#allocation21 + $0x1c0] sm:$0xff] }
 0x8de   : > { %8415 = vmatprep.subr.bf16.mxu0 %v8414_v31  ;;  %v8500_v24 = vpack.c.bf16 %v4043_v14, %v4037_v20  ;;  %v8516_v62 = vpack.c.bf16 %v4091_v60, %v4085_v59  ;;  %v4098_v20 = vld [vmem:[#allocation21 + $0x1f8] sm:$0xff] }
 0x8df   : > { %8469 = vmatpush1.bf16.msra.mxu1 %v8468_v41  ;;  %v4102_v41 = vld [vmem:[#allocation21 + $0x218] sm:$0xff] }
 0x8e1   : > { %8417 = vmatpush3.bf16.msra.mxu0 %v8414_v31  ;;  %v4054_v31 = vld [vmem:[#allocation21 + $0x98] sm:$0xff] }
 0x8e2   : > { %8419 = vmatprep.subr.bf16.mxu0 %v8418_v35  ;;  %v8470_v50 = vpack.c.bf16 %v4054_v31, %v4048_v48  ;;  %v4095_v48 = vld [vmem:[#allocation21 + $0x1e0] sm:$0xff]  ;;  %v4101_v31 = vld [vmem:[#allocation21 + $0x210] sm:$0xff] }
 0x8e4   : > { %8471 = vmatprep.subr.bf16.mxu1 %v8470_v50  ;;  %v8488_v50 = vpack.c.bf16 %v4101_v31, %v4095_v48 }
 0x8e5   : > { %8421 = vmatpush3.bf16.msra.mxu0 %v8418_v35  ;;  %v4056_v35 = vld [vmem:[#allocation21 + $0xa8] sm:$0xff]  ;;  %8473 = vmatpush1.bf16.msra.mxu1 %v8472_v42  ;;  %v4114_v42 = vld [vmem:[#allocation21 + $0x278] sm:$0xff] }
 0x8e6   : > { %8423 = vmatprep.subr.bf16.mxu0 %v8422_v19 }
 0x8e9   : > { %8425 = vmatpush3.bf16.msra.mxu0 %v8422_v19  ;;  %v8502_v19 = vpack.c.bf16 %v4056_v35, %v4050_v55  ;;  %v4097_v35 = vld [vmem:[#allocation21 + $0x1f0] sm:$0xff] }
 0x8ea   : > { %8427 = vmatprep.subr.bf16.mxu0 %v8426_v38  ;;  %v8520_v25 = vpack.c.bf16 %v4103_v8, %v4097_v35 }
 0x8ed   : > { %8429 = vmatpush3.bf16.msra.mxu0 %v8426_v38  ;;  %v4055_v38 = vld [vmem:[#allocation21 + $0xa0] sm:$0xff] }
 0x8ee   : > { %8431 = vmatprep.subr.bf16.mxu0 %v8430_v46  ;;  %v8504_v17 = vpack.c.bf16 %v4055_v38, %v4049_v58  ;;  %v4110_v58 = vld [vmem:[#allocation21 + $0x258] sm:$0xff] }
 0x8f1   : > { %8433 = vmatpush3.bf16.msra.mxu0 %v8430_v46  ;;  %v4066_v46 = vld [vmem:[#allocation21 + $0xf8] sm:$0xff] }
 0x8f2   : > { %8435 = vmatprep.subr.bf16.mxu0 %v8434_v9  ;;  %v8474_v28 = vpack.c.bf16 %v4066_v46, %v4060_v0  ;;  %v4107_v0 = vld [vmem:[#allocation21 + $0x240] sm:$0xff]  ;;  %v4113_v46 = vld [vmem:[#allocation21 + $0x270] sm:$0xff] }
 0x8f4   : > { %7611 = vmatmul.mubr.f32.vlgmr.msra.gmra.mrb[18].mxu0 %v3690_v33  ;;  %v8476_v33 = vpack.c.bf16 %v4065_v27, %v4059_v40  ;;  %8475 = vmatprep.subr.bf16.mxu1 %v8474_v28  ;;  %v8492_v28 = vpack.c.bf16 %v4113_v46, %v4107_v0  ;;  %v4115_v40 = vld [vmem:[#allocation21 + $0x280] sm:$0xff] }
 0x8f5   : > { %8437 = vmatpush3.bf16.msra.mxu0 %v8434_v9  ;;  %7645 = vmatprep.mubr.f32.mxu0 %v3876_v51  ;;  %v4068_v9 = vld [vmem:[#allocation21 + $0x108] sm:$0xff]  ;;  %v8508_v51 = vpack.c.bf16 %v4067_v23, %v4061_v6  ;;  %v4122_v6 = vld [vmem:[#allocation21 + $0x2b8] sm:$0xff] }
 0x8f6   : > { %8439 = vmatprep.subr.bf16.mxu0 %v8438_v18  ;;  %8477 = vmatpush1.bf16.msra.mxu1 %v8476_v33  ;;  %v4126_v33 = vld [vmem:[#allocation21 + $0x2d8] sm:$0xff] }
 0x8f9   : > { %8441 = vmatpush3.bf16.msra.mxu0 %v8438_v18  ;;  %v8506_v18 = vpack.c.bf16 %v4068_v9, %v4062_v32  ;;  %v4109_v9 = vld [vmem:[#allocation21 + $0x250] sm:$0xff] }
 0x8fa   : > { %8443 = vmatprep.subr.bf16.mxu0 %v8442_v54  ;;  %v8524_v27 = vpack.c.bf16 %v4115_v40, %v4109_v9 }
 0x8fd   : > { %8445 = vmatpush3.bf16.msra.mxu0 %v8442_v54  ;;  %v4072_v54 = vld [vmem:[#allocation21 + $0x128] sm:$0xff] }
 0x8fe   : > { %8447 = vmatprep.subr.bf16.mxu0 %v8446_v37 }
 0x901   : > { %8449 = vmatpush3.bf16.msra.mxu0 %v8446_v37  ;;  %v8478_v37 = vpack.c.bf16 %v4078_v13, %v4072_v54  ;;  %v4119_v54 = vld [vmem:[#allocation21 + $0x2a0] sm:$0xff]  ;;  %v4125_v13 = vld [vmem:[#allocation21 + $0x2d0] sm:$0xff] }
 0x902   : > { %8451 = vmatprep.subr.bf16.mxu0 %v8450_v30 }
 0x903   : > { %8479 = vmatprep.subr.bf16.mxu1 %v8478_v37  ;;  %v8496_v37 = vpack.c.bf16 %v4125_v13, %v4119_v54 }
 0x905   : > { %8453 = vmatpush3.bf16.msra.mxu0 %v8450_v30  ;;  %v4077_v30 = vld [vmem:[#allocation21 + $0x150] sm:$0xff] }
 0x906   : > { %8455 = vmatprep.subr.bf16.mxu0 %v8454_v21  ;;  %v8480_v10 = vpack.c.bf16 %v4077_v30, %v4071_v53  ;;  %v4127_v53 = vld [vmem:[#allocation21 + $0x2e0] sm:$0xff] }
 0x907   : > { %v8528_v30 = vpack.c.bf16 %v4127_v53, %v4121_v52 }
 0x908   : > { %8481 = vmatpush1.bf16.msra.mxu1 %v8480_v10  ;;  %v4046_v10 = vld [vmem:[#allocation21 + $0x58] sm:$0xff] }
 0x909   : > { %8457 = vmatpush3.bf16.msra.mxu0 %v8454_v21  ;;  %v4073_v21 = vld [vmem:[#allocation21 + $0x130] sm:$0xff] }
 0x90a   : > { %8459 = vmatprep.subr.bf16.mxu0 %v8458_v45  ;;  %v8512_v44 = vpack.c.bf16 %v4079_v63, %v4073_v21  ;;  %v4435_v21 = vld [vmem:[#allocation23 + $0x8] sm:$0xff] }
 0x90d   : > { %8461 = vmatpush3.bf16.msra.mxu0 %v8458_v45  ;;  %v4084_v45 = vld [vmem:[#allocation21 + $0x188] sm:$0xff] }
 0x90e   : > { %8463 = vmatprep.subr.bf16.mxu0 %v8462_v49 }
 0x911   : > { %8465 = vmatpush3.bf16.msra.mxu0 %v8462_v49  ;;  %v8482_v49 = vpack.c.bf16 %v4090_v29, %v4084_v45  ;;  %v6579_v29 = vld [vmem:[%s12021_s19] ss:$0 sm:$0xff] }
 0x912   : > { %8499 = vmatprep.subr.bf16.mxu0 %v8498_v47  ;;  %v4096_v47 = vld [vmem:[#allocation21 + $0x1e8] sm:$0xff] }
 0x913   : > { %8483 = vmatprep.subr.bf16.mxu1 %v8482_v49  ;;  %v8486_v14 = vpack.c.bf16 %v4102_v41, %v4096_v47 }
 0x914   : > { %7646 = vmatmul.mubr.f32.vlgmr.msra.gmra.mrb[18].mxu0 %v3877_v36  ;;  %v4092_v36 = vld [vmem:[#allocation21 + $0x1c8] sm:$0xff]  ;;  %8485 = vmatpush1.bf16.msra.mxu1 %v8484_v56 }
 0x915   : > { %4304 = vmatprep.mubr.f32.mxu0 %v10141_v12  ;;  %8501 = vmatpush1.bf16.msra.mxu0 %v8500_v24  ;;  %v8514_v11 = vpack.c.bf16 %v4092_v36, %v4086_v57  ;;  %v4104_v24 = vld [vmem:[#allocation21 + $0x228] sm:$0xff] }
 0x916   : > { %8503 = vmatprep.subr.bf16.mxu0 %v8502_v19  ;;  %v8518_v55 = vpack.c.bf16 %v4104_v24, %v4098_v20  ;;  %8487 = vmatprep.subr.bf16.mxu1 %v8486_v14  ;;  %v4108_v19 = vld [vmem:[#allocation21 + $0x248] sm:$0xff] }
 0x917   : > { %v8490_v38 = vpack.c.bf16 %v4114_v42, %v4108_v19 }
 0x918   : > { %8489 = vmatpush1.bf16.msra.mxu1 %v8488_v50 }
 0x919   : > { %8505 = vmatpush1.bf16.msra.mxu0 %v8504_v17  ;;  %v4116_v17 = vld [vmem:[#allocation21 + $0x288] sm:$0xff]  ;;  %8491 = vmatprep.subr.bf16.mxu1 %v8490_v38 }
 0x91a   : > { %8507 = vmatprep.subr.bf16.mxu0 %v8506_v18  ;;  %v8522_v32 = vpack.c.bf16 %v4116_v17, %v4110_v58  ;;  %v4120_v18 = vld [vmem:[#allocation21 + $0x2a8] sm:$0xff] }
 0x91b   : > { %v8494_v23 = vpack.c.bf16 %v4126_v33, %v4120_v18 }
 0x91c   : > { %8493 = vmatpush1.bf16.msra.mxu1 %v8492_v28 }
 0x91d   : > { %8509 = vmatpush1.bf16.msra.mxu0 %v8508_v51  ;;  %v4128_v51 = vld [vmem:[#allocation21 + $0x2e8] sm:$0xff]  ;;  %8495 = vmatprep.subr.bf16.mxu1 %v8494_v23 }
 0x91e   : > { %8511 = vmatprep.subr.bf16.mxu0 %v8510_v43  ;;  %v8526_v4 = vpack.c.bf16 %v4128_v51, %v4122_v6  ;;  %v4040_v43 = vld [vmem:[#allocation21 + $0x28] sm:$0xff] }
 0x91f   : > { %v8530_v63 = vpack.c.bf16 %v4046_v10, %v4040_v43  ;;  %v4039_v43 = vld [vmem:[#allocation21 + $0x20] sm:$0xff] }
 0x920   : > { %8497 = vmatpush1.bf16.msra.mxu1 %v8496_v37 }
 0x921   : > { %8513 = vmatpush1.bf16.msra.mxu0 %v8512_v44  ;;  %v4439_v44 = vld [vmem:[#allocation23 + $0x28] sm:$0xff]  ;;  %8531 = vmatprep.subr.bf16.mxu1 %v8530_v63  ;;  %v4434_v63 = vld [vmem:[#allocation23] sm:$0xff] }
 0x922   : > { %8515 = vmatprep.subr.bf16.mxu0 %v8514_v11  ;;  %v8562_v45 = vpack.c.bf16 %v4439_v44, %v4435_v21  ;;  %v4045_v21 = vld [vmem:[#allocation21 + $0x50] sm:$0xff]  ;;  %v4438_v44 = vld [vmem:[#allocation23 + $0x20] sm:$0xff] }
 0x925   : > { %8517 = vmatpush1.bf16.msra.mxu0 %v8516_v62 }
 0x926   : > { %8519 = vmatprep.subr.bf16.mxu0 %v8518_v55 }
 0x929   : > { %8521 = vmatpush1.bf16.msra.mxu0 %v8520_v25 }
 0x92a   : > { %8523 = vmatprep.subr.bf16.mxu0 %v8522_v32 }
 0x92d   : > { %8525 = vmatpush1.bf16.msra.mxu0 %v8524_v27 }
 0x92e   : > { %8527 = vmatprep.subr.bf16.mxu0 %v8526_v4 }
 0x931   : > { %8529 = vmatpush1.bf16.msra.mxu0 %v8528_v30 }
 0x932   : > { %8563 = vmatprep.subr.bf16.mxu0 %v8562_v45 }
 0x9e7   : > { %v7647_v57 = vpop.f32.mrb[18].mxu0 }
 0x9e8   : > { %v11462_v49 = vadd.f32 %v7647_v57, %v6579_v29  ;;  %v3961_v36 = vpop.f32.mrb[19].mxu0 }
 0x9e9   : > { %v3979_v1 = vadd.f32 %v6579_v29, %v3961_v36  ;;  %v4052_v29 = vld [vmem:[#allocation21 + $0x88] sm:$0xff] }
 0x9ea   : > { %v3984_v39 = vmul.f32 0.70710677, %v11462_v49 }
 0x9eb   : > { %v3983_v11 = vmul.f32 0.70710677, %v3979_v1  ;;  %v3981_v57 = vmul.f32 0.5, %v3979_v1  ;;  %v3982_v1 = vmul.f32 0.5, %v11462_v49  ;;  %v4454_v49 = vld [vmem:[#allocation23 + $0xa0] sm:$0xff] }
 0x9ec   : > { %v3990_v56 = vand.u32 2147483647, %v3984_v39  ;;  %vm3986_vm10 = vcmp.ge.f32.partialorder %v3984_v39, 0.0  ;;  %v4447_v39 = vld [vmem:[#allocation23 + $0x68] sm:$0xff] }
 0x9ed   : > { %v3989_v59 = vand.u32 2147483647, %v3983_v11  ;;  %vm3985_vm11 = vcmp.ge.f32.partialorder %v3983_v11, 0.0  ;;  %v3988_v53 = vsel %vm3986_vm10, 1.0, %v11973_v61  ;;  %v8532_v11 = vpack.c.bf16 %v4045_v21, %v4039_v43  ;;  %v4093_v21 = vld [vmem:[#allocation21 + $0x1d0] sm:$0xff] }
 0x9ee   : > { %v3992_v60 = vmul.f32 0.3275911, %v3990_v56  ;;  %v4018_v20 = vsub.f32 0.0, %v3990_v56  ;;  %v3987_v30 = vsel %vm3985_vm11, 1.0, %v11973_v61 }
 0x9ef   : > { %v3991_v62 = vmul.f32 0.3275911, %v3989_v59  ;;  %v4017_v14 = vsub.f32 0.0, %v3989_v59 }
 0x9f0   : > { %v3994_v47 = vadd.f32 1.0, %v3992_v60  ;;  %v4020_v48 = vmul.f32 %v4018_v20, %v3990_v56  ;;  %v4058_v56 = vld [vmem:[#allocation21 + $0xb8] sm:$0xff]  ;;  %v8564_v60 = vpack.c.bf16 %v4438_v44, %v4434_v63 }
 0x9f1   : > { %v3993_v41 = vadd.f32 1.0, %v3991_v62  ;;  %v4019_v55 = vmul.f32 %v4017_v14, %v3989_v59  ;;  %v4443_v59 = vld [vmem:[#allocation23 + $0x48] sm:$0xff]  ;;  %v4051_v62 = vld [vmem:[#allocation21 + $0x80] sm:$0xff] }
 0x9f2   : > { %9363 = vrcp.f32 %v3994_v47  ;;  %v4023_v25 = vmul.f32 1.442695, %v4020_v48  ;;  %v4057_v47 = vld [vmem:[#allocation21 + $0xb0] sm:$0xff]  ;;  %v4442_v14 = vld [vmem:[#allocation23 + $0x40] sm:$0xff]  ;;  %v4064_v48 = vld [vmem:[#allocation21 + $0xe8] sm:$0xff] }
 0x9f3   : > { %9365 = vrcp.f32 %v3993_v41  ;;  %v4021_v42 = vmul.f32 1.442695, %v4019_v55  ;;  %v8566_v55 = vpack.c.bf16 %v4447_v39, %v4443_v59  ;;  %v4479_v59 = vld [vmem:[#allocation23 + $0x168] sm:$0xff] }
 0x9f4   : > { %9367 = vpow2.f32 %v4023_v25  ;;  %v8536_v25 = vpack.c.bf16 %v4057_v47, %v4051_v62  ;;  %v4105_v62 = vld [vmem:[#allocation21 + $0x230] sm:$0xff] }
 0x9f5   : > { %9369 = vpow2.f32 %v4021_v42  ;;  %v4063_v42 = vld [vmem:[#allocation21 + $0xe0] sm:$0xff] }
 0x9fc   : > { %v9364_v24 = vpop.eup %9363 }
 0x9fd   : > { %v9366_v31 = vpop.eup %9365  ;;  %v4000_v50 = vmul.f32 1.0614054, %v9364_v24 }
 0x9fe   : > { %v3999_v35 = vmul.f32 1.0614054, %v9366_v31  ;;  %v9368_v23 = vpop.eup %9367 }
 0x9ff   : > { %v4002_v8 = vadd.f32 -1.4531521, %v4000_v50  ;;  %v9370_v54 = vpop.eup %9369  ;;  %v4070_v50 = vld [vmem:[#allocation21 + $0x118] sm:$0xff] }
 0xa00   : > { %v4001_v19 = vadd.f32 -1.4531521, %v3999_v35  ;;  %v4451_v35 = vld [vmem:[#allocation23 + $0x88] sm:$0xff] }
 0xa01   : > { %v4004_v58 = vmul.f32 %v9364_v24, %v4002_v8  ;;  %v4455_v8 = vld [vmem:[#allocation23 + $0xa8] sm:$0xff] }
 0xa02   : > { %v4003_v38 = vmul.f32 %v9366_v31, %v4001_v19 }
 0xa03   : > { %v4006_v17 = vadd.f32 1.4214138, %v4004_v58  ;;  %v4069_v58 = vld [vmem:[#allocation21 + $0x110] sm:$0xff] }
 0xa04   : > { %v4005_v0 = vadd.f32 1.4214138, %v4003_v38 }
 0xa05   : > { %v4008_v46 = vmul.f32 %v9364_v24, %v4006_v17  ;;  %v8538_v17 = vpack.c.bf16 %v4070_v50, %v4064_v48  ;;  %v4112_v48 = vld [vmem:[#allocation21 + $0x268] sm:$0xff] }
 0xa06   : > { %v4007_v32 = vmul.f32 %v9366_v31, %v4005_v0  ;;  %v8570_v0 = vpack.c.bf16 %v4455_v8, %v4451_v35  ;;  %v4487_v50 = vld [vmem:[#allocation23 + $0x1a8] sm:$0xff] }
 0xa07   : > { %v4010_v28 = vadd.f32 -0.28449672, %v4008_v46  ;;  %v4450_v46 = vld [vmem:[#allocation23 + $0x80] sm:$0xff] }
 0xa08   : > { %v4009_v9 = vadd.f32 -0.28449672, %v4007_v32  ;;  %v4076_v32 = vld [vmem:[#allocation21 + $0x148] sm:$0xff] }
 0xa09   : > { %v4012_v40 = vmul.f32 %v9364_v24, %v4010_v28  ;;  %v4082_v28 = vld [vmem:[#allocation21 + $0x178] sm:$0xff] }
 0xa0a   : > { %v4011_v27 = vmul.f32 %v9366_v31, %v4009_v9  ;;  %v4459_v9 = vld [vmem:[#allocation23 + $0xc8] sm:$0xff] }
 0xa0b   : > { %v4014_v18 = vadd.f32 0.2548296, %v4012_v40  ;;  %v4463_v40 = vld [vmem:[#allocation23 + $0xe8] sm:$0xff] }
 0xa0c   : > { %v4013_v33 = vadd.f32 0.2548296, %v4011_v27  ;;  %v8540_v27 = vpack.c.bf16 %v4069_v58, %v4063_v42  ;;  %v4482_v58 = vld [vmem:[#allocation23 + $0x180] sm:$0xff] }
 0xa0d   : > { %v4016_v6 = vmul.f32 %v9364_v24, %v4014_v18  ;;  %v4446_v24 = vld [vmem:[#allocation23 + $0x60] sm:$0xff]  ;;  %v8572_v18 = vpack.c.bf16 %v4454_v49, %v4450_v46  ;;  %v4130_v46 = vld [vmem:[#allocation21 + $0x2f8] sm:$0xff]  ;;  %v4491_v49 = vld [vmem:[#allocation23 + $0x1c8] sm:$0xff] }
 0xa0e   : > { %v4015_v51 = vmul.f32 %v9366_v31, %v4013_v33  ;;  %v8534_v31 = vpack.c.bf16 %v4058_v56, %v4052_v29  ;;  %v8568_v19 = vpack.c.bf16 %v4446_v24, %v4442_v14  ;;  %v4075_v33 = vld [vmem:[#allocation21 + $0x140] sm:$0xff]  ;;  %v4475_v56 = vld [vmem:[#allocation23 + $0x148] sm:$0xff] }
 0xa0f   : > { %v4026_v13 = vmul.f32 %v9368_v23, %v4016_v6  ;;  %v4081_v6 = vld [vmem:[#allocation21 + $0x170] sm:$0xff]  ;;  %v8542_v23 = vpack.c.bf16 %v4082_v28, %v4076_v32  ;;  %v4470_v29 = vld [vmem:[#allocation23 + $0x120] sm:$0xff]  ;;  %v4495_v32 = vld [vmem:[#allocation23 + $0x1e8] sm:$0xff] }
 0xa10   : > { %v4025_v4 = vmul.f32 %v9370_v54, %v4015_v51  ;;  %v8574_v51 = vpack.c.bf16 %v4463_v40, %v4459_v9  ;;  %v4458_v54 = vld [vmem:[#allocation23 + $0xc0] sm:$0xff] }
 0xa11   : > { %v4028_v37 = vsub.f32 1.0, %v4026_v13  ;;  %v4462_v13 = vld [vmem:[#allocation23 + $0xe0] sm:$0xff] }
 0xa12   : > { %v4027_v52 = vsub.f32 1.0, %v4025_v4  ;;  %v4088_v4 = vld [vmem:[#allocation21 + $0x1a8] sm:$0xff]  ;;  %v8576_v43 = vpack.c.bf16 %v4462_v13, %v4458_v54  ;;  %v4474_v14 = vld [vmem:[#allocation23 + $0x140] sm:$0xff]  ;;  %v4441_v54 = vld [vmem:[#allocation23 + $0x38] sm:$0xff] }
 0xa13   : > { %v4030_v45 = vmul.f32 %v4028_v37, %v3988_v53  ;;  %v4094_v37 = vld [vmem:[#allocation21 + $0x1d8] sm:$0xff]  ;;  %v4471_v53 = vld [vmem:[#allocation23 + $0x128] sm:$0xff]  ;;  %v4478_v24 = vld [vmem:[#allocation23 + $0x160] sm:$0xff] }
 0xa14   : > { %v4029_v10 = vmul.f32 %v4027_v52, %v3987_v30  ;;  %v4467_v52 = vld [vmem:[#allocation23 + $0x108] sm:$0xff]  ;;  %v8544_v30 = vpack.c.bf16 %v4081_v6, %v4075_v33  ;;  %v8546_v63 = vpack.c.bf16 %v4094_v37, %v4088_v4  ;;  %v8584_v8 = vpack.c.bf16 %v4478_v24, %v4474_v14  ;;  %v4123_v40 = vld [vmem:[#allocation21 + $0x2c0] sm:$0xff]  ;;  %v4129_v33 = vld [vmem:[#allocation21 + $0x2f0] sm:$0xff] }
 0xa15   : > { %v4032_v20 = vadd.f32 1.0, %v4030_v45  ;;  %v8578_v44 = vpack.c.bf16 %v4471_v53, %v4467_v52  ;;  %v4466_v45 = vld [vmem:[#allocation23 + $0x100] sm:$0xff]  ;;  %v8560_v13 = vpack.c.bf16 %v4129_v33, %v4123_v40  ;;  %v4436_v52 = vld [vmem:[#allocation23 + $0x10] sm:$0xff]  ;;  %v4469_v24 = vld [vmem:[#allocation23 + $0x118] sm:$0xff] }
 0xa16   : > { %v4031_v36 = vadd.f32 1.0, %v4029_v10  ;;  %v4087_v10 = vld [vmem:[#allocation21 + $0x1a0] sm:$0xff]  ;;  %v4440_v53 = vld [vmem:[#allocation23 + $0x30] sm:$0xff] }
 0xa17   : > { %v11474_v38 = vmul.f32 %v4032_v20, %v3982_v1  ;;  %v8548_v39 = vpack.c.bf16 %v4093_v21, %v4087_v10  ;;  %v8582_v20 = vpack.c.bf16 %v4479_v59, %v4475_v56  ;;  %v4111_v1 = vld [vmem:[#allocation21 + $0x260] sm:$0xff]  ;;  %v8596_v10 = vpack.c.bf16 %v4440_v53, %v4436_v52  ;;  %v4452_v59 = vld [vmem:[#allocation23 + $0x90] sm:$0xff]  ;;  %v4917_v53 = vld [vmem:[#allocation24 + $0x98] sm:$0xff] }
 0xa18   : > { %v11467_v41 = vmul.f32 %v4031_v36, %v3981_v57  ;;  %v4100_v57 = vld [vmem:[#allocation21 + $0x208] sm:$0xff]  ;;  %v4106_v36 = vld [vmem:[#allocation21 + $0x238] sm:$0xff]  ;;  %v4490_v6 = vld [vmem:[#allocation23 + $0x1c0] sm:$0xff] }
 0xa19   : > { %v8550_v47 = vpack.c.bf16 %v4106_v36, %v4100_v57  ;;  %v9431_v57 = vld [vmem:[%s11441_s5] sm:$0xff] }
 0xa1a   : > { %4228 = vmatmul.mubr.f32.vlgmr.msra.gmra.mrb[16].mxu1 %v11467_v41  ;;  %4305 = vmatmul.mubr.f32.vlgmr.msra.gmra.mrb[20].mxu0 %v11467_v41  ;;  %v4464_v14 = vld [vmem:[#allocation23 + $0xf0] sm:$0xff] }
 0xa1b   : > { %8533 = vmatpush1.bf16.msra.mxu1 %v8532_v11  ;;  %8565 = vmatpush1.bf16.msra.mxu0 %v8564_v60  ;;  %v8580_v11 = vpack.c.bf16 %v4470_v29, %v4466_v45  ;;  %v4099_v60 = vld [vmem:[#allocation21 + $0x200] sm:$0xff]  ;;  %v4453_v45 = vld [vmem:[#allocation23 + $0x98] sm:$0xff]  ;;  %v4496_v33 = vld [vmem:[#allocation23 + $0x1f0] sm:$0xff] }
 0xa1c   : > { %4233 = vmatprep.mubr.f32.mxu1 %v10141_v12  ;;  %4310 = vmatprep.mubr.f32.mxu0 %v10141_v12  ;;  %v8552_v35 = vpack.c.bf16 %v4105_v62, %v4099_v60  ;;  %v4457_v29 = vld [vmem:[#allocation23 + $0xb8] sm:$0xff]  ;;  %v4916_v52 = vld [vmem:[#allocation24 + $0x90] sm:$0xff] }
 0xa1d   : > { %8535 = vmatprep.subr.bf16.mxu1 %v8534_v31  ;;  %8567 = vmatprep.subr.bf16.mxu0 %v8566_v55  ;;  %v4118_v31 = vld [vmem:[#allocation21 + $0x298] sm:$0xff]  ;;  %v4483_v55 = vld [vmem:[#allocation23 + $0x188] sm:$0xff]  ;;  %v8602_v56 = vpack.c.bf16 %v4457_v29, %v4453_v45  ;;  %v4902_v29 = vld [vmem:[#allocation24 + $0x20] sm:$0xff] }
 0xa1e   : > { %4234 = vmatmul.mubr.f32.gmra.mrb[18].mxu1 %v11474_v38  ;;  %4311 = vmatmul.mubr.f32.gmra.mrb[22].mxu0 %v11474_v38  ;;  %v8586_v42 = vpack.c.bf16 %v4487_v50, %v4483_v55  ;;  %v4465_v60 = vld [vmem:[#allocation23 + $0xf8] sm:$0xff]  ;;  %v4468_v50 = vld [vmem:[#allocation23 + $0x110] sm:$0xff] }
 0xa1f   : > { %8537 = vmatpush1.bf16.msra.mxu1 %v8536_v25  ;;  %8569 = vmatpush1.bf16.msra.mxu0 %v8568_v19  ;;  %v4117_v25 = vld [vmem:[#allocation21 + $0x290] sm:$0xff]  ;;  %v8554_v19 = vpack.c.bf16 %v4118_v31, %v4112_v48  ;;  %v9432_v62 = vld [vmem:[%s11441_s5 + $0x8] sm:$0xff]  ;;  %s9929_s5 = scalar_lea.vmem %s9928_s13, 512 }
 0xa20   : > { %8539 = vmatprep.subr.bf16.mxu1 %v8538_v17  ;;  %8571 = vmatprep.subr.bf16.mxu0 %v8570_v0  ;;  %v4486_v17 = vld [vmem:[#allocation23 + $0x1a0] sm:$0xff]  ;;  %v4124_v0 = vld [vmem:[#allocation21 + $0x2c8] sm:$0xff]  ;;  %v8556_v28 = vpack.c.bf16 %v4117_v25, %v4111_v1  ;;  %v4473_v48 = vld [vmem:[#allocation23 + $0x138] sm:$0xff]  ;;  %p9931_p8 = scmp.lt.s32.totalorder %s9929_s5, %s9923_s9 }
 0xa21   : > { %4381 = vmatprep.mubr.f32.mxu1 %v10141_v12  ;;  %4584 = vmatprep.mubr.f32.mxu0 %v10141_v12  ;;  %v8588_v9 = vpack.c.bf16 %v4486_v17, %v4482_v58  ;;  %v8610_v55 = vpack.c.bf16 %v4473_v48, %v4469_v24  ;;  %v4485_v58 = vld [vmem:[#allocation23 + $0x198] sm:$0xff]  ;;  %v4907_v24 = vld [vmem:[#allocation24 + $0x48] sm:$0xff] }
 0xa22   : > { %v4489_v17 = vld [vmem:[#allocation23 + $0x1b8] sm:$0xff]  ;;  %p9932_p12 = por %p9931_p8, %p9930_p11 }
 0xa23   : > { %8541 = vmatpush1.bf16.msra.mxu1 %v8540_v27  ;;  %8573 = vmatpush1.bf16.msra.mxu0 %v8572_v18  ;;  %v8558_v27 = vpack.c.bf16 %v4130_v46, %v4124_v0  ;;  %v8590_v18 = vpack.c.bf16 %v4495_v32, %v4491_v49  ;;  %v8618_v46 = vpack.c.bf16 %v4489_v17, %v4485_v58  ;;  %v4484_v49 = vld [vmem:[#allocation23 + $0x190] sm:$0xff]  ;;  %v4911_v58 = vld [vmem:[#allocation24 + $0x68] sm:$0xff] }
 0xa24   : > { %8543 = vmatprep.subr.bf16.mxu1 %v8542_v23  ;;  %8575 = vmatprep.subr.bf16.mxu0 %v8574_v51  ;;  %v4494_v23 = vld [vmem:[#allocation23 + $0x1e0] sm:$0xff]  ;;  %v4437_v51 = vld [vmem:[#allocation23 + $0x18] sm:$0xff]  ;;  %v4488_v32 = vld [vmem:[#allocation23 + $0x1b0] sm:$0xff]  ;;  %p9933_p1 = pnand %p9932_p12, %p9926_p10 }
 0xa25   : > { %v8592_v4 = vpack.c.bf16 %v4494_v23, %v4490_v6  ;;  %v8594_v37 = vpack.c.bf16 %v4441_v54, %v4437_v51  ;;  %v8620_v40 = vpack.c.bf16 %v4488_v32, %v4484_v49  ;;  %v4914_v23 = vld [vmem:[#allocation24 + $0x80] sm:$0xff]  ;;  %v4915_v51 = vld [vmem:[#allocation24 + $0x88] sm:$0xff]  ;;  %v4912_v32 = vld [vmem:[#allocation24 + $0x70] sm:$0xff] }
 0xa26   : > { %v8626_v54 = vpack.c.bf16 %v4915_v51, %v4914_v23  ;;  %v4948_v51 = vld [vmem:[#allocation24 + $0x190] sm:$0xff] }
 0xa27   : > { %8545 = vmatpush1.bf16.msra.mxu1 %v8544_v30  ;;  %8577 = vmatpush1.bf16.msra.mxu0 %v8576_v43  ;;  %v4445_v30 = vld [vmem:[#allocation23 + $0x58] sm:$0xff] }
 0xa28   : > { %8547 = vmatprep.subr.bf16.mxu1 %v8546_v63  ;;  %8579 = vmatprep.subr.bf16.mxu0 %v8578_v44  ;;  %v4449_v43 = vld [vmem:[#allocation23 + $0x78] sm:$0xff]  ;;  %v4444_v63 = vld [vmem:[#allocation23 + $0x50] sm:$0xff] }
 0xa29   : > { %v8598_v21 = vpack.c.bf16 %v4449_v43, %v4445_v30  ;;  %v4448_v44 = vld [vmem:[#allocation23 + $0x70] sm:$0xff]  ;;  %v8630_v30 = vpack.c.bf16 %v4917_v53, %v4916_v52  ;;  %v4950_v53 = vld [vmem:[#allocation24 + $0x1a0] sm:$0xff] }
 0xa2a   : > { %v8600_v36 = vpack.c.bf16 %v4448_v44, %v4444_v63  ;;  %v4900_v43 = vld [vmem:[#allocation24 + $0x10] sm:$0xff]  ;;  %v4918_v63 = vld [vmem:[#allocation24 + $0xa0] sm:$0xff]  ;;  %v4919_v44 = vld [vmem:[#allocation24 + $0xa8] sm:$0xff] }
 0xa2b   : > { %8549 = vmatpush1.bf16.msra.mxu1 %v8548_v39  ;;  %8581 = vmatpush1.bf16.msra.mxu0 %v8580_v11  ;;  %v4456_v39 = vld [vmem:[#allocation23 + $0xb0] sm:$0xff]  ;;  %v4461_v11 = vld [vmem:[#allocation23 + $0xd8] sm:$0xff]  ;;  %v8634_v45 = vpack.c.bf16 %v4919_v44, %v4918_v63 }
 0xa2c   : > { %8551 = vmatprep.subr.bf16.mxu1 %v8550_v47  ;;  %8583 = vmatprep.subr.bf16.mxu0 %v8582_v20  ;;  %v8606_v47 = vpack.c.bf16 %v4465_v60, %v4461_v11  ;;  %v4460_v20 = vld [vmem:[#allocation23 + $0xd0] sm:$0xff]  ;;  %v4905_v60 = vld [vmem:[#allocation24 + $0x38] sm:$0xff] }
 0xa2d   : > { %v8608_v31 = vpack.c.bf16 %v4464_v14, %v4460_v20  ;;  %v4904_v11 = vld [vmem:[#allocation24 + $0x30] sm:$0xff]  ;;  %v4906_v14 = vld [vmem:[#allocation24 + $0x40] sm:$0xff] }
 0xa2e   : > { %v8644_v48 = vpack.c.bf16 %v4907_v24, %v4906_v14  ;;  %v4952_v44 = vld [vmem:[#allocation24 + $0x1b0] sm:$0xff] }
 0xa2f   : > { %8553 = vmatpush1.bf16.msra.mxu1 %v8552_v35  ;;  %8585 = vmatpush1.bf16.msra.mxu0 %v8584_v8  ;;  %v4472_v35 = vld [vmem:[#allocation23 + $0x130] sm:$0xff]  ;;  %v4477_v8 = vld [vmem:[#allocation23 + $0x158] sm:$0xff] }
 0xa30   : > { %8555 = vmatprep.subr.bf16.mxu1 %v8554_v19  ;;  %8587 = vmatprep.subr.bf16.mxu0 %v8586_v42  ;;  %v8612_v1 = vpack.c.bf16 %v4472_v35, %v4468_v50  ;;  %v4476_v19 = vld [vmem:[#allocation23 + $0x150] sm:$0xff] }
 0xa31   : > { %v4480_v42 = vld [vmem:[#allocation23 + $0x170] sm:$0xff] }
 0xa32   : > { %v8616_v0 = vpack.c.bf16 %v4480_v42, %v4476_v19  ;;  %v4908_v35 = vld [vmem:[#allocation24 + $0x50] sm:$0xff]  ;;  %v4910_v42 = vld [vmem:[#allocation24 + $0x60] sm:$0xff] }
 0xa33   : > { %8557 = vmatpush1.bf16.msra.mxu1 %v8556_v28  ;;  %8589 = vmatpush1.bf16.msra.mxu0 %v8588_v9  ;;  %v4493_v28 = vld [vmem:[#allocation23 + $0x1d8] sm:$0xff]  ;;  %v8652_v17 = vpack.c.bf16 %v4911_v58, %v4910_v42  ;;  %v4940_v14 = vld [vmem:[#allocation24 + $0x150] sm:$0xff] }
 0xa34   : > { %8559 = vmatprep.subr.bf16.mxu1 %v8558_v27  ;;  %8591 = vmatprep.subr.bf16.mxu0 %v8590_v18  ;;  %v4497_v9 = vld [vmem:[#allocation23 + $0x1f8] sm:$0xff]  ;;  %v4492_v18 = vld [vmem:[#allocation23 + $0x1d0] sm:$0xff] }
 0xa35   : > { %v8622_v27 = vpack.c.bf16 %v4497_v9, %v4493_v28  ;;  %v8624_v6 = vpack.c.bf16 %v4496_v33, %v4492_v18  ;;  %v4913_v28 = vld [vmem:[#allocation24 + $0x78] sm:$0xff]  ;;  %v4930_v33 = vld [vmem:[#allocation24 + $0x100] sm:$0xff]  ;;  %v4944_v58 = vld [vmem:[#allocation24 + $0x170] sm:$0xff] }
 0xa36   : > { %v8656_v9 = vpack.c.bf16 %v4913_v28, %v4912_v32 }
 0xa37   : > { %8561 = vmatpush1.bf16.msra.mxu1 %v8560_v13  ;;  %8593 = vmatpush1.bf16.msra.mxu0 %v8592_v4  ;;  %v4898_v13 = vld [vmem:[#allocation24] sm:$0xff]  ;;  %v4899_v4 = vld [vmem:[#allocation24 + $0x8] sm:$0xff] }
 0xa38   : > { %8595 = vmatprep.subr.bf16.mxu1 %v8594_v37  ;;  %v8628_v37 = vpack.c.bf16 %v4899_v4, %v4898_v13  ;;  %8627 = vmatprep.subr.bf16.mxu0 %v8626_v54  ;;  %v4949_v54 = vld [vmem:[#allocation24 + $0x198] sm:$0xff]  ;;  %v4932_v4 = vld [vmem:[#allocation24 + $0x110] sm:$0xff] }
 0xa39   : > { %v8662_v13 = vpack.c.bf16 %v4949_v54, %v4948_v51 }
 0xa3a   : > { %4382 = vmatmul.mubr.f32.vlgmr.msra.gmra.mrb[20].mxu1 %v11467_v41  ;;  %4585 = vmatmul.mubr.f32.vlgmr.msra.gmra.mrb[20].mxu0 %v9431_v57  ;;  %v8604_v41 = vpack.c.bf16 %v4456_v39, %v4452_v59  ;;  %v4921_v59 = vld [vmem:[#allocation24 + $0xb8] sm:$0xff] }
 0xa3b   : > { %8597 = vmatpush1.bf16.msra.mxu1 %v8596_v10  ;;  %4387 = vmatprep.mubr.f32.mxu1 %v10141_v12  ;;  %v4901_v10 = vld [vmem:[#allocation24 + $0x18] sm:$0xff] }
 0xa3c   : > { %4590 = vmatprep.mubr.f32.mxu0 %v10141_v12  ;;  %8599 = vmatprep.subr.bf16.mxu1 %v8598_v21  ;;  %v8632_v21 = vpack.c.bf16 %v4901_v10, %v4900_v43  ;;  %v4934_v10 = vld [vmem:[#allocation24 + $0x120] sm:$0xff] }
 0xa3d   : > { %8629 = vmatpush3.bf16.msra.mxu0 %v8628_v37  ;;  %v4933_v37 = vld [vmem:[#allocation24 + $0x118] sm:$0xff] }
 0xa3e   : > { %4388 = vmatmul.mubr.f32.gmra.mrb[22].mxu1 %v11474_v38  ;;  %4591 = vmatmul.mubr.f32.gmra.mrb[22].mxu0 %v9432_v62  ;;  %v4481_v38 = vld [vmem:[#allocation23 + $0x178] sm:$0xff]  ;;  %v8664_v52 = vpack.c.bf16 %v4933_v37, %v4932_v4 }
 0xa3f   : > { %8601 = vmatpush1.bf16.msra.mxu1 %v8600_v36  ;;  %4661 = vmatprep.mubr.f32.mxu1 %v10141_v12  ;;  %v8614_v25 = vpack.c.bf16 %v4481_v38, %v4477_v8  ;;  %v4909_v8 = vld [vmem:[#allocation24 + $0x58] sm:$0xff] }
 0xa40   : > { %8603 = vmatprep.subr.bf16.mxu1 %v8602_v56  ;;  %8631 = vmatprep.subr.bf16.mxu0 %v8630_v30  ;;  %v4920_v56 = vld [vmem:[#allocation24 + $0xb0] sm:$0xff]  ;;  %v8648_v38 = vpack.c.bf16 %v4909_v8, %v4908_v35  ;;  %v4951_v30 = vld [vmem:[#allocation24 + $0x1a8] sm:$0xff]  ;;  %v4942_v8 = vld [vmem:[#allocation24 + $0x160] sm:$0xff] }
 0xa41   : > { %8633 = vmatpush3.bf16.msra.mxu0 %v8632_v21  ;;  %v8638_v39 = vpack.c.bf16 %v4921_v59, %v4920_v56  ;;  %v8666_v43 = vpack.c.bf16 %v4951_v30, %v4950_v53  ;;  %v4935_v21 = vld [vmem:[#allocation24 + $0x128] sm:$0xff]  ;;  %v4954_v59 = vld [vmem:[#allocation24 + $0x1c0] sm:$0xff] }
 0xa42   : > { %8635 = vmatprep.subr.bf16.mxu0 %v8634_v45  ;;  %v8668_v63 = vpack.c.bf16 %v4935_v21, %v4934_v10  ;;  %v4953_v45 = vld [vmem:[#allocation24 + $0x1b8] sm:$0xff] }
 0xa43   : > { %8605 = vmatpush1.bf16.msra.mxu1 %v8604_v41  ;;  %v4922_v41 = vld [vmem:[#allocation24 + $0xc0] sm:$0xff] }
 0xa44   : > { %8607 = vmatprep.subr.bf16.mxu1 %v8606_v47  ;;  %v4923_v47 = vld [vmem:[#allocation24 + $0xc8] sm:$0xff] }
 0xa45   : > { %v8642_v20 = vpack.c.bf16 %v4923_v47, %v4922_v41  ;;  %v4956_v47 = vld [vmem:[#allocation24 + $0x1d0] sm:$0xff] }
 0xa47   : > { %8609 = vmatpush1.bf16.msra.mxu1 %v8608_v31  ;;  %v4924_v31 = vld [vmem:[#allocation24 + $0xd0] sm:$0xff] }
 0xa48   : > { %8611 = vmatprep.subr.bf16.mxu1 %v8610_v55  ;;  %v4925_v55 = vld [vmem:[#allocation24 + $0xd8] sm:$0xff] }
 0xa49   : > { %v8646_v50 = vpack.c.bf16 %v4925_v55, %v4924_v31  ;;  %v4958_v31 = vld [vmem:[#allocation24 + $0x1e0] sm:$0xff]  ;;  %v4959_v55 = vld [vmem:[#allocation24 + $0x1e8] sm:$0xff] }
 0xa4a   : > { %v8682_v35 = vpack.c.bf16 %v4959_v55, %v4958_v31 }
 0xa4b   : > { %8613 = vmatpush1.bf16.msra.mxu1 %v8612_v1  ;;  %v4926_v1 = vld [vmem:[#allocation24 + $0xe0] sm:$0xff] }
 0xa4c   : > { %8615 = vmatprep.subr.bf16.mxu1 %v8614_v25  ;;  %v4927_v25 = vld [vmem:[#allocation24 + $0xe8] sm:$0xff] }
 0xa4d   : > { %v8650_v19 = vpack.c.bf16 %v4927_v25, %v4926_v1  ;;  %v4960_v1 = vld [vmem:[#allocation24 + $0x1f0] sm:$0xff]  ;;  %v4961_v25 = vld [vmem:[#allocation24 + $0x1f8] sm:$0xff] }
 0xa4e   : > { %v8686_v42 = vpack.c.bf16 %v4961_v25, %v4960_v1 }
 0xa4f   : > { %8617 = vmatpush1.bf16.msra.mxu1 %v8616_v0  ;;  %v4928_v0 = vld [vmem:[#allocation24 + $0xf0] sm:$0xff] }
 0xa50   : > { %8619 = vmatprep.subr.bf16.mxu1 %v8618_v46  ;;  %v4929_v46 = vld [vmem:[#allocation24 + $0xf8] sm:$0xff] }
 0xa51   : > { %v8654_v49 = vpack.c.bf16 %v4929_v46, %v4928_v0  ;;  %v11489_v46 = vld [vmem:[%s12022_s16] sm:$0x3f] }
 0xa52   : > { %v4140_v32 = vrot.slane %v11489_v46, %v11411_v2 }
 0xa53   : > { %8621 = vmatpush1.bf16.msra.mxu1 %v8620_v40  ;;  %v4946_v40 = vld [vmem:[#allocation24 + $0x180] sm:$0xff] }
 0xa54   : > { %8623 = vmatprep.subr.bf16.mxu1 %v8622_v27  ;;  %v4947_v27 = vld [vmem:[#allocation24 + $0x188] sm:$0xff] }
 0xa55   : > { %v8658_v18 = vpack.c.bf16 %v4947_v27, %v4946_v40 }
 0xa57   : > { %8625 = vmatpush1.bf16.msra.mxu1 %v8624_v6  ;;  %v4931_v6 = vld [vmem:[#allocation24 + $0x108] sm:$0xff] }
 0xa58   : > { %v8660_v23 = vpack.c.bf16 %v4931_v6, %v4930_v33  ;;  %8659 = vmatprep.subr.bf16.mxu1 %v8658_v18 }
 0xa5a   : > { %4662 = vmatmul.mubr.f32.vlgmr.msra.gmra.mrb[20].mxu1 %v9431_v57  ;;  %v4903_v57 = vld [vmem:[#allocation24 + $0x28] sm:$0xff] }
 0xa5b   : > { %4667 = vmatprep.mubr.f32.mxu1 %v10141_v12  ;;  %v8636_v36 = vpack.c.bf16 %v4903_v57, %v4902_v29  ;;  %8661 = vmatpush3.bf16.msra.mxu1 %v8660_v23  ;;  %v8670_v29 = vpack.c.bf16 %v4953_v45, %v4952_v44  ;;  %v4936_v57 = vld [vmem:[#allocation24 + $0x130] sm:$0xff]  ;;  %v4406_v23 = vmul.f32 %v11427_v16, %v11427_v16  ;;  %v11502_v44 = vsub.s32 2, %v11408_v22 }
 0xa5c   : > { %8663 = vmatprep.subr.bf16.mxu1 %v8662_v13 }
 0xa5d   : > { %8637 = vmatpush3.bf16.msra.mxu0 %v8636_v36  ;;  %v4937_v36 = vld [vmem:[#allocation24 + $0x138] sm:$0xff] }
 0xa5e   : > { %4668 = vmatmul.mubr.f32.gmra.mrb[22].mxu1 %v9432_v62  ;;  %v8640_v62 = vpack.c.bf16 %v4905_v60, %v4904_v11  ;;  %8639 = vmatprep.subr.bf16.mxu0 %v8638_v39  ;;  %v8672_v56 = vpack.c.bf16 %v4937_v36, %v4936_v57  ;;  %v4955_v39 = vld [vmem:[#allocation24 + $0x1c8] sm:$0xff]  ;;  %v4938_v60 = vld [vmem:[#allocation24 + $0x140] sm:$0xff] }
 0xa5f   : > { %8665 = vmatpush3.bf16.msra.mxu1 %v8664_v52  ;;  %v8674_v11 = vpack.c.bf16 %v4955_v39, %v4954_v59  ;;  %v4144_v59 = vrot.slane %v11489_v46, %v11502_v44 }
 0xa60   : > { %8667 = vmatprep.subr.bf16.mxu1 %v8666_v43  ;;  %v4407_v43 = vmul.f32 %v11435_v26, %v11435_v26 }
 0xa61   : > { %8641 = vmatpush3.bf16.msra.mxu0 %v8640_v62  ;;  %v4939_v62 = vld [vmem:[#allocation24 + $0x148] sm:$0xff] }
 0xa62   : > { %8643 = vmatprep.subr.bf16.mxu0 %v8642_v20  ;;  %v8676_v41 = vpack.c.bf16 %v4939_v62, %v4938_v60  ;;  %v4957_v20 = vld [vmem:[#allocation24 + $0x1d8] sm:$0xff] }
 0xa63   : > { %8669 = vmatpush3.bf16.msra.mxu1 %v8668_v63  ;;  %v8678_v24 = vpack.c.bf16 %v4957_v20, %v4956_v47  ;;  %v9433_v20 = vld [vmem:[%s10714_s17] sm:$0xff] }
 0xa64   : > { %8671 = vmatprep.subr.bf16.mxu1 %v8670_v29  ;;  %v11505_v29 = vsub.s32 3, %v11408_v22 }
 0xa65   : > { %8645 = vmatpush3.bf16.msra.mxu0 %v8644_v48  ;;  %v4941_v48 = vld [vmem:[#allocation24 + $0x158] sm:$0xff] }
 0xa66   : > { %8647 = vmatprep.subr.bf16.mxu0 %v8646_v50  ;;  %v8680_v50 = vpack.c.bf16 %v4941_v48, %v4940_v14  ;;  %v4148_v60 = vrot.slane %v11489_v46, %v11505_v29  ;;  %v8946_v14 = vadd.f32 %v9433_v20, %v4144_v59  ;;  %v9434_v48 = vld [vmem:[%s10714_s17 + $0x8] sm:$0xff] }
 0xa67   : > { %8673 = vmatpush3.bf16.msra.mxu1 %v8672_v56 }
 0xa68   : > { %8675 = vmatprep.subr.bf16.mxu1 %v8674_v11  ;;  %v11511_v11 = vld [vmem:[%s12023_s4] sm:$0xf]  ;;  %v8949_v31 = vadd.f32 %v9434_v48, %v4148_v60 }
 0xa69   : > { %8649 = vmatpush3.bf16.msra.mxu0 %v8648_v38  ;;  %v4943_v38 = vld [vmem:[#allocation24 + $0x168] sm:$0xff]  ;;  %v4503_v47 = vrot.slane %v11511_v11, %v11422_v3 }
 0xa6a   : > { %8651 = vmatprep.subr.bf16.mxu0 %v8650_v19  ;;  %v8684_v19 = vpack.c.bf16 %v4943_v38, %v4942_v8  ;;  %v9436_v38 = vld [vmem:[%s10714_s17 + $0x28] sm:$0xff] }
 0xa6b   : > { %8677 = vmatpush3.bf16.msra.mxu1 %v8676_v41  ;;  %v8947_v55 = vadd.f32 %v8946_v14, %v4503_v47  ;;  %v8955_v1 = vadd.f32 %v9436_v38, %v4148_v60  ;;  %v9438_v14 = vld [vmem:[%s10714_s17 + $0x18] sm:$0xff]  ;;  %v9439_v38 = vld [vmem:[%s10714_s17 + $0x30] sm:$0xff] }
 0xa6c   : > { %8679 = vmatprep.subr.bf16.mxu1 %v8678_v24  ;;  %v4507_v24 = vrot.slane %v11511_v11, %v11411_v2 }
 0xa6d   : > { %8653 = vmatpush3.bf16.msra.mxu0 %v8652_v17  ;;  %v4945_v17 = vld [vmem:[#allocation24 + $0x178] sm:$0xff] }
 0xa6e   : > { %8655 = vmatprep.subr.bf16.mxu0 %v8654_v49  ;;  %v8688_v0 = vpack.c.bf16 %v4945_v17, %v4944_v58  ;;  %v4136_v49 = vrot.slane %v11489_v46, %v11422_v3  ;;  %v8950_v8 = vadd.f32 %v8949_v31, %v4507_v24  ;;  %v8956_v17 = vadd.f32 %v8955_v1, %v4507_v24 }
 0xa6f   : > { %8681 = vmatpush3.bf16.msra.mxu1 %v8680_v50  ;;  %v9435_v50 = vld [vmem:[%s10714_s17 + $0x20] sm:$0xff] }
 0xa70   : > { %8683 = vmatprep.subr.bf16.mxu1 %v8682_v35  ;;  %v8952_v35 = vadd.f32 %v9435_v50, %v4144_v59 }
 0xa71   : > { %8657 = vmatpush3.bf16.msra.mxu0 %v8656_v9 }
 0xa73   : > { %8685 = vmatpush3.bf16.msra.mxu1 %v8684_v19 }
 0xa74   : > { %8687 = vmatprep.subr.bf16.mxu1 %v8686_v42  ;;  %v8953_v42 = vadd.f32 %v8952_v35, %v4503_v47 }
 0xa77   : > { %8689 = vmatpush3.bf16.msra.mxu1 %v8688_v0 }
 0xaed   : > { %v4229_v28 = vpop.f32.mrb[16].mxu1 }
 0xaee   : > { %v4230_v9 = vadd.f32 %v4229_v28, %v4136_v49  ;;  %v4231_v40 = vpop.f32.mrb[17].mxu1 }
 0xaef   : > { %v4232_v27 = vadd.f32 %v4231_v40, %v4140_v32 }
 0xaf0   : > { %v4408_v18 = vsub.f32 %v11429_v15, %v4230_v9 }
 0xaf1   : > { %v4416_v33 = vmul.f32 -2.0, %v4232_v27  ;;  %v4235_v6 = vpop.f32.mrb[18].mxu1  ;;  %v4402_v16 = vadd.f32 -0.5, %v4232_v27 }
 0xaf2   : > { %v4410_v51 = vmul.f32 %v4408_v18, %v4408_v18  ;;  %v4236_v54 = vadd.f32 %v4235_v6, %v4136_v49  ;;  %v4237_v13 = vpop.f32.mrb[19].mxu1 }
 0xaf3   : > { %v4418_v4 = vmul.f32 1.442695, %v4416_v33  ;;  %v4238_v37 = vadd.f32 %v4237_v13, %v4140_v32 }
 0xaf4   : > { %v4412_v52 = vadd.f32 %v4410_v51, %v4406_v23  ;;  %v4409_v53 = vsub.f32 %v11437_v34, %v4236_v54  ;;  %v4404_v34 = vsub.f32 %v4402_v16, %v11415_v5 }
 0xaf5   : > { %9371 = vpow2.f32 %v4418_v4  ;;  %v4417_v30 = vmul.f32 -2.0, %v4238_v37  ;;  %v4403_v26 = vadd.f32 -0.5, %v4238_v37 }
 0xaf6   : > { %v4411_v10 = vmul.f32 %v4409_v53, %v4409_v53  ;;  %v4414_v63 = vmul.f32 0.5, %v4412_v52 }
 0xaf7   : > { %v4420_v15 = vmul.f32 1.442695, %v4417_v30  ;;  %v4405_v5 = vsub.f32 %v4403_v26, %v11418_v7 }
 0xaf8   : > { %v4413_v21 = vadd.f32 %v4411_v10, %v4407_v43 }
 0xaf9   : > { %9373 = vpow2.f32 %v4420_v15  ;;  %v4151_v15 = vsub.s32 4, %v11408_v22 }
 0xafa   : > { %v4415_v56 = vmul.f32 0.5, %v4413_v21  ;;  %v4155_v21 = vsub.s32 5, %v11408_v22  ;;  %v4511_v22 = vrot.slane %v11511_v11, %v11502_v44 }
 0xafc   : > { %v4156_v26 = vrot.slane %v11489_v46, %v4155_v21 }
 0xafe   : > { %v8961_v24 = vadd.f32 %v9438_v14, %v4156_v26 }
 0xaff   : > { %v9372_v45 = vpop.eup %9371 }
 0xb00   : > { %v4422_v57 = vmul.f32 %v9372_v45, %v4414_v63  ;;  %v4152_v45 = vrot.slane %v11489_v46, %v4151_v15  ;;  %v4515_v46 = vrot.slane %v11511_v11, %v11505_v29 }
 0xb02   : > { %v4424_v36 = vadd.f32 %v4422_v57, %v4404_v34  ;;  %v8964_v1 = vadd.f32 %v9439_v38, %v4152_v45  ;;  %v8962_v11 = vadd.f32 %v8961_v24, %v4515_v46 }
 0xb03   : > { %v9374_v39 = vpop.eup %9373 }
 0xb04   : > { %6111 = vst [vmem:[%s11516_s28] sm:$0xff] %v4424_v36  ;;  %v4423_v62 = vmul.f32 %v9374_v39, %v4415_v56 }
 0xb06   : > { %v4425_v41 = vadd.f32 %v4423_v62, %v4405_v5  ;;  %v9437_v5 = vld [vmem:[%s10714_s17 + $0x10] sm:$0xff] }
 0xb07   : > { %v8958_v62 = vadd.f32 %v9437_v5, %v4152_v45 }
 0xb08   : > { %6112 = vst [vmem:[%s11516_s28 + $0x8] sm:$0xff] %v4425_v41 }
 0xb0d   : > { %v4586_v7 = vpop.f32.mrb[20].mxu0 }
 0xb0e   : > { %v11529_v25 = vadd.f32 %v8947_v55, %v4586_v7  ;;  %v4588_v19 = vpop.f32.mrb[21].mxu0 }
 0xb0f   : > { %v11531_v58 = vadd.f32 %v8950_v8, %v4588_v19  ;;  %v8959_v8 = vadd.f32 %v8958_v62, %v4511_v22 }
 0xb10   : > { %v11534_v0 = vmul.f32 0.70710677, %v11529_v25 }
 0xb11   : > { %v11537_v49 = vmul.f32 0.70710677, %v11531_v58  ;;  %v4592_v32 = vpop.f32.mrb[22].mxu0 }
 0xb12   : > { %v4714_v28 = vand.u32 2147483647, %v11534_v0  ;;  %v11540_v9 = vadd.f32 %v8953_v42, %v4592_v32  ;;  %v4594_v40 = vpop.f32.mrb[23].mxu0  ;;  %vm4698_vm12 = vcmp.ge.f32.partialorder %v11534_v0, 0.0 }
 0xb13   : > { %v4715_v27 = vand.u32 2147483647, %v11537_v49  ;;  %v11543_v18 = vadd.f32 %v8956_v17, %v4594_v40  ;;  %vm4699_vm13 = vcmp.ge.f32.partialorder %v11537_v49, 0.0  ;;  %v4683_v49 = vmul.f32 0.5, %v11531_v58 }
 0xb14   : > { %v4722_v33 = vmul.f32 0.3275911, %v4714_v28  ;;  %v11546_v6 = vmul.f32 0.70710677, %v11540_v9  ;;  %v4826_v10 = vsub.f32 0.0, %v4714_v28 }
 0xb15   : > { %v4723_v23 = vmul.f32 0.3275911, %v4715_v27  ;;  %v11549_v51 = vmul.f32 0.70710677, %v11543_v18  ;;  %v4827_v36 = vsub.f32 0.0, %v4715_v27 }
 0xb16   : > { %v4730_v54 = vadd.f32 1.0, %v4722_v33  ;;  %v4718_v13 = vand.u32 2147483647, %v11546_v6  ;;  %v4834_v63 = vmul.f32 %v4826_v10, %v4714_v28  ;;  %v9440_v28 = vld [vmem:[%s10714_s17 + $0x38] sm:$0xff]  ;;  %vm4702_vm15 = vcmp.ge.f32.partialorder %v11546_v6, 0.0  ;;  %s12025_s17 = sld [smem:[#allocation67_spill]] }
 0xb17   : > { %v4731_v4 = vadd.f32 1.0, %v4723_v23  ;;  %v4719_v37 = vand.u32 2147483647, %v11549_v51  ;;  %v4835_v48 = vmul.f32 %v4827_v36, %v4715_v27  ;;  %v8967_v40 = vadd.f32 %v9440_v28, %v4156_v26 }
 0xb18   : > { %9375 = vrcp.f32 %v4730_v54  ;;  %v4726_v52 = vmul.f32 0.3275911, %v4718_v13  ;;  %v4842_v60 = vmul.f32 1.442695, %v4834_v63  ;;  %v4830_v42 = vsub.f32 0.0, %v4718_v13 }
 0xb19   : > { %9377 = vrcp.f32 %v4731_v4  ;;  %v4727_v53 = vmul.f32 0.3275911, %v4719_v37  ;;  %v4831_v17 = vsub.f32 0.0, %v4719_v37  ;;  %v4844_v32 = vmul.f32 1.442695, %v4835_v48 }
 0xb1a   : > { %v4734_v30 = vadd.f32 1.0, %v4726_v52  ;;  %v4838_v15 = vmul.f32 %v4830_v42, %v4718_v13  ;;  %vm4703_vm14 = vcmp.ge.f32.partialorder %v11549_v51, 0.0 }
 0xb1b   : > { %v4735_v43 = vadd.f32 1.0, %v4727_v53  ;;  %v4839_v21 = vmul.f32 %v4831_v17, %v4719_v37 }
 0xb1c   : > { %9379 = vrcp.f32 %v4734_v30  ;;  %v8965_v30 = vadd.f32 %v8964_v1, %v4511_v22 }
 0xb1d   : > { %9381 = vrcp.f32 %v4735_v43 }
 0xb1e   : > { %9383 = vpow2.f32 %v4842_v60 }
 0xb1f   : > { %9385 = vpow2.f32 %v4844_v32 }
 0xb22   : > { %v9376_v16 = vpop.eup %9375 }
 0xb23   : > { %v11556_v34 = vpop.eup %9377  ;;  %v4754_v57 = vmul.f32 1.0614054, %v9376_v16 }
 0xb24   : > { %v4755_v56 = vmul.f32 1.0614054, %v11556_v34 }
 0xb25   : > { %v4762_v59 = vadd.f32 -1.4531521, %v4754_v57  ;;  %v8968_v57 = vadd.f32 %v8967_v40, %v4515_v46 }
 0xb26   : > { %v11560_v39 = vpop.eup %9379  ;;  %v4763_v41 = vadd.f32 -1.4531521, %v4755_v56 }
 0xb27   : > { %v11565_v47 = vpop.eup %9381  ;;  %v4770_v20 = vmul.f32 %v9376_v16, %v4762_v59  ;;  %v4758_v35 = vmul.f32 1.0614054, %v11560_v39 }
 0xb28   : > { %v4771_v31 = vmul.f32 %v11556_v34, %v4763_v41  ;;  %v4759_v55 = vmul.f32 1.0614054, %v11565_v47  ;;  %v4850_v41 = vmul.f32 1.442695, %v4838_v15  ;;  %v9384_v14 = vpop.eup %9383 }
 0xb29   : > { %v4778_v50 = vadd.f32 1.4214138, %v4770_v20  ;;  %v4766_v4 = vadd.f32 -1.4531521, %v4758_v35  ;;  %v4852_v20 = vmul.f32 1.442695, %v4839_v21 }
 0xb2a   : > { %v4779_v7 = vadd.f32 1.4214138, %v4771_v31  ;;  %v4767_v33 = vadd.f32 -1.4531521, %v4759_v55  ;;  %v4682_v21 = vmul.f32 0.5, %v11529_v25 }
 0xb2b   : > { %v4786_v19 = vmul.f32 %v9376_v16, %v4778_v50  ;;  %v4774_v60 = vmul.f32 %v11560_v39, %v4766_v4  ;;  %9387 = vpow2.f32 %v4852_v20 }
 0xb2c   : > { %v4787_v27 = vmul.f32 %v11556_v34, %v4779_v7  ;;  %v4775_v26 = vmul.f32 %v11565_v47, %v4767_v33  ;;  %v4706_v33 = vsel %vm4698_vm12, 1.0, %v11973_v61 }
 0xb2d   : > { %v4794_v23 = vadd.f32 -0.28449672, %v4786_v19  ;;  %v4663_v54 = vpop.f32.mrb[20].mxu1 }
 0xb2e   : > { %v11576_v52 = vadd.f32 %v8959_v8, %v4663_v54  ;;  %v4665_v53 = vpop.f32.mrb[21].mxu1  ;;  %v4795_v43 = vadd.f32 -0.28449672, %v4787_v27  ;;  %v4783_v31 = vadd.f32 1.4214138, %v4775_v26  ;;  %v9386_v27 = vpop.eup %9385  ;;  %v4707_v26 = vsel %vm4699_vm13, 1.0, %v11973_v61 }
 0xb2f   : > { %v4802_v10 = vmul.f32 %v9376_v16, %v4794_v23  ;;  %v11578_v63 = vadd.f32 %v8962_v11, %v4665_v53  ;;  %v4782_v8 = vadd.f32 1.4214138, %v4774_v60 }
 0xb30   : > { %v11581_v45 = vmul.f32 0.70710677, %v11576_v52  ;;  %v4803_v5 = vmul.f32 %v11556_v34, %v4795_v43  ;;  %v4791_v42 = vmul.f32 %v11565_v47, %v4783_v31 }
 0xb31   : > { %v4810_v36 = vadd.f32 0.2548296, %v4802_v10  ;;  %v11585_v56 = vmul.f32 0.70710677, %v11578_v63  ;;  %v4669_v59 = vpop.f32.mrb[22].mxu1  ;;  %v4790_v32 = vmul.f32 %v11560_v39, %v4782_v8  ;;  %v4686_v8 = vmul.f32 0.5, %v11540_v9 }
 0xb32   : > { %v4716_v22 = vand.u32 2147483647, %v11581_v45  ;;  %v11589_v13 = vadd.f32 %v8965_v30, %v4669_v59  ;;  %v4671_v37 = vpop.f32.mrb[23].mxu1  ;;  %v4799_v54 = vadd.f32 -0.28449672, %v4791_v42  ;;  %vm4700_vm0 = vcmp.ge.f32.partialorder %v11581_v45, 0.0 }
 0xb33   : > { %v4818_v62 = vmul.f32 %v9376_v16, %v4810_v36  ;;  %v4717_v46 = vand.u32 2147483647, %v11585_v56  ;;  %v11596_v35 = vadd.f32 %v8968_v57, %v4671_v37  ;;  %v4811_v16 = vadd.f32 0.2548296, %v4803_v5 }
 0xb34   : > { %v4724_v24 = vmul.f32 0.3275911, %v4716_v22  ;;  %v11594_v48 = vmul.f32 0.70710677, %v11589_v13  ;;  %v4828_v53 = vsub.f32 0.0, %v4716_v22  ;;  %vm4701_vm1 = vcmp.ge.f32.partialorder %v11585_v56, 0.0 }
 0xb35   : > { %v4858_v55 = vmul.f32 %v9384_v14, %v4818_v62  ;;  %v4725_v50 = vmul.f32 0.3275911, %v4717_v46  ;;  %v11605_v11 = vmul.f32 0.70710677, %v11596_v35  ;;  %v4819_v40 = vmul.f32 %v11556_v34, %v4811_v16  ;;  %v9388_v37 = vpop.eup %9387 }
 0xb36   : > { %v4732_v38 = vadd.f32 1.0, %v4724_v24  ;;  %v11599_v1 = vand.u32 2147483647, %v11594_v48  ;;  %v4798_v43 = vadd.f32 -0.28449672, %v4790_v32  ;;  %v4829_v10 = vsub.f32 0.0, %v4717_v46 }
 0xb37   : > { %v4733_v7 = vadd.f32 1.0, %v4725_v50  ;;  %v4866_v17 = vsub.f32 1.0, %v4858_v55  ;;  %v11611_v0 = vand.u32 2147483647, %v11605_v11  ;;  %v4859_v23 = vmul.f32 %v9386_v27, %v4819_v40 }
 0xb38   : > { %9389 = vrcp.f32 %v4732_v38  ;;  %v4728_v19 = vmul.f32 0.3275911, %v11599_v1  ;;  %v4807_v34 = vmul.f32 %v11565_v47, %v4799_v54  ;;  %v4806_v36 = vmul.f32 %v11560_v39, %v4798_v43 }
 0xb39   : > { %9391 = vrcp.f32 %v4733_v7  ;;  %v4874_v4 = vmul.f32 %v4866_v17, %v4706_v33  ;;  %v4729_v30 = vmul.f32 0.3275911, %v11611_v0  ;;  %v4867_v15 = vsub.f32 1.0, %v4859_v23 }
 0xb3a   : > { %9393 = vpow2.f32 %v4850_v41  ;;  %v4736_v28 = vadd.f32 1.0, %v4728_v19  ;;  %v4815_v60 = vadd.f32 0.2548296, %v4807_v34  ;;  %v4836_v62 = vmul.f32 %v4828_v53, %v4716_v22 }
 0xb3b   : > { %v4737_v57 = vadd.f32 1.0, %v4729_v30  ;;  %v4875_v59 = vmul.f32 %v4867_v15, %v4707_v26  ;;  %v4882_v5 = vadd.f32 1.0, %v4874_v4  ;;  %v4814_v41 = vadd.f32 0.2548296, %v4806_v36 }
 0xb3c   : > { %9395 = vrcp.f32 %v4736_v28  ;;  %v4837_v14 = vmul.f32 %v4829_v10, %v4717_v46  ;;  %v4832_v24 = vsub.f32 0.0, %v11599_v1  ;;  %v4823_v55 = vmul.f32 %v11565_v47, %v4815_v60 }
 0xb3d   : > { %9397 = vrcp.f32 %v4737_v57  ;;  %v4883_v31 = vadd.f32 1.0, %v4875_v59  ;;  %v4822_v22 = vmul.f32 %v11560_v39, %v4814_v41  ;;  %v4711_v46 = vsel %vm4703_vm14, 1.0, %v11973_v61 }
 0xb3e   : > { %v4863_v19 = vmul.f32 %v9388_v37, %v4823_v55  ;;  %v4890_v47 = vmul.f32 %v4882_v5, %v4682_v21  ;;  %v4846_v32 = vmul.f32 1.442695, %v4836_v62  ;;  %v4848_v27 = vmul.f32 1.442695, %v4837_v14 }
 0xb3f   : > { %v4891_v7 = vmul.f32 %v4883_v31, %v4683_v49  ;;  %v4840_v33 = vmul.f32 %v4832_v24, %v11599_v1  ;;  %v4833_v4 = vsub.f32 0.0, %v11611_v0  ;;  %v4687_v30 = vmul.f32 0.5, %v11543_v18 }
 0xb40   : > { %v4871_v23 = vsub.f32 1.0, %v4863_v19  ;;  %v4710_v10 = vsel %vm4702_vm15, 1.0, %v11973_v61  ;;  %9399 = vpow2.f32 %v4846_v32  ;;  %vm4704_vm2 = vcmp.ge.f32.partialorder %v11594_v48, 0.0 }
 0xb41   : > { %5033 = vmatprep.mubr.f32.mxu0 %v4891_v7  ;;  %9401 = vpow2.f32 %v4848_v27  ;;  %v4854_v57 = vmul.f32 1.442695, %v4840_v33  ;;  %v4841_v60 = vmul.f32 %v4833_v4, %v11611_v0  ;;  %v4685_v56 = vmul.f32 0.5, %v11578_v63 }
 0xb42   : > { %v11621_v20 = vpop.eup %9389  ;;  %5034 = vmatmul.mubr.f32.vlgmr.msra.gmra.mrb[24].mxu0 %v4890_v47  ;;  %v4879_v43 = vmul.f32 %v4871_v23, %v4711_v46  ;;  %vm4705_vm3 = vcmp.ge.f32.partialorder %v11605_v11, 0.0 }
 0xb43   : > { %v11625_v50 = vpop.eup %9391  ;;  %v4756_v38 = vmul.f32 1.0614054, %v11621_v20  ;;  %9403 = vpow2.f32 %v4854_v57  ;;  %v4713_v48 = vsel %vm4705_vm3, 1.0, %v11973_v61 }
 0xb44   : > { %v9394_v16 = vpop.eup %9393  ;;  %v4757_v42 = vmul.f32 1.0614054, %v11625_v50  ;;  %v4887_v26 = vadd.f32 1.0, %v4879_v43 }
 0xb45   : > { %v4764_v17 = vadd.f32 -1.4531521, %v4756_v38  ;;  %v4862_v28 = vmul.f32 %v9394_v16, %v4822_v22  ;;  %v4856_v16 = vmul.f32 1.442695, %v4841_v60  ;;  %v4684_v60 = vmul.f32 0.5, %v11576_v52 }
 0xb46   : > { %v9396_v40 = vpop.eup %9395  ;;  %v4765_v39 = vadd.f32 -1.4531521, %v4757_v42  ;;  %v4895_v62 = vmul.f32 %v4887_v26, %v4687_v30 }
 0xb47   : > { %v4772_v54 = vmul.f32 %v11621_v20, %v4764_v17  ;;  %v4870_v51 = vsub.f32 1.0, %v4862_v28  ;;  %v4760_v53 = vmul.f32 1.0614054, %v9396_v40  ;;  %v9398_v49 = vpop.eup %9397  ;;  %9405 = vpow2.f32 %v4856_v16  ;;  %v5196_v16 = vld [vmem:[#allocation26 + $0x80] sm:$0xff] }
 0xb48   : > { %v4773_v15 = vmul.f32 %v11625_v50, %v4765_v39  ;;  %v4761_v41 = vmul.f32 1.0614054, %v9398_v49  ;;  %5038 = vmatprep.mubr.f32.mxu0 %v4895_v62  ;;  %v4712_v62 = vsel %vm4704_vm2, 1.0, %v11973_v61 }
 0xb49   : > { %v4780_v1 = vadd.f32 1.4214138, %v4772_v54  ;;  %v4878_v34 = vmul.f32 %v4870_v51, %v4710_v10  ;;  %v4768_v21 = vadd.f32 -1.4531521, %v4760_v53  ;;  %v4708_v10 = vsel %vm4700_vm0, 1.0, %v11973_v61 }
 0xb4a   : > { %v4781_v36 = vadd.f32 1.4214138, %v4773_v15  ;;  %v4769_v38 = vadd.f32 -1.4531521, %v4761_v41  ;;  %v9400_v32 = vpop.eup %9399 }
 0xb4b   : > { %v4788_v59 = vmul.f32 %v11621_v20, %v4780_v1  ;;  %v4886_v37 = vadd.f32 1.0, %v4878_v34  ;;  %v4776_v5 = vmul.f32 %v9396_v40, %v4768_v21  ;;  %v9402_v27 = vpop.eup %9401  ;;  %v4709_v34 = vsel %vm4701_vm1, 1.0, %v11973_v61 }
 0xb4c   : > { %v4789_v6 = vmul.f32 %v11625_v50, %v4781_v36  ;;  %v4777_v46 = vmul.f32 %v9398_v49, %v4769_v38  ;;  %v4688_v38 = vmul.f32 0.5, %v11589_v13 }
 0xb4d   : > { %v4796_v14 = vadd.f32 -0.28449672, %v4788_v59  ;;  %v4894_v24 = vmul.f32 %v4886_v37, %v4686_v8  ;;  %v4784_v31 = vadd.f32 1.4214138, %v4776_v5  ;;  %v9404_v43 = vpop.eup %9403 }
 0xb4e   : > { %v4797_v55 = vadd.f32 -0.28449672, %v4789_v6  ;;  %v4785_v17 = vadd.f32 1.4214138, %v4777_v46  ;;  %v5198_v46 = vld [vmem:[#allocation26 + $0x90] sm:$0xff] }
 0xb4f   : > { %v4804_v22 = vmul.f32 %v11621_v20, %v4796_v14  ;;  %5039 = vmatmul.mubr.f32.gmra.mrb[26].mxu0 %v4894_v24  ;;  %v4792_v7 = vmul.f32 %v9396_v40, %v4784_v31 }
 0xb50   : > { %v4805_v0 = vmul.f32 %v11625_v50, %v4797_v55  ;;  %v4793_v23 = vmul.f32 %v9398_v49, %v4785_v17  ;;  %v5201_v17 = vld [vmem:[#allocation26 + $0xa8] sm:$0xff] }
 0xb51   : > { %v4812_v19 = vadd.f32 0.2548296, %v4804_v22  ;;  %v4800_v42 = vadd.f32 -0.28449672, %v4792_v7  ;;  %v5197_v7 = vld [vmem:[#allocation26 + $0x88] sm:$0xff] }
 0xb52   : > { %v4813_v47 = vadd.f32 0.2548296, %v4805_v0  ;;  %v4801_v51 = vadd.f32 -0.28449672, %v4793_v23  ;;  %v8690_v0 = vpack.c.bf16 %v5197_v7, %v5196_v16  ;;  %v5205_v23 = vld [vmem:[#allocation26 + $0xc8] sm:$0xff] }
 0xb53   : > { %v4820_v8 = vmul.f32 %v11621_v20, %v4812_v19  ;;  %v4808_v28 = vmul.f32 %v9396_v40, %v4800_v42  ;;  %v5199_v19 = vld [vmem:[#allocation26 + $0x98] sm:$0xff] }
 0xb54   : > { %v4821_v33 = vmul.f32 %v11625_v50, %v4813_v47  ;;  %v4809_v15 = vmul.f32 %v9398_v49, %v4801_v51  ;;  %8691 = vmatprep.subr.bf16.mxu0 %v8690_v0  ;;  %v8694_v42 = vpack.c.bf16 %v5199_v19, %v5198_v46  ;;  %v5200_v47 = vld [vmem:[#allocation26 + $0xa0] sm:$0xff] }
 0xb55   : > { %v4860_v39 = vmul.f32 %v9400_v32, %v4820_v8  ;;  %v4816_v54 = vadd.f32 0.2548296, %v4808_v28  ;;  %8693 = vmatpush3.bf16.msra.mxu0 %v8690_v0  ;;  %v8698_v32 = vpack.c.bf16 %v5201_v17, %v5200_v47  ;;  %v5202_v8 = vld [vmem:[#allocation26 + $0xb0] sm:$0xff]  ;;  %v5203_v28 = vld [vmem:[#allocation26 + $0xb8] sm:$0xff] }
 0xb56   : > { %v4861_v4 = vmul.f32 %v9402_v27, %v4821_v33  ;;  %v4817_v57 = vadd.f32 0.2548296, %v4809_v15  ;;  %8695 = vmatprep.subr.bf16.mxu0 %v8694_v42  ;;  %v8702_v27 = vpack.c.bf16 %v5203_v28, %v5202_v8  ;;  %v5204_v33 = vld [vmem:[#allocation26 + $0xc0] sm:$0xff] }
 0xb57   : > { %v4868_v53 = vsub.f32 1.0, %v4860_v39  ;;  %v4824_v30 = vmul.f32 %v9396_v40, %v4816_v54  ;;  %v9406_v40 = vpop.eup %9405  ;;  %v8706_v39 = vpack.c.bf16 %v5205_v23, %v5204_v33  ;;  %v5206_v54 = vld [vmem:[#allocation26 + $0xd0] sm:$0xff]  ;;  %v5177_v15 = vld [vmem:[#allocation26] sm:$0xff] }
 0xb58   : > { %v4869_v20 = vsub.f32 1.0, %v4861_v4  ;;  %v4825_v59 = vmul.f32 %v9398_v49, %v4817_v57  ;;  %v4689_v49 = vmul.f32 0.5, %v11596_v35  ;;  %v5207_v4 = vld [vmem:[#allocation26 + $0xd8] sm:$0xff] }
 0xb59   : > { %v4876_v1 = vmul.f32 %v4868_v53, %v4708_v10  ;;  %v4864_v50 = vmul.f32 %v9404_v43, %v4824_v30  ;;  %8697 = vmatpush3.bf16.msra.mxu0 %v8694_v42  ;;  %v8710_v51 = vpack.c.bf16 %v5207_v4, %v5206_v54  ;;  %v5208_v53 = vld [vmem:[#allocation26 + $0xe0] sm:$0xff]  ;;  %v5209_v30 = vld [vmem:[#allocation26 + $0xe8] sm:$0xff]  ;;  %v5210_v10 = vld [vmem:[#allocation26 + $0xf0] sm:$0xff] }
 0xb5a   : > { %v4877_v21 = vmul.f32 %v4869_v20, %v4709_v34  ;;  %v4865_v5 = vmul.f32 %v9406_v40, %v4825_v59  ;;  %8699 = vmatprep.subr.bf16.mxu0 %v8698_v32  ;;  %v8714_v43 = vpack.c.bf16 %v5209_v30, %v5208_v53  ;;  %v5211_v20 = vld [vmem:[#allocation26 + $0xf8] sm:$0xff]  ;;  %v5178_v34 = vld [vmem:[#allocation26 + $0x8] sm:$0xff] }
 0xb5b   : > { %v4884_v45 = vadd.f32 1.0, %v4876_v1  ;;  %v4872_v26 = vsub.f32 1.0, %v4864_v50  ;;  %v8718_v1 = vpack.c.bf16 %v5211_v20, %v5210_v10  ;;  %v11662_v50 = vpack.c.bf16 %v5178_v34, %v5177_v15  ;;  %v6580_v59 = vld [vmem:[%s12024_s6] ss:$0 sm:$0xff] }
 0xb5c   : > { %v4885_v36 = vadd.f32 1.0, %v4877_v21  ;;  %v4873_v14 = vsub.f32 1.0, %v4865_v5 }
 0xb5d   : > { %v4892_v6 = vmul.f32 %v4884_v45, %v4684_v60  ;;  %v4880_v41 = vmul.f32 %v4872_v26, %v4712_v62  ;;  %8701 = vmatpush3.bf16.msra.mxu0 %v8698_v32 }
 0xb5e   : > { %v4893_v37 = vmul.f32 %v4885_v36, %v4685_v56  ;;  %v4881_v24 = vmul.f32 %v4873_v14, %v4713_v48  ;;  %8703 = vmatprep.subr.bf16.mxu0 %v8702_v27 }
 0xb5f   : > { %v4888_v31 = vadd.f32 1.0, %v4880_v41 }
 0xb60   : > { %5108 = vmatprep.mubr.f32.mxu1 %v4893_v37  ;;  %v4889_v55 = vadd.f32 1.0, %v4881_v24 }
 0xb61   : > { %5109 = vmatmul.mubr.f32.vlgmr.msra.gmra.mrb[24].mxu1 %v4892_v6  ;;  %v4896_v11 = vmul.f32 %v4888_v31, %v4688_v38  ;;  %8705 = vmatpush3.bf16.msra.mxu0 %v8702_v27 }
 0xb62   : > { %v4897_v22 = vmul.f32 %v4889_v55, %v4689_v49  ;;  %8707 = vmatprep.subr.bf16.mxu0 %v8706_v39 }
 0xb64   : > { %5113 = vmatprep.mubr.f32.mxu1 %v4897_v22 }
 0xb65   : > { %5114 = vmatmul.mubr.f32.gmra.mrb[26].mxu1 %v4896_v11  ;;  %8709 = vmatpush3.bf16.msra.mxu0 %v8706_v39 }
 0xb66   : > { %8711 = vmatprep.subr.bf16.mxu0 %v8710_v51 }
 0xb69   : > { %8713 = vmatpush3.bf16.msra.mxu0 %v8710_v51 }
 0xb6a   : > { %8715 = vmatprep.subr.bf16.mxu0 %v8714_v43 }
 0xb6d   : > { %8717 = vmatpush3.bf16.msra.mxu0 %v8714_v43 }
 0xb6e   : > { %8719 = vmatprep.subr.bf16.mxu0 %v8718_v1 }
 0xb71   : > { %8721 = vmatpush3.bf16.msra.mxu0 %v8718_v1 }
 0xb72   : > { %8723 = vmatprep.subr.bf16.mxu0 %v11662_v50 }
 0xc15   : > { %v7076_v21 = vpop.f32.mrb[24].mxu0 }
 0xc16   : > { %v7077_v57 = vpop.f32.mrb[25].mxu0 }
 0xc17   : > { %v7078_v45 = vadd.f32 %v7077_v57, %v7076_v21 }
 0xc19   : > { %v5036_v37 = vadd.f32 %v7078_v45, %v6580_v59 }
 0xc22   : > { %v7079_v26 = vpop.f32.mrb[26].mxu0 }
 0xc23   : > { %v7080_v56 = vpop.f32.mrb[27].mxu0 }
 0xc24   : > { %v7081_v36 = vadd.f32 %v7080_v56, %v7079_v26 }
 0xc26   : > { %v5041_v24 = vadd.f32 %v7081_v36, %v6580_v59 }
 0xc34   : > { %v7114_v40 = vpop.f32.mrb[24].mxu1 }
 0xc35   : > { %v7115_v60 = vpop.f32.mrb[25].mxu1 }
 0xc36   : > { %v7116_v5 = vadd.f32 %v7115_v60, %v7114_v40 }
 0xc38   : > { %v5111_v62 = vadd.f32 %v7116_v5, %v5036_v37  ;;  %v7117_v14 = vpop.f32.mrb[26].mxu1 }
 0xc39   : > { %v7118_v48 = vpop.f32.mrb[27].mxu1 }
 0xc3a   : > { %v5121_v6 = vmul.f32 0.70710677, %v5111_v62  ;;  %v7119_v49 = vadd.f32 %v7118_v48, %v7117_v14  ;;  %v5119_v59 = vmul.f32 0.5, %v5111_v62  ;;  %v5181_v62 = vld [vmem:[#allocation26 + $0x20] sm:$0xff] }
 0xc3c   : > { %v5127_v41 = vand.u32 2147483647, %v5121_v6  ;;  %v5116_v38 = vadd.f32 %v7119_v49, %v5041_v24  ;;  %vm5123_vm4 = vcmp.ge.f32.partialorder %v5121_v6, 0.0  ;;  %v5179_v24 = vld [vmem:[#allocation26 + $0x10] sm:$0xff] }
 0xc3d   : > { %v5125_v26 = vsel %vm5123_vm4, 1.0, %v11973_v61 }
 0xc3e   : > { %v5129_v31 = vmul.f32 0.3275911, %v5127_v41  ;;  %v5122_v22 = vmul.f32 0.70710677, %v5116_v38  ;;  %v5155_v7 = vsub.f32 0.0, %v5127_v41  ;;  %v5120_v49 = vmul.f32 0.5, %v5116_v38 }
 0xc3f   : > { %v5186_v38 = vld [vmem:[#allocation26 + $0x48] sm:$0xff] }
 0xc40   : > { %v5131_v55 = vadd.f32 1.0, %v5129_v31  ;;  %v5128_v11 = vand.u32 2147483647, %v5122_v22  ;;  %v5157_v19 = vmul.f32 %v5155_v7, %v5127_v41  ;;  %vm5124_vm5 = vcmp.ge.f32.partialorder %v5122_v22, 0.0  ;;  %v5180_v31 = vld [vmem:[#allocation26 + $0x18] sm:$0xff] }
 0xc41   : > { %v5126_v6 = vsel %vm5124_vm5, 1.0, %v11973_v61 }
 0xc42   : > { %9407 = vrcp.f32 %v5131_v55  ;;  %v5130_v16 = vmul.f32 0.3275911, %v5128_v11  ;;  %v5159_v17 = vmul.f32 1.442695, %v5157_v19  ;;  %v5156_v32 = vsub.f32 0.0, %v5128_v11  ;;  %v5184_v19 = vld [vmem:[#allocation26 + $0x38] sm:$0xff] }
 0xc44   : > { %v5132_v0 = vadd.f32 1.0, %v5130_v16  ;;  %v5158_v33 = vmul.f32 %v5156_v32, %v5128_v11  ;;  %v8726_v16 = vpack.c.bf16 %v5180_v31, %v5179_v24  ;;  %v5187_v32 = vld [vmem:[#allocation26 + $0x50] sm:$0xff] }
 0xc46   : > { %9409 = vrcp.f32 %v5132_v0  ;;  %v5161_v51 = vmul.f32 1.442695, %v5158_v33  ;;  %v5182_v0 = vld [vmem:[#allocation26 + $0x28] sm:$0xff] }
 0xc47   : > { %9411 = vpow2.f32 %v5159_v17  ;;  %v8730_v22 = vpack.c.bf16 %v5182_v0, %v5181_v62  ;;  %v5548_v0 = vld [vmem:[#allocation27 + $0xa0] sm:$0xff] }
 0xc48   : > { %9413 = vpow2.f32 %v5161_v51  ;;  %v5366_v51 = vld [vmem:[#allocation26 + $0x108] sm:$0xff] }
 0xc4c   : > { %v9408_v46 = vpop.eup %9407 }
 0xc4d   : > { %v5137_v42 = vmul.f32 1.0614054, %v9408_v46 }
 0xc4f   : > { %v5139_v47 = vadd.f32 -1.4531521, %v5137_v42 }
 0xc50   : > { %v9410_v27 = vpop.eup %9409 }
 0xc51   : > { %v5141_v8 = vmul.f32 %v9408_v46, %v5139_v47  ;;  %v5138_v39 = vmul.f32 1.0614054, %v9410_v27  ;;  %v9412_v1 = vpop.eup %9411  ;;  %v5185_v47 = vld [vmem:[#allocation26 + $0x40] sm:$0xff] }
 0xc52   : > { %v9414_v37 = vpop.eup %9413  ;;  %v8738_v17 = vpack.c.bf16 %v5186_v38, %v5185_v47  ;;  %v5552_v38 = vld [vmem:[#allocation27 + $0xc0] sm:$0xff] }
 0xc53   : > { %v5143_v28 = vadd.f32 1.4214138, %v5141_v8  ;;  %v5140_v4 = vadd.f32 -1.4531521, %v5138_v39  ;;  %v5188_v8 = vld [vmem:[#allocation26 + $0x58] sm:$0xff] }
 0xc54   : > { %v5192_v39 = vld [vmem:[#allocation26 + $0x78] sm:$0xff] }
 0xc55   : > { %v5145_v23 = vmul.f32 %v9408_v46, %v5143_v28  ;;  %v5142_v30 = vmul.f32 %v9410_v27, %v5140_v4  ;;  %v8742_v28 = vpack.c.bf16 %v5188_v8, %v5187_v32  ;;  %v5365_v4 = vld [vmem:[#allocation26 + $0x100] sm:$0xff]  ;;  %v5554_v8 = vld [vmem:[#allocation27 + $0xd0] sm:$0xff] }
 0xc57   : > { %v5147_v54 = vadd.f32 -0.28449672, %v5145_v23  ;;  %v5144_v10 = vadd.f32 1.4214138, %v5142_v30  ;;  %v5191_v23 = vld [vmem:[#allocation26 + $0x70] sm:$0xff] }
 0xc58   : > { %v5367_v30 = vld [vmem:[#allocation26 + $0x110] sm:$0xff] }
 0xc59   : > { %v5149_v53 = vmul.f32 %v9408_v46, %v5147_v54  ;;  %v5146_v15 = vmul.f32 %v9410_v27, %v5144_v10  ;;  %v8750_v54 = vpack.c.bf16 %v5192_v39, %v5191_v23  ;;  %v5558_v39 = vld [vmem:[#allocation27 + $0xf0] sm:$0xff] }
 0xc5b   : > { %v5151_v43 = vadd.f32 0.2548296, %v5149_v53  ;;  %v5148_v21 = vadd.f32 -0.28449672, %v5146_v15  ;;  %v8754_v53 = vpack.c.bf16 %v5366_v51, %v5365_v4  ;;  %v5369_v15 = vld [vmem:[#allocation26 + $0x120] sm:$0xff] }
 0xc5c   : > { %v5525_v4 = vld [vmem:[#allocation27] sm:$0xff] }
 0xc5d   : > { %v5153_v20 = vmul.f32 %v9408_v46, %v5151_v43  ;;  %v5150_v45 = vmul.f32 %v9410_v27, %v5148_v21  ;;  %v5183_v46 = vld [vmem:[#allocation26 + $0x30] sm:$0xff]  ;;  %v5368_v43 = vld [vmem:[#allocation26 + $0x118] sm:$0xff] }
 0xc5e   : > { %v8734_v42 = vpack.c.bf16 %v5184_v19, %v5183_v46  ;;  %v8758_v10 = vpack.c.bf16 %v5368_v43, %v5367_v30  ;;  %v5550_v19 = vld [vmem:[#allocation27 + $0xb0] sm:$0xff]  ;;  %v6581_v43 = vld [vmem:[%s12025_s17] ss:$0 sm:$0xff] }
 0xc5f   : > { %v5163_v34 = vmul.f32 %v9412_v1, %v5153_v20  ;;  %v5152_v36 = vadd.f32 0.2548296, %v5150_v45  ;;  %v5370_v1 = vld [vmem:[#allocation26 + $0x128] sm:$0xff]  ;;  %v5372_v45 = vld [vmem:[#allocation26 + $0x138] sm:$0xff] }
 0xc60   : > { %v8762_v21 = vpack.c.bf16 %v5370_v1, %v5369_v15 }
 0xc61   : > { %v5165_v57 = vsub.f32 1.0, %v5163_v34  ;;  %v5154_v60 = vmul.f32 %v9410_v27, %v5152_v36  ;;  %v5189_v27 = vld [vmem:[#allocation26 + $0x60] sm:$0xff]  ;;  %v5374_v36 = vld [vmem:[#allocation26 + $0x148] sm:$0xff] }
 0xc63   : > { %v5167_v56 = vmul.f32 %v5165_v57, %v5125_v26  ;;  %v5164_v41 = vmul.f32 %v9414_v37, %v5154_v60  ;;  %v5371_v57 = vld [vmem:[#allocation26 + $0x130] sm:$0xff]  ;;  %v5376_v60 = vld [vmem:[#allocation26 + $0x158] sm:$0xff] }
 0xc64   : > { %v8766_v26 = vpack.c.bf16 %v5372_v45, %v5371_v57 }
 0xc65   : > { %v5169_v40 = vadd.f32 1.0, %v5167_v56  ;;  %v5166_v14 = vsub.f32 1.0, %v5164_v41  ;;  %v5373_v56 = vld [vmem:[#allocation26 + $0x140] sm:$0xff]  ;;  %v5378_v41 = vld [vmem:[#allocation26 + $0x168] sm:$0xff] }
 0xc67   : > { %v5171_v5 = vmul.f32 %v5169_v40, %v5119_v59  ;;  %v5168_v48 = vmul.f32 %v5166_v14, %v5126_v6  ;;  %v8770_v59 = vpack.c.bf16 %v5374_v36, %v5373_v56  ;;  %v5375_v40 = vld [vmem:[#allocation26 + $0x150] sm:$0xff] }
 0xc68   : > { %v8774_v37 = vpack.c.bf16 %v5376_v60, %v5375_v40  ;;  %v5379_v6 = vld [vmem:[#allocation26 + $0x170] sm:$0xff] }
 0xc69   : > { %5173 = vst [vmem:[#allocation2 + $0x1] sm:$0xff] %v5171_v5  ;;  %7680 = vmatprep.mubr.f32.mxu0 %v5171_v5  ;;  %v5170_v55 = vadd.f32 1.0, %v5168_v48  ;;  %v5377_v5 = vld [vmem:[#allocation26 + $0x160] sm:$0xff]  ;;  %v5380_v48 = vld [vmem:[#allocation26 + $0x178] sm:$0xff] }
 0xc6a   : > { %v8778_v14 = vpack.c.bf16 %v5378_v41, %v5377_v5  ;;  %v8782_v24 = vpack.c.bf16 %v5380_v48, %v5379_v6 }
 0xc6b   : > { %v5172_v11 = vmul.f32 %v5170_v55, %v5120_v49  ;;  %v5544_v49 = vld [vmem:[#allocation27 + $0x80] sm:$0xff]  ;;  %v5545_v55 = vld [vmem:[#allocation27 + $0x88] sm:$0xff] }
 0xc6d   : > { %5174 = vst [vmem:[#allocation2 + $0x9] sm:$0xff] %v5172_v11  ;;  %7681 = vmatmul.mubr.f32.vlgmr.msra.gmra.mrb[28].mxu0 %v5172_v11  ;;  %v8786_v11 = vpack.c.bf16 %v5545_v55, %v5544_v49 }
 0xc6e   : > { %8725 = vmatpush3.bf16.msra.mxu0 %v11662_v50  ;;  %v5190_v50 = vld [vmem:[#allocation26 + $0x68] sm:$0xff] }
 0xc6f   : > { %8727 = vmatprep.subr.bf16.mxu0 %v8726_v16  ;;  %v8746_v33 = vpack.c.bf16 %v5190_v50, %v5189_v27  ;;  %8787 = vmatprep.subr.bf16.mxu1 %v8786_v11  ;;  %v5556_v50 = vld [vmem:[#allocation27 + $0xe0] sm:$0xff] }
 0xc70   : > { %v5175_v7 = vld [vmem:[#allocation2] sm:$0xff]  ;;  %8789 = vmatpush3.bf16.msra.mxu1 %v8786_v11 }
 0xc71   : > { %7715 = vmatprep.mubr.f32.mxu0 %v5175_v7  ;;  %v5547_v7 = vld [vmem:[#allocation27 + $0x98] sm:$0xff] }
 0xc72   : > { %8729 = vmatpush3.bf16.msra.mxu0 %v8726_v16  ;;  %v5546_v16 = vld [vmem:[#allocation27 + $0x90] sm:$0xff] }
 0xc73   : > { %8731 = vmatprep.subr.bf16.mxu0 %v8730_v22  ;;  %v8790_v62 = vpack.c.bf16 %v5547_v7, %v5546_v16 }
 0xc74   : > { %v5176_v20 = vld [vmem:[#allocation2 + $0x8] sm:$0xff] }
 0xc75   : > { %v5362_v34 = vld [vmem:[#allocation2 + $0x2] sm:$0xff]  ;;  %v5363_v31 = vld [vmem:[#allocation2 + $0xa] sm:$0xff]  ;;  %8791 = vmatprep.subr.bf16.mxu1 %v8790_v62 }
 0xc76   : > { %8733 = vmatpush3.bf16.msra.mxu0 %v8730_v22  ;;  %8793 = vmatpush3.bf16.msra.mxu1 %v8790_v62  ;;  %v5549_v22 = vld [vmem:[#allocation27 + $0xa8] sm:$0xff] }
 0xc77   : > { %8735 = vmatprep.subr.bf16.mxu0 %v8734_v42  ;;  %v8794_v46 = vpack.c.bf16 %v5549_v22, %v5548_v0 }
 0xc79   : > { %8795 = vmatprep.subr.bf16.mxu1 %v8794_v46 }
 0xc7a   : > { %8737 = vmatpush3.bf16.msra.mxu0 %v8734_v42  ;;  %8797 = vmatpush3.bf16.msra.mxu1 %v8794_v46  ;;  %v5551_v42 = vld [vmem:[#allocation27 + $0xb8] sm:$0xff] }
 0xc7b   : > { %8739 = vmatprep.subr.bf16.mxu0 %v8738_v17  ;;  %v8798_v47 = vpack.c.bf16 %v5551_v42, %v5550_v19 }
 0xc7d   : > { %8799 = vmatprep.subr.bf16.mxu1 %v8798_v47 }
 0xc7e   : > { %8741 = vmatpush3.bf16.msra.mxu0 %v8738_v17  ;;  %8801 = vmatpush3.bf16.msra.mxu1 %v8798_v47  ;;  %v5553_v17 = vld [vmem:[#allocation27 + $0xc8] sm:$0xff] }
 0xc7f   : > { %8743 = vmatprep.subr.bf16.mxu0 %v8742_v28  ;;  %v8802_v32 = vpack.c.bf16 %v5553_v17, %v5552_v38 }
 0xc81   : > { %8803 = vmatprep.subr.bf16.mxu1 %v8802_v32 }
 0xc82   : > { %8745 = vmatpush3.bf16.msra.mxu0 %v8742_v28  ;;  %8805 = vmatpush3.bf16.msra.mxu1 %v8802_v32  ;;  %v5555_v28 = vld [vmem:[#allocation27 + $0xd8] sm:$0xff] }
 0xc83   : > { %8747 = vmatprep.subr.bf16.mxu0 %v8746_v33  ;;  %v8806_v27 = vpack.c.bf16 %v5555_v28, %v5554_v8 }
 0xc85   : > { %8807 = vmatprep.subr.bf16.mxu1 %v8806_v27 }
 0xc86   : > { %8749 = vmatpush3.bf16.msra.mxu0 %v8746_v33  ;;  %8809 = vmatpush3.bf16.msra.mxu1 %v8806_v27  ;;  %v5557_v33 = vld [vmem:[#allocation27 + $0xe8] sm:$0xff] }
 0xc87   : > { %8751 = vmatprep.subr.bf16.mxu0 %v8750_v54  ;;  %v8810_v23 = vpack.c.bf16 %v5557_v33, %v5556_v50 }
 0xc89   : > { %8811 = vmatprep.subr.bf16.mxu1 %v8810_v23 }
 0xc8a   : > { %8753 = vmatpush3.bf16.msra.mxu0 %v8750_v54  ;;  %8813 = vmatpush3.bf16.msra.mxu1 %v8810_v23  ;;  %v5559_v54 = vld [vmem:[#allocation27 + $0xf8] sm:$0xff] }
 0xc8b   : > { %8755 = vmatprep.subr.bf16.mxu0 %v8754_v53  ;;  %v8814_v51 = vpack.c.bf16 %v5559_v54, %v5558_v39 }
 0xc8d   : > { %7716 = vmatmul.mubr.f32.vlgmr.msra.gmra.mrb[28].mxu0 %v5176_v20  ;;  %8815 = vmatprep.subr.bf16.mxu1 %v8814_v51 }
 0xc8e   : > { %8757 = vmatpush3.bf16.msra.mxu0 %v8754_v53  ;;  %7750 = vmatprep.mubr.f32.mxu0 %v5362_v34  ;;  %v5526_v53 = vld [vmem:[#allocation27 + $0x8] sm:$0xff] }
 0xc8f   : > { %8759 = vmatprep.subr.bf16.mxu0 %v8758_v10  ;;  %v11670_v30 = vpack.c.bf16 %v5526_v53, %v5525_v4  ;;  %8817 = vmatpush3.bf16.msra.mxu1 %v8814_v51 }
 0xc91   : > { %8819 = vmatprep.subr.bf16.mxu1 %v11670_v30 }
 0xc92   : > { %8761 = vmatpush3.bf16.msra.mxu0 %v8758_v10 }
 0xc93   : > { %8763 = vmatprep.subr.bf16.mxu0 %v8762_v21 }
 0xc96   : > { %8765 = vmatpush3.bf16.msra.mxu0 %v8762_v21 }
 0xc97   : > { %8767 = vmatprep.subr.bf16.mxu0 %v8766_v26 }
 0xc9a   : > { %8769 = vmatpush3.bf16.msra.mxu0 %v8766_v26 }
 0xc9b   : > { %8771 = vmatprep.subr.bf16.mxu0 %v8770_v59 }
 0xc9e   : > { %8773 = vmatpush3.bf16.msra.mxu0 %v8770_v59 }
 0xc9f   : > { %8775 = vmatprep.subr.bf16.mxu0 %v8774_v37 }
 0xca2   : > { %8777 = vmatpush3.bf16.msra.mxu0 %v8774_v37 }
 0xca3   : > { %8779 = vmatprep.subr.bf16.mxu0 %v8778_v14 }
 0xca6   : > { %8781 = vmatpush3.bf16.msra.mxu0 %v8778_v14 }
 0xca7   : > { %8783 = vmatprep.subr.bf16.mxu0 %v8782_v24 }
 0xcaa   : > { %8785 = vmatpush3.bf16.msra.mxu0 %v8782_v24 }
 0xcad   : > { %7751 = vmatmul.mubr.f32.vlgmr.msra.gmra.mrb[28].mxu0 %v5363_v31 }
 0xcae   : > { %6019 = vmatprep.mubr.f32.mxu0 %v10141_v12 }
 0xd80   : > { %v7752_v10 = vpop.f32.mrb[28].mxu0 }
 0xd81   : > { %v5466_v20 = vadd.f32 %v7752_v10, %v6581_v43  ;;  %v5447_v15 = vpop.f32.mrb[29].mxu0 }
 0xd82   : > { %v5465_v1 = vadd.f32 %v6581_v43, %v5447_v15 }
 0xd83   : > { %v5470_v34 = vmul.f32 0.70710677, %v5466_v20  ;;  %v5468_v43 = vmul.f32 0.5, %v5466_v20  ;;  %v5532_v20 = vld [vmem:[#allocation27 + $0x38] sm:$0xff] }
 0xd84   : > { %v5469_v21 = vmul.f32 0.70710677, %v5465_v1  ;;  %v5467_v15 = vmul.f32 0.5, %v5465_v1 }
 0xd85   : > { %v5476_v57 = vand.u32 2147483647, %v5470_v34  ;;  %vm5472_vm6 = vcmp.ge.f32.partialorder %v5470_v34, 0.0 }
 0xd86   : > { %v5475_v45 = vand.u32 2147483647, %v5469_v21  ;;  %vm5471_vm7 = vcmp.ge.f32.partialorder %v5469_v21, 0.0  ;;  %v5474_v39 = vsel %vm5472_vm6, 1.0, %v11973_v61  ;;  %v5529_v21 = vld [vmem:[#allocation27 + $0x20] sm:$0xff] }
 0xd87   : > { %v5478_v26 = vmul.f32 0.3275911, %v5476_v57  ;;  %v5504_v40 = vsub.f32 0.0, %v5476_v57  ;;  %v5473_v51 = vsel %vm5471_vm7, 1.0, %v11973_v61 }
 0xd88   : > { %v5477_v56 = vmul.f32 0.3275911, %v5475_v45  ;;  %v5503_v60 = vsub.f32 0.0, %v5475_v45 }
 0xd89   : > { %v5480_v36 = vadd.f32 1.0, %v5478_v26  ;;  %v5506_v5 = vmul.f32 %v5504_v40, %v5476_v57  ;;  %v5528_v26 = vld [vmem:[#allocation27 + $0x18] sm:$0xff] }
 0xd8a   : > { %v5479_v59 = vadd.f32 1.0, %v5477_v56  ;;  %v5505_v6 = vmul.f32 %v5503_v60, %v5475_v45  ;;  %v5527_v45 = vld [vmem:[#allocation27 + $0x10] sm:$0xff] }
 0xd8b   : > { %9415 = vrcp.f32 %v5480_v36  ;;  %v5509_v31 = vmul.f32 1.442695, %v5506_v5  ;;  %v8822_v34 = vpack.c.bf16 %v5528_v26, %v5527_v45  ;;  %v5531_v60 = vld [vmem:[#allocation27 + $0x30] sm:$0xff]  ;;  %v5533_v5 = vld [vmem:[#allocation27 + $0x40] sm:$0xff]  ;;  %v5870_v26 = vld [vmem:[#allocation29 + $0x8] sm:$0xff] }
 0xd8c   : > { %9417 = vrcp.f32 %v5479_v59  ;;  %v5507_v11 = vmul.f32 1.442695, %v5505_v6  ;;  %v5530_v59 = vld [vmem:[#allocation27 + $0x28] sm:$0xff]  ;;  %v5535_v6 = vld [vmem:[#allocation27 + $0x50] sm:$0xff] }
 0xd8d   : > { %9419 = vpow2.f32 %v5509_v31  ;;  %v8826_v40 = vpack.c.bf16 %v5530_v59, %v5529_v21  ;;  %v5538_v31 = vld [vmem:[#allocation27 + $0x68] sm:$0xff]  ;;  %v5876_v21 = vld [vmem:[#allocation29 + $0x38] sm:$0xff]  ;;  %v5869_v59 = vld [vmem:[#allocation29] sm:$0xff] }
 0xd8e   : > { %9421 = vpow2.f32 %v5507_v11  ;;  %v5540_v11 = vld [vmem:[#allocation27 + $0x78] sm:$0xff] }
 0xd95   : > { %v9416_v37 = vpop.eup %9415 }
 0xd96   : > { %v9418_v41 = vpop.eup %9417  ;;  %v5486_v14 = vmul.f32 1.0614054, %v9416_v37 }
 0xd97   : > { %v5485_v48 = vmul.f32 1.0614054, %v9418_v41  ;;  %v9420_v8 = vpop.eup %9419 }
 0xd98   : > { %v5488_v24 = vadd.f32 -1.4531521, %v5486_v14  ;;  %v9422_v27 = vpop.eup %9421 }
 0xd99   : > { %v5487_v49 = vadd.f32 -1.4531521, %v5485_v48  ;;  %v5536_v48 = vld [vmem:[#allocation27 + $0x58] sm:$0xff] }
 0xd9a   : > { %v5490_v55 = vmul.f32 %v9416_v37, %v5488_v24  ;;  %v8838_v24 = vpack.c.bf16 %v5536_v48, %v5535_v6  ;;  %v5880_v6 = vld [vmem:[#allocation29 + $0x58] sm:$0xff] }
 0xd9b   : > { %v5489_v16 = vmul.f32 %v9418_v41, %v5487_v49 }
 0xd9c   : > { %v5492_v7 = vadd.f32 1.4214138, %v5490_v55  ;;  %v5539_v55 = vld [vmem:[#allocation27 + $0x70] sm:$0xff] }
 0xd9d   : > { %v5491_v62 = vadd.f32 1.4214138, %v5489_v16  ;;  %v8846_v16 = vpack.c.bf16 %v5540_v11, %v5539_v55  ;;  %v5879_v11 = vld [vmem:[#allocation29 + $0x50] sm:$0xff] }
 0xd9e   : > { %v5494_v0 = vmul.f32 %v9416_v37, %v5492_v7  ;;  %v5713_v7 = vld [vmem:[#allocation27 + $0x100] sm:$0xff] }
 0xd9f   : > { %v5493_v22 = vmul.f32 %v9418_v41, %v5491_v62  ;;  %v5714_v62 = vld [vmem:[#allocation27 + $0x108] sm:$0xff] }
 0xda0   : > { %v5496_v46 = vadd.f32 -0.28449672, %v5494_v0  ;;  %v8850_v0 = vpack.c.bf16 %v5714_v62, %v5713_v7  ;;  %v5886_v62 = vld [vmem:[#allocation29 + $0x88] sm:$0xff] }
 0xda1   : > { %v5495_v19 = vadd.f32 -0.28449672, %v5493_v22  ;;  %v5715_v22 = vld [vmem:[#allocation27 + $0x110] sm:$0xff] }
 0xda2   : > { %v5498_v42 = vmul.f32 %v9416_v37, %v5496_v46  ;;  %v5716_v46 = vld [vmem:[#allocation27 + $0x118] sm:$0xff] }
 0xda3   : > { %v5497_v47 = vmul.f32 %v9418_v41, %v5495_v19  ;;  %v8854_v19 = vpack.c.bf16 %v5716_v46, %v5715_v22  ;;  %v5888_v22 = vld [vmem:[#allocation29 + $0x98] sm:$0xff] }
 0xda4   : > { %v5500_v38 = vadd.f32 0.2548296, %v5498_v42 }
 0xda5   : > { %v5499_v17 = vadd.f32 0.2548296, %v5497_v47  ;;  %v5717_v47 = vld [vmem:[#allocation27 + $0x120] sm:$0xff] }
 0xda6   : > { %v5502_v32 = vmul.f32 %v9416_v37, %v5500_v38  ;;  %v8830_v37 = vpack.c.bf16 %v5532_v20, %v5531_v60  ;;  %v5718_v38 = vld [vmem:[#allocation27 + $0x128] sm:$0xff] }
 0xda7   : > { %v5501_v28 = vmul.f32 %v9418_v41, %v5499_v17  ;;  %v5534_v41 = vld [vmem:[#allocation27 + $0x48] sm:$0xff] }
 0xda8   : > { %v5512_v50 = vmul.f32 %v9420_v8, %v5502_v32  ;;  %v8834_v14 = vpack.c.bf16 %v5534_v41, %v5533_v5  ;;  %v8858_v32 = vpack.c.bf16 %v5718_v38, %v5717_v47  ;;  %v5719_v8 = vld [vmem:[#allocation27 + $0x130] sm:$0xff]  ;;  %v5878_v41 = vld [vmem:[#allocation29 + $0x48] sm:$0xff]  ;;  %v5889_v47 = vld [vmem:[#allocation29 + $0xa0] sm:$0xff] }
 0xda9   : > { %v5511_v33 = vmul.f32 %v9422_v27, %v5501_v28  ;;  %v5720_v28 = vld [vmem:[#allocation27 + $0x138] sm:$0xff] }
 0xdaa   : > { %v5514_v23 = vsub.f32 1.0, %v5512_v50  ;;  %v8862_v27 = vpack.c.bf16 %v5720_v28, %v5719_v8  ;;  %v5721_v50 = vld [vmem:[#allocation27 + $0x140] sm:$0xff]  ;;  %v5891_v8 = vld [vmem:[#allocation29 + $0xb0] sm:$0xff] }
 0xdab   : > { %v5513_v54 = vsub.f32 1.0, %v5511_v33  ;;  %v5722_v33 = vld [vmem:[#allocation27 + $0x148] sm:$0xff] }
 0xdac   : > { %v5516_v4 = vmul.f32 %v5514_v23, %v5474_v39  ;;  %v8866_v23 = vpack.c.bf16 %v5722_v33, %v5721_v50  ;;  %v5723_v39 = vld [vmem:[#allocation27 + $0x150] sm:$0xff]  ;;  %v5898_v50 = vld [vmem:[#allocation29 + $0xe8] sm:$0xff]  ;;  %v5896_v33 = vld [vmem:[#allocation29 + $0xd8] sm:$0xff] }
 0xdad   : > { %v5515_v53 = vmul.f32 %v5513_v54, %v5473_v51  ;;  %v5724_v54 = vld [vmem:[#allocation27 + $0x158] sm:$0xff]  ;;  %v5725_v51 = vld [vmem:[#allocation27 + $0x160] sm:$0xff] }
 0xdae   : > { %v5518_v10 = vadd.f32 1.0, %v5516_v4  ;;  %v8870_v4 = vpack.c.bf16 %v5724_v54, %v5723_v39  ;;  %v5900_v39 = vld [vmem:[#allocation29 + $0xf8] sm:$0xff]  ;;  %v5893_v54 = vld [vmem:[#allocation29 + $0xc0] sm:$0xff] }
 0xdaf   : > { %v5517_v57 = vadd.f32 1.0, %v5515_v53  ;;  %v5726_v53 = vld [vmem:[#allocation27 + $0x168] sm:$0xff] }
 0xdb0   : > { %v5520_v56 = vmul.f32 %v5518_v10, %v5468_v43  ;;  %v8874_v43 = vpack.c.bf16 %v5726_v53, %v5725_v51  ;;  %v5727_v10 = vld [vmem:[#allocation27 + $0x170] sm:$0xff]  ;;  %v8926_v51 = vpack.c.bf16 %v5900_v39, %v5896_v33  ;;  %v5932_v33 = vld [vmem:[#allocation29 + $0x1f8] sm:$0xff]  ;;  %v5929_v39 = vld [vmem:[#allocation29 + $0x1e0] sm:$0xff] }
 0xdb1   : > { %v5519_v36 = vmul.f32 %v5517_v57, %v5467_v15  ;;  %v5728_v15 = vld [vmem:[#allocation27 + $0x178] sm:$0xff] }
 0xdb2   : > { %5522 = vst [vmem:[#allocation2 + $0x9] sm:$0xff] %v5520_v56  ;;  %v8878_v57 = vpack.c.bf16 %v5728_v15, %v5727_v10  ;;  %v5899_v10 = vld [vmem:[#allocation29 + $0xf0] sm:$0xff] }
 0xdb3   : > { %5521 = vst [vmem:[#allocation2 + $0x1] sm:$0xff] %v5519_v36  ;;  %7785 = vmatprep.mubr.f32.mxu1 %v5519_v36  ;;  %v5872_v36 = vld [vmem:[#allocation29 + $0x18] sm:$0xff] }
 0xdb4   : > { %7786 = vmatmul.mubr.f32.vlgmr.msra.gmra.mrb[28].mxu1 %v5520_v56  ;;  %v5874_v56 = vld [vmem:[#allocation29 + $0x28] sm:$0xff]  ;;  %v8914_v60 = vpack.c.bf16 %v5876_v21, %v5872_v36  ;;  %v5908_v36 = vld [vmem:[#allocation29 + $0x138] sm:$0xff]  ;;  %v5905_v21 = vld [vmem:[#allocation29 + $0x120] sm:$0xff] }
 0xdb5   : > { %8821 = vmatpush3.bf16.msra.mxu1 %v11670_v30  ;;  %v5537_v30 = vld [vmem:[#allocation27 + $0x60] sm:$0xff] }
 0xdb6   : > { %8823 = vmatprep.subr.bf16.mxu1 %v8822_v34  ;;  %v8842_v49 = vpack.c.bf16 %v5538_v31, %v5537_v30  ;;  %v5877_v30 = vld [vmem:[#allocation29 + $0x40] sm:$0xff] }
 0xdb7   : > { %v5881_v31 = vld [vmem:[#allocation29 + $0x60] sm:$0xff] }
 0xdb8   : > { %v8888_v55 = vpack.c.bf16 %v5881_v31, %v5877_v30 }
 0xdb9   : > { %8825 = vmatpush3.bf16.msra.mxu1 %v8822_v34  ;;  %v5711_v45 = vld [vmem:[#allocation2 + $0xa] sm:$0xff]  ;;  %v8882_v34 = vpack.c.bf16 %v5874_v56, %v5870_v26 }
 0xdba   : > { %v5523_v1 = vld [vmem:[#allocation2] sm:$0xff]  ;;  %8827 = vmatprep.subr.bf16.mxu1 %v8826_v40  ;;  %v5524_v42 = vld [vmem:[#allocation2 + $0x8] sm:$0xff]  ;;  %v5904_v26 = vld [vmem:[#allocation29 + $0x118] sm:$0xff] }
 0xdbb   : > { %7820 = vmatprep.mubr.f32.mxu1 %v5523_v1  ;;  %v5710_v17 = vld [vmem:[#allocation2 + $0x2] sm:$0xff]  ;;  %8883 = vmatprep.subr.bf16.mxu0 %v8882_v34  ;;  %v5901_v34 = vld [vmem:[#allocation29 + $0x100] sm:$0xff] }
 0xdbc   : > { %v5871_v1 = vld [vmem:[#allocation29 + $0x10] sm:$0xff] }
 0xdbd   : > { %8829 = vmatpush3.bf16.msra.mxu1 %v8826_v40  ;;  %v5873_v40 = vld [vmem:[#allocation29 + $0x20] sm:$0xff] }
 0xdbe   : > { %8831 = vmatprep.subr.bf16.mxu1 %v8830_v37  ;;  %v8884_v20 = vpack.c.bf16 %v5873_v40, %v5869_v59  ;;  %v8930_v59 = vpack.c.bf16 %v5908_v36, %v5904_v26  ;;  %v8900_v40 = vpack.c.bf16 %v5905_v21, %v5901_v34 }
 0xdc0   : > { %8885 = vmatpush1.bf16.msra.mxu0 %v8884_v20  ;;  %v5907_v20 = vld [vmem:[#allocation29 + $0x130] sm:$0xff] }
 0xdc1   : > { %8833 = vmatpush3.bf16.msra.mxu1 %v8830_v37  ;;  %v5875_v37 = vld [vmem:[#allocation29 + $0x30] sm:$0xff] }
 0xdc2   : > { %8835 = vmatprep.subr.bf16.mxu1 %v8834_v14  ;;  %v8916_v5 = vpack.c.bf16 %v5875_v37, %v5871_v1  ;;  %v5910_v37 = vld [vmem:[#allocation29 + $0x148] sm:$0xff] }
 0xdc5   : > { %8837 = vmatpush3.bf16.msra.mxu1 %v8834_v14  ;;  %v5882_v14 = vld [vmem:[#allocation29 + $0x68] sm:$0xff] }
 0xdc6   : > { %8839 = vmatprep.subr.bf16.mxu1 %v8838_v24  ;;  %v8886_v48 = vpack.c.bf16 %v5882_v14, %v5878_v41  ;;  %v5912_v41 = vld [vmem:[#allocation29 + $0x158] sm:$0xff] }
 0xdc8   : > { %8887 = vmatprep.subr.bf16.mxu0 %v8886_v48  ;;  %v5909_v48 = vld [vmem:[#allocation29 + $0x140] sm:$0xff] }
 0xdc9   : > { %8841 = vmatpush3.bf16.msra.mxu1 %v8838_v24  ;;  %v5884_v24 = vld [vmem:[#allocation29 + $0x78] sm:$0xff]  ;;  %8889 = vmatpush1.bf16.msra.mxu0 %v8888_v55  ;;  %v5915_v55 = vld [vmem:[#allocation29 + $0x170] sm:$0xff] }
 0xdca   : > { %8843 = vmatprep.subr.bf16.mxu1 %v8842_v49 }
 0xdcd   : > { %8845 = vmatpush3.bf16.msra.mxu1 %v8842_v49  ;;  %v8918_v49 = vpack.c.bf16 %v5884_v24, %v5880_v6  ;;  %v5916_v6 = vld [vmem:[#allocation29 + $0x178] sm:$0xff]  ;;  %v5913_v24 = vld [vmem:[#allocation29 + $0x160] sm:$0xff] }
 0xdce   : > { %8847 = vmatprep.subr.bf16.mxu1 %v8846_v16  ;;  %v8934_v30 = vpack.c.bf16 %v5916_v6, %v5912_v41  ;;  %v8904_v31 = vpack.c.bf16 %v5913_v24, %v5909_v48 }
 0xdd1   : > { %8849 = vmatpush3.bf16.msra.mxu1 %v8846_v16  ;;  %v5883_v16 = vld [vmem:[#allocation29 + $0x70] sm:$0xff] }
 0xdd2   : > { %8851 = vmatprep.subr.bf16.mxu1 %v8850_v0  ;;  %v8920_v7 = vpack.c.bf16 %v5883_v16, %v5879_v11  ;;  %v5918_v16 = vld [vmem:[#allocation29 + $0x188] sm:$0xff] }
 0xdd4   : > { %7821 = vmatmul.mubr.f32.vlgmr.msra.gmra.mrb[28].mxu1 %v5524_v42  ;;  %v5885_v42 = vld [vmem:[#allocation29 + $0x80] sm:$0xff] }
 0xdd5   : > { %8853 = vmatpush3.bf16.msra.mxu1 %v8850_v0  ;;  %7855 = vmatprep.mubr.f32.mxu1 %v5710_v17  ;;  %v5890_v0 = vld [vmem:[#allocation29 + $0xa8] sm:$0xff]  ;;  %v8892_v17 = vpack.c.bf16 %v5889_v47, %v5885_v42 }
 0xdd6   : > { %8855 = vmatprep.subr.bf16.mxu1 %v8854_v19  ;;  %v8890_v46 = vpack.c.bf16 %v5890_v0, %v5886_v62  ;;  %v5920_v62 = vld [vmem:[#allocation29 + $0x198] sm:$0xff] }
 0xdd8   : > { %8891 = vmatprep.subr.bf16.mxu0 %v8890_v46  ;;  %v5917_v46 = vld [vmem:[#allocation29 + $0x180] sm:$0xff] }
 0xdd9   : > { %8857 = vmatpush3.bf16.msra.mxu1 %v8854_v19  ;;  %v5892_v19 = vld [vmem:[#allocation29 + $0xb8] sm:$0xff]  ;;  %8893 = vmatpush1.bf16.msra.mxu0 %v8892_v17  ;;  %v5923_v17 = vld [vmem:[#allocation29 + $0x1b0] sm:$0xff] }
 0xdda   : > { %8859 = vmatprep.subr.bf16.mxu1 %v8858_v32  ;;  %v8922_v38 = vpack.c.bf16 %v5892_v19, %v5888_v22  ;;  %v5924_v22 = vld [vmem:[#allocation29 + $0x1b8] sm:$0xff]  ;;  %v5921_v19 = vld [vmem:[#allocation29 + $0x1a0] sm:$0xff] }
 0xddb   : > { %v8938_v42 = vpack.c.bf16 %v5924_v22, %v5920_v62  ;;  %v8908_v47 = vpack.c.bf16 %v5921_v19, %v5917_v46 }
 0xddd   : > { %8861 = vmatpush3.bf16.msra.mxu1 %v8858_v32  ;;  %v5887_v32 = vld [vmem:[#allocation29 + $0x90] sm:$0xff] }
 0xdde   : > { %8863 = vmatprep.subr.bf16.mxu1 %v8862_v27  ;;  %v8924_v28 = vpack.c.bf16 %v5891_v8, %v5887_v32  ;;  %v5926_v8 = vld [vmem:[#allocation29 + $0x1c8] sm:$0xff] }
 0xde1   : > { %8865 = vmatpush3.bf16.msra.mxu1 %v8862_v27  ;;  %v5894_v27 = vld [vmem:[#allocation29 + $0xc8] sm:$0xff] }
 0xde2   : > { %8867 = vmatprep.subr.bf16.mxu1 %v8866_v23 }
 0xde5   : > { %8869 = vmatpush3.bf16.msra.mxu1 %v8866_v23  ;;  %v8894_v23 = vpack.c.bf16 %v5898_v50, %v5894_v27  ;;  %v5928_v27 = vld [vmem:[#allocation29 + $0x1d8] sm:$0xff] }
 0xde6   : > { %8871 = vmatprep.subr.bf16.mxu1 %v8870_v4 }
 0xde7   : > { %8895 = vmatprep.subr.bf16.mxu0 %v8894_v23  ;;  %v5925_v23 = vld [vmem:[#allocation29 + $0x1c0] sm:$0xff] }
 0xde9   : > { %8873 = vmatpush3.bf16.msra.mxu1 %v8870_v4  ;;  %v5897_v4 = vld [vmem:[#allocation29 + $0xe0] sm:$0xff] }
 0xdea   : > { %8875 = vmatprep.subr.bf16.mxu1 %v8874_v43  ;;  %v8896_v53 = vpack.c.bf16 %v5897_v4, %v5893_v54  ;;  %v8942_v54 = vpack.c.bf16 %v5932_v33, %v5928_v27  ;;  %v8912_v4 = vpack.c.bf16 %v5929_v39, %v5925_v23 }
 0xdec   : > { %8897 = vmatpush1.bf16.msra.mxu0 %v8896_v53  ;;  %v5931_v53 = vld [vmem:[#allocation29 + $0x1f0] sm:$0xff] }
 0xded   : > { %8877 = vmatpush3.bf16.msra.mxu1 %v8874_v43  ;;  %v5895_v43 = vld [vmem:[#allocation29 + $0xd0] sm:$0xff] }
 0xdee   : > { %8879 = vmatprep.subr.bf16.mxu1 %v8878_v57  ;;  %v8928_v15 = vpack.c.bf16 %v5899_v10, %v5895_v43  ;;  %v6582_v10 = vld [vmem:[%s12026_s15] ss:$0 sm:$0xff] }
 0xdf1   : > { %8881 = vmatpush3.bf16.msra.mxu1 %v8878_v57  ;;  %v5902_v57 = vld [vmem:[#allocation29 + $0x108] sm:$0xff] }
 0xdf2   : > { %8915 = vmatprep.subr.bf16.mxu1 %v8914_v60  ;;  %v5903_v60 = vld [vmem:[#allocation29 + $0x110] sm:$0xff] }
 0xdf3   : > { %v8932_v1 = vpack.c.bf16 %v5907_v20, %v5903_v60 }
 0xdf4   : > { %7856 = vmatmul.mubr.f32.vlgmr.msra.gmra.mrb[28].mxu1 %v5711_v45  ;;  %v5906_v45 = vld [vmem:[#allocation29 + $0x128] sm:$0xff] }
 0xdf5   : > { %6096 = vmatprep.mubr.f32.mxu1 %v10141_v12  ;;  %8917 = vmatpush1.bf16.msra.mxu1 %v8916_v5  ;;  %v8898_v56 = vpack.c.bf16 %v5906_v45, %v5902_v57  ;;  %v5914_v5 = vld [vmem:[#allocation29 + $0x168] sm:$0xff] }
 0xdf6   : > { %8919 = vmatprep.subr.bf16.mxu1 %v8918_v49  ;;  %v8902_v14 = vpack.c.bf16 %v5914_v5, %v5910_v37  ;;  %v5911_v49 = vld [vmem:[#allocation29 + $0x150] sm:$0xff] }
 0xdf7   : > { %8899 = vmatprep.subr.bf16.mxu0 %v8898_v56  ;;  %v8936_v11 = vpack.c.bf16 %v5915_v55, %v5911_v49 }
 0xdf8   : > { %8901 = vmatpush1.bf16.msra.mxu0 %v8900_v40 }
 0xdf9   : > { %8921 = vmatpush1.bf16.msra.mxu1 %v8920_v7  ;;  %8903 = vmatprep.subr.bf16.mxu0 %v8902_v14  ;;  %v5922_v7 = vld [vmem:[#allocation29 + $0x1a8] sm:$0xff] }
 0xdfa   : > { %8923 = vmatprep.subr.bf16.mxu1 %v8922_v38  ;;  %v8906_v0 = vpack.c.bf16 %v5922_v7, %v5918_v16  ;;  %v5919_v38 = vld [vmem:[#allocation29 + $0x190] sm:$0xff] }
 0xdfb   : > { %v8940_v32 = vpack.c.bf16 %v5923_v17, %v5919_v38 }
 0xdfc   : > { %8905 = vmatpush1.bf16.msra.mxu0 %v8904_v31 }
 0xdfd   : > { %8925 = vmatpush1.bf16.msra.mxu1 %v8924_v28  ;;  %8907 = vmatprep.subr.bf16.mxu0 %v8906_v0  ;;  %v5930_v28 = vld [vmem:[#allocation29 + $0x1e8] sm:$0xff] }
 0xdfe   : > { %8927 = vmatprep.subr.bf16.mxu1 %v8926_v51  ;;  %v8910_v50 = vpack.c.bf16 %v5930_v28, %v5926_v8  ;;  %v5927_v51 = vld [vmem:[#allocation29 + $0x1d0] sm:$0xff] }
 0xdff   : > { %v8944_v43 = vpack.c.bf16 %v5931_v53, %v5927_v51 }
 0xe00   : > { %8909 = vmatpush1.bf16.msra.mxu0 %v8908_v47 }
 0xe01   : > { %8929 = vmatpush1.bf16.msra.mxu1 %v8928_v15  ;;  %8911 = vmatprep.subr.bf16.mxu0 %v8910_v50 }
 0xe02   : > { %8931 = vmatprep.subr.bf16.mxu1 %v8930_v59 }
 0xe04   : > { %8913 = vmatpush1.bf16.msra.mxu0 %v8912_v4 }
 0xe05   : > { %8933 = vmatpush1.bf16.msra.mxu1 %v8932_v1 }
 0xe06   : > { %8935 = vmatprep.subr.bf16.mxu1 %v8934_v30 }
 0xe09   : > { %8937 = vmatpush1.bf16.msra.mxu1 %v8936_v11 }
 0xe0a   : > { %8939 = vmatprep.subr.bf16.mxu1 %v8938_v42 }
 0xe0d   : > { %8941 = vmatpush1.bf16.msra.mxu1 %v8940_v32 }
 0xe0e   : > { %8943 = vmatprep.subr.bf16.mxu1 %v8942_v54 }
 0xe11   : > { %8945 = vmatpush1.bf16.msra.mxu1 %v8944_v43 }
 0xec7   : > { %v7857_v15 = vpop.f32.mrb[28].mxu1 }
 0xec8   : > { %v5814_v57 = vadd.f32 %v7857_v15, %v6582_v10  ;;  %v5795_v45 = vpop.f32.mrb[29].mxu1 }
 0xec9   : > { %v5813_v26 = vadd.f32 %v6582_v10, %v5795_v45 }
 0xeca   : > { %v5818_v56 = vmul.f32 0.70710677, %v5814_v57 }
 0xecb   : > { %v5817_v36 = vmul.f32 0.70710677, %v5813_v26  ;;  %v5815_v43 = vmul.f32 0.5, %v5813_v26 }
 0xecc   : > { %v5824_v34 = vand.u32 2147483647, %v5818_v56  ;;  %vm5820_vm8 = vcmp.ge.f32.partialorder %v5818_v56, 0.0  ;;  %v5816_v56 = vmul.f32 0.5, %v5814_v57 }
 0xecd   : > { %v5823_v21 = vand.u32 2147483647, %v5817_v36  ;;  %vm5819_vm9 = vcmp.ge.f32.partialorder %v5817_v36, 0.0  ;;  %v5822_v54 = vsel %vm5820_vm8, 1.0, %v11973_v61 }
 0xece   : > { %v5826_v59 = vmul.f32 0.3275911, %v5824_v34  ;;  %v5852_v1 = vsub.f32 0.0, %v5824_v34  ;;  %v5821_v4 = vsel %vm5819_vm9, 1.0, %v11973_v61 }
 0xecf   : > { %v5825_v40 = vmul.f32 0.3275911, %v5823_v21  ;;  %v5851_v37 = vsub.f32 0.0, %v5823_v21 }
 0xed0   : > { %v5828_v60 = vadd.f32 1.0, %v5826_v59  ;;  %v5854_v41 = vmul.f32 %v5852_v1, %v5824_v34 }
 0xed1   : > { %v5827_v20 = vadd.f32 1.0, %v5825_v40  ;;  %v5853_v6 = vmul.f32 %v5851_v37, %v5823_v21 }
 0xed2   : > { %9423 = vrcp.f32 %v5828_v60  ;;  %v5857_v31 = vmul.f32 1.442695, %v5854_v41 }
 0xed3   : > { %9425 = vrcp.f32 %v5827_v20  ;;  %v5855_v55 = vmul.f32 1.442695, %v5853_v6 }
 0xed4   : > { %9427 = vpow2.f32 %v5857_v31 }
 0xed5   : > { %9429 = vpow2.f32 %v5855_v55 }
 0xedc   : > { %v9424_v5 = vpop.eup %9423 }
 0xedd   : > { %v9426_v14 = vpop.eup %9425  ;;  %v5834_v48 = vmul.f32 1.0614054, %v9424_v5 }
 0xede   : > { %v5833_v24 = vmul.f32 1.0614054, %v9426_v14  ;;  %v9428_v8 = vpop.eup %9427 }
 0xedf   : > { %v5836_v30 = vadd.f32 -1.4531521, %v5834_v48  ;;  %v9430_v27 = vpop.eup %9429 }
 0xee0   : > { %v5835_v49 = vadd.f32 -1.4531521, %v5833_v24 }
 0xee1   : > { %v5838_v11 = vmul.f32 %v9424_v5, %v5836_v30 }
 0xee2   : > { %v5837_v16 = vmul.f32 %v9426_v14, %v5835_v49 }
 0xee3   : > { %v5840_v7 = vadd.f32 1.4214138, %v5838_v11 }
 0xee4   : > { %v5839_v62 = vadd.f32 1.4214138, %v5837_v16 }
 0xee5   : > { %v5842_v0 = vmul.f32 %v9424_v5, %v5840_v7 }
 0xee6   : > { %v5841_v22 = vmul.f32 %v9426_v14, %v5839_v62 }
 0xee7   : > { %v5844_v46 = vadd.f32 -0.28449672, %v5842_v0 }
 0xee8   : > { %v5843_v19 = vadd.f32 -0.28449672, %v5841_v22 }
 0xee9   : > { %v5846_v42 = vmul.f32 %v9424_v5, %v5844_v46 }
 0xeea   : > { %v5845_v47 = vmul.f32 %v9426_v14, %v5843_v19 }
 0xeeb   : > { %v5848_v38 = vadd.f32 0.2548296, %v5846_v42 }
 0xeec   : > { %v5847_v17 = vadd.f32 0.2548296, %v5845_v47 }
 0xeed   : > { %v5850_v32 = vmul.f32 %v9424_v5, %v5848_v38 }
 0xeee   : > { %v5849_v28 = vmul.f32 %v9426_v14, %v5847_v17 }
 0xeef   : > { %v5860_v50 = vmul.f32 %v9428_v8, %v5850_v32 }
 0xef0   : > { %v5859_v33 = vmul.f32 %v9430_v27, %v5849_v28 }
 0xef1   : > { %v5862_v23 = vsub.f32 1.0, %v5860_v50 }
 0xef2   : > { %v5861_v39 = vsub.f32 1.0, %v5859_v33 }
 0xef3   : > { %v5864_v53 = vmul.f32 %v5862_v23, %v5822_v54 }
 0xef4   : > { %v5863_v51 = vmul.f32 %v5861_v39, %v5821_v4 }
 0xef5   : > { %v5866_v45 = vadd.f32 1.0, %v5864_v53 }
 0xef6   : > { %v5865_v10 = vadd.f32 1.0, %v5863_v51 }
 0xef7   : > { %v5868_v61 = vmul.f32 %v5866_v45, %v5816_v56 }
 0xef8   : > { %v5867_v15 = vmul.f32 %v5865_v10, %v5815_v43 }
 0xefa   : > { %6020 = vmatmul.mubr.f32.vlgmr.msra.gmra.mrb[30].mxu0 %v5867_v15  ;;  %6097 = vmatmul.mubr.f32.vlgmr.msra.gmra.mrb[30].mxu1 %v5867_v15 }
 0xefb   : > { %6025 = vmatprep.mubr.f32.mxu0 %v10141_v12  ;;  %6102 = vmatprep.mubr.f32.mxu1 %v10141_v12 }
 0xefe   : > { %6026 = vmatmul.mubr.f32.gmra.mrb[32].mxu0 %v5868_v61  ;;  %6103 = vmatmul.mubr.f32.gmra.mrb[32].mxu1 %v5868_v61 }
 0xeff   : > { %9936 = shalt.err (!%p9933_p1)
}
 0xf00   : > { %s9937_s0 = scalar_lea.hbm %s11691_s12, 256  ;;  %s9941_s22 = scalar_lea.hbm %s10312_s20, 512 }
 0xf01   : > { %p9938_p2 = scmp.ne.s32.totalorder %s11691_s12, %s9937_s0  ;;  %p9942_p5 = scmp.lt.u32.totalorder %s11691_s12, %s10312_s20 }
 0xf02   : > { %p9943_p6 = scmp.lt.u32.totalorder %s9941_s22, %s9937_s0  ;;  %p9945_p13 = scmp.lt.u32.totalorder %s9937_s0, %s11691_s12 }
 0xf03   : > { %p9939_p9 = pnand %p9938_p2, %p12027_p7 }
 0xf04   : > { %p9944_p4 = por %p9943_p6, %p9942_p5 }
 0xf05   : > { %p9940_p0 = pneg %p9939_p9 }
 0xf06   : > { %p9946_p3 = por %p9945_p13, %p9944_p4 }
 0xf08   : > { %p9947_p10 = pnand %p9946_p3, %p9940_p0 }
 0xf0a   : > { %9950 = shalt.err (!%p9947_p10)
}
 0xf0b   : > { %s10143_s19 = smov 128   ;;  %s12028_s16 = sld [smem:[#allocation72_spill]] }
 0xf0c   : > { %s10144_s4 = smov 8   ;;  %s6130_s6 = scalar_lea.sflag [#allocation5], %s10707_s21 }
 0xf0d   : > { %9065 = dma.vmem_to_hbm [thread:$0]  (%p12027_p7), %s11693_s7, 256, %s11691_s12, %s11697_s14, %s10143_s19, %s10143_s19, %s10144_s4  }
 0xf0e   : > { %s9951_s17 = scalar_lea.vmem %s11684_s26, 256  ;;  %s10145_s15 = smov [#allocation30]  }
 0xf0f   : > { %p9952_p11 = scmp.ne.s32.totalorder %s11684_s26, %s9951_s17  ;;  %s9955_s9 = sshll.u32 %s10145_s15, 4  ;;  %s9956_s9 = int_to_ptr.vmem [resolvable:$false] %s9955_s9 }
 0xf10   : > { %s9957_s10 = scalar_lea.vmem %s9956_s9, 512  ;;  %p9958_p1 = scmp.lt.s32.totalorder %s11684_s26, %s9956_s9 }
 0xf11   : > { %s11723_s28 = scalar_lea.hbm %s12028_s16, %s6597_s18  ;;  %p9953_p8 = pnand %p9952_p11, %p12027_p7 }
 0xf12   : > { %p9959_p2 = scmp.lt.s32.totalorder %s9957_s10, %s9951_s17 }
 0xf13   : > { %p9954_p12 = pneg %p9953_p8 }
 0xf14   : > { %p9960_p9 = por %p9959_p2, %p9958_p1 }
 0xf16   : > { %p9961_p0 = pnand %p9960_p9, %p9954_p12 }
 0xf18   : > { %9964 = shalt.err (!%p9961_p0)
}
 0xf19   : > { %s9965_s7 = scalar_lea.hbm %s11723_s28, 256  ;;  %s9969_s18 = scalar_lea.hbm %s12028_s16, 512 }
 0xf1a   : > { %p9966_p5 = scmp.ne.s32.totalorder %s11723_s28, %s9965_s7  ;;  %p9970_p13 = scmp.lt.u32.totalorder %s11723_s28, %s12028_s16 }
 0xf1b   : > { %p9971_p3 = scmp.lt.u32.totalorder %s9969_s18, %s9965_s7  ;;  %p9973_p11 = scmp.lt.u32.totalorder %s9965_s7, %s11723_s28 }
 0xf1c   : > { %p9967_p6 = pnand %p9966_p5, %p12027_p7 }
 0xf1d   : > { %p9972_p10 = por %p9971_p3, %p9970_p13 }
 0xf1e   : > { %p9968_p4 = pneg %p9967_p6 }
 0xf1f   : > { %p9974_p8 = por %p9973_p11, %p9972_p10 }
 0xf21   : > { %p9975_p12 = pnand %p9974_p8, %p9968_p4 }
 0xf23   : > { %9978 = shalt.err (!%p9975_p12)
}
 0xf24   : > { %s12029_s12 = sld [smem:[#allocation71_spill]]  ;;  %s1302_s21 = scalar_lea.vmem [#allocation33], %s10710_s8 }
 0xf25   : > { %9064 = dma.vmem_to_hbm [thread:$0]  (%p12027_p7), %s11684_s26, 256, %s11723_s28, %s6130_s6, %s10143_s19, %s10143_s19, %s10144_s4  }
 0xf26   : > { %s6185_s26 = sshll.u32 %s1302_s21, 4  ;;  %s12030_s13 = sld [smem:[#allocation73_spill]]  ;;  %s11759_s26 = int_to_ptr.vmem [resolvable:$true] %s6185_s26 }
 0xf27   : > { %s6599_s5 = sshll.u32 %s10340_s11, 10  ;;  %s9979_s11 = scalar_lea.vmem %s11759_s26, 1024 }
 0xf28   : > { %p9980_p1 = scmp.ne.s32.totalorder %s11759_s26, %s9979_s11  ;;  %s10146_s0 = smov [#allocation33]  }
 0xf29   : > { %s9983_s22 = sshll.u32 %s10146_s0, 4  ;;  %s9984_s22 = int_to_ptr.vmem [resolvable:$false] %s9983_s22 }
 0xf2a   : > { %v5933_v12 = vld [vmem:[%s12029_s12] sm:$0xf]  ;;  %p9981_p2 = pnand %p9980_p1, %p12027_p7  ;;  %s9985_s19 = scalar_lea.vmem %s9984_s22, 2048 }
 0xf2b   : > { %v5938_v57 = vrot.slane %v5933_v12, %v11422_v3  ;;  %v5946_v26 = vrot.slane %v5933_v12, %v11502_v44  ;;  %v5942_v36 = vrot.slane %v5933_v12, %v11411_v2  ;;  %v5950_v34 = vrot.slane %v5933_v12, %v11505_v29  ;;  %p9986_p0 = scmp.lt.s32.totalorder %s11759_s26, %s9984_s22  ;;  %p9987_p5 = scmp.lt.s32.totalorder %s9985_s19, %s9979_s11 }
 0xf2c   : > { %s11766_s8 = scalar_lea.hbm %s12030_s13, %s6599_s5  ;;  %p9982_p9 = pneg %p9981_p2 }
 0xf2d   : > { %p9988_p6 = por %p9987_p5, %p9986_p0 }
 0xf2f   : > { %p9989_p4 = pnand %p9988_p6, %p9982_p9 }
 0xfcd   : > { %v6021_v21 = vpop.f32.mrb[30].mxu0  ;;  %v6098_v59 = vpop.f32.mrb[30].mxu1 }
 0xfce   : > { %v6022_v40 = vadd.f32 %v6021_v21, %v5938_v57  ;;  %v6099_v60 = vadd.f32 %v6098_v59, %v5946_v26  ;;  %v6023_v20 = vpop.f32.mrb[31].mxu0  ;;  %v6100_v1 = vpop.f32.mrb[31].mxu1 }
 0xfcf   : > { %v6024_v37 = vadd.f32 %v6023_v20, %v5942_v36  ;;  %v6101_v5 = vadd.f32 %v6100_v1, %v5950_v34 }
 0xfd0   : > { %v6113_v41 = vadd.f32 %v11529_v25, %v6022_v40  ;;  %v6115_v14 = vadd.f32 %v11576_v52, %v6099_v60 }
 0xfd1   : > { %v6114_v3 = vadd.f32 %v11531_v58, %v6024_v37  ;;  %v6116_v2 = vadd.f32 %v11578_v63, %v6101_v5  ;;  %v6027_v44 = vpop.f32.mrb[32].mxu0  ;;  %v6104_v29 = vpop.f32.mrb[32].mxu1 }
 0xfd2   : > { %6121 = vst [vmem:[%s1302_s21] sm:$0xff] %v6113_v41  ;;  %6123 = vst [vmem:[%s1302_s21 + $0x10] sm:$0xff] %v6115_v14  ;;  %v6028_v6 = vadd.f32 %v6027_v44, %v5938_v57  ;;  %v6105_v48 = vadd.f32 %v6104_v29, %v5946_v26  ;;  %v6029_v24 = vpop.f32.mrb[33].mxu0  ;;  %v6106_v30 = vpop.f32.mrb[33].mxu1 }
 0xfd3   : > { %6122 = vst [vmem:[%s1302_s21 + $0x8] sm:$0xff] %v6114_v3  ;;  %6124 = vst [vmem:[%s1302_s21 + $0x18] sm:$0xff] %v6116_v2  ;;  %v6030_v25 = vadd.f32 %v6029_v24, %v5942_v36  ;;  %v6107_v52 = vadd.f32 %v6106_v30, %v5950_v34 }
 0xfd4   : > { %v6117_v58 = vadd.f32 %v11540_v9, %v6028_v6  ;;  %v6119_v63 = vadd.f32 %v11589_v13, %v6105_v48 }
 0xfd5   : > { %v6118_v31 = vadd.f32 %v11543_v18, %v6030_v25  ;;  %v6120_v49 = vadd.f32 %v11596_v35, %v6107_v52 }
 0xfd6   : > { %6125 = vst [vmem:[%s1302_s21 + $0x20] sm:$0xff] %v6117_v58  ;;  %6127 = vst [vmem:[%s1302_s21 + $0x30] sm:$0xff] %v6119_v63 }
 0xfd7   : > { %6126 = vst [vmem:[%s1302_s21 + $0x28] sm:$0xff] %v6118_v31  ;;  %6128 = vst [vmem:[%s1302_s21 + $0x38] sm:$0xff] %v6120_v49 }
 0xfd8   : > { %9992 = shalt.err (!%p9989_p4)
}
 0xfd9   : > { %s9993_s4 = scalar_lea.hbm %s11766_s8, 1024  ;;  %s9997_s28 = scalar_lea.hbm %s12030_s13, 2048 }
 0xfda   : > { %p9994_p13 = scmp.ne.s32.totalorder %s11766_s8, %s9993_s4  ;;  %p9998_p11 = scmp.lt.u32.totalorder %s11766_s8, %s12030_s13 }
 0xfdb   : > { %p9999_p8 = scmp.lt.u32.totalorder %s9997_s28, %s9993_s4  ;;  %p10001_p1 = scmp.lt.u32.totalorder %s9993_s4, %s11766_s8 }
 0xfdc   : > { %p9995_p3 = pnand %p9994_p13, %p12027_p7 }
 0xfdd   : > { %p10000_p12 = por %p9999_p8, %p9998_p11 }
 0xfde   : > { %p9996_p10 = pneg %p9995_p3 }
 0xfdf   : > { %p10002_p2 = por %p10001_p1, %p10000_p12 }
 0xfe1   : > { %p10003_p9 = pnand %p10002_p2, %p9996_p10 }
 0xfe3   : > { %10006 = shalt.err (!%p10003_p9)
}
 0xfe4   : > { %s10147_s6 = smov 512   ;;  %s10148_s17 = smov 32  }
 0xfe5   : > { %9066 = dma.vmem_to_hbm [thread:$0]  (%p12027_p7), %s11759_s26, 1024, %s11766_s8, %s11697_s14, %s10147_s6, %s10147_s6, %s10148_s17  }
 0xfe6 PF: > { %s12031_s15 = sld [smem:[#allocation74_spill]]  ;;  %s12032_s9 = sld [smem:[#allocation78_spill]] }
 0xfe7   : > { %p12034_p5 = scmp.ge.s32.totalorder %s10081_s2, 2 }
 0xfec   : > { %s6200_s10 = sand.u32 1, %s12031_s15   ;;  %p12033_p0 = scmp.ne.s32.totalorder %s12032_s9, 0 }
 0xfed   : > { %s6201_s7 = scalar_lea.sflag [#allocation5], %s6200_s10 }
 0xfee   : > { %p9124_p6 = pnand %p12034_p5, %p12033_p0 }
 0xff0   : > { %10060 = dma.done.wait (!%p9124_p6), %s6201_s7, 256  }
 0xff1   : > { %10062 = vsyncadd (!%p9124_p6), %s6201_s7, 4294967040  ;;  %s12035_s18 = sadd.s32 4294967294, %s10081_s2  }
 0xff2   : > { %s6209_s12 = sand.u32 1, %s12035_s18  }
 0xff3   : > { %s6210_s21 = scalar_lea.sflag [#allocation32], %s6209_s12 }
 0xff4   : > { %10064 = dma.done.wait (!%p9124_p6), %s6210_s21, 1280  }
 0xff5   : > { %10066 = vsyncadd (!%p9124_p6), %s6210_s21, 4294966016  ;;  %s12036_s2 = sld [smem:[#allocation76_spill]]  ;;  %s12037_s29 = sld [smem:[#allocation75_spill]] }
 0xff6   : > { %s12038_s0 = sld [smem:[#allocation77_spill]]  ;;  %s12039_s28 = smov %s10073_s1 }
 0xffb   : > { %p92_p7 = scmp.ge.s32.totalorder %s12036_s2, 4   ;;  %s12040_s1 = smov %s12037_s29 }
 0xffd   :  { %94 = sbr.rel (!%p92_p7) target bundleno = 81 (0x51), region = 341 }
0x1004   :  { %6224 = vsyncpa [#allocation4], 1 }
0x1005   :  { %6226 = vsyncpa [#allocation4 + $0x1], 1 }
0x1006   :  { %6227 = vsyncpa [#allocation7], 1 }
0x1007   :  { %6229 = vsyncpa [#allocation7 + $0x1], 1 }
0x1008   :  { %6230 = vsyncpa [#allocation10], 1 }
0x1009   :  { %6231 = vsyncpa [#allocation13], 1 }
0x100a   :  { %6232 = vsyncpa [#allocation16], 1 }
0x100b   :  { %6233 = vsyncpa [#allocation19], 1 }
0x100c   :  { %6234 = vsyncpa [#allocation22], 1 }
0x100d   :  { %6235 = vsyncpa [#allocation25], 1 }
0x100e   :  { %6236 = vsyncpa [#allocation28], 1 }
0x100f   :  { %6237 = vsyncpa [#allocation5], 1 }
0x1010   :  { %6239 = vsyncpa [#allocation5 + $0x1], 1 }
0x1011   :  { %6240 = vsyncpa [#allocation32], 1 }
0x1012   :  { %6242 = vsyncpa [#allocation32 + $0x1], 1 }

</bundles_post_ra>
